<compile_context>
chip_gen: v7x
topology: tpu7x:2x2x1
jax: 0.10.0
libtpu: 0.0.40
codegen_flags: <defaults>
</compile_context>

<pallas_src>
import functools
import numpy as np
import jax
import jax.numpy as jnp
from jax import lax
from jax.experimental import pallas as pl
from jax.experimental.pallas import tpu as pltpu

# ----------------------- scaled config -----------------------
C1, C2, C3, C4, C5 = 16, 32, 48, 32, 32
FC6, FC7, FCA = 256, 256, 64
SEQ = 16            # classifier output dim -> LSTM sequence length (AlexNet head's "100")
HIDDEN = 128        # hidden_unit (lane-aligned)
D_OUT = 2           # D_out ; D_in == HIDDEN
IMG = 127           # input spatial size


def _round_up(n, m):
    return ((n + m - 1) // m) * m


def _full_block(shape):
    """BlockSpec covering the full array (exempt from (8,128) divisibility).
    index_map accepts any grid rank (only used with grid=(1,))."""
    nd = len(shape)
    return pl.BlockSpec(tuple(shape), lambda *_: (0,) * nd)


# ----------------------- im2col (plain-JAX glue) -----------------------
def _im2col_nhwc(x, kh, kw, stride, pad):
    B, H, W, C = x.shape
    if pad:
        x = jnp.pad(x, ((0, 0), (pad, pad), (pad, pad), (0, 0)))
    Hp, Wp = H + 2 * pad, W + 2 * pad
    Ho = (Hp - kh) // stride + 1
    Wo = (Wp - kw) // stride + 1
    cols = []
    for i in range(kh):
        for j in range(kw):
            cols.append(x[:, i:i + stride * Ho:stride, j:j + stride * Wo:stride, :])
    col = jnp.stack(cols, axis=3)                         # (B, Ho, Wo, kh*kw, C)
    return col.reshape(B * Ho * Wo, kh * kw * C), Ho, Wo


# ----------------------- conv1: 2-way parallel batch grid, bias+ReLU fused -----------------------
def _conv1_kernel(a_ref, w_ref, b_ref, o_ref):
    out = jnp.dot(a_ref[0], w_ref[...], preferred_element_type=jnp.float32)
    o_ref[0] = jnp.maximum(out + b_ref[...], 0.0)


def conv1_pallas(x, w, b2):
    """x: (B,127,127,3) f32 NHWC; w: (Kpad, C1) bf16; b2: (1, C1) f32.
    One block per image -> 2 'parallel' grid steps feed both v7x TensorCores."""
    B = x.shape[0]
    cols, Ho, Wo = _im2col_nhwc(x, 11, 11, 4, 2)          # (B*961, 363)
    K = cols.shape[1]
    Kp, N = w.shape
    cols = jnp.pad(cols, ((0, 0), (0, Kp - K))).astype(w.dtype)   # K -> 384, bf16
    cols = cols.reshape(B, Ho * Wo, Kp)
    out = pl.pallas_call(
        _conv1_kernel,
        out_shape=jax.ShapeDtypeStruct((B, Ho * Wo, N), jnp.float32),
        grid=(B,),
        in_specs=[pl.BlockSpec((1, Ho * Wo, Kp), lambda b: (b, 0, 0)),
                  pl.BlockSpec((Kp, N), lambda b: (0, 0)),
                  pl.BlockSpec((1, N), lambda b: (0, 0))],
        out_specs=pl.BlockSpec((1, Ho * Wo, N), lambda b: (b, 0, 0)),
        compiler_params=pltpu.CompilerParams(dimension_semantics=("parallel",)),
    )(cols, w, b2)
    return out.reshape(B, Ho, Wo, N)


# ----------------------- single-block linear (+bias, +optional ReLU) -----------------------
def _linear_kernel(a_ref, w_ref, b_ref, o_ref, *, apply_relu):
    out = jnp.dot(a_ref[...], w_ref[...], preferred_element_type=jnp.float32)
    out = out + b_ref[...]                                # bias in the f32 epilogue
    if apply_relu:
        out = jnp.maximum(out, 0.0)
    o_ref[...] = out.astype(o_ref.dtype)


def pallas_linear(a, w, b2, *, relu=False):
    """a:(M,K) bf16, w:(K,N) bf16, b2:(1,N) f32 -> relu?(a @ w + b2) in one full block."""
    M, K = a.shape
    N = w.shape[1]
    return pl.pallas_call(
        functools.partial(_linear_kernel, apply_relu=relu),
        out_shape=jax.ShapeDtypeStruct((M, N), jnp.float32),
        grid=(1,),
        in_specs=[_full_block((M, K)), _full_block((K, N)), _full_block((1, N))],
        out_specs=_full_block((M, N)),
    )(a, w, b2)


def conv2d_nhwc(x, w_flat, b2, *, kh, kw, stride, pad, relu):
    """x: NHWC f32; w_flat: (Kpad, Cout) bf16 (rows zero-padded); b2: (1, Cout) f32."""
    B = x.shape[0]
    cols, Ho, Wo = _im2col_nhwc(x, kh, kw, stride, pad)
    K = cols.shape[1]
    Kp = w_flat.shape[0]
    if Kp != K:
        cols = jnp.pad(cols, ((0, 0), (0, Kp - K)))       # K -> multiple of 128
    cols = cols.astype(w_flat.dtype)                      # bf16 MXU inputs, f32 accumulate
    out = pallas_linear(cols, w_flat, b2, relu=relu)
    return out.reshape(B, Ho, Wo, w_flat.shape[1])        # stays NHWC


def maxpool3x3s2_nhwc(x):
    # TODO(synk): kept as plain-JAX glue; fusing the stride-2 windows into the adjacent
    # conv kernels needs strided in-kernel value slicing that Mosaic does not lower robustly.
    return lax.reduce_window(x, -jnp.inf, lax.max,
                             (1, 3, 3, 1), (1, 2, 2, 1), "VALID")


# ----------------------- fused tail: classifier + LSTM + head in ONE kernel -----------------------
def _tail_kernel(feat_ref, w6_ref, b6_ref, w7_ref, b7_ref, wa_ref, ba_ref,
                 wb_ref, bb_ref, wih_ref, bih_ref, whh_ref, wl_ref, bl_ref,
                 o_ref):
    f32, bf16 = jnp.float32, jnp.bfloat16
    # classifier: Dropout(id) -> Linear+ReLU -> Dropout(id) -> Linear -> Linear -> Linear
    # (fc6 weight already has the 6x6 adaptive-avg-pool folded in; feat is the 3x3x32 flatten)
    h = jnp.dot(feat_ref[...], w6_ref[...], preferred_element_type=f32) + b6_ref[...]
    h = jnp.maximum(h, 0.0)
    h = jnp.dot(h.astype(bf16), w7_ref[...], preferred_element_type=f32) + b7_ref[...]
    h = jnp.dot(h.astype(bf16), wa_ref[...], preferred_element_type=f32) + ba_ref[...]
    seq = jnp.dot(h.astype(bf16), wb_ref[...], preferred_element_type=f32) + bb_ref[...]  # (B, T)

    B, T = seq.shape
    H = whh_ref.shape[0]
    wih = wih_ref[...]           # (1, 4H)  input-projection row (LSTM feature = 1)
    bgate = bih_ref[...]         # (1, 4H)  b_ih + b_hh
    whh = whh_ref[...]           # (H, 4H)  f32 (latency-critical recurrence stays f32)
    # Hoisted input projections: all T broadcasts/multiplies happen before the recurrence,
    # keeping only the hs @ whh matmul + gate math on the serial hs->hs chain.
    gate_base = [seq[:, t:t + 1] * wih + bgate for t in range(T)]
    hs = jnp.zeros((B, H), f32)
    cs = jnp.zeros((B, H), f32)
    # LSTM recurrence, fully unrolled at trace time (T = 16, static); gate order [i,f,g,o].
    for t in range(T):
        gates = gate_base[t] + jnp.dot(hs, whh, preferred_element_type=f32)
        i_g = jax.nn.sigmoid(gates[:, 0 * H:1 * H])
        f_g = jax.nn.sigmoid(gates[:, 1 * H:2 * H])
        g_g = jnp.tanh(gates[:, 2 * H:3 * H])
        o_g = jax.nn.sigmoid(gates[:, 3 * H:4 * H])
        cs = f_g * cs + i_g * g_g
        hs = o_g * jnp.tanh(cs)
    # y_pred = self.linear(rnn[:, -1])
    o_ref[...] = (jnp.dot(hs, wl_ref[...], preferred_element_type=f32)
                  + bl_ref[...]).astype(o_ref.dtype)


def pallas_tail(feat, q):
    B = feat.shape[0]
    args = (feat, q["fc6_w"], q["fc6_b"], q["fc7_w"], q["fc7_b"],
            q["fca_w"], q["fca_b"], q["fcb_w"], q["fcb_b"],
            q["w_ih"], q["b_ihh"], q["w_hh"], q["lin_w"], q["lin_b"])
    return pl.pallas_call(
        _tail_kernel,
        out_shape=jax.ShapeDtypeStruct((B, D_OUT), jnp.float32),
        grid=(1,),
        in_specs=[_full_block(a.shape) for a in args],
        out_specs=_full_block((B, D_OUT)),
    )(*args)


# ----------------------- full forward -----------------------
def forward(q, x):
    x = jnp.transpose(x, (0, 2, 3, 1))                    # NCHW -> NHWC once
    h = conv1_pallas(x, q["conv1_w"], q["conv1_b"])       # bias+ReLU fused, 2-way batch grid
    h = maxpool3x3s2_nhwc(h)
    h = conv2d_nhwc(h, q["conv2_w"], q["conv2_b"], kh=5, kw=5, stride=1, pad=2, relu=True)
    h = maxpool3x3s2_nhwc(h)
    h = conv2d_nhwc(h, q["conv3_w"], q["conv3_b"], kh=3, kw=3, stride=1, pad=1, relu=True)
    h = conv2d_nhwc(h, q["conv4_w"], q["conv4_b"], kh=3, kw=3, stride=1, pad=1, relu=True)
    h = conv2d_nhwc(h, q["conv5_w"], q["conv5_b"], kh=3, kw=3, stride=1, pad=1, relu=True)
    h = maxpool3x3s2_nhwc(h)
    # adaptive_avg_pool(6,6) is folded into fc6_w offline -> feed the raw 3x3x32 flatten.
    feat = h.reshape(h.shape[0], -1).astype(jnp.bfloat16)  # (B, 288)
    # fc6..fcb + unsqueeze(2) + LSTM + rnn[:, -1] + final Linear — one fused kernel
    return pallas_tail(feat, q)


# ----------------------- deterministic parameter init (PyTorch layout) -----------------------
def _uniform(key, shape, fan_in):
    lim = 1.0 / float(np.sqrt(fan_in))
    return jax.random.uniform(key, shape, jnp.float32, -lim, lim)


def init_params(key):
    ks = iter(jax.random.split(key, 32))

    def u(shape, fan_in):
        return _uniform(next(ks), shape, fan_in)

    p = {}
    p["conv1_w"] = u((C1, 3, 11, 11), 3 * 121); p["conv1_b"] = u((C1,), 3 * 121)
    p["conv2_w"] = u((C2, C1, 5, 5), C1 * 25);  p["conv2_b"] = u((C2,), C1 * 25)
    p["conv3_w"] = u((C3, C2, 3, 3), C2 * 9);   p["conv3_b"] = u((C3,), C2 * 9)
    p["conv4_w"] = u((C4, C3, 3, 3), C3 * 9);   p["conv4_b"] = u((C4,), C3 * 9)
    p["conv5_w"] = u((C5, C4, 3, 3), C4 * 9);   p["conv5_b"] = u((C5,), C4 * 9)
    flat = C5 * 6 * 6
    p["fc6_w"] = u((FC6, flat), flat);  p["fc6_b"] = u((FC6,), flat)
    p["fc7_w"] = u((FC7, FC6), FC6);    p["fc7_b"] = u((FC7,), FC6)
    p["fca_w"] = u((FCA, FC7), FC7);    p["fca_b"] = u((FCA,), FC7)
    p["fcb_w"] = u((SEQ, FCA), FCA);    p["fcb_b"] = u((SEQ,), FCA)
    # LSTM(feature=1, hidden_unit=HIDDEN), PyTorch gate order [i, f, g, o]
    p["w_ih"] = u((4 * HIDDEN, 1), HIDDEN)
    p["w_hh"] = u((4 * HIDDEN, HIDDEN), HIDDEN)
    p["b_ih"] = u((4 * HIDDEN,), HIDDEN)
    p["b_hh"] = u((4 * HIDDEN,), HIDDEN)
    # final Linear(D_in=HIDDEN, D_out=D_OUT)
    p["lin_w"] = u((D_OUT, HIDDEN), HIDDEN)
    p["lin_b"] = u((D_OUT,), HIDDEN)
    return p


def _adaptive_pool_matrix(h_in, w_in, h_out, w_out, c):
    """(h_in*w_in*c, h_out*w_out*c) matrix P such that flat_in @ P reproduces
    nn.AdaptiveAvgPool2d((h_out, w_out)) in NHWC-flatten order (replication/averaging)."""
    P = np.zeros((h_in * w_in * c, h_out * w_out * c), np.float32)
    for i in range(h_out):
        hs, he = (i * h_in) // h_out, -((-(i + 1) * h_in) // h_out)
        for j in range(w_out):
            ws, we = (j * w_in) // w_out, -((-(j + 1) * w_in) // w_out)
            inv_area = 1.0 / float((he - hs) * (we - ws))
            for hh in range(hs, he):
                for ww in range(ws, we):
                    for cc in range(c):
                        P[(hh * w_in + ww) * c + cc, (i * w_out + j) * c + cc] = inv_area
    return P


def prepare_params(p):
    """One-time layout prep (outside the jitted forward):
       * conv weights -> (round_up(kh*kw*Cin,128), Cout) bf16 in NHWC im2col row order,
         K rows zero-padded to a lane multiple (matches the padded im2col cols);
       * fc weights transposed and cast to bf16; fc6 additionally gets the NHWC flatten
         permutation AND the 6x6 adaptive-avg-pool folded in (K: 1152 -> 288);
       * LSTM / head weights stay f32 (latency-bound recurrence, tiny);
       * biases as (1, N) f32 rows."""
    q = {}

    def conv(wk, bk):
        w = p[wk]                                        # (O, Cin, kh, kw)
        O = w.shape[0]
        wf = w.transpose(2, 3, 1, 0).reshape(-1, O)      # (kh*kw*Cin, O), C fastest
        Kp = _round_up(wf.shape[0], 128)
        wf = jnp.pad(wf, ((0, Kp - wf.shape[0]), (0, 0)))
        q[wk] = wf.astype(jnp.bfloat16)
        q[bk] = p[bk].reshape(1, O).astype(jnp.float32)

    conv("conv1_w", "conv1_b"); conv("conv2_w", "conv2_b")
    conv("conv3_w", "conv3_b"); conv("conv4_w", "conv4_b")
    conv("conv5_w", "conv5_b")

    # backbone spatial size after the last maxpool: 127 -> 31 -> 15 -> 7 -> 3
    s = (IMG + 2 * 2 - 11) // 4 + 1
    for _ in range(3):
        s = (s - 3) // 2 + 1

    # fc6: PyTorch flatten order is (C, h, w); our NHWC flatten is (h, w, C); then fold
    # the 6x6 adaptive average pool (pure replication/averaging from s x s) into it.
    w6 = p["fc6_w"].reshape(FC6, C5, 6, 6).transpose(0, 2, 3, 1).reshape(FC6, -1).T  # (1152, FC6)
    P = jnp.asarray(_adaptive_pool_matrix(s, s, 6, 6, C5))                            # (288, 1152)
    q["fc6_w"] = (P @ w6).astype(jnp.bfloat16)            # (288, FC6), pool folded in
    q["fc6_b"] = p["fc6_b"].reshape(1, FC6)
    q["fc7_w"] = p["fc7_w"].T.astype(jnp.bfloat16); q["fc7_b"] = p["fc7_b"].reshape(1, FC7)
    q["fca_w"] = p["fca_w"].T.astype(jnp.bfloat16); q["fca_b"] = p["fca_b"].reshape(1, FCA)
    q["fcb_w"] = p["fcb_w"].T.astype(jnp.bfloat16); q["fcb_b"] = p["fcb_b"].reshape(1, SEQ)

    q["w_ih"] = p["w_ih"].T                              # (1, 4H) f32
    q["b_ihh"] = (p["b_ih"] + p["b_hh"]).reshape(1, 4 * HIDDEN)
    q["w_hh"] = p["w_hh"].T                              # (H, 4H) f32
    q["lin_w"] = p["lin_w"].T                            # (H, D_out) f32
    q["lin_b"] = p["lin_b"].reshape(1, D_OUT)
    return q


if __name__ == "__main__":
    root = jax.random.PRNGKey(0)
    k_x, k_p = jax.random.split(root)
    x = jax.random.normal(k_x, (2, 3, IMG, IMG), jnp.float32)   # NCHW
    params = init_params(k_p)
    prepped = prepare_params(params)          # one-time weight layout / pool-fold prep

    fwd = jax.jit(forward)
    y = jax.block_until_ready(fwd(prepped, x))

    assert y.shape == (2, D_OUT), y.shape
    assert bool(jnp.all(jnp.isfinite(y)))
    print("KERNEL_OK")
</pallas_src>

<mosaic_0001>
module attributes {stable_mosaic.version = 11 : i64} {
  func.func @_conv1_kernel(%arg0: i32, %arg1: memref<1x961x384xbf16, #tpu.memory_space<vmem>>, %arg2: memref<384x16xbf16, #tpu.memory_space<vmem>>, %arg3: memref<1x16xf32, #tpu.memory_space<vmem>>, %arg4: memref<1x961x16xf32, #tpu.memory_space<vmem>>) attributes {dimension_semantics = [#tpu.dimension_semantics<parallel>], iteration_bounds = array<i64: 2>, scalar_prefetch = 0 : i64, scratch_operands = 0 : i64, tpu.core_type = #tpu.core_type<tc>, window_params = [{transform_indices = @transform_0, window_bounds = array<i64: 1, 961, 384>}, {pipeline_mode = #tpu.pipeline_mode<synchronous>, transform_indices = @transform_1, window_bounds = array<i64: 384, 16>}, {pipeline_mode = #tpu.pipeline_mode<synchronous>, transform_indices = @transform_2, window_bounds = array<i64: 1, 16>}, {transform_indices = @transform_3, window_bounds = array<i64: 1, 961, 16>}]} {
    %c0 = arith.constant 0 : index
    %c0_0 = arith.constant 0 : index
    %c0_1 = arith.constant 0 : index
    %0 = vector.load %arg1[%c0, %c0_0, %c0_1] : memref<1x961x384xbf16, #tpu.memory_space<vmem>>, vector<1x961x384xbf16>
    %1 = vector.shape_cast %0 : vector<1x961x384xbf16> to vector<961x384xbf16>
    %c0_2 = arith.constant 0 : index
    %c0_3 = arith.constant 0 : index
    %2 = vector.load %arg2[%c0_2, %c0_3] : memref<384x16xbf16, #tpu.memory_space<vmem>>, vector<384x16xbf16>
    %cst = arith.constant dense<0.000000e+00> : vector<961x16xf32>
    %3 = tpu.matmul %1, %2, %cst {dimension_numbers = #tpu.dot_dimension_numbers<[1], [0], [0], [1], [0, 0, 1, 1], [], []>} : vector<961x384xbf16>, vector<384x16xbf16>, vector<961x16xf32> -> vector<961x16xf32>
    %c0_4 = arith.constant 0 : index
    %c0_5 = arith.constant 0 : index
    %4 = vector.load %arg3[%c0_4, %c0_5] : memref<1x16xf32, #tpu.memory_space<vmem>>, vector<1x16xf32>
    %5 = vector.broadcast %4 : vector<1x16xf32> to vector<961x16xf32>
    %6 = arith.addf %3, %5 : vector<961x16xf32>
    %cst_6 = arith.constant 0.000000e+00 : f32
    %7 = vector.broadcast %cst_6 : f32 to vector<961x16xf32>
    %8 = arith.maximumf %6, %7 : vector<961x16xf32>
    %c0_7 = arith.constant 0 : index
    %c0_8 = arith.constant 0 : index
    %c0_9 = arith.constant 0 : index
    %9 = vector.load %arg4[%c0_7, %c0_8, %c0_9] : memref<1x961x16xf32, #tpu.memory_space<vmem>>, vector<1x961x16xf32>
    %10 = vector.shape_cast %9 : vector<1x961x16xf32> to vector<961x16xf32>
    %11 = vector.shape_cast %8 : vector<961x16xf32> to vector<1x961x16xf32>
    tpu.vector_store %arg4[%c0_7, %c0_8, %c0_9], %11 {strides = array<i32>} : memref<1x961x16xf32, #tpu.memory_space<vmem>>, vector<1x961x16xf32>,
    return
  }
  func.func @transform_0(%arg0: i32) -> (i32, i32, i32) {
    %c0_i32 = arith.constant 0 : i32
    %c0_i32_0 = arith.constant 0 : i32
    %c0_i32_1 = arith.constant 0 : i32
    return %arg0, %c0_i32, %c0_i32_0 : i32, i32, i32
  }
  func.func @transform_1(%arg0: i32) -> (i32, i32) {
    %c0_i32 = arith.constant 0 : i32
    %c0_i32_0 = arith.constant 0 : i32
    %c0_i32_1 = arith.constant 0 : i32
    return %c0_i32, %c0_i32_0 : i32, i32
  }
  func.func @transform_2(%arg0: i32) -> (i32, i32) {
    %c0_i32 = arith.constant 0 : i32
    %c0_i32_0 = arith.constant 0 : i32
    %c0_i32_1 = arith.constant 0 : i32
    return %c0_i32, %c0_i32_0 : i32, i32
  }
  func.func @transform_3(%arg0: i32) -> (i32, i32, i32) {
    %c0_i32 = arith.constant 0 : i32
    %c0_i32_0 = arith.constant 0 : i32
    %c0_i32_1 = arith.constant 0 : i32
    return %arg0, %c0_i32, %c0_i32_0 : i32, i32, i32
  }
}

module attributes {stable_mosaic.version = 11 : i64} {
  func.func @_linear_kernel(%arg0: i32, %arg1: memref<450x512xbf16, #tpu.memory_space<vmem>>, %arg2: memref<512x32xbf16, #tpu.memory_space<vmem>>, %arg3: memref<1x32xf32, #tpu.memory_space<vmem>>, %arg4: memref<450x32xf32, #tpu.memory_space<vmem>>) attributes {dimension_semantics = [#tpu.dimension_semantics<arbitrary>], iteration_bounds = array<i64: 1>, scalar_prefetch = 0 : i64, scratch_operands = 0 : i64, tpu.core_type = #tpu.core_type<tc>, window_params = [{pipeline_mode = #tpu.pipeline_mode<synchronous>, transform_indices = @transform_0, window_bounds = array<i64: 450, 512>}, {pipeline_mode = #tpu.pipeline_mode<synchronous>, transform_indices = @transform_1, window_bounds = array<i64: 512, 32>}, {pipeline_mode = #tpu.pipeline_mode<synchronous>, transform_indices = @transform_2, window_bounds = array<i64: 1, 32>}, {pipeline_mode = #tpu.pipeline_mode<synchronous>, transform_indices = @transform_3, window_bounds = array<i64: 450, 32>}]} {
    %c0 = arith.constant 0 : index
    %c0_0 = arith.constant 0 : index
    %0 = vector.load %arg1[%c0, %c0_0] : memref<450x512xbf16, #tpu.memory_space<vmem>>, vector<450x512xbf16>
    %c0_1 = arith.constant 0 : index
    %c0_2 = arith.constant 0 : index
    %1 = vector.load %arg2[%c0_1, %c0_2] : memref<512x32xbf16, #tpu.memory_space<vmem>>, vector<512x32xbf16>
    %cst = arith.constant dense<0.000000e+00> : vector<450x32xf32>
    %2 = tpu.matmul %0, %1, %cst {dimension_numbers = #tpu.dot_dimension_numbers<[1], [0], [0], [1], [0, 0, 1, 1], [], []>} : vector<450x512xbf16>, vector<512x32xbf16>, vector<450x32xf32> -> vector<450x32xf32>
    %c0_3 = arith.constant 0 : index
    %c0_4 = arith.constant 0 : index
    %3 = vector.load %arg3[%c0_3, %c0_4] : memref<1x32xf32, #tpu.memory_space<vmem>>, vector<1x32xf32>
    %4 = vector.broadcast %3 : vector<1x32xf32> to vector<450x32xf32>
    %5 = arith.addf %2, %4 : vector<450x32xf32>
    %cst_5 = arith.constant 0.000000e+00 : f32
    %6 = vector.broadcast %cst_5 : f32 to vector<450x32xf32>
    %7 = arith.maximumf %5, %6 : vector<450x32xf32>
    %c0_6 = arith.constant 0 : index
    %c0_7 = arith.constant 0 : index
    %8 = vector.load %arg4[%c0_6, %c0_7] : memref<450x32xf32, #tpu.memory_space<vmem>>, vector<450x32xf32>
    tpu.vector_store %arg4[%c0_6, %c0_7], %7 {strides = array<i32>} : memref<450x32xf32, #tpu.memory_space<vmem>>, vector<450x32xf32>,
    return
  }
  func.func @transform_0(%arg0: i32) -> (i32, i32) {
    %c0_i32 = arith.constant 0 : i32
    %c0_i32_0 = arith.constant 0 : i32
    %c0_i32_1 = arith.constant 0 : i32
    return %c0_i32, %c0_i32_0 : i32, i32
  }
  func.func @transform_1(%arg0: i32) -> (i32, i32) {
    %c0_i32 = arith.constant 0 : i32
    %c0_i32_0 = arith.constant 0 : i32
    %c0_i32_1 = arith.constant 0 : i32
    return %c0_i32, %c0_i32_0 : i32, i32
  }
  func.func @transform_2(%arg0: i32) -> (i32, i32) {
    %c0_i32 = arith.constant 0 : i32
    %c0_i32_0 = arith.constant 0 : i32
    %c0_i32_1 = arith.constant 0 : i32
    return %c0_i32, %c0_i32_0 : i32, i32
  }
  func.func @transform_3(%arg0: i32) -> (i32, i32) {
    %c0_i32 = arith.constant 0 : i32
    %c0_i32_0 = arith.constant 0 : i32
    %c0_i32_1 = arith.constant 0 : i32
    return %c0_i32, %c0_i32_0 : i32, i32
  }
}

module attributes {stable_mosaic.version = 11 : i64} {
  func.func @_linear_kernel(%arg0: i32, %arg1: memref<98x384xbf16, #tpu.memory_space<vmem>>, %arg2: memref<384x48xbf16, #tpu.memory_space<vmem>>, %arg3: memref<1x48xf32, #tpu.memory_space<vmem>>, %arg4: memref<98x48xf32, #tpu.memory_space<vmem>>) attributes {dimension_semantics = [#tpu.dimension_semantics<arbitrary>], iteration_bounds = array<i64: 1>, scalar_prefetch = 0 : i64, scratch_operands = 0 : i64, tpu.core_type = #tpu.core_type<tc>, window_params = [{pipeline_mode = #tpu.pipeline_mode<synchronous>, transform_indices = @transform_0, window_bounds = array<i64: 98, 384>}, {pipeline_mode = #tpu.pipeline_mode<synchronous>, transform_indices = @transform_1, window_bounds = array<i64: 384, 48>}, {pipeline_mode = #tpu.pipeline_mode<synchronous>, transform_indices = @transform_2, window_bounds = array<i64: 1, 48>}, {pipeline_mode = #tpu.pipeline_mode<synchronous>, transform_indices = @transform_3, window_bounds = array<i64: 98, 48>}]} {
    %c0 = arith.constant 0 : index
    %c0_0 = arith.constant 0 : index
    %0 = vector.load %arg1[%c0, %c0_0] : memref<98x384xbf16, #tpu.memory_space<vmem>>, vector<98x384xbf16>
    %c0_1 = arith.constant 0 : index
    %c0_2 = arith.constant 0 : index
    %1 = vector.load %arg2[%c0_1, %c0_2] : memref<384x48xbf16, #tpu.memory_space<vmem>>, vector<384x48xbf16>
    %cst = arith.constant dense<0.000000e+00> : vector<98x48xf32>
    %2 = tpu.matmul %0, %1, %cst {dimension_numbers = #tpu.dot_dimension_numbers<[1], [0], [0], [1], [0, 0, 1, 1], [], []>} : vector<98x384xbf16>, vector<384x48xbf16>, vector<98x48xf32> -> vector<98x48xf32>
    %c0_3 = arith.constant 0 : index
    %c0_4 = arith.constant 0 : index
    %3 = vector.load %arg3[%c0_3, %c0_4] : memref<1x48xf32, #tpu.memory_space<vmem>>, vector<1x48xf32>
    %4 = vector.broadcast %3 : vector<1x48xf32> to vector<98x48xf32>
    %5 = arith.addf %2, %4 : vector<98x48xf32>
    %cst_5 = arith.constant 0.000000e+00 : f32
    %6 = vector.broadcast %cst_5 : f32 to vector<98x48xf32>
    %7 = arith.maximumf %5, %6 : vector<98x48xf32>
    %c0_6 = arith.constant 0 : index
    %c0_7 = arith.constant 0 : index
    %8 = vector.load %arg4[%c0_6, %c0_7] : memref<98x48xf32, #tpu.memory_space<vmem>>, vector<98x48xf32>
    tpu.vector_store %arg4[%c0_6, %c0_7], %7 {strides = array<i32>} : memref<98x48xf32, #tpu.memory_space<vmem>>, vector<98x48xf32>,
    return
  }
  func.func @transform_0(%arg0: i32) -> (i32, i32) {
    %c0_i32 = arith.constant 0 : i32
    %c0_i32_0 = arith.constant 0 : i32
    %c0_i32_1 = arith.constant 0 : i32
    return %c0_i32, %c0_i32_0 : i32, i32
  }
  func.func @transform_1(%arg0: i32) -> (i32, i32) {
    %c0_i32 = arith.constant 0 : i32
    %c0_i32_0 = arith.constant 0 : i32
    %c0_i32_1 = arith.constant 0 : i32
    return %c0_i32, %c0_i32_0 : i32, i32
  }
  func.func @transform_2(%arg0: i32) -> (i32, i32) {
    %c0_i32 = arith.constant 0 : i32
    %c0_i32_0 = arith.constant 0 : i32
    %c0_i32_1 = arith.constant 0 : i32
    return %c0_i32, %c0_i32_0 : i32, i32
  }
  func.func @transform_3(%arg0: i32) -> (i32, i32) {
    %c0_i32 = arith.constant 0 : i32
    %c0_i32_0 = arith.constant 0 : i32
    %c0_i32_1 = arith.constant 0 : i32
    return %c0_i32, %c0_i32_0 : i32, i32
  }
}

module attributes {stable_mosaic.version = 11 : i64} {
  func.func @_linear_kernel(%arg0: i32, %arg1: memref<98x512xbf16, #tpu.memory_space<vmem>>, %arg2: memref<512x32xbf16, #tpu.memory_space<vmem>>, %arg3: memref<1x32xf32, #tpu.memory_space<vmem>>, %arg4: memref<98x32xf32, #tpu.memory_space<vmem>>) attributes {dimension_semantics = [#tpu.dimension_semantics<arbitrary>], iteration_bounds = array<i64: 1>, scalar_prefetch = 0 : i64, scratch_operands = 0 : i64, tpu.core_type = #tpu.core_type<tc>, window_params = [{pipeline_mode = #tpu.pipeline_mode<synchronous>, transform_indices = @transform_0, window_bounds = array<i64: 98, 512>}, {pipeline_mode = #tpu.pipeline_mode<synchronous>, transform_indices = @transform_1, window_bounds = array<i64: 512, 32>}, {pipeline_mode = #tpu.pipeline_mode<synchronous>, transform_indices = @transform_2, window_bounds = array<i64: 1, 32>}, {pipeline_mode = #tpu.pipeline_mode<synchronous>, transform_indices = @transform_3, window_bounds = array<i64: 98, 32>}]} {
    %c0 = arith.constant 0 : index
    %c0_0 = arith.constant 0 : index
    %0 = vector.load %arg1[%c0, %c0_0] : memref<98x512xbf16, #tpu.memory_space<vmem>>, vector<98x512xbf16>
    %c0_1 = arith.constant 0 : index
    %c0_2 = arith.constant 0 : index
    %1 = vector.load %arg2[%c0_1, %c0_2] : memref<512x32xbf16, #tpu.memory_space<vmem>>, vector<512x32xbf16>
    %cst = arith.constant dense<0.000000e+00> : vector<98x32xf32>
    %2 = tpu.matmul %0, %1, %cst {dimension_numbers = #tpu.dot_dimension_numbers<[1], [0], [0], [1], [0, 0, 1, 1], [], []>} : vector<98x512xbf16>, vector<512x32xbf16>, vector<98x32xf32> -> vector<98x32xf32>
    %c0_3 = arith.constant 0 : index
    %c0_4 = arith.constant 0 : index
    %3 = vector.load %arg3[%c0_3, %c0_4] : memref<1x32xf32, #tpu.memory_space<vmem>>, vector<1x32xf32>
    %4 = vector.broadcast %3 : vector<1x32xf32> to vector<98x32xf32>
    %5 = arith.addf %2, %4 : vector<98x32xf32>
    %cst_5 = arith.constant 0.000000e+00 : f32
    %6 = vector.broadcast %cst_5 : f32 to vector<98x32xf32>
    %7 = arith.maximumf %5, %6 : vector<98x32xf32>
    %c0_6 = arith.constant 0 : index
    %c0_7 = arith.constant 0 : index
    %8 = vector.load %arg4[%c0_6, %c0_7] : memref<98x32xf32, #tpu.memory_space<vmem>>, vector<98x32xf32>
    tpu.vector_store %arg4[%c0_6, %c0_7], %7 {strides = array<i32>} : memref<98x32xf32, #tpu.memory_space<vmem>>, vector<98x32xf32>,
    return
  }
  func.func @transform_0(%arg0: i32) -> (i32, i32) {
    %c0_i32 = arith.constant 0 : i32
    %c0_i32_0 = arith.constant 0 : i32
    %c0_i32_1 = arith.constant 0 : i32
    return %c0_i32, %c0_i32_0 : i32, i32
  }
  func.func @transform_1(%arg0: i32) -> (i32, i32) {
    %c0_i32 = arith.constant 0 : i32
    %c0_i32_0 = arith.constant 0 : i32
    %c0_i32_1 = arith.constant 0 : i32
    return %c0_i32, %c0_i32_0 : i32, i32
  }
  func.func @transform_2(%arg0: i32) -> (i32, i32) {
    %c0_i32 = arith.constant 0 : i32
    %c0_i32_0 = arith.constant 0 : i32
    %c0_i32_1 = arith.constant 0 : i32
    return %c0_i32, %c0_i32_0 : i32, i32
  }
  func.func @transform_3(%arg0: i32) -> (i32, i32) {
    %c0_i32 = arith.constant 0 : i32
    %c0_i32_0 = arith.constant 0 : i32
    %c0_i32_1 = arith.constant 0 : i32
    return %c0_i32, %c0_i32_0 : i32, i32
  }
}

module attributes {stable_mosaic.version = 11 : i64} {
  func.func @_linear_kernel(%arg0: i32, %arg1: memref<98x384xbf16, #tpu.memory_space<vmem>>, %arg2: memref<384x32xbf16, #tpu.memory_space<vmem>>, %arg3: memref<1x32xf32, #tpu.memory_space<vmem>>, %arg4: memref<98x32xf32, #tpu.memory_space<vmem>>) attributes {dimension_semantics = [#tpu.dimension_semantics<arbitrary>], iteration_bounds = array<i64: 1>, scalar_prefetch = 0 : i64, scratch_operands = 0 : i64, tpu.core_type = #tpu.core_type<tc>, window_params = [{pipeline_mode = #tpu.pipeline_mode<synchronous>, transform_indices = @transform_0, window_bounds = array<i64: 98, 384>}, {pipeline_mode = #tpu.pipeline_mode<synchronous>, transform_indices = @transform_1, window_bounds = array<i64: 384, 32>}, {pipeline_mode = #tpu.pipeline_mode<synchronous>, transform_indices = @transform_2, window_bounds = array<i64: 1, 32>}, {pipeline_mode = #tpu.pipeline_mode<synchronous>, transform_indices = @transform_3, window_bounds = array<i64: 98, 32>}]} {
    %c0 = arith.constant 0 : index
    %c0_0 = arith.constant 0 : index
    %0 = vector.load %arg1[%c0, %c0_0] : memref<98x384xbf16, #tpu.memory_space<vmem>>, vector<98x384xbf16>
    %c0_1 = arith.constant 0 : index
    %c0_2 = arith.constant 0 : index
    %1 = vector.load %arg2[%c0_1, %c0_2] : memref<384x32xbf16, #tpu.memory_space<vmem>>, vector<384x32xbf16>
    %cst = arith.constant dense<0.000000e+00> : vector<98x32xf32>
    %2 = tpu.matmul %0, %1, %cst {dimension_numbers = #tpu.dot_dimension_numbers<[1], [0], [0], [1], [0, 0, 1, 1], [], []>} : vector<98x384xbf16>, vector<384x32xbf16>, vector<98x32xf32> -> vector<98x32xf32>
    %c0_3 = arith.constant 0 : index
    %c0_4 = arith.constant 0 : index
    %3 = vector.load %arg3[%c0_3, %c0_4] : memref<1x32xf32, #tpu.memory_space<vmem>>, vector<1x32xf32>
    %4 = vector.broadcast %3 : vector<1x32xf32> to vector<98x32xf32>
    %5 = arith.addf %2, %4 : vector<98x32xf32>
    %cst_5 = arith.constant 0.000000e+00 : f32
    %6 = vector.broadcast %cst_5 : f32 to vector<98x32xf32>
    %7 = arith.maximumf %5, %6 : vector<98x32xf32>
    %c0_6 = arith.constant 0 : index
    %c0_7 = arith.constant 0 : index
    %8 = vector.load %arg4[%c0_6, %c0_7] : memref<98x32xf32, #tpu.memory_space<vmem>>, vector<98x32xf32>
    tpu.vector_store %arg4[%c0_6, %c0_7], %7 {strides = array<i32>} : memref<98x32xf32, #tpu.memory_space<vmem>>, vector<98x32xf32>,
    return
  }
  func.func @transform_0(%arg0: i32) -> (i32, i32) {
    %c0_i32 = arith.constant 0 : i32
    %c0_i32_0 = arith.constant 0 : i32
    %c0_i32_1 = arith.constant 0 : i32
    return %c0_i32, %c0_i32_0 : i32, i32
  }
  func.func @transform_1(%arg0: i32) -> (i32, i32) {
    %c0_i32 = arith.constant 0 : i32
    %c0_i32_0 = arith.constant 0 : i32
    %c0_i32_1 = arith.constant 0 : i32
    return %c0_i32, %c0_i32_0 : i32, i32
  }
  func.func @transform_2(%arg0: i32) -> (i32, i32) {
    %c0_i32 = arith.constant 0 : i32
    %c0_i32_0 = arith.constant 0 : i32
    %c0_i32_1 = arith.constant 0 : i32
    return %c0_i32, %c0_i32_0 : i32, i32
  }
  func.func @transform_3(%arg0: i32) -> (i32, i32) {
    %c0_i32 = arith.constant 0 : i32
    %c0_i32_0 = arith.constant 0 : i32
    %c0_i32_1 = arith.constant 0 : i32
    return %c0_i32, %c0_i32_0 : i32, i32
  }
}

module attributes {stable_mosaic.version = 11 : i64} {
  func.func @_tail_kernel(%arg0: i32, %arg1: memref<2x288xbf16, #tpu.memory_space<vmem>>, %arg2: memref<288x256xbf16, #tpu.memory_space<vmem>>, %arg3: memref<1x256xf32, #tpu.memory_space<vmem>>, %arg4: memref<256x256xbf16, #tpu.memory_space<vmem>>, %arg5: memref<1x256xf32, #tpu.memory_space<vmem>>, %arg6: memref<256x64xbf16, #tpu.memory_space<vmem>>, %arg7: memref<1x64xf32, #tpu.memory_space<vmem>>, %arg8: memref<64x16xbf16, #tpu.memory_space<vmem>>, %arg9: memref<1x16xf32, #tpu.memory_space<vmem>>, %arg10: memref<1x512xf32, #tpu.memory_space<vmem>>, %arg11: memref<1x512xf32, #tpu.memory_space<vmem>>, %arg12: memref<128x512xf32, #tpu.memory_space<vmem>>, %arg13: memref<128x2xf32, #tpu.memory_space<vmem>>, %arg14: memref<1x2xf32, #tpu.memory_space<vmem>>, %arg15: memref<2x2xf32, #tpu.memory_space<vmem>>) attributes {dimension_semantics = [#tpu.dimension_semantics<arbitrary>], iteration_bounds = array<i64: 1>, scalar_prefetch = 0 : i64, scratch_operands = 0 : i64, tpu.core_type = #tpu.core_type<tc>, window_params = [{pipeline_mode = #tpu.pipeline_mode<synchronous>, transform_indices = @transform_0, window_bounds = array<i64: 2, 288>}, {pipeline_mode = #tpu.pipeline_mode<synchronous>, transform_indices = @transform_1, window_bounds = array<i64: 288, 256>}, {pipeline_mode = #tpu.pipeline_mode<synchronous>, transform_indices = @transform_2, window_bounds = array<i64: 1, 256>}, {pipeline_mode = #tpu.pipeline_mode<synchronous>, transform_indices = @transform_3, window_bounds = array<i64: 256, 256>}, {pipeline_mode = #tpu.pipeline_mode<synchronous>, transform_indices = @transform_4, window_bounds = array<i64: 1, 256>}, {pipeline_mode = #tpu.pipeline_mode<synchronous>, transform_indices = @transform_5, window_bounds = array<i64: 256, 64>}, {pipeline_mode = #tpu.pipeline_mode<synchronous>, transform_indices = @transform_6, window_bounds = array<i64: 1, 64>}, {pipeline_mode = #tpu.pipeline_mode<synchronous>, transform_indices = @transform_7, window_bounds = array<i64: 64, 16>}, {pipeline_mode = #tpu.pipeline_mode<synchronous>, transform_indices = @transform_8, window_bounds = array<i64: 1, 16>}, {pipeline_mode = #tpu.pipeline_mode<synchronous>, transform_indices = @transform_9, window_bounds = array<i64: 1, 512>}, {pipeline_mode = #tpu.pipeline_mode<synchronous>, transform_indices = @transform_10, window_bounds = array<i64: 1, 512>}, {pipeline_mode = #tpu.pipeline_mode<synchronous>, transform_indices = @transform_11, window_bounds = array<i64: 128, 512>}, {pipeline_mode = #tpu.pipeline_mode<synchronous>, transform_indices = @transform_12, window_bounds = array<i64: 128, 2>}, {pipeline_mode = #tpu.pipeline_mode<synchronous>, transform_indices = @transform_13, window_bounds = array<i64: 1, 2>}, {pipeline_mode = #tpu.pipeline_mode<synchronous>, transform_indices = @transform_14, window_bounds = array<i64: 2, 2>}]} {
    %c0 = arith.constant 0 : index
    %c0_0 = arith.constant 0 : index
    %0 = vector.load %arg1[%c0, %c0_0] : memref<2x288xbf16, #tpu.memory_space<vmem>>, vector<2x288xbf16>
    %c0_1 = arith.constant 0 : index
    %c0_2 = arith.constant 0 : index
    %1 = vector.load %arg2[%c0_1, %c0_2] : memref<288x256xbf16, #tpu.memory_space<vmem>>, vector<288x256xbf16>
    %cst = arith.constant dense<0.000000e+00> : vector<2x256xf32>
    %2 = tpu.matmul %0, %1, %cst {dimension_numbers = #tpu.dot_dimension_numbers<[1], [0], [0], [1], [0, 0, 1, 1], [], []>} : vector<2x288xbf16>, vector<288x256xbf16>, vector<2x256xf32> -> vector<2x256xf32>
    %c0_3 = arith.constant 0 : index
    %c0_4 = arith.constant 0 : index
    %3 = vector.load %arg3[%c0_3, %c0_4] : memref<1x256xf32, #tpu.memory_space<vmem>>, vector<1x256xf32>
    %4 = vector.broadcast %3 : vector<1x256xf32> to vector<2x256xf32>
    %5 = arith.addf %2, %4 : vector<2x256xf32>
    %cst_5 = arith.constant 0.000000e+00 : f32
    %6 = vector.broadcast %cst_5 : f32 to vector<2x256xf32>
    %7 = arith.maximumf %5, %6 : vector<2x256xf32>
    %8 = arith.truncf %7 : vector<2x256xf32> to vector<2x256xbf16>
    %c0_6 = arith.constant 0 : index
    %c0_7 = arith.constant 0 : index
    %9 = vector.load %arg4[%c0_6, %c0_7] : memref<256x256xbf16, #tpu.memory_space<vmem>>, vector<256x256xbf16>
    %cst_8 = arith.constant dense<0.000000e+00> : vector<2x256xf32>
    %10 = tpu.matmul %8, %9, %cst_8 {dimension_numbers = #tpu.dot_dimension_numbers<[1], [0], [0], [1], [0, 0, 1, 1], [], []>} : vector<2x256xbf16>, vector<256x256xbf16>, vector<2x256xf32> -> vector<2x256xf32>
    %c0_9 = arith.constant 0 : index
    %c0_10 = arith.constant 0 : index
    %11 = vector.load %arg5[%c0_9, %c0_10] : memref<1x256xf32, #tpu.memory_space<vmem>>, vector<1x256xf32>
    %12 = vector.broadcast %11 : vector<1x256xf32> to vector<2x256xf32>
    %13 = arith.addf %10, %12 : vector<2x256xf32>
    %14 = arith.truncf %13 : vector<2x256xf32> to vector<2x256xbf16>
    %c0_11 = arith.constant 0 : index
    %c0_12 = arith.constant 0 : index
    %15 = vector.load %arg6[%c0_11, %c0_12] : memref<256x64xbf16, #tpu.memory_space<vmem>>, vector<256x64xbf16>
    %cst_13 = arith.constant dense<0.000000e+00> : vector<2x64xf32>
    %16 = tpu.matmul %14, %15, %cst_13 {dimension_numbers = #tpu.dot_dimension_numbers<[1], [0], [0], [1], [0, 0, 1, 1], [], []>} : vector<2x256xbf16>, vector<256x64xbf16>, vector<2x64xf32> -> vector<2x64xf32>
    %c0_14 = arith.constant 0 : index
    %c0_15 = arith.constant 0 : index
    %17 = vector.load %arg7[%c0_14, %c0_15] : memref<1x64xf32, #tpu.memory_space<vmem>>, vector<1x64xf32>
    %18 = vector.broadcast %17 : vector<1x64xf32> to vector<2x64xf32>
    %19 = arith.addf %16, %18 : vector<2x64xf32>
    %20 = arith.truncf %19 : vector<2x64xf32> to vector<2x64xbf16>
    %c0_16 = arith.constant 0 : index
    %c0_17 = arith.constant 0 : index
    %21 = vector.load %arg8[%c0_16, %c0_17] : memref<64x16xbf16, #tpu.memory_space<vmem>>, vector<64x16xbf16>
    %cst_18 = arith.constant dense<0.000000e+00> : vector<2x16xf32>
    %22 = tpu.matmul %20, %21, %cst_18 {dimension_numbers = #tpu.dot_dimension_numbers<[1], [0], [0], [1], [0, 0, 1, 1], [], []>} : vector<2x64xbf16>, vector<64x16xbf16>, vector<2x16xf32> -> vector<2x16xf32>
    %c0_19 = arith.constant 0 : index
    %c0_20 = arith.constant 0 : index
    %23 = vector.load %arg9[%c0_19, %c0_20] : memref<1x16xf32, #tpu.memory_space<vmem>>, vector<1x16xf32>
    %24 = vector.broadcast %23 : vector<1x16xf32> to vector<2x16xf32>
    %25 = arith.addf %22, %24 : vector<2x16xf32>
    %c0_21 = arith.constant 0 : index
    %c0_22 = arith.constant 0 : index
    %26 = vector.load %arg10[%c0_21, %c0_22] : memref<1x512xf32, #tpu.memory_space<vmem>>, vector<1x512xf32>
    %c0_23 = arith.constant 0 : index
    %c0_24 = arith.constant 0 : index
    %27 = vector.load %arg11[%c0_23, %c0_24] : memref<1x512xf32, #tpu.memory_space<vmem>>, vector<1x512xf32>
    %c0_25 = arith.constant 0 : index
    %c0_26 = arith.constant 0 : index
    %28 = vector.load %arg12[%c0_25, %c0_26] : memref<128x512xf32, #tpu.memory_space<vmem>>, vector<128x512xf32>
    %29 = vector.extract_strided_slice %25 {offsets = [0, 0], sizes = [2, 1], strides = [1, 1]} : vector<2x16xf32> to vector<2x1xf32>
    %30 = vector.broadcast %29 : vector<2x1xf32> to vector<2x512xf32>
    %31 = vector.broadcast %26 : vector<1x512xf32> to vector<2x512xf32>
    %32 = arith.mulf %30, %31 : vector<2x512xf32>
    %33 = vector.broadcast %27 : vector<1x512xf32> to vector<2x512xf32>
    %34 = arith.addf %32, %33 : vector<2x512xf32>
    %35 = vector.extract_strided_slice %25 {offsets = [0, 1], sizes = [2, 1], strides = [1, 1]} : vector<2x16xf32> to vector<2x1xf32>
    %36 = vector.broadcast %35 : vector<2x1xf32> to vector<2x512xf32>
    %37 = vector.broadcast %26 : vector<1x512xf32> to vector<2x512xf32>
    %38 = arith.mulf %36, %37 : vector<2x512xf32>
    %39 = vector.broadcast %27 : vector<1x512xf32> to vector<2x512xf32>
    %40 = arith.addf %38, %39 : vector<2x512xf32>
    %41 = vector.extract_strided_slice %25 {offsets = [0, 2], sizes = [2, 1], strides = [1, 1]} : vector<2x16xf32> to vector<2x1xf32>
    %42 = vector.broadcast %41 : vector<2x1xf32> to vector<2x512xf32>
    %43 = vector.broadcast %26 : vector<1x512xf32> to vector<2x512xf32>
    %44 = arith.mulf %42, %43 : vector<2x512xf32>
    %45 = vector.broadcast %27 : vector<1x512xf32> to vector<2x512xf32>
    %46 = arith.addf %44, %45 : vector<2x512xf32>
    %47 = vector.extract_strided_slice %25 {offsets = [0, 3], sizes = [2, 1], strides = [1, 1]} : vector<2x16xf32> to vector<2x1xf32>
    %48 = vector.broadcast %47 : vector<2x1xf32> to vector<2x512xf32>
    %49 = vector.broadcast %26 : vector<1x512xf32> to vector<2x512xf32>
    %50 = arith.mulf %48, %49 : vector<2x512xf32>
    %51 = vector.broadcast %27 : vector<1x512xf32> to vector<2x512xf32>
    %52 = arith.addf %50, %51 : vector<2x512xf32>
    %53 = vector.extract_strided_slice %25 {offsets = [0, 4], sizes = [2, 1], strides = [1, 1]} : vector<2x16xf32> to vector<2x1xf32>
    %54 = vector.broadcast %53 : vector<2x1xf32> to vector<2x512xf32>
    %55 = vector.broadcast %26 : vector<1x512xf32> to vector<2x512xf32>
    %56 = arith.mulf %54, %55 : vector<2x512xf32>
    %57 = vector.broadcast %27 : vector<1x512xf32> to vector<2x512xf32>
    %58 = arith.addf %56, %57 : vector<2x512xf32>
    %59 = vector.extract_strided_slice %25 {offsets = [0, 5], sizes = [2, 1], strides = [1, 1]} : vector<2x16xf32> to vector<2x1xf32>
    %60 = vector.broadcast %59 : vector<2x1xf32> to vector<2x512xf32>
    %61 = vector.broadcast %26 : vector<1x512xf32> to vector<2x512xf32>
    %62 = arith.mulf %60, %61 : vector<2x512xf32>
    %63 = vector.broadcast %27 : vector<1x512xf32> to vector<2x512xf32>
    %64 = arith.addf %62, %63 : vector<2x512xf32>
    %65 = vector.extract_strided_slice %25 {offsets = [0, 6], sizes = [2, 1], strides = [1, 1]} : vector<2x16xf32> to vector<2x1xf32>
    %66 = vector.broadcast %65 : vector<2x1xf32> to vector<2x512xf32>
    %67 = vector.broadcast %26 : vector<1x512xf32> to vector<2x512xf32>
    %68 = arith.mulf %66, %67 : vector<2x512xf32>
    %69 = vector.broadcast %27 : vector<1x512xf32> to vector<2x512xf32>
    %70 = arith.addf %68, %69 : vector<2x512xf32>
    %71 = vector.extract_strided_slice %25 {offsets = [0, 7], sizes = [2, 1], strides = [1, 1]} : vector<2x16xf32> to vector<2x1xf32>
    %72 = vector.broadcast %71 : vector<2x1xf32> to vector<2x512xf32>
    %73 = vector.broadcast %26 : vector<1x512xf32> to vector<2x512xf32>
    %74 = arith.mulf %72, %73 : vector<2x512xf32>
    %75 = vector.broadcast %27 : vector<1x512xf32> to vector<2x512xf32>
    %76 = arith.addf %74, %75 : vector<2x512xf32>
    %77 = vector.extract_strided_slice %25 {offsets = [0, 8], sizes = [2, 1], strides = [1, 1]} : vector<2x16xf32> to vector<2x1xf32>
    %78 = vector.broadcast %77 : vector<2x1xf32> to vector<2x512xf32>
    %79 = vector.broadcast %26 : vector<1x512xf32> to vector<2x512xf32>
    %80 = arith.mulf %78, %79 : vector<2x512xf32>
    %81 = vector.broadcast %27 : vector<1x512xf32> to vector<2x512xf32>
    %82 = arith.addf %80, %81 : vector<2x512xf32>
    %83 = vector.extract_strided_slice %25 {offsets = [0, 9], sizes = [2, 1], strides = [1, 1]} : vector<2x16xf32> to vector<2x1xf32>
    %84 = vector.broadcast %83 : vector<2x1xf32> to vector<2x512xf32>
    %85 = vector.broadcast %26 : vector<1x512xf32> to vector<2x512xf32>
    %86 = arith.mulf %84, %85 : vector<2x512xf32>
    %87 = vector.broadcast %27 : vector<1x512xf32> to vector<2x512xf32>
    %88 = arith.addf %86, %87 : vector<2x512xf32>
    %89 = vector.extract_strided_slice %25 {offsets = [0, 10], sizes = [2, 1], strides = [1, 1]} : vector<2x16xf32> to vector<2x1xf32>
    %90 = vector.broadcast %89 : vector<2x1xf32> to vector<2x512xf32>
    %91 = vector.broadcast %26 : vector<1x512xf32> to vector<2x512xf32>
    %92 = arith.mulf %90, %91 : vector<2x512xf32>
    %93 = vector.broadcast %27 : vector<1x512xf32> to vector<2x512xf32>
    %94 = arith.addf %92, %93 : vector<2x512xf32>
    %95 = vector.extract_strided_slice %25 {offsets = [0, 11], sizes = [2, 1], strides = [1, 1]} : vector<2x16xf32> to vector<2x1xf32>
    %96 = vector.broadcast %95 : vector<2x1xf32> to vector<2x512xf32>
    %97 = vector.broadcast %26 : vector<1x512xf32> to vector<2x512xf32>
    %98 = arith.mulf %96, %97 : vector<2x512xf32>
    %99 = vector.broadcast %27 : vector<1x512xf32> to vector<2x512xf32>
    %100 = arith.addf %98, %99 : vector<2x512xf32>
    %101 = vector.extract_strided_slice %25 {offsets = [0, 12], sizes = [2, 1], strides = [1, 1]} : vector<2x16xf32> to vector<2x1xf32>
    %102 = vector.broadcast %101 : vector<2x1xf32> to vector<2x512xf32>
    %103 = vector.broadcast %26 : vector<1x512xf32> to vector<2x512xf32>
    %104 = arith.mulf %102, %103 : vector<2x512xf32>
    %105 = vector.broadcast %27 : vector<1x512xf32> to vector<2x512xf32>
    %106 = arith.addf %104, %105 : vector<2x512xf32>
    %107 = vector.extract_strided_slice %25 {offsets = [0, 13], sizes = [2, 1], strides = [1, 1]} : vector<2x16xf32> to vector<2x1xf32>
    %108 = vector.broadcast %107 : vector<2x1xf32> to vector<2x512xf32>
    %109 = vector.broadcast %26 : vector<1x512xf32> to vector<2x512xf32>
    %110 = arith.mulf %108, %109 : vector<2x512xf32>
    %111 = vector.broadcast %27 : vector<1x512xf32> to vector<2x512xf32>
    %112 = arith.addf %110, %111 : vector<2x512xf32>
    %113 = vector.extract_strided_slice %25 {offsets = [0, 14], sizes = [2, 1], strides = [1, 1]} : vector<2x16xf32> to vector<2x1xf32>
    %114 = vector.broadcast %113 : vector<2x1xf32> to vector<2x512xf32>
    %115 = vector.broadcast %26 : vector<1x512xf32> to vector<2x512xf32>
    %116 = arith.mulf %114, %115 : vector<2x512xf32>
    %117 = vector.broadcast %27 : vector<1x512xf32> to vector<2x512xf32>
    %118 = arith.addf %116, %117 : vector<2x512xf32>
    %119 = vector.extract_strided_slice %25 {offsets = [0, 15], sizes = [2, 1], strides = [1, 1]} : vector<2x16xf32> to vector<2x1xf32>
    %120 = vector.broadcast %119 : vector<2x1xf32> to vector<2x512xf32>
    %121 = vector.broadcast %26 : vector<1x512xf32> to vector<2x512xf32>
    %122 = arith.mulf %120, %121 : vector<2x512xf32>
    %123 = vector.broadcast %27 : vector<1x512xf32> to vector<2x512xf32>
    %124 = arith.addf %122, %123 : vector<2x512xf32>
    %cst_27 = arith.constant 0.000000e+00 : f32
    %125 = vector.broadcast %cst_27 : f32 to vector<2x128xf32>
    %cst_28 = arith.constant 0.000000e+00 : f32
    %126 = vector.broadcast %cst_28 : f32 to vector<2x128xf32>
    %cst_29 = arith.constant dense<0.000000e+00> : vector<2x512xf32>
    %127 = tpu.matmul %125, %28, %cst_29 {dimension_numbers = #tpu.dot_dimension_numbers<[1], [0], [0], [1], [0, 0, 1, 1], [], []>} : vector<2x128xf32>, vector<128x512xf32>, vector<2x512xf32> -> vector<2x512xf32>
    %128 = arith.addf %34, %127 : vector<2x512xf32>
    %129 = vector.extract_strided_slice %128 {offsets = [0, 0], sizes = [2, 128], strides = [1, 1]} : vector<2x512xf32> to vector<2x128xf32>
    %130 = arith.negf %129 : vector<2x128xf32>
    %131 = math.exp %130 : vector<2x128xf32>
    %cst_30 = arith.constant 1.000000e+00 : f32
    %132 = vector.broadcast %cst_30 : f32 to vector<2x128xf32>
    %133 = arith.addf %132, %131 : vector<2x128xf32>
    %134 = arith.divf %132, %133 : vector<2x128xf32>
    %135 = vector.extract_strided_slice %128 {offsets = [0, 128], sizes = [2, 128], strides = [1, 1]} : vector<2x512xf32> to vector<2x128xf32>
    %136 = arith.negf %135 : vector<2x128xf32>
    %137 = math.exp %136 : vector<2x128xf32>
    %cst_31 = arith.constant 1.000000e+00 : f32
    %138 = vector.broadcast %cst_31 : f32 to vector<2x128xf32>
    %139 = arith.addf %138, %137 : vector<2x128xf32>
    %140 = arith.divf %138, %139 : vector<2x128xf32>
    %141 = vector.extract_strided_slice %128 {offsets = [0, 256], sizes = [2, 128], strides = [1, 1]} : vector<2x512xf32> to vector<2x128xf32>
    %142 = math.tanh %141 : vector<2x128xf32>
    %143 = vector.extract_strided_slice %128 {offsets = [0, 384], sizes = [2, 128], strides = [1, 1]} : vector<2x512xf32> to vector<2x128xf32>
    %144 = arith.negf %143 : vector<2x128xf32>
    %145 = math.exp %144 : vector<2x128xf32>
    %cst_32 = arith.constant 1.000000e+00 : f32
    %146 = vector.broadcast %cst_32 : f32 to vector<2x128xf32>
    %147 = arith.addf %146, %145 : vector<2x128xf32>
    %148 = arith.divf %146, %147 : vector<2x128xf32>
    %149 = arith.mulf %140, %126 : vector<2x128xf32>
    %150 = arith.mulf %134, %142 : vector<2x128xf32>
    %151 = arith.addf %149, %150 : vector<2x128xf32>
    %152 = math.tanh %151 : vector<2x128xf32>
    %153 = arith.mulf %148, %152 : vector<2x128xf32>
    %cst_33 = arith.constant dense<0.000000e+00> : vector<2x512xf32>
    %154 = tpu.matmul %153, %28, %cst_33 {dimension_numbers = #tpu.dot_dimension_numbers<[1], [0], [0], [1], [0, 0, 1, 1], [], []>} : vector<2x128xf32>, vector<128x512xf32>, vector<2x512xf32> -> vector<2x512xf32>
    %155 = arith.addf %40, %154 : vector<2x512xf32>
    %156 = vector.extract_strided_slice %155 {offsets = [0, 0], sizes = [2, 128], strides = [1, 1]} : vector<2x512xf32> to vector<2x128xf32>
    %157 = arith.negf %156 : vector<2x128xf32>
    %158 = math.exp %157 : vector<2x128xf32>
    %cst_34 = arith.constant 1.000000e+00 : f32
    %159 = vector.broadcast %cst_34 : f32 to vector<2x128xf32>
    %160 = arith.addf %159, %158 : vector<2x128xf32>
    %161 = arith.divf %159, %160 : vector<2x128xf32>
    %162 = vector.extract_strided_slice %155 {offsets = [0, 128], sizes = [2, 128], strides = [1, 1]} : vector<2x512xf32> to vector<2x128xf32>
    %163 = arith.negf %162 : vector<2x128xf32>
    %164 = math.exp %163 : vector<2x128xf32>
    %cst_35 = arith.constant 1.000000e+00 : f32
    %165 = vector.broadcast %cst_35 : f32 to vector<2x128xf32>
    %166 = arith.addf %165, %164 : vector<2x128xf32>
    %167 = arith.divf %165, %166 : vector<2x128xf32>
    %168 = vector.extract_strided_slice %155 {offsets = [0, 256], sizes = [2, 128], strides = [1, 1]} : vector<2x512xf32> to vector<2x128xf32>
    %169 = math.tanh %168 : vector<2x128xf32>
    %170 = vector.extract_strided_slice %155 {offsets = [0, 384], sizes = [2, 128], strides = [1, 1]} : vector<2x512xf32> to vector<2x128xf32>
    %171 = arith.negf %170 : vector<2x128xf32>
    %172 = math.exp %171 : vector<2x128xf32>
    %cst_36 = arith.constant 1.000000e+00 : f32
    %173 = vector.broadcast %cst_36 : f32 to vector<2x128xf32>
    %174 = arith.addf %173, %172 : vector<2x128xf32>
    %175 = arith.divf %173, %174 : vector<2x128xf32>
    %176 = arith.mulf %167, %151 : vector<2x128xf32>
    %177 = arith.mulf %161, %169 : vector<2x128xf32>
    %178 = arith.addf %176, %177 : vector<2x128xf32>
    %179 = math.tanh %178 : vector<2x128xf32>
    %180 = arith.mulf %175, %179 : vector<2x128xf32>
    %cst_37 = arith.constant dense<0.000000e+00> : vector<2x512xf32>
    %181 = tpu.matmul %180, %28, %cst_37 {dimension_numbers = #tpu.dot_dimension_numbers<[1], [0], [0], [1], [0, 0, 1, 1], [], []>} : vector<2x128xf32>, vector<128x512xf32>, vector<2x512xf32> -> vector<2x512xf32>
    %182 = arith.addf %46, %181 : vector<2x512xf32>
    %183 = vector.extract_strided_slice %182 {offsets = [0, 0], sizes = [2, 128], strides = [1, 1]} : vector<2x512xf32> to vector<2x128xf32>
    %184 = arith.negf %183 : vector<2x128xf32>
    %185 = math.exp %184 : vector<2x128xf32>
    %cst_38 = arith.constant 1.000000e+00 : f32
    %186 = vector.broadcast %cst_38 : f32 to vector<2x128xf32>
    %187 = arith.addf %186, %185 : vector<2x128xf32>
    %188 = arith.divf %186, %187 : vector<2x128xf32>
    %189 = vector.extract_strided_slice %182 {offsets = [0, 128], sizes = [2, 128], strides = [1, 1]} : vector<2x512xf32> to vector<2x128xf32>
    %190 = arith.negf %189 : vector<2x128xf32>
    %191 = math.exp %190 : vector<2x128xf32>
    %cst_39 = arith.constant 1.000000e+00 : f32
    %192 = vector.broadcast %cst_39 : f32 to vector<2x128xf32>
    %193 = arith.addf %192, %191 : vector<2x128xf32>
    %194 = arith.divf %192, %193 : vector<2x128xf32>
    %195 = vector.extract_strided_slice %182 {offsets = [0, 256], sizes = [2, 128], strides = [1, 1]} : vector<2x512xf32> to vector<2x128xf32>
    %196 = math.tanh %195 : vector<2x128xf32>
    %197 = vector.extract_strided_slice %182 {offsets = [0, 384], sizes = [2, 128], strides = [1, 1]} : vector<2x512xf32> to vector<2x128xf32>
    %198 = arith.negf %197 : vector<2x128xf32>
    %199 = math.exp %198 : vector<2x128xf32>
    %cst_40 = arith.constant 1.000000e+00 : f32
    %200 = vector.broadcast %cst_40 : f32 to vector<2x128xf32>
    %201 = arith.addf %200, %199 : vector<2x128xf32>
    %202 = arith.divf %200, %201 : vector<2x128xf32>
    %203 = arith.mulf %194, %178 : vector<2x128xf32>
    %204 = arith.mulf %188, %196 : vector<2x128xf32>
    %205 = arith.addf %203, %204 : vector<2x128xf32>
    %206 = math.tanh %205 : vector<2x128xf32>
    %207 = arith.mulf %202, %206 : vector<2x128xf32>
    %cst_41 = arith.constant dense<0.000000e+00> : vector<2x512xf32>
    %208 = tpu.matmul %207, %28, %cst_41 {dimension_numbers = #tpu.dot_dimension_numbers<[1], [0], [0], [1], [0, 0, 1, 1], [], []>} : vector<2x128xf32>, vector<128x512xf32>, vector<2x512xf32> -> vector<2x512xf32>
    %209 = arith.addf %52, %208 : vector<2x512xf32>
    %210 = vector.extract_strided_slice %209 {offsets = [0, 0], sizes = [2, 128], strides = [1, 1]} : vector<2x512xf32> to vector<2x128xf32>
    %211 = arith.negf %210 : vector<2x128xf32>
    %212 = math.exp %211 : vector<2x128xf32>
    %cst_42 = arith.constant 1.000000e+00 : f32
    %213 = vector.broadcast %cst_42 : f32 to vector<2x128xf32>
    %214 = arith.addf %213, %212 : vector<2x128xf32>
    %215 = arith.divf %213, %214 : vector<2x128xf32>
    %216 = vector.extract_strided_slice %209 {offsets = [0, 128], sizes = [2, 128], strides = [1, 1]} : vector<2x512xf32> to vector<2x128xf32>
    %217 = arith.negf %216 : vector<2x128xf32>
    %218 = math.exp %217 : vector<2x128xf32>
    %cst_43 = arith.constant 1.000000e+00 : f32
    %219 = vector.broadcast %cst_43 : f32 to vector<2x128xf32>
    %220 = arith.addf %219, %218 : vector<2x128xf32>
    %221 = arith.divf %219, %220 : vector<2x128xf32>
    %222 = vector.extract_strided_slice %209 {offsets = [0, 256], sizes = [2, 128], strides = [1, 1]} : vector<2x512xf32> to vector<2x128xf32>
    %223 = math.tanh %222 : vector<2x128xf32>
    %224 = vector.extract_strided_slice %209 {offsets = [0, 384], sizes = [2, 128], strides = [1, 1]} : vector<2x512xf32> to vector<2x128xf32>
    %225 = arith.negf %224 : vector<2x128xf32>
    %226 = math.exp %225 : vector<2x128xf32>
    %cst_44 = arith.constant 1.000000e+00 : f32
    %227 = vector.broadcast %cst_44 : f32 to vector<2x128xf32>
    %228 = arith.addf %227, %226 : vector<2x128xf32>
    %229 = arith.divf %227, %228 : vector<2x128xf32>
    %230 = arith.mulf %221, %205 : vector<2x128xf32>
    %231 = arith.mulf %215, %223 : vector<2x128xf32>
    %232 = arith.addf %230, %231 : vector<2x128xf32>
    %233 = math.tanh %232 : vector<2x128xf32>
    %234 = arith.mulf %229, %233 : vector<2x128xf32>
    %cst_45 = arith.constant dense<0.000000e+00> : vector<2x512xf32>
    %235 = tpu.matmul %234, %28, %cst_45 {dimension_numbers = #tpu.dot_dimension_numbers<[1], [0], [0], [1], [0, 0, 1, 1], [], []>} : vector<2x128xf32>, vector<128x512xf32>, vector<2x512xf32> -> vector<2x512xf32>
    %236 = arith.addf %58, %235 : vector<2x512xf32>
    %237 = vector.extract_strided_slice %236 {offsets = [0, 0], sizes = [2, 128], strides = [1, 1]} : vector<2x512xf32> to vector<2x128xf32>
    %238 = arith.negf %237 : vector<2x128xf32>
    %239 = math.exp %238 : vector<2x128xf32>
    %cst_46 = arith.constant 1.000000e+00 : f32
    %240 = vector.broadcast %cst_46 : f32 to vector<2x128xf32>
    %241 = arith.addf %240, %239 : vector<2x128xf32>
    %242 = arith.divf %240, %241 : vector<2x128xf32>
    %243 = vector.extract_strided_slice %236 {offsets = [0, 128], sizes = [2, 128], strides = [1, 1]} : vector<2x512xf32> to vector<2x128xf32>
    %244 = arith.negf %243 : vector<2x128xf32>
    %245 = math.exp %244 : vector<2x128xf32>
    %cst_47 = arith.constant 1.000000e+00 : f32
    %246 = vector.broadcast %cst_47 : f32 to vector<2x128xf32>
    %247 = arith.addf %246, %245 : vector<2x128xf32>
    %248 = arith.divf %246, %247 : vector<2x128xf32>
    %249 = vector.extract_strided_slice %236 {offsets = [0, 256], sizes = [2, 128], strides = [1, 1]} : vector<2x512xf32> to vector<2x128xf32>
    %250 = math.tanh %249 : vector<2x128xf32>
    %251 = vector.extract_strided_slice %236 {offsets = [0, 384], sizes = [2, 128], strides = [1, 1]} : vector<2x512xf32> to vector<2x128xf32>
    %252 = arith.negf %251 : vector<2x128xf32>
    %253 = math.exp %252 : vector<2x128xf32>
    %cst_48 = arith.constant 1.000000e+00 : f32
    %254 = vector.broadcast %cst_48 : f32 to vector<2x128xf32>
    %255 = arith.addf %254, %253 : vector<2x128xf32>
    %256 = arith.divf %254, %255 : vector<2x128xf32>
    %257 = arith.mulf %248, %232 : vector<2x128xf32>
    %258 = arith.mulf %242, %250 : vector<2x128xf32>
    %259 = arith.addf %257, %258 : vector<2x128xf32>
    %260 = math.tanh %259 : vector<2x128xf32>
    %261 = arith.mulf %256, %260 : vector<2x128xf32>
    %cst_49 = arith.constant dense<0.000000e+00> : vector<2x512xf32>
    %262 = tpu.matmul %261, %28, %cst_49 {dimension_numbers = #tpu.dot_dimension_numbers<[1], [0], [0], [1], [0, 0, 1, 1], [], []>} : vector<2x128xf32>, vector<128x512xf32>, vector<2x512xf32> -> vector<2x512xf32>
    %263 = arith.addf %64, %262 : vector<2x512xf32>
    %264 = vector.extract_strided_slice %263 {offsets = [0, 0], sizes = [2, 128], strides = [1, 1]} : vector<2x512xf32> to vector<2x128xf32>
    %265 = arith.negf %264 : vector<2x128xf32>
    %266 = math.exp %265 : vector<2x128xf32>
    %cst_50 = arith.constant 1.000000e+00 : f32
    %267 = vector.broadcast %cst_50 : f32 to vector<2x128xf32>
    %268 = arith.addf %267, %266 : vector<2x128xf32>
    %269 = arith.divf %267, %268 : vector<2x128xf32>
    %270 = vector.extract_strided_slice %263 {offsets = [0, 128], sizes = [2, 128], strides = [1, 1]} : vector<2x512xf32> to vector<2x128xf32>
    %271 = arith.negf %270 : vector<2x128xf32>
    %272 = math.exp %271 : vector<2x128xf32>
    %cst_51 = arith.constant 1.000000e+00 : f32
    %273 = vector.broadcast %cst_51 : f32 to vector<2x128xf32>
    %274 = arith.addf %273, %272 : vector<2x128xf32>
    %275 = arith.divf %273, %274 : vector<2x128xf32>
    %276 = vector.extract_strided_slice %263 {offsets = [0, 256], sizes = [2, 128], strides = [1, 1]} : vector<2x512xf32> to vector<2x128xf32>
    %277 = math.tanh %276 : vector<2x128xf32>
    %278 = vector.extract_strided_slice %263 {offsets = [0, 384], sizes = [2, 128], strides = [1, 1]} : vector<2x512xf32> to vector<2x128xf32>
    %279 = arith.negf %278 : vector<2x128xf32>
    %280 = math.exp %279 : vector<2x128xf32>
    %cst_52 = arith.constant 1.000000e+00 : f32
    %281 = vector.broadcast %cst_52 : f32 to vector<2x128xf32>
    %282 = arith.addf %281, %280 : vector<2x128xf32>
    %283 = arith.divf %281, %282 : vector<2x128xf32>
    %284 = arith.mulf %275, %259 : vector<2x128xf32>
    %285 = arith.mulf %269, %277 : vector<2x128xf32>
    %286 = arith.addf %284, %285 : vector<2x128xf32>
    %287 = math.tanh %286 : vector<2x128xf32>
    %288 = arith.mulf %283, %287 : vector<2x128xf32>
    %cst_53 = arith.constant dense<0.000000e+00> : vector<2x512xf32>
    %289 = tpu.matmul %288, %28, %cst_53 {dimension_numbers = #tpu.dot_dimension_numbers<[1], [0], [0], [1], [0, 0, 1, 1], [], []>} : vector<2x128xf32>, vector<128x512xf32>, vector<2x512xf32> -> vector<2x512xf32>
    %290 = arith.addf %70, %289 : vector<2x512xf32>
    %291 = vector.extract_strided_slice %290 {offsets = [0, 0], sizes = [2, 128], strides = [1, 1]} : vector<2x512xf32> to vector<2x128xf32>
    %292 = arith.negf %291 : vector<2x128xf32>
    %293 = math.exp %292 : vector<2x128xf32>
    %cst_54 = arith.constant 1.000000e+00 : f32
    %294 = vector.broadcast %cst_54 : f32 to vector<2x128xf32>
    %295 = arith.addf %294, %293 : vector<2x128xf32>
    %296 = arith.divf %294, %295 : vector<2x128xf32>
    %297 = vector.extract_strided_slice %290 {offsets = [0, 128], sizes = [2, 128], strides = [1, 1]} : vector<2x512xf32> to vector<2x128xf32>
    %298 = arith.negf %297 : vector<2x128xf32>
    %299 = math.exp %298 : vector<2x128xf32>
    %cst_55 = arith.constant 1.000000e+00 : f32
    %300 = vector.broadcast %cst_55 : f32 to vector<2x128xf32>
    %301 = arith.addf %300, %299 : vector<2x128xf32>
    %302 = arith.divf %300, %301 : vector<2x128xf32>
    %303 = vector.extract_strided_slice %290 {offsets = [0, 256], sizes = [2, 128], strides = [1, 1]} : vector<2x512xf32> to vector<2x128xf32>
    %304 = math.tanh %303 : vector<2x128xf32>
    %305 = vector.extract_strided_slice %290 {offsets = [0, 384], sizes = [2, 128], strides = [1, 1]} : vector<2x512xf32> to vector<2x128xf32>
    %306 = arith.negf %305 : vector<2x128xf32>
    %307 = math.exp %306 : vector<2x128xf32>
    %cst_56 = arith.constant 1.000000e+00 : f32
    %308 = vector.broadcast %cst_56 : f32 to vector<2x128xf32>
    %309 = arith.addf %308, %307 : vector<2x128xf32>
    %310 = arith.divf %308, %309 : vector<2x128xf32>
    %311 = arith.mulf %302, %286 : vector<2x128xf32>
    %312 = arith.mulf %296, %304 : vector<2x128xf32>
    %313 = arith.addf %311, %312 : vector<2x128xf32>
    %314 = math.tanh %313 : vector<2x128xf32>
    %315 = arith.mulf %310, %314 : vector<2x128xf32>
    %cst_57 = arith.constant dense<0.000000e+00> : vector<2x512xf32>
    %316 = tpu.matmul %315, %28, %cst_57 {dimension_numbers = #tpu.dot_dimension_numbers<[1], [0], [0], [1], [0, 0, 1, 1], [], []>} : vector<2x128xf32>, vector<128x512xf32>, vector<2x512xf32> -> vector<2x512xf32>
    %317 = arith.addf %76, %316 : vector<2x512xf32>
    %318 = vector.extract_strided_slice %317 {offsets = [0, 0], sizes = [2, 128], strides = [1, 1]} : vector<2x512xf32> to vector<2x128xf32>
    %319 = arith.negf %318 : vector<2x128xf32>
    %320 = math.exp %319 : vector<2x128xf32>
    %cst_58 = arith.constant 1.000000e+00 : f32
    %321 = vector.broadcast %cst_58 : f32 to vector<2x128xf32>
    %322 = arith.addf %321, %320 : vector<2x128xf32>
    %323 = arith.divf %321, %322 : vector<2x128xf32>
    %324 = vector.extract_strided_slice %317 {offsets = [0, 128], sizes = [2, 128], strides = [1, 1]} : vector<2x512xf32> to vector<2x128xf32>
    %325 = arith.negf %324 : vector<2x128xf32>
    %326 = math.exp %325 : vector<2x128xf32>
    %cst_59 = arith.constant 1.000000e+00 : f32
    %327 = vector.broadcast %cst_59 : f32 to vector<2x128xf32>
    %328 = arith.addf %327, %326 : vector<2x128xf32>
    %329 = arith.divf %327, %328 : vector<2x128xf32>
    %330 = vector.extract_strided_slice %317 {offsets = [0, 256], sizes = [2, 128], strides = [1, 1]} : vector<2x512xf32> to vector<2x128xf32>
    %331 = math.tanh %330 : vector<2x128xf32>
    %332 = vector.extract_strided_slice %317 {offsets = [0, 384], sizes = [2, 128], strides = [1, 1]} : vector<2x512xf32> to vector<2x128xf32>
    %333 = arith.negf %332 : vector<2x128xf32>
    %334 = math.exp %333 : vector<2x128xf32>
    %cst_60 = arith.constant 1.000000e+00 : f32
    %335 = vector.broadcast %cst_60 : f32 to vector<2x128xf32>
    %336 = arith.addf %335, %334 : vector<2x128xf32>
    %337 = arith.divf %335, %336 : vector<2x128xf32>
    %338 = arith.mulf %329, %313 : vector<2x128xf32>
    %339 = arith.mulf %323, %331 : vector<2x128xf32>
    %340 = arith.addf %338, %339 : vector<2x128xf32>
    %341 = math.tanh %340 : vector<2x128xf32>
    %342 = arith.mulf %337, %341 : vector<2x128xf32>
    %cst_61 = arith.constant dense<0.000000e+00> : vector<2x512xf32>
    %343 = tpu.matmul %342, %28, %cst_61 {dimension_numbers = #tpu.dot_dimension_numbers<[1], [0], [0], [1], [0, 0, 1, 1], [], []>} : vector<2x128xf32>, vector<128x512xf32>, vector<2x512xf32> -> vector<2x512xf32>
    %344 = arith.addf %82, %343 : vector<2x512xf32>
    %345 = vector.extract_strided_slice %344 {offsets = [0, 0], sizes = [2, 128], strides = [1, 1]} : vector<2x512xf32> to vector<2x128xf32>
    %346 = arith.negf %345 : vector<2x128xf32>
    %347 = math.exp %346 : vector<2x128xf32>
    %cst_62 = arith.constant 1.000000e+00 : f32
    %348 = vector.broadcast %cst_62 : f32 to vector<2x128xf32>
    %349 = arith.addf %348, %347 : vector<2x128xf32>
    %350 = arith.divf %348, %349 : vector<2x128xf32>
    %351 = vector.extract_strided_slice %344 {offsets = [0, 128], sizes = [2, 128], strides = [1, 1]} : vector<2x512xf32> to vector<2x128xf32>
    %352 = arith.negf %351 : vector<2x128xf32>
    %353 = math.exp %352 : vector<2x128xf32>
    %cst_63 = arith.constant 1.000000e+00 : f32
    %354 = vector.broadcast %cst_63 : f32 to vector<2x128xf32>
    %355 = arith.addf %354, %353 : vector<2x128xf32>
    %356 = arith.divf %354, %355 : vector<2x128xf32>
    %357 = vector.extract_strided_slice %344 {offsets = [0, 256], sizes = [2, 128], strides = [1, 1]} : vector<2x512xf32> to vector<2x128xf32>
    %358 = math.tanh %357 : vector<2x128xf32>
    %359 = vector.extract_strided_slice %344 {offsets = [0, 384], sizes = [2, 128], strides = [1, 1]} : vector<2x512xf32> to vector<2x128xf32>
    %360 = arith.negf %359 : vector<2x128xf32>
    %361 = math.exp %360 : vector<2x128xf32>
    %cst_64 = arith.constant 1.000000e+00 : f32
    %362 = vector.broadcast %cst_64 : f32 to vector<2x128xf32>
    %363 = arith.addf %362, %361 : vector<2x128xf32>
    %364 = arith.divf %362, %363 : vector<2x128xf32>
    %365 = arith.mulf %356, %340 : vector<2x128xf32>
    %366 = arith.mulf %350, %358 : vector<2x128xf32>
    %367 = arith.addf %365, %366 : vector<2x128xf32>
    %368 = math.tanh %367 : vector<2x128xf32>
    %369 = arith.mulf %364, %368 : vector<2x128xf32>
    %cst_65 = arith.constant dense<0.000000e+00> : vector<2x512xf32>
    %370 = tpu.matmul %369, %28, %cst_65 {dimension_numbers = #tpu.dot_dimension_numbers<[1], [0], [0], [1], [0, 0, 1, 1], [], []>} : vector<2x128xf32>, vector<128x512xf32>, vector<2x512xf32> -> vector<2x512xf32>
    %371 = arith.addf %88, %370 : vector<2x512xf32>
    %372 = vector.extract_strided_slice %371 {offsets = [0, 0], sizes = [2, 128], strides = [1, 1]} : vector<2x512xf32> to vector<2x128xf32>
    %373 = arith.negf %372 : vector<2x128xf32>
    %374 = math.exp %373 : vector<2x128xf32>
    %cst_66 = arith.constant 1.000000e+00 : f32
    %375 = vector.broadcast %cst_66 : f32 to vector<2x128xf32>
    %376 = arith.addf %375, %374 : vector<2x128xf32>
    %377 = arith.divf %375, %376 : vector<2x128xf32>
    %378 = vector.extract_strided_slice %371 {offsets = [0, 128], sizes = [2, 128], strides = [1, 1]} : vector<2x512xf32> to vector<2x128xf32>
    %379 = arith.negf %378 : vector<2x128xf32>
    %380 = math.exp %379 : vector<2x128xf32>
    %cst_67 = arith.constant 1.000000e+00 : f32
    %381 = vector.broadcast %cst_67 : f32 to vector<2x128xf32>
    %382 = arith.addf %381, %380 : vector<2x128xf32>
    %383 = arith.divf %381, %382 : vector<2x128xf32>
    %384 = vector.extract_strided_slice %371 {offsets = [0, 256], sizes = [2, 128], strides = [1, 1]} : vector<2x512xf32> to vector<2x128xf32>
    %385 = math.tanh %384 : vector<2x128xf32>
    %386 = vector.extract_strided_slice %371 {offsets = [0, 384], sizes = [2, 128], strides = [1, 1]} : vector<2x512xf32> to vector<2x128xf32>
    %387 = arith.negf %386 : vector<2x128xf32>
    %388 = math.exp %387 : vector<2x128xf32>
    %cst_68 = arith.constant 1.000000e+00 : f32
    %389 = vector.broadcast %cst_68 : f32 to vector<2x128xf32>
    %390 = arith.addf %389, %388 : vector<2x128xf32>
    %391 = arith.divf %389, %390 : vector<2x128xf32>
    %392 = arith.mulf %383, %367 : vector<2x128xf32>
    %393 = arith.mulf %377, %385 : vector<2x128xf32>
    %394 = arith.addf %392, %393 : vector<2x128xf32>
    %395 = math.tanh %394 : vector<2x128xf32>
    %396 = arith.mulf %391, %395 : vector<2x128xf32>
    %cst_69 = arith.constant dense<0.000000e+00> : vector<2x512xf32>
    %397 = tpu.matmul %396, %28, %cst_69 {dimension_numbers = #tpu.dot_dimension_numbers<[1], [0], [0], [1], [0, 0, 1, 1], [], []>} : vector<2x128xf32>, vector<128x512xf32>, vector<2x512xf32> -> vector<2x512xf32>
    %398 = arith.addf %94, %397 : vector<2x512xf32>
    %399 = vector.extract_strided_slice %398 {offsets = [0, 0], sizes = [2, 128], strides = [1, 1]} : vector<2x512xf32> to vector<2x128xf32>
    %400 = arith.negf %399 : vector<2x128xf32>
    %401 = math.exp %400 : vector<2x128xf32>
    %cst_70 = arith.constant 1.000000e+00 : f32
    %402 = vector.broadcast %cst_70 : f32 to vector<2x128xf32>
    %403 = arith.addf %402, %401 : vector<2x128xf32>
    %404 = arith.divf %402, %403 : vector<2x128xf32>
    %405 = vector.extract_strided_slice %398 {offsets = [0, 128], sizes = [2, 128], strides = [1, 1]} : vector<2x512xf32> to vector<2x128xf32>
    %406 = arith.negf %405 : vector<2x128xf32>
    %407 = math.exp %406 : vector<2x128xf32>
    %cst_71 = arith.constant 1.000000e+00 : f32
    %408 = vector.broadcast %cst_71 : f32 to vector<2x128xf32>
    %409 = arith.addf %408, %407 : vector<2x128xf32>
    %410 = arith.divf %408, %409 : vector<2x128xf32>
    %411 = vector.extract_strided_slice %398 {offsets = [0, 256], sizes = [2, 128], strides = [1, 1]} : vector<2x512xf32> to vector<2x128xf32>
    %412 = math.tanh %411 : vector<2x128xf32>
    %413 = vector.extract_strided_slice %398 {offsets = [0, 384], sizes = [2, 128], strides = [1, 1]} : vector<2x512xf32> to vector<2x128xf32>
    %414 = arith.negf %413 : vector<2x128xf32>
    %415 = math.exp %414 : vector<2x128xf32>
    %cst_72 = arith.constant 1.000000e+00 : f32
    %416 = vector.broadcast %cst_72 : f32 to vector<2x128xf32>
    %417 = arith.addf %416, %415 : vector<2x128xf32>
    %418 = arith.divf %416, %417 : vector<2x128xf32>
    %419 = arith.mulf %410, %394 : vector<2x128xf32>
    %420 = arith.mulf %404, %412 : vector<2x128xf32>
    %421 = arith.addf %419, %420 : vector<2x128xf32>
    %422 = math.tanh %421 : vector<2x128xf32>
    %423 = arith.mulf %418, %422 : vector<2x128xf32>
    %cst_73 = arith.constant dense<0.000000e+00> : vector<2x512xf32>
    %424 = tpu.matmul %423, %28, %cst_73 {dimension_numbers = #tpu.dot_dimension_numbers<[1], [0], [0], [1], [0, 0, 1, 1], [], []>} : vector<2x128xf32>, vector<128x512xf32>, vector<2x512xf32> -> vector<2x512xf32>
    %425 = arith.addf %100, %424 : vector<2x512xf32>
    %426 = vector.extract_strided_slice %425 {offsets = [0, 0], sizes = [2, 128], strides = [1, 1]} : vector<2x512xf32> to vector<2x128xf32>
    %427 = arith.negf %426 : vector<2x128xf32>
    %428 = math.exp %427 : vector<2x128xf32>
    %cst_74 = arith.constant 1.000000e+00 : f32
    %429 = vector.broadcast %cst_74 : f32 to vector<2x128xf32>
    %430 = arith.addf %429, %428 : vector<2x128xf32>
    %431 = arith.divf %429, %430 : vector<2x128xf32>
    %432 = vector.extract_strided_slice %425 {offsets = [0, 128], sizes = [2, 128], strides = [1, 1]} : vector<2x512xf32> to vector<2x128xf32>
    %433 = arith.negf %432 : vector<2x128xf32>
    %434 = math.exp %433 : vector<2x128xf32>
    %cst_75 = arith.constant 1.000000e+00 : f32
    %435 = vector.broadcast %cst_75 : f32 to vector<2x128xf32>
    %436 = arith.addf %435, %434 : vector<2x128xf32>
    %437 = arith.divf %435, %436 : vector<2x128xf32>
    %438 = vector.extract_strided_slice %425 {offsets = [0, 256], sizes = [2, 128], strides = [1, 1]} : vector<2x512xf32> to vector<2x128xf32>
    %439 = math.tanh %438 : vector<2x128xf32>
    %440 = vector.extract_strided_slice %425 {offsets = [0, 384], sizes = [2, 128], strides = [1, 1]} : vector<2x512xf32> to vector<2x128xf32>
    %441 = arith.negf %440 : vector<2x128xf32>
    %442 = math.exp %441 : vector<2x128xf32>
    %cst_76 = arith.constant 1.000000e+00 : f32
    %443 = vector.broadcast %cst_76 : f32 to vector<2x128xf32>
    %444 = arith.addf %443, %442 : vector<2x128xf32>
    %445 = arith.divf %443, %444 : vector<2x128xf32>
    %446 = arith.mulf %437, %421 : vector<2x128xf32>
    %447 = arith.mulf %431, %439 : vector<2x128xf32>
    %448 = arith.addf %446, %447 : vector<2x128xf32>
    %449 = math.tanh %448 : vector<2x128xf32>
    %450 = arith.mulf %445, %449 : vector<2x128xf32>
    %cst_77 = arith.constant dense<0.000000e+00> : vector<2x512xf32>
    %451 = tpu.matmul %450, %28, %cst_77 {dimension_numbers = #tpu.dot_dimension_numbers<[1], [0], [0], [1], [0, 0, 1, 1], [], []>} : vector<2x128xf32>, vector<128x512xf32>, vector<2x512xf32> -> vector<2x512xf32>
    %452 = arith.addf %106, %451 : vector<2x512xf32>
    %453 = vector.extract_strided_slice %452 {offsets = [0, 0], sizes = [2, 128], strides = [1, 1]} : vector<2x512xf32> to vector<2x128xf32>
    %454 = arith.negf %453 : vector<2x128xf32>
    %455 = math.exp %454 : vector<2x128xf32>
    %cst_78 = arith.constant 1.000000e+00 : f32
    %456 = vector.broadcast %cst_78 : f32 to vector<2x128xf32>
    %457 = arith.addf %456, %455 : vector<2x128xf32>
    %458 = arith.divf %456, %457 : vector<2x128xf32>
    %459 = vector.extract_strided_slice %452 {offsets = [0, 128], sizes = [2, 128], strides = [1, 1]} : vector<2x512xf32> to vector<2x128xf32>
    %460 = arith.negf %459 : vector<2x128xf32>
    %461 = math.exp %460 : vector<2x128xf32>
    %cst_79 = arith.constant 1.000000e+00 : f32
    %462 = vector.broadcast %cst_79 : f32 to vector<2x128xf32>
    %463 = arith.addf %462, %461 : vector<2x128xf32>
    %464 = arith.divf %462, %463 : vector<2x128xf32>
    %465 = vector.extract_strided_slice %452 {offsets = [0, 256], sizes = [2, 128], strides = [1, 1]} : vector<2x512xf32> to vector<2x128xf32>
    %466 = math.tanh %465 : vector<2x128xf32>
    %467 = vector.extract_strided_slice %452 {offsets = [0, 384], sizes = [2, 128], strides = [1, 1]} : vector<2x512xf32> to vector<2x128xf32>
    %468 = arith.negf %467 : vector<2x128xf32>
    %469 = math.exp %468 : vector<2x128xf32>
    %cst_80 = arith.constant 1.000000e+00 : f32
    %470 = vector.broadcast %cst_80 : f32 to vector<2x128xf32>
    %471 = arith.addf %470, %469 : vector<2x128xf32>
    %472 = arith.divf %470, %471 : vector<2x128xf32>
    %473 = arith.mulf %464, %448 : vector<2x128xf32>
    %474 = arith.mulf %458, %466 : vector<2x128xf32>
    %475 = arith.addf %473, %474 : vector<2x128xf32>
    %476 = math.tanh %475 : vector<2x128xf32>
    %477 = arith.mulf %472, %476 : vector<2x128xf32>
    %cst_81 = arith.constant dense<0.000000e+00> : vector<2x512xf32>
    %478 = tpu.matmul %477, %28, %cst_81 {dimension_numbers = #tpu.dot_dimension_numbers<[1], [0], [0], [1], [0, 0, 1, 1], [], []>} : vector<2x128xf32>, vector<128x512xf32>, vector<2x512xf32> -> vector<2x512xf32>
    %479 = arith.addf %112, %478 : vector<2x512xf32>
    %480 = vector.extract_strided_slice %479 {offsets = [0, 0], sizes = [2, 128], strides = [1, 1]} : vector<2x512xf32> to vector<2x128xf32>
    %481 = arith.negf %480 : vector<2x128xf32>
    %482 = math.exp %481 : vector<2x128xf32>
    %cst_82 = arith.constant 1.000000e+00 : f32
    %483 = vector.broadcast %cst_82 : f32 to vector<2x128xf32>
    %484 = arith.addf %483, %482 : vector<2x128xf32>
    %485 = arith.divf %483, %484 : vector<2x128xf32>
    %486 = vector.extract_strided_slice %479 {offsets = [0, 128], sizes = [2, 128], strides = [1, 1]} : vector<2x512xf32> to vector<2x128xf32>
    %487 = arith.negf %486 : vector<2x128xf32>
    %488 = math.exp %487 : vector<2x128xf32>
    %cst_83 = arith.constant 1.000000e+00 : f32
    %489 = vector.broadcast %cst_83 : f32 to vector<2x128xf32>
    %490 = arith.addf %489, %488 : vector<2x128xf32>
    %491 = arith.divf %489, %490 : vector<2x128xf32>
    %492 = vector.extract_strided_slice %479 {offsets = [0, 256], sizes = [2, 128], strides = [1, 1]} : vector<2x512xf32> to vector<2x128xf32>
    %493 = math.tanh %492 : vector<2x128xf32>
    %494 = vector.extract_strided_slice %479 {offsets = [0, 384], sizes = [2, 128], strides = [1, 1]} : vector<2x512xf32> to vector<2x128xf32>
    %495 = arith.negf %494 : vector<2x128xf32>
    %496 = math.exp %495 : vector<2x128xf32>
    %cst_84 = arith.constant 1.000000e+00 : f32
    %497 = vector.broadcast %cst_84 : f32 to vector<2x128xf32>
    %498 = arith.addf %497, %496 : vector<2x128xf32>
    %499 = arith.divf %497, %498 : vector<2x128xf32>
    %500 = arith.mulf %491, %475 : vector<2x128xf32>
    %501 = arith.mulf %485, %493 : vector<2x128xf32>
    %502 = arith.addf %500, %501 : vector<2x128xf32>
    %503 = math.tanh %502 : vector<2x128xf32>
    %504 = arith.mulf %499, %503 : vector<2x128xf32>
    %cst_85 = arith.constant dense<0.000000e+00> : vector<2x512xf32>
    %505 = tpu.matmul %504, %28, %cst_85 {dimension_numbers = #tpu.dot_dimension_numbers<[1], [0], [0], [1], [0, 0, 1, 1], [], []>} : vector<2x128xf32>, vector<128x512xf32>, vector<2x512xf32> -> vector<2x512xf32>
    %506 = arith.addf %118, %505 : vector<2x512xf32>
    %507 = vector.extract_strided_slice %506 {offsets = [0, 0], sizes = [2, 128], strides = [1, 1]} : vector<2x512xf32> to vector<2x128xf32>
    %508 = arith.negf %507 : vector<2x128xf32>
    %509 = math.exp %508 : vector<2x128xf32>
    %cst_86 = arith.constant 1.000000e+00 : f32
    %510 = vector.broadcast %cst_86 : f32 to vector<2x128xf32>
    %511 = arith.addf %510, %509 : vector<2x128xf32>
    %512 = arith.divf %510, %511 : vector<2x128xf32>
    %513 = vector.extract_strided_slice %506 {offsets = [0, 128], sizes = [2, 128], strides = [1, 1]} : vector<2x512xf32> to vector<2x128xf32>
    %514 = arith.negf %513 : vector<2x128xf32>
    %515 = math.exp %514 : vector<2x128xf32>
    %cst_87 = arith.constant 1.000000e+00 : f32
    %516 = vector.broadcast %cst_87 : f32 to vector<2x128xf32>
    %517 = arith.addf %516, %515 : vector<2x128xf32>
    %518 = arith.divf %516, %517 : vector<2x128xf32>
    %519 = vector.extract_strided_slice %506 {offsets = [0, 256], sizes = [2, 128], strides = [1, 1]} : vector<2x512xf32> to vector<2x128xf32>
    %520 = math.tanh %519 : vector<2x128xf32>
    %521 = vector.extract_strided_slice %506 {offsets = [0, 384], sizes = [2, 128], strides = [1, 1]} : vector<2x512xf32> to vector<2x128xf32>
    %522 = arith.negf %521 : vector<2x128xf32>
    %523 = math.exp %522 : vector<2x128xf32>
    %cst_88 = arith.constant 1.000000e+00 : f32
    %524 = vector.broadcast %cst_88 : f32 to vector<2x128xf32>
    %525 = arith.addf %524, %523 : vector<2x128xf32>
    %526 = arith.divf %524, %525 : vector<2x128xf32>
    %527 = arith.mulf %518, %502 : vector<2x128xf32>
    %528 = arith.mulf %512, %520 : vector<2x128xf32>
    %529 = arith.addf %527, %528 : vector<2x128xf32>
    %530 = math.tanh %529 : vector<2x128xf32>
    %531 = arith.mulf %526, %530 : vector<2x128xf32>
    %cst_89 = arith.constant dense<0.000000e+00> : vector<2x512xf32>
    %532 = tpu.matmul %531, %28, %cst_89 {dimension_numbers = #tpu.dot_dimension_numbers<[1], [0], [0], [1], [0, 0, 1, 1], [], []>} : vector<2x128xf32>, vector<128x512xf32>, vector<2x512xf32> -> vector<2x512xf32>
    %533 = arith.addf %124, %532 : vector<2x512xf32>
    %534 = vector.extract_strided_slice %533 {offsets = [0, 0], sizes = [2, 128], strides = [1, 1]} : vector<2x512xf32> to vector<2x128xf32>
    %535 = arith.negf %534 : vector<2x128xf32>
    %536 = math.exp %535 : vector<2x128xf32>
    %cst_90 = arith.constant 1.000000e+00 : f32
    %537 = vector.broadcast %cst_90 : f32 to vector<2x128xf32>
    %538 = arith.addf %537, %536 : vector<2x128xf32>
    %539 = arith.divf %537, %538 : vector<2x128xf32>
    %540 = vector.extract_strided_slice %533 {offsets = [0, 128], sizes = [2, 128], strides = [1, 1]} : vector<2x512xf32> to vector<2x128xf32>
    %541 = arith.negf %540 : vector<2x128xf32>
    %542 = math.exp %541 : vector<2x128xf32>
    %cst_91 = arith.constant 1.000000e+00 : f32
    %543 = vector.broadcast %cst_91 : f32 to vector<2x128xf32>
    %544 = arith.addf %543, %542 : vector<2x128xf32>
    %545 = arith.divf %543, %544 : vector<2x128xf32>
    %546 = vector.extract_strided_slice %533 {offsets = [0, 256], sizes = [2, 128], strides = [1, 1]} : vector<2x512xf32> to vector<2x128xf32>
    %547 = math.tanh %546 : vector<2x128xf32>
    %548 = vector.extract_strided_slice %533 {offsets = [0, 384], sizes = [2, 128], strides = [1, 1]} : vector<2x512xf32> to vector<2x128xf32>
    %549 = arith.negf %548 : vector<2x128xf32>
    %550 = math.exp %549 : vector<2x128xf32>
    %cst_92 = arith.constant 1.000000e+00 : f32
    %551 = vector.broadcast %cst_92 : f32 to vector<2x128xf32>
    %552 = arith.addf %551, %550 : vector<2x128xf32>
    %553 = arith.divf %551, %552 : vector<2x128xf32>
    %554 = arith.mulf %545, %529 : vector<2x128xf32>
    %555 = arith.mulf %539, %547 : vector<2x128xf32>
    %556 = arith.addf %554, %555 : vector<2x128xf32>
    %557 = math.tanh %556 : vector<2x128xf32>
    %558 = arith.mulf %553, %557 : vector<2x128xf32>
    %c0_93 = arith.constant 0 : index
    %c0_94 = arith.constant 0 : index
    %559 = vector.load %arg13[%c0_93, %c0_94] : memref<128x2xf32, #tpu.memory_space<vmem>>, vector<128x2xf32>
    %cst_95 = arith.constant dense<0.000000e+00> : vector<2x2xf32>
    %560 = tpu.matmul %558, %559, %cst_95 {dimension_numbers = #tpu.dot_dimension_numbers<[1], [0], [0], [1], [0, 0, 1, 1], [], []>} : vector<2x128xf32>, vector<128x2xf32>, vector<2x2xf32> -> vector<2x2xf32>
    %c0_96 = arith.constant 0 : index
    %c0_97 = arith.constant 0 : index
    %561 = vector.load %arg14[%c0_96, %c0_97] : memref<1x2xf32, #tpu.memory_space<vmem>>, vector<1x2xf32>
    %562 = vector.broadcast %561 : vector<1x2xf32> to vector<2x2xf32>
    %563 = arith.addf %560, %562 : vector<2x2xf32>
    %c0_98 = arith.constant 0 : index
    %c0_99 = arith.constant 0 : index
    %564 = vector.load %arg15[%c0_98, %c0_99] : memref<2x2xf32, #tpu.memory_space<vmem>>, vector<2x2xf32>
    tpu.vector_store %arg15[%c0_98, %c0_99], %563 {strides = array<i32>} : memref<2x2xf32, #tpu.memory_space<vmem>>, vector<2x2xf32>,
    return
  }
  func.func @transform_0(%arg0: i32) -> (i32, i32) {
    %c0_i32 = arith.constant 0 : i32
    %c0_i32_0 = arith.constant 0 : i32
    %c0_i32_1 = arith.constant 0 : i32
    return %c0_i32, %c0_i32_0 : i32, i32
  }
  func.func @transform_1(%arg0: i32) -> (i32, i32) {
    %c0_i32 = arith.constant 0 : i32
    %c0_i32_0 = arith.constant 0 : i32
    %c0_i32_1 = arith.constant 0 : i32
    return %c0_i32, %c0_i32_0 : i32, i32
  }
  func.func @transform_2(%arg0: i32) -> (i32, i32) {
    %c0_i32 = arith.constant 0 : i32
    %c0_i32_0 = arith.constant 0 : i32
    %c0_i32_1 = arith.constant 0 : i32
    return %c0_i32, %c0_i32_0 : i32, i32
  }
  func.func @transform_3(%arg0: i32) -> (i32, i32) {
    %c0_i32 = arith.constant 0 : i32
    %c0_i32_0 = arith.constant 0 : i32
    %c0_i32_1 = arith.constant 0 : i32
    return %c0_i32, %c0_i32_0 : i32, i32
  }
  func.func @transform_4(%arg0: i32) -> (i32, i32) {
    %c0_i32 = arith.constant 0 : i32
    %c0_i32_0 = arith.constant 0 : i32
    %c0_i32_1 = arith.constant 0 : i32
    return %c0_i32, %c0_i32_0 : i32, i32
  }
  func.func @transform_5(%arg0: i32) -> (i32, i32) {
    %c0_i32 = arith.constant 0 : i32
    %c0_i32_0 = arith.constant 0 : i32
    %c0_i32_1 = arith.constant 0 : i32
    return %c0_i32, %c0_i32_0 : i32, i32
  }
  func.func @transform_6(%arg0: i32) -> (i32, i32) {
    %c0_i32 = arith.constant 0 : i32
    %c0_i32_0 = arith.constant 0 : i32
    %c0_i32_1 = arith.constant 0 : i32
    return %c0_i32, %c0_i32_0 : i32, i32
  }
  func.func @transform_7(%arg0: i32) -> (i32, i32) {
    %c0_i32 = arith.constant 0 : i32
    %c0_i32_0 = arith.constant 0 : i32
    %c0_i32_1 = arith.constant 0 : i32
    return %c0_i32, %c0_i32_0 : i32, i32
  }
  func.func @transform_8(%arg0: i32) -> (i32, i32) {
    %c0_i32 = arith.constant 0 : i32
    %c0_i32_0 = arith.constant 0 : i32
    %c0_i32_1 = arith.constant 0 : i32
    return %c0_i32, %c0_i32_0 : i32, i32
  }
  func.func @transform_9(%arg0: i32) -> (i32, i32) {
    %c0_i32 = arith.constant 0 : i32
    %c0_i32_0 = arith.constant 0 : i32
    %c0_i32_1 = arith.constant 0 : i32
    return %c0_i32, %c0_i32_0 : i32, i32
  }
  func.func @transform_10(%arg0: i32) -> (i32, i32) {
    %c0_i32 = arith.constant 0 : i32
    %c0_i32_0 = arith.constant 0 : i32
    %c0_i32_1 = arith.constant 0 : i32
    return %c0_i32, %c0_i32_0 : i32, i32
  }
  func.func @transform_11(%arg0: i32) -> (i32, i32) {
    %c0_i32 = arith.constant 0 : i32
    %c0_i32_0 = arith.constant 0 : i32
    %c0_i32_1 = arith.constant 0 : i32
    return %c0_i32, %c0_i32_0 : i32, i32
  }
  func.func @transform_12(%arg0: i32) -> (i32, i32) {
    %c0_i32 = arith.constant 0 : i32
    %c0_i32_0 = arith.constant 0 : i32
    %c0_i32_1 = arith.constant 0 : i32
    return %c0_i32, %c0_i32_0 : i32, i32
  }
  func.func @transform_13(%arg0: i32) -> (i32, i32) {
    %c0_i32 = arith.constant 0 : i32
    %c0_i32_0 = arith.constant 0 : i32
    %c0_i32_1 = arith.constant 0 : i32
    return %c0_i32, %c0_i32_0 : i32, i32
  }
  func.func @transform_14(%arg0: i32) -> (i32, i32) {
    %c0_i32 = arith.constant 0 : i32
    %c0_i32_0 = arith.constant 0 : i32
    %c0_i32_1 = arith.constant 0 : i32
    return %c0_i32, %c0_i32_0 : i32, i32
  }
}

</mosaic_0001>

<bundles_post_ra>
// kernel: forward.6
= control target key start
LH: loop header
LB: loop body
LE: loop exit
PB: predicated region body
PF: predicated region fallthrough
CT: control target
= control target key end

     0   :  { %s4024_s12 = smov 0   ;;  %s5028_s0 = inlined_call_operand.vmem [shape: bf16[2,961,384], index: 0, kind: input, shape index: {}]   ;;  %s5029_s1 = inlined_call_operand.vmem [shape: bf16[384,16], index: 1, kind: input, shape index: {}]   ;;  %s5030_s2 = inlined_call_operand.vmem [shape: f32[1,16], index: 2, kind: input, shape index: {}]   ;;  %s5031_s3 = inlined_call_operand.vmem [shape: f32[2,961,16], index: 3, kind: output, shape index: {}]  }
   0x1 LB: > { %s2923_s13 = sadd.s32 4294967295, %s3999_s12   ;;  %p2927_p0 = scmp.ge.s32.totalorder %s3999_s12, 1  ;;  %s3999_s12 = sphi %s4024_s12, %s13_s12  }
   0x2   : > { %p137_p1 = scmp.lt.s32.totalorder %s3999_s12, 3 }
   0x4   : > { %p138_p2 = pnand %p2927_p0, %p137_p1 }
   0x5   : > { %v3724_v0 = vld [vmem:[%s5029_s1] sm:$0xff] (!%p138_p2)   ;;  %v4001_v1 = vmov (!%p138_p2), 0   ;;  %v3725_v2 = vld [vmem:[%s5029_s1 + $0x8] sm:$0xff] (!%p138_p2)   ;;  %v4002_v3 = vmov (!%p138_p2), 0.0   ;;  %vm4003_vm0 = vmmov (!%p138_p2), 0   ;;  %v3726_v4 = vld [vmem:[%s5029_s1 + $0x10] sm:$0xff] (!%p138_p2)  }
   0x6   : > { %141 = sbr.rel (%p138_p2) target bundleno = 769 (0x301), region = 32  ;;  %1584 = vmatprep.subr.bf16.mxu1 (!%p138_p2), %v4001_v1  ;;  %3209 = vmatprep.subr.bf16.mxu0 (!%p138_p2), %v4002_v3  ;;  %v3732_v5 = vld [vmem:[%s5029_s1 + $0x80] sm:$0xff] (!%p138_p2)   ;;  %v3727_v6 = vld [vmem:[%s5029_s1 + $0x18] sm:$0xff] (!%p138_p2)   ;;  %v3734_v7 = vld [vmem:[%s5029_s1 + $0x88] sm:$0xff] (!%p138_p2)   ;;  %p161_p3 = scmp.lt.s32.totalorder (!%p138_p2), %s2923_s13, 1  ;;  %vm2745_vm1 = vcmask (!%p138_p2), 130048  }
   0x7   : > { %1585 = vmatpush1.bf16.msra.mxu1 (!%p138_p2), %v3724_v0  ;;  %3225 = vmatprep.mubr.msk.bf16.mxu0 (!%p138_p2), %vm4003_vm0, %v4002_v3  ;;  %v3728_v8 = vld [vmem:[%s5029_s1 + $0x20] sm:$0xff] (!%p138_p2)   ;;  %v3736_v9 = vld [vmem:[%s5029_s1 + $0x90] sm:$0xff] (!%p138_p2)   ;;  %v3729_v10 = vld [vmem:[%s5029_s1 + $0x28] sm:$0xff] (!%p138_p2)   ;;  %vm2866_vm2 = vcmask (!%p138_p2), 122880  }
   0x8   : > { %1586 = vmatprep.subr.bf16.mxu1 (!%p138_p2), %v4001_v1  ;;  %3210 = vmatpush3.bf16.msra.mxu0 (!%p138_p2), %v3732_v5  ;;  %v3738_v11 = vld [vmem:[%s5029_s1 + $0x98] sm:$0xff] (!%p138_p2)   ;;  %v3730_v12 = vld [vmem:[%s5029_s1 + $0x30] sm:$0xff] (!%p138_p2)   ;;  %v3740_v13 = vld [vmem:[%s5029_s1 + $0xa0] sm:$0xff] (!%p138_p2)  }
   0x9   : > { %3211 = vmatprep.subr.bf16.mxu0 (!%p138_p2), %v4002_v3  ;;  %v3731_v14 = vld [vmem:[%s5029_s1 + $0x38] sm:$0xff] (!%p138_p2)   ;;  %v3742_v16 = vld [vmem:[%s5029_s1 + $0xa8] sm:$0xff] (!%p138_p2)   ;;  %v3733_v17 = vld [vmem:[%s5029_s1 + $0x40] sm:$0xff] (!%p138_p2)  }
   0xa   : > { %v3744_v18 = vld [vmem:[%s5029_s1 + $0xb0] sm:$0xff] (!%p138_p2)   ;;  %v3735_v19 = vld [vmem:[%s5029_s1 + $0x48] sm:$0xff] (!%p138_p2)   ;;  %v3746_v20 = vld [vmem:[%s5029_s1 + $0xb8] sm:$0xff] (!%p138_p2)  }
   0xb   : > { %1587 = vmatpush1.bf16.msra.mxu1 (!%p138_p2), %v3725_v2  ;;  %v3737_v22 = vld [vmem:[%s5029_s1 + $0x50] sm:$0xff] (!%p138_p2)   ;;  %v3739_v23 = vld [vmem:[%s5029_s1 + $0x58] sm:$0xff] (!%p138_p2)   ;;  %v3741_v25 = vld [vmem:[%s5029_s1 + $0x60] sm:$0xff] (!%p138_p2)  }
   0xc   : > { %1588 = vmatprep.subr.bf16.mxu1 (!%p138_p2), %v4001_v1  ;;  %3212 = vmatpush3.bf16.msra.mxu0 (!%p138_p2), %v3734_v7  ;;  %v3743_v26 = vld [vmem:[%s5029_s1 + $0x68] sm:$0xff] (!%p138_p2)   ;;  %v3745_v28 = vld [vmem:[%s5029_s1 + $0x70] sm:$0xff] (!%p138_p2)   ;;  %v3747_v29 = vld [vmem:[%s5029_s1 + $0x78] sm:$0xff] (!%p138_p2)  }
   0xd   : > { %s5033_s13 = smov (!%p161_p3, %s2923_s13), 1  ;;  %3213 = vmatprep.subr.bf16.mxu0 %v4002_v3 }
   0xe   : > { %s3711_s7 = smul.u32 1452, %s5033_s13 }
   0xf   : > { %1589 = vmatpush1.bf16.msra.mxu1 %v3726_v4  ;;  %s3712_s19 = smul.u32 968, %s5033_s13 }
  0x10   : > { %1590 = vmatprep.subr.bf16.mxu1 %v4001_v1  ;;  %3214 = vmatpush3.bf16.msra.mxu0 %v3736_v9  ;;  %s4090_s16 = scalar_lea.vmem %s5028_s0, %s3711_s7 }
  0x11   : > { %3215 = vmatprep.subr.bf16.mxu0 %v4002_v3  ;;  %v3750_v15 = vld [vmem:[%s4090_s16 + $0x4] ss:$12 sps:$4 sm:$0xff]   ;;  %v3751_v21 = vld [vmem:[%s4090_s16 + $0x8] ss:$12 sps:$4 sm:$0xff]   ;;  %v3754_v24 = vld [vmem:[%s4090_s16 + $0x20] ss:$12 sps:$4 sm:$0xff]   ;;  %s4309_s21 = scalar_lea.vmem %s5031_s3, %s3712_s19 }
  0x12   : > { %1616 = vmatprep.mubr.bf16.mxu1 %v3750_v15  ;;  %v3758_v27 = vld [vmem:[%s4090_s16 + $0x38] ss:$12 sps:$4 sm:$0xff]   ;;  %v3748_v30 = vld [vmem:[%s4090_s16] ss:$12 sps:$4 sm:$0xff]   ;;  %v3762_v31 = vld [vmem:[%s4090_s16 + $0x50] ss:$12 sps:$4 sm:$0xff]  }
  0x13   : > { %1591 = vmatpush1.bf16.msra.mxu1 %v3727_v6  ;;  %v3752_v32 = vld [vmem:[%s4090_s16 + $0x1c] ss:$12 sps:$4 sm:$0xff]   ;;  %v3755_v33 = vld [vmem:[%s4090_s16 + $0x18] ss:$12 sps:$4 sm:$0xff]   ;;  %v3756_v35 = vld [vmem:[%s4090_s16 + $0x34] ss:$12 sps:$4 sm:$0xff]  }
  0x14   : > { %1592 = vmatprep.subr.bf16.mxu1 %v4001_v1  ;;  %3216 = vmatpush3.bf16.msra.mxu0 %v3738_v11  ;;  %v3766_v34 = vld [vmem:[%s4090_s16 + $0x68] ss:$12 sps:$4 sm:$0xff]   ;;  %v3759_v36 = vld [vmem:[%s4090_s16 + $0x30] ss:$12 sps:$4 sm:$0xff]   ;;  %v3770_v37 = vld [vmem:[%s4090_s16 + $0x80] ss:$12 sps:$4 sm:$0xff]  }
  0x15   : > { %3217 = vmatprep.subr.bf16.mxu0 %v4002_v3  ;;  %v3760_v38 = vld [vmem:[%s4090_s16 + $0x4c] ss:$12 sps:$4 sm:$0xff]   ;;  %v3763_v39 = vld [vmem:[%s4090_s16 + $0x48] ss:$12 sps:$4 sm:$0xff]   ;;  %v3764_v41 = vld [vmem:[%s4090_s16 + $0x64] ss:$12 sps:$4 sm:$0xff]  }
  0x16   : > { %v3774_v40 = vld [vmem:[%s4090_s16 + $0x98] ss:$12 sps:$4 sm:$0xff]   ;;  %v3767_v42 = vld [vmem:[%s4090_s16 + $0x60] ss:$12 sps:$4 sm:$0xff]   ;;  %v3778_v43 = vld [vmem:[%s4090_s16 + $0xb0] ss:$12 sps:$4 sm:$0xff]  }
  0x17   : > { %1593 = vmatpush1.bf16.msra.mxu1 %v3728_v8  ;;  %v3768_v44 = vld [vmem:[%s4090_s16 + $0x7c] ss:$12 sps:$4 sm:$0xff]   ;;  %v3771_v45 = vld [vmem:[%s4090_s16 + $0x78] ss:$12 sps:$4 sm:$0xff]   ;;  %v3772_v47 = vld [vmem:[%s4090_s16 + $0x94] ss:$12 sps:$4 sm:$0xff]  }
  0x18   : > { %1594 = vmatprep.subr.bf16.mxu1 %v4001_v1  ;;  %3218 = vmatpush3.bf16.msra.mxu0 %v3740_v13  ;;  %v3782_v46 = vld [vmem:[%s4090_s16 + $0xc8] ss:$12 sps:$4 sm:$0xff]   ;;  %v3775_v48 = vld [vmem:[%s4090_s16 + $0x90] ss:$12 sps:$4 sm:$0xff]   ;;  %v3786_v49 = vld [vmem:[%s4090_s16 + $0xe0] ss:$12 sps:$4 sm:$0xff]  }
  0x19   : > { %3219 = vmatprep.subr.bf16.mxu0 %v4002_v3  ;;  %v3776_v50 = vld [vmem:[%s4090_s16 + $0xac] ss:$12 sps:$4 sm:$0xff]   ;;  %v3779_v51 = vld [vmem:[%s4090_s16 + $0xa8] ss:$12 sps:$4 sm:$0xff]   ;;  %v3780_v53 = vld [vmem:[%s4090_s16 + $0xc4] ss:$12 sps:$4 sm:$0xff]  }
  0x1a   : > { %v3790_v52 = vld [vmem:[%s4090_s16 + $0xf8] ss:$12 sps:$4 sm:$0xff]   ;;  %v3783_v54 = vld [vmem:[%s4090_s16 + $0xc0] ss:$12 sps:$4 sm:$0xff]   ;;  %v3794_v55 = vld [vmem:[%s4090_s16 + $0x110] ss:$12 sps:$4 sm:$0xff]  }
  0x1b   : > { %1595 = vmatpush1.bf16.msra.mxu1 %v3729_v10  ;;  %v3784_v56 = vld [vmem:[%s4090_s16 + $0xdc] ss:$12 sps:$4 sm:$0xff]   ;;  %v3787_v57 = vld [vmem:[%s4090_s16 + $0xd8] ss:$12 sps:$4 sm:$0xff]   ;;  %v3788_v59 = vld [vmem:[%s4090_s16 + $0xf4] ss:$12 sps:$4 sm:$0xff]  }
  0x1c   : > { %1596 = vmatprep.subr.bf16.mxu1 %v4001_v1  ;;  %3220 = vmatpush3.bf16.msra.mxu0 %v3742_v16  ;;  %v3798_v58 = vld [vmem:[%s4090_s16 + $0x128] ss:$12 sps:$4 sm:$0xff]   ;;  %v3791_v60 = vld [vmem:[%s4090_s16 + $0xf0] ss:$12 sps:$4 sm:$0xff]   ;;  %v3802_v61 = vld [vmem:[%s4090_s16 + $0x140] ss:$12 sps:$4 sm:$0xff]  }
  0x1d   : > { %3221 = vmatprep.subr.bf16.mxu0 %v4002_v3  ;;  %v3792_v62 = vld [vmem:[%s4090_s16 + $0x10c] ss:$12 sps:$4 sm:$0xff]   ;;  %v3795_v63 = vld [vmem:[%s4090_s16 + $0x108] ss:$12 sps:$4 sm:$0xff]   ;;  %v3810_v4 = vld [vmem:[%s4090_s16 + $0x170] ss:$12 sps:$4 sm:$0xff]  }
  0x1e   : > { %v3806_v0 = vld [vmem:[%s4090_s16 + $0x158] ss:$12 sps:$4 sm:$0xff]   ;;  %v3799_v2 = vld [vmem:[%s4090_s16 + $0x120] ss:$12 sps:$4 sm:$0xff]   ;;  %v3800_v5 = vld [vmem:[%s4090_s16 + $0x13c] ss:$12 sps:$4 sm:$0xff]  }
  0x1f   : > { %1597 = vmatpush1.bf16.msra.mxu1 %v3730_v12  ;;  %v3803_v6 = vld [vmem:[%s4090_s16 + $0x138] ss:$12 sps:$4 sm:$0xff]   ;;  %v3814_v7 = vld [vmem:[%s4090_s16 + $0x188] ss:$12 sps:$4 sm:$0xff]   ;;  %v3807_v9 = vld [vmem:[%s4090_s16 + $0x150] ss:$12 sps:$4 sm:$0xff]  }
  0x20   : > { %1598 = vmatprep.subr.bf16.mxu1 %v4001_v1  ;;  %3222 = vmatpush3.bf16.msra.mxu0 %v3744_v18  ;;  %v3804_v8 = vld [vmem:[%s4090_s16 + $0x154] ss:$12 sps:$4 sm:$0xff]   ;;  %v3808_v11 = vld [vmem:[%s4090_s16 + $0x16c] ss:$12 sps:$4 sm:$0xff]   ;;  %v3826_v16 = vld [vmem:[%s4090_s16 + $0x1d0] ss:$12 sps:$4 sm:$0xff]  }
  0x21   : > { %3223 = vmatprep.subr.bf16.mxu0 %v4002_v3  ;;  %v3818_v10 = vld [vmem:[%s4090_s16 + $0x1a0] ss:$12 sps:$4 sm:$0xff]   ;;  %v3811_v12 = vld [vmem:[%s4090_s16 + $0x168] ss:$12 sps:$4 sm:$0xff]   ;;  %v3822_v13 = vld [vmem:[%s4090_s16 + $0x1b8] ss:$12 sps:$4 sm:$0xff]  }
  0x22   : > { %v3815_v15 = vld [vmem:[%s4090_s16 + $0x180] ss:$12 sps:$4 sm:$0xff]   ;;  %v3819_v18 = vld [vmem:[%s4090_s16 + $0x198] ss:$12 sps:$4 sm:$0xff]  }
  0x23   : > { %1599 = vmatpush1.bf16.msra.mxu1 %v3731_v14  ;;  %v3812_v14 = vld [vmem:[%s4090_s16 + $0x184] ss:$12 sps:$4 sm:$0xff]  }
  0x24   : > { %1600 = vmatprep.subr.bf16.mxu1 %v4001_v1  ;;  %3224 = vmatpush3.bf16.msra.mxu0 %v3746_v20  ;;  %v3820_v20 = vld [vmem:[%s4090_s16 + $0x1b4] ss:$12 sps:$4 sm:$0xff]  }
  0x27   : > { %1601 = vmatpush1.bf16.msra.mxu1 %v3733_v17  ;;  %3226 = vmatmul.mubr.bf16.vlgmr.msra.gmra.mrb[0].mxu0 %v3751_v21  ;;  %v3816_v17 = vld [vmem:[%s4090_s16 + $0x19c] ss:$12 sps:$4 sm:$0xff]  }
  0x28   : > { %1602 = vmatprep.subr.bf16.mxu1 %v4001_v1  ;;  %3229 = vmatprep.mubr.msk.bf16.mxu0 %vm4003_vm0, %v4002_v3  ;;  %v3823_v21 = vld [vmem:[%s4090_s16 + $0x1b0] ss:$12 sps:$4 sm:$0xff]  }
  0x2b   : > { %1603 = vmatpush1.bf16.msra.mxu1 %v3735_v19  ;;  %v3830_v19 = vld [vmem:[%s4090_s16 + $0x1e8] ss:$12 sps:$4 sm:$0xff]  }
  0x2c   : > { %1604 = vmatprep.subr.bf16.mxu1 %v4001_v1 }
  0x2f   : > { %1605 = vmatpush1.bf16.msra.mxu1 %v3737_v22  ;;  %3230 = vmatmul.mubr.bf16.gmra.mrb[4].mxu0 %v3754_v24  ;;  %v3834_v22 = vld [vmem:[%s4090_s16 + $0x200] ss:$12 sps:$4 sm:$0xff]   ;;  %v3827_v24 = vld [vmem:[%s4090_s16 + $0x1c8] ss:$12 sps:$4 sm:$0xff]  }
  0x30   : > { %1606 = vmatprep.subr.bf16.mxu1 %v4001_v1  ;;  %3233 = vmatprep.mubr.msk.bf16.mxu0 %vm4003_vm0, %v4002_v3 }
  0x33   : > { %1607 = vmatpush1.bf16.msra.mxu1 %v3739_v23  ;;  %v3824_v23 = vld [vmem:[%s4090_s16 + $0x1cc] ss:$12 sps:$4 sm:$0xff]  }
  0x34   : > { %1608 = vmatprep.subr.bf16.mxu1 %v4001_v1 }
  0x37   : > { %1609 = vmatpush1.bf16.msra.mxu1 %v3741_v25  ;;  %3234 = vmatmul.mubr.bf16.gmra.mrb[8].mxu0 %v3758_v27  ;;  %v3838_v25 = vld [vmem:[%s4090_s16 + $0x218] ss:$12 sps:$4 sm:$0xff]   ;;  %v3831_v27 = vld [vmem:[%s4090_s16 + $0x1e0] ss:$12 sps:$4 sm:$0xff]  }
  0x38   : > { %1610 = vmatprep.subr.bf16.mxu1 %v4001_v1  ;;  %3237 = vmatprep.mubr.msk.bf16.mxu0 %vm4003_vm0, %v4002_v3 }
  0x3b   : > { %1611 = vmatpush1.bf16.msra.mxu1 %v3743_v26  ;;  %v3828_v26 = vld [vmem:[%s4090_s16 + $0x1e4] ss:$12 sps:$4 sm:$0xff]  }
  0x3c   : > { %1612 = vmatprep.subr.bf16.mxu1 %v4001_v1 }
  0x3f   : > { %1613 = vmatpush1.bf16.msra.mxu1 %v3745_v28  ;;  %3238 = vmatmul.mubr.bf16.gmra.mrb[12].mxu0 %v3762_v31  ;;  %v3842_v28 = vld [vmem:[%s4090_s16 + $0x230] ss:$12 sps:$4 sm:$0xff]   ;;  %v3846_v31 = vld [vmem:[%s4090_s16 + $0x248] ss:$12 sps:$4 sm:$0xff]  }
  0x40   : > { %1614 = vmatprep.subr.bf16.mxu1 %v4001_v1  ;;  %3241 = vmatprep.mubr.msk.bf16.mxu0 %vm4003_vm0, %v4002_v3  ;;  %v3796_v1 = vld [vmem:[%s4090_s16 + $0x124] ss:$12 sps:$4 sm:$0xff]  }
  0x43   : > { %1615 = vmatpush1.bf16.msra.mxu1 %v3747_v29  ;;  %v3832_v29 = vld [vmem:[%s4090_s16 + $0x1fc] ss:$12 sps:$4 sm:$0xff]  }
  0x46   : > { %1617 = vmatmul.mubr.bf16.vlgmr.msra.gmra.mrb[0].mxu1 %v3748_v30  ;;  %v3835_v30 = vld [vmem:[%s4090_s16 + $0x1f8] ss:$12 sps:$4 sm:$0xff]  }
  0x47   : > { %1624 = vmatprep.mubr.bf16.mxu1 %v3752_v32  ;;  %3242 = vmatmul.mubr.bf16.gmra.mrb[16].mxu0 %v3766_v34  ;;  %v3836_v32 = vld [vmem:[%s4090_s16 + $0x214] ss:$12 sps:$4 sm:$0xff]  }
  0x48   : > { %3245 = vmatprep.mubr.msk.bf16.mxu0 %vm4003_vm0, %v4002_v3  ;;  %v3850_v34 = vld [vmem:[%s4090_s16 + $0x260] ss:$12 sps:$4 sm:$0xff]  }
  0x4e   : > { %1625 = vmatmul.mubr.bf16.gmra.mrb[4].mxu1 %v3755_v33  ;;  %v3839_v33 = vld [vmem:[%s4090_s16 + $0x210] ss:$12 sps:$4 sm:$0xff]  }
  0x4f   : > { %1632 = vmatprep.mubr.bf16.mxu1 %v3756_v35  ;;  %3246 = vmatmul.mubr.bf16.gmra.mrb[20].mxu0 %v3770_v37  ;;  %v3840_v35 = vld [vmem:[%s4090_s16 + $0x22c] ss:$12 sps:$4 sm:$0xff]  }
  0x50   : > { %3249 = vmatprep.mubr.msk.bf16.mxu0 %vm4003_vm0, %v4002_v3  ;;  %v3854_v37 = vld [vmem:[%s4090_s16 + $0x278] ss:$12 sps:$4 sm:$0xff]  }
  0x56   : > { %1633 = vmatmul.mubr.bf16.gmra.mrb[8].mxu1 %v3759_v36  ;;  %v3843_v36 = vld [vmem:[%s4090_s16 + $0x228] ss:$12 sps:$4 sm:$0xff]  }
  0x57   : > { %1640 = vmatprep.mubr.bf16.mxu1 %v3760_v38  ;;  %3250 = vmatmul.mubr.bf16.gmra.mrb[24].mxu0 %v3774_v40  ;;  %v3844_v38 = vld [vmem:[%s4090_s16 + $0x244] ss:$12 sps:$4 sm:$0xff]   ;;  %v3847_v40 = vld [vmem:[%s4090_s16 + $0x240] ss:$12 sps:$4 sm:$0xff]  }
  0x58   : > { %3253 = vmatprep.mubr.msk.bf16.mxu0 %vm4003_vm0, %v4002_v3 }
  0x5e   : > { %1641 = vmatmul.mubr.bf16.gmra.mrb[12].mxu1 %v3763_v39 }
  0x5f   : > { %1648 = vmatprep.mubr.bf16.mxu1 %v3764_v41  ;;  %3254 = vmatmul.mubr.bf16.gmra.mrb[28].mxu0 %v3778_v43  ;;  %v3848_v43 = vld [vmem:[%s4090_s16 + $0x25c] ss:$12 sps:$4 sm:$0xff]  }
  0x60   : > { %3257 = vmatprep.mubr.msk.bf16.mxu0 %vm4003_vm0, %v4002_v3 }
  0x66   : > { %1649 = vmatmul.mubr.bf16.gmra.mrb[16].mxu1 %v3767_v42  ;;  %v3858_v42 = vld [vmem:[%s4090_s16 + $0x290] ss:$12 sps:$4 sm:$0xff]  }
  0x67   : > { %1656 = vmatprep.mubr.bf16.mxu1 %v3768_v44  ;;  %3258 = vmatmul.mubr.bf16.gmra.mrb[32].mxu0 %v3782_v46 }
  0x68   : > { %3261 = vmatprep.mubr.msk.bf16.mxu0 %vm4003_vm0, %v4002_v3 }
  0x6e   : > { %1657 = vmatmul.mubr.bf16.gmra.mrb[20].mxu1 %v3771_v45 }
  0x6f   : > { %1664 = vmatprep.mubr.bf16.mxu1 %v3772_v47  ;;  %3262 = vmatmul.mubr.bf16.gmra.mrb[36].mxu0 %v3786_v49  ;;  %v3851_v47 = vld [vmem:[%s4090_s16 + $0x258] ss:$12 sps:$4 sm:$0xff]   ;;  %v3862_v49 = vld [vmem:[%s4090_s16 + $0x2a8] ss:$12 sps:$4 sm:$0xff]  }
  0x70   : > { %3265 = vmatprep.mubr.msk.bf16.mxu0 %vm4003_vm0, %v4002_v3 }
  0x76   : > { %1665 = vmatmul.mubr.bf16.gmra.mrb[24].mxu1 %v3775_v48 }
  0x77   : > { %1672 = vmatprep.mubr.bf16.mxu1 %v3776_v50  ;;  %3266 = vmatmul.mubr.bf16.gmra.mrb[40].mxu0 %v3790_v52  ;;  %v3852_v50 = vld [vmem:[%s4090_s16 + $0x274] ss:$12 sps:$4 sm:$0xff]  }
  0x78   : > { %3269 = vmatprep.mubr.msk.bf16.mxu0 %vm4003_vm0, %v4002_v3 }
  0x7e   : > { %1673 = vmatmul.mubr.bf16.gmra.mrb[28].mxu1 %v3779_v51 }
  0x7f   : > { %1680 = vmatprep.mubr.bf16.mxu1 %v3780_v53  ;;  %3270 = vmatmul.mubr.bf16.gmra.mrb[44].mxu0 %v3794_v55 }
  0x80   : > { %3273 = vmatprep.mubr.msk.bf16.mxu0 %vm4003_vm0, %v4002_v3 }
  0x86   : > { %1681 = vmatmul.mubr.bf16.gmra.mrb[32].mxu1 %v3783_v54  ;;  %v3855_v54 = vld [vmem:[%s4090_s16 + $0x270] ss:$12 sps:$4 sm:$0xff]  }
  0x87   : > { %1688 = vmatprep.mubr.bf16.mxu1 %v3784_v56  ;;  %3274 = vmatmul.mubr.bf16.gmra.mrb[48].mxu0 %v3798_v58  ;;  %v3866_v56 = vld [vmem:[%s4090_s16 + $0x2c0] ss:$12 sps:$4 sm:$0xff]  }
  0x88   : > { %3277 = vmatprep.mubr.msk.bf16.mxu0 %vm4003_vm0, %v4002_v3 }
  0x8e   : > { %1689 = vmatmul.mubr.bf16.gmra.mrb[36].mxu1 %v3787_v57  ;;  %v3856_v57 = vld [vmem:[%s4090_s16 + $0x28c] ss:$12 sps:$4 sm:$0xff]  }
  0x8f   : > { %1696 = vmatprep.mubr.bf16.mxu1 %v3788_v59  ;;  %3278 = vmatmul.mubr.bf16.gmra.mrb[52].mxu0 %v3802_v61 }
  0x90   : > { %3281 = vmatprep.mubr.msk.bf16.mxu0 %vm4003_vm0, %v4002_v3 }
  0x96   : > { %1697 = vmatmul.mubr.bf16.gmra.mrb[40].mxu1 %v3791_v60  ;;  %v4292_v60 = vld [vmem:[%s5030_s2] ss:$0 sm:$0xff] }
  0x97   : > { %1704 = vmatprep.mubr.bf16.mxu1 %v3792_v62  ;;  %3282 = vmatmul.mubr.bf16.gmra.mrb[56].mxu0 %v3806_v0 }
  0x98   : > { %3285 = vmatprep.mubr.msk.bf16.mxu0 %vm4003_vm0, %v4002_v3 }
  0x9e   : > { %1705 = vmatmul.mubr.bf16.gmra.mrb[44].mxu1 %v3795_v63 }
  0x9f   : > { %1712 = vmatprep.mubr.bf16.mxu1 %v3796_v1  ;;  %3286 = vmatmul.mubr.bf16.gmra.mrb[60].mxu0 %v3810_v4  ;;  %v3859_v1 = vld [vmem:[%s4090_s16 + $0x288] ss:$12 sps:$4 sm:$0xff]   ;;  %v3870_v4 = vld [vmem:[%s4090_s16 + $0x2d8] ss:$12 sps:$4 sm:$0xff]  }
  0xa0   : > { %3289 = vmatprep.mubr.msk.bf16.mxu0 %vm4003_vm0, %v4002_v3 }
  0xa6   : > { %1713 = vmatmul.mubr.bf16.gmra.mrb[48].mxu1 %v3799_v2 }
  0xa7   : > { %1720 = vmatprep.mubr.bf16.mxu1 %v3800_v5  ;;  %3290 = vmatmul.mubr.bf16.gmra.mrb[64].mxu0 %v3814_v7 }
  0xa8   : > { %3293 = vmatprep.mubr.msk.bf16.mxu0 %vm4003_vm0, %v4002_v3 }
  0xae   : > { %1721 = vmatmul.mubr.bf16.gmra.mrb[52].mxu1 %v3803_v6  ;;  %v3860_v6 = vld [vmem:[%s4090_s16 + $0x2a4] ss:$12 sps:$4 sm:$0xff]  }
  0xaf   : > { %1728 = vmatprep.mubr.bf16.mxu1 %v3804_v8  ;;  %3294 = vmatmul.mubr.bf16.gmra.mrb[68].mxu0 %v3818_v10 }
  0xb0   : > { %3297 = vmatprep.mubr.msk.bf16.mxu0 %vm4003_vm0, %v4002_v3 }
  0xb6   : > { %1729 = vmatmul.mubr.bf16.gmra.mrb[56].mxu1 %v3807_v9 }
  0xb7   : > { %1736 = vmatprep.mubr.bf16.mxu1 %v3808_v11  ;;  %3298 = vmatmul.mubr.bf16.gmra.mrb[72].mxu0 %v3822_v13 }
  0xb8   : > { %3301 = vmatprep.mubr.msk.bf16.mxu0 %vm4003_vm0, %v4002_v3 }
  0xbe   : > { %1737 = vmatmul.mubr.bf16.gmra.mrb[60].mxu1 %v3811_v12 }
  0xbf   : > { %1744 = vmatprep.mubr.bf16.mxu1 %v3812_v14  ;;  %3302 = vmatmul.mubr.bf16.gmra.mrb[76].mxu0 %v3826_v16 }
  0xc0   : > { %3305 = vmatprep.mubr.msk.bf16.mxu0 %vm4003_vm0, %v4002_v3 }
  0xc6   : > { %1745 = vmatmul.mubr.bf16.gmra.mrb[64].mxu1 %v3815_v15 }
  0xc7   : > { %1752 = vmatprep.mubr.bf16.mxu1 %v3816_v17  ;;  %3306 = vmatmul.mubr.bf16.gmra.mrb[80].mxu0 %v3830_v19  ;;  %v3863_v19 = vld [vmem:[%s4090_s16 + $0x2a0] ss:$12 sps:$4 sm:$0xff]  }
  0xc8   : > { %3309 = vmatprep.mubr.msk.bf16.mxu0 %vm4003_vm0, %v4002_v3 }
  0xce   : > { %1753 = vmatmul.mubr.bf16.gmra.mrb[68].mxu1 %v3819_v18 }
  0xcf   : > { %1760 = vmatprep.mubr.bf16.mxu1 %v3820_v20  ;;  %3310 = vmatmul.mubr.bf16.gmra.mrb[84].mxu0 %v3834_v22 }
  0xd0   : > { %3313 = vmatprep.mubr.msk.bf16.mxu0 %vm4003_vm0, %v4002_v3 }
  0xd6   : > { %1761 = vmatmul.mubr.bf16.gmra.mrb[72].mxu1 %v3823_v21  ;;  %v3874_v21 = vld [vmem:[%s4090_s16 + $0x2f0] ss:$12 sps:$4 sm:$0xff]  }
  0xd7   : > { %1768 = vmatprep.mubr.bf16.mxu1 %v3824_v23  ;;  %3314 = vmatmul.mubr.bf16.gmra.mrb[88].mxu0 %v3838_v25  ;;  %v3864_v23 = vld [vmem:[%s4090_s16 + $0x2bc] ss:$12 sps:$4 sm:$0xff]  }
  0xd8   : > { %3317 = vmatprep.mubr.msk.bf16.mxu0 %vm4003_vm0, %v4002_v3 }
  0xde   : > { %1769 = vmatmul.mubr.bf16.gmra.mrb[76].mxu1 %v3827_v24 }
  0xdf   : > { %1776 = vmatprep.mubr.bf16.mxu1 %v3828_v26  ;;  %3318 = vmatmul.mubr.bf16.gmra.mrb[92].mxu0 %v3842_v28 }
  0xe0   : > { %3321 = vmatprep.mubr.msk.bf16.mxu0 %vm4003_vm0, %v4002_v3 }
  0xe6   : > { %1777 = vmatmul.mubr.bf16.gmra.mrb[80].mxu1 %v3831_v27 }
  0xe7   : > { %1784 = vmatprep.mubr.bf16.mxu1 %v3832_v29  ;;  %3322 = vmatmul.mubr.bf16.gmra.mrb[96].mxu0 %v3846_v31 }
  0xe8   : > { %3325 = vmatprep.mubr.msk.bf16.mxu0 %vm4003_vm0, %v4002_v3 }
  0xee   : > { %1785 = vmatmul.mubr.bf16.gmra.mrb[84].mxu1 %v3835_v30 }
  0xef   : > { %1792 = vmatprep.mubr.bf16.mxu1 %v3836_v32  ;;  %3326 = vmatmul.mubr.bf16.gmra.mrb[100].mxu0 %v3850_v34 }
  0xf0   : > { %3329 = vmatprep.mubr.msk.bf16.mxu0 %vm4003_vm0, %v4002_v3 }
  0xf6   : > { %1793 = vmatmul.mubr.bf16.gmra.mrb[88].mxu1 %v3839_v33 }
  0xf7   : > { %1800 = vmatprep.mubr.bf16.mxu1 %v3840_v35  ;;  %3330 = vmatmul.mubr.bf16.gmra.mrb[104].mxu0 %v3854_v37 }
  0xf8   : > { %3333 = vmatprep.mubr.msk.bf16.mxu0 %vm4003_vm0, %v4002_v3 }
  0xfa   : > { %v2138_v39 = vpop.f32.mrb[0].mxu0 }
  0xfb   : > { %v3227_v41 = vpop.f32.mrb[1].mxu0 }
  0xfc   : > { %v2141_v44 = vpop.f32.mrb[2].mxu0 }
  0xfd   : > { %v3228_v45 = vpop.f32.mrb[3].mxu0 }
  0xfe   : > { %1801 = vmatmul.mubr.bf16.gmra.mrb[92].mxu1 %v3843_v36  ;;  %v3867_v36 = vld [vmem:[%s4090_s16 + $0x2b8] ss:$12 sps:$4 sm:$0xff]  }
  0xff   : > { %1808 = vmatprep.mubr.bf16.mxu1 %v3844_v38  ;;  %3334 = vmatmul.mubr.bf16.gmra.mrb[108].mxu0 %v3858_v42  ;;  %v3878_v38 = vld [vmem:[%s4090_s16 + $0x308] ss:$12 sps:$4 sm:$0xff]  }
 0x100   : > { %3337 = vmatprep.mubr.msk.bf16.mxu0 %vm4003_vm0, %v4002_v3 }
 0x102   : > { %v2146_v46 = vpop.f32.mrb[4].mxu0 }
 0x103   : > { %v3231_v48 = vpop.f32.mrb[5].mxu0 }
 0x104   : > { %v2149_v51 = vpop.f32.mrb[6].mxu0 }
 0x105   : > { %v3232_v52 = vpop.f32.mrb[7].mxu0 }
 0x106   : > { %1809 = vmatmul.mubr.bf16.gmra.mrb[96].mxu1 %v3847_v40  ;;  %v3868_v40 = vld [vmem:[%s4090_s16 + $0x2d4] ss:$12 sps:$4 sm:$0xff]  }
 0x107   : > { %1816 = vmatprep.mubr.bf16.mxu1 %v3848_v43  ;;  %3338 = vmatmul.mubr.bf16.gmra.mrb[112].mxu0 %v3862_v49 }
 0x108   : > { %3341 = vmatprep.mubr.msk.bf16.mxu0 %vm4003_vm0, %v4002_v3 }
 0x10a   : > { %v4282_v53 = vpop.f32.mrb[8].mxu0 }
 0x10b   : > { %v3235_v55 = vpop.f32.mrb[9].mxu0 }
 0x10c   : > { %v4287_v58 = vpop.f32.mrb[10].mxu0  ;;  %v3882_v55 = vld [vmem:[%s4090_s16 + $0x320] ss:$12 sps:$4 sm:$0xff]  }
 0x10d   : > { %v3236_v59 = vpop.f32.mrb[11].mxu0 }
 0x10e   : > { %1817 = vmatmul.mubr.bf16.gmra.mrb[100].mxu1 %v3851_v47 }
 0x10f   : > { %1824 = vmatprep.mubr.bf16.mxu1 %v3852_v50  ;;  %3342 = vmatmul.mubr.bf16.gmra.mrb[116].mxu0 %v3866_v56 }
 0x110   : > { %3345 = vmatprep.mubr.msk.bf16.mxu0 %vm4003_vm0, %v4002_v3 }
 0x112   : > { %v4297_v62 = vpop.f32.mrb[12].mxu0 }
 0x113   : > { %v3239_v2 = vpop.f32.mrb[13].mxu0 }
 0x114   : > { %v4303_v7 = vpop.f32.mrb[14].mxu0 }
 0x115   : > { %v3240_v11 = vpop.f32.mrb[15].mxu0 }
 0x116   : > { %1825 = vmatmul.mubr.bf16.gmra.mrb[104].mxu1 %v3855_v54 }
 0x117   : > { %1832 = vmatprep.mubr.bf16.mxu1 %v3856_v57  ;;  %3346 = vmatmul.mubr.bf16.gmra.mrb[120].mxu0 %v3870_v4  ;;  %v3872_v57 = vld [vmem:[%s4090_s16 + $0x2ec] ss:$12 sps:$4 sm:$0xff]  }
 0x118   : > { %3349 = vmatprep.mubr.msk.bf16.mxu0 %vm4003_vm0, %v4002_v3 }
 0x119   : > { %v1618_v61 = vpop.f32.mrb[0].mxu1 }
 0x11a   : > { %v1619_v63 = vadd.f32 %v4292_v60, %v1618_v61  ;;  %v1620_v0 = vpop.f32.mrb[1].mxu1  ;;  %v4315_v16 = vpop.f32.mrb[16].mxu0 }
 0x11b   : > { %v1621_v5 = vpop.f32.mrb[2].mxu1  ;;  %v3243_v20 = vpop.f32.mrb[17].mxu0 }
 0x11c   : > { %v2139_v8 = vadd.f32 %v2138_v39, %v1619_v63  ;;  %v1622_v9 = vadd.f32 %v4292_v60, %v1621_v5  ;;  %v1623_v10 = vpop.f32.mrb[3].mxu1  ;;  %v4323_v24 = vpop.f32.mrb[18].mxu0 }
 0x11d   : > { %v3244_v28 = vpop.f32.mrb[19].mxu0  ;;  %v3886_v10 = vld [vmem:[%s4090_s16 + $0x338] ss:$12 sps:$4 sm:$0xff]  }
 0x11e   : > { %v2624_v12 = vmax.f32 %v2139_v8, 0.0  ;;  %v2142_v13 = vadd.f32 %v2141_v44, %v1622_v9  ;;  %1833 = vmatmul.mubr.bf16.gmra.mrb[108].mxu1 %v3859_v1  ;;  %v3875_v9 = vld [vmem:[%s4090_s16 + $0x2e8] ss:$12 sps:$4 sm:$0xff]  }
 0x11f   : > { %1840 = vmatprep.mubr.bf16.mxu1 %v3860_v6  ;;  %3350 = vmatmul.mubr.bf16.gmra.mrb[124].mxu0 %v3874_v21 }
 0x120   : > { %2746 = vst.msk [vmem:[%s4309_s21] sm:$0xff] %vm2745_vm1, %v2624_v12  ;;  %v2625_v14 = vmax.f32 %v2142_v13, 0.0  ;;  %3353 = vmatprep.mubr.msk.bf16.mxu0 %vm4003_vm0, %v4002_v3  ;;  %v3876_v12 = vld [vmem:[%s4090_s16 + $0x304] ss:$12 sps:$4 sm:$0xff]  }
 0x121   : > { %v1626_v15 = vpop.f32.mrb[4].mxu1 }
 0x122   : > { %2747 = vst.msk [vmem:[%s4309_s21 + $0x8] sm:$0xff] %vm2745_vm1, %v2625_v14  ;;  %v1627_v17 = vadd.f32 %v4292_v60, %v1626_v15  ;;  %v1628_v18 = vpop.f32.mrb[5].mxu1  ;;  %v4330_v33 = vpop.f32.mrb[20].mxu0 }
 0x123   : > { %v1629_v22 = vpop.f32.mrb[6].mxu1  ;;  %v3247_v37 = vpop.f32.mrb[21].mxu0 }
 0x124   : > { %v2147_v25 = vadd.f32 %v2146_v46, %v1627_v17  ;;  %v1630_v26 = vadd.f32 %v4292_v60, %v1629_v22  ;;  %v1631_v27 = vpop.f32.mrb[7].mxu1  ;;  %v4338_v41 = vpop.f32.mrb[22].mxu0 }
 0x125   : > { %v3248_v45 = vpop.f32.mrb[23].mxu0  ;;  %v3890_v27 = vld [vmem:[%s4090_s16 + $0x350] ss:$12 sps:$4 sm:$0xff]  }
 0x126   : > { %v2626_v29 = vmax.f32 %v2147_v25, 0.0  ;;  %v2150_v30 = vadd.f32 %v2149_v51, %v1630_v26  ;;  %1841 = vmatmul.mubr.bf16.gmra.mrb[112].mxu1 %v3863_v19  ;;  %v3879_v26 = vld [vmem:[%s4090_s16 + $0x300] ss:$12 sps:$4 sm:$0xff]  }
 0x127   : > { %1848 = vmatprep.mubr.bf16.mxu1 %v3864_v23  ;;  %3354 = vmatmul.mubr.bf16.gmra.mrb[128].mxu0 %v3878_v38 }
 0x128   : > { %2748 = vst.msk [vmem:[%s4309_s21 + $0x10] sm:$0xff] %vm2745_vm1, %v2626_v29  ;;  %v2627_v31 = vmax.f32 %v2150_v30, 0.0  ;;  %3357 = vmatprep.mubr.msk.bf16.mxu0 %vm4003_vm0, %v4002_v3  ;;  %v3880_v29 = vld [vmem:[%s4090_s16 + $0x31c] ss:$12 sps:$4 sm:$0xff]  }
 0x129   : > { %v1634_v32 = vpop.f32.mrb[8].mxu1 }
 0x12a   : > { %2749 = vst.msk [vmem:[%s4309_s21 + $0x18] sm:$0xff] %vm2745_vm1, %v2627_v31  ;;  %v1635_v34 = vadd.f32 %v4292_v60, %v1634_v32  ;;  %v1636_v35 = vpop.f32.mrb[9].mxu1  ;;  %v4347_v50 = vpop.f32.mrb[24].mxu0 }
 0x12b   : > { %v1637_v39 = vpop.f32.mrb[10].mxu1  ;;  %v3251_v54 = vpop.f32.mrb[25].mxu0 }
 0x12c   : > { %v2155_v42 = vadd.f32 %v4282_v53, %v1635_v34  ;;  %v1638_v43 = vadd.f32 %v4292_v60, %v1637_v39  ;;  %v1639_v44 = vpop.f32.mrb[11].mxu1  ;;  %v3871_v53 = vld [vmem:[%s4090_s16 + $0x2d0] ss:$12 sps:$4 sm:$0xff]  }
 0x12d   : > { %v3894_v44 = vld [vmem:[%s4090_s16 + $0x368] ss:$12 sps:$4 sm:$0xff]  }
 0x12e   : > { %v2628_v46 = vmax.f32 %v2155_v42, 0.0  ;;  %v2158_v47 = vadd.f32 %v4287_v58, %v1638_v43  ;;  %1849 = vmatmul.mubr.bf16.gmra.mrb[116].mxu1 %v3867_v36  ;;  %v4355_v58 = vpop.f32.mrb[26].mxu0  ;;  %v3883_v43 = vld [vmem:[%s4090_s16 + $0x318] ss:$12 sps:$4 sm:$0xff]  }
 0x12f   : > { %1856 = vmatprep.mubr.bf16.mxu1 %v3868_v40  ;;  %v3252_v0 = vpop.f32.mrb[27].mxu0  ;;  %3358 = vmatmul.mubr.bf16.gmra.mrb[132].mxu0 %v3882_v55 }
 0x130   : > { %2750 = vst.msk [vmem:[%s4309_s21 + $0x20] sm:$0xff] %vm2745_vm1, %v2628_v46  ;;  %v2629_v48 = vmax.f32 %v2158_v47, 0.0  ;;  %3361 = vmatprep.mubr.msk.bf16.mxu0 %vm4003_vm0, %v4002_v3  ;;  %v3884_v46 = vld [vmem:[%s4090_s16 + $0x334] ss:$12 sps:$4 sm:$0xff]  }
 0x131   : > { %v1642_v49 = vpop.f32.mrb[12].mxu1 }
 0x132   : > { %2751 = vst.msk [vmem:[%s4309_s21 + $0x28] sm:$0xff] %vm2745_vm1, %v2629_v48  ;;  %v1643_v51 = vadd.f32 %v4292_v60, %v1642_v49  ;;  %v1644_v52 = vpop.f32.mrb[13].mxu1  ;;  %v4364_v5 = vpop.f32.mrb[28].mxu0 }
 0x133   : > { %v1645_v56 = vpop.f32.mrb[14].mxu1 }
 0x134   : > { %v2163_v59 = vadd.f32 %v4297_v62, %v1643_v51  ;;  %v1646_v61 = vadd.f32 %v4292_v60, %v1645_v56  ;;  %v1647_v63 = vpop.f32.mrb[15].mxu1 }
 0x135   : > { %v3898_v63 = vld [vmem:[%s4090_s16 + $0x380] ss:$12 sps:$4 sm:$0xff]  }
 0x136   : > { %v2630_v1 = vmax.f32 %v2163_v59, 0.0  ;;  %v2166_v2 = vadd.f32 %v4303_v7, %v1646_v61  ;;  %1857 = vmatmul.mubr.bf16.gmra.mrb[120].mxu1 %v3871_v53  ;;  %v3255_v7 = vpop.f32.mrb[29].mxu0  ;;  %v3887_v61 = vld [vmem:[%s4090_s16 + $0x330] ss:$12 sps:$4 sm:$0xff]  }
 0x137   : > { %1864 = vmatprep.mubr.bf16.mxu1 %v3872_v57  ;;  %v4372_v13 = vpop.f32.mrb[30].mxu0  ;;  %3362 = vmatmul.mubr.bf16.gmra.mrb[136].mxu0 %v3886_v10 }
 0x138   : > { %2752 = vst.msk [vmem:[%s4309_s21 + $0x30] sm:$0xff] %vm2745_vm1, %v2630_v1  ;;  %v2631_v4 = vmax.f32 %v2166_v2, 0.0  ;;  %v3256_v18 = vpop.f32.mrb[31].mxu0  ;;  %3365 = vmatprep.mubr.msk.bf16.mxu0 %vm4003_vm0, %v4002_v3  ;;  %v3888_v1 = vld [vmem:[%s4090_s16 + $0x34c] ss:$12 sps:$4 sm:$0xff]  }
 0x139   : > { %v1650_v62 = vpop.f32.mrb[16].mxu1 }
 0x13a   : > { %2753 = vst.msk [vmem:[%s4309_s21 + $0x38] sm:$0xff] %vm2745_vm1, %v2631_v4  ;;  %v1651_v6 = vadd.f32 %v4292_v60, %v1650_v62  ;;  %v1652_v8 = vpop.f32.mrb[17].mxu1  ;;  %v4381_v22 = vpop.f32.mrb[32].mxu0 }
 0x13b   : > { %v1653_v11 = vpop.f32.mrb[18].mxu1 }
 0x13c   : > { %v2171_v14 = vadd.f32 %v4315_v16, %v1651_v6  ;;  %v1654_v15 = vadd.f32 %v4292_v60, %v1653_v11  ;;  %v1655_v17 = vpop.f32.mrb[19].mxu1 }
 0x13d   : > { %v3902_v17 = vld [vmem:[%s4090_s16 + $0x398] ss:$12 sps:$4 sm:$0xff]  }
 0x13e   : > { %v2632_v19 = vmax.f32 %v2171_v14, 0.0  ;;  %v2174_v20 = vadd.f32 %v4323_v24, %v1654_v15  ;;  %1865 = vmatmul.mubr.bf16.gmra.mrb[124].mxu1 %v3875_v9  ;;  %v3259_v24 = vpop.f32.mrb[33].mxu0  ;;  %v3891_v15 = vld [vmem:[%s4090_s16 + $0x348] ss:$12 sps:$4 sm:$0xff]  }
 0x13f   : > { %1872 = vmatprep.mubr.bf16.mxu1 %v3876_v12  ;;  %v4389_v30 = vpop.f32.mrb[34].mxu0  ;;  %3366 = vmatmul.mubr.bf16.gmra.mrb[140].mxu0 %v3890_v27 }
 0x140   : > { %2754 = vst.msk [vmem:[%s4309_s21 + $0x40] sm:$0xff] %vm2745_vm1, %v2632_v19  ;;  %v2633_v21 = vmax.f32 %v2174_v20, 0.0  ;;  %v3260_v35 = vpop.f32.mrb[35].mxu0  ;;  %3369 = vmatprep.mubr.msk.bf16.mxu0 %vm4003_vm0, %v4002_v3  ;;  %v3892_v19 = vld [vmem:[%s4090_s16 + $0x364] ss:$12 sps:$4 sm:$0xff]  }
 0x141   : > { %v1658_v16 = vpop.f32.mrb[20].mxu1 }
 0x142   : > { %2755 = vst.msk [vmem:[%s4309_s21 + $0x48] sm:$0xff] %vm2745_vm1, %v2633_v21  ;;  %v1659_v23 = vadd.f32 %v4292_v60, %v1658_v16  ;;  %v1660_v25 = vpop.f32.mrb[21].mxu1  ;;  %v4398_v39 = vpop.f32.mrb[36].mxu0 }
 0x143   : > { %v1661_v28 = vpop.f32.mrb[22].mxu1 }
 0x144   : > { %v2179_v31 = vadd.f32 %v4330_v33, %v1659_v23  ;;  %v1662_v32 = vadd.f32 %v4292_v60, %v1661_v28  ;;  %v1663_v34 = vpop.f32.mrb[23].mxu1 }
 0x145   : > { %v3906_v34 = vld [vmem:[%s4090_s16 + $0x3b0] ss:$12 sps:$4 sm:$0xff]  }
 0x146   : > { %v2634_v36 = vmax.f32 %v2179_v31, 0.0  ;;  %v2182_v37 = vadd.f32 %v4338_v41, %v1662_v32  ;;  %1873 = vmatmul.mubr.bf16.gmra.mrb[128].mxu1 %v3879_v26  ;;  %v3263_v41 = vpop.f32.mrb[37].mxu0  ;;  %v3895_v32 = vld [vmem:[%s4090_s16 + $0x360] ss:$12 sps:$4 sm:$0xff]  }
 0x147   : > { %1880 = vmatprep.mubr.bf16.mxu1 %v3880_v29  ;;  %v4406_v47 = vpop.f32.mrb[38].mxu0  ;;  %3370 = vmatmul.mubr.bf16.gmra.mrb[144].mxu0 %v3894_v44 }
 0x148   : > { %2756 = vst.msk [vmem:[%s4309_s21 + $0x50] sm:$0xff] %vm2745_vm1, %v2634_v36  ;;  %v2635_v38 = vmax.f32 %v2182_v37, 0.0  ;;  %v3264_v52 = vpop.f32.mrb[39].mxu0  ;;  %3373 = vmatprep.mubr.msk.bf16.mxu0 %vm4003_vm0, %v4002_v3  ;;  %v3896_v36 = vld [vmem:[%s4090_s16 + $0x37c] ss:$12 sps:$4 sm:$0xff]  }
 0x149   : > { %v1666_v33 = vpop.f32.mrb[24].mxu1 }
 0x14a   : > { %2757 = vst.msk [vmem:[%s4309_s21 + $0x58] sm:$0xff] %vm2745_vm1, %v2635_v38  ;;  %v1667_v40 = vadd.f32 %v4292_v60, %v1666_v33  ;;  %v1668_v42 = vpop.f32.mrb[25].mxu1  ;;  %v4415_v56 = vpop.f32.mrb[40].mxu0 }
 0x14b   : > { %v1669_v45 = vpop.f32.mrb[26].mxu1 }
 0x14c   : > { %v2187_v48 = vadd.f32 %v4347_v50, %v1667_v40  ;;  %v1670_v49 = vadd.f32 %v4292_v60, %v1669_v45  ;;  %v1671_v51 = vpop.f32.mrb[27].mxu1 }
 0x14d   : > { %v3910_v51 = vld [vmem:[%s4090_s16 + $0x3c8] ss:$12 sps:$4 sm:$0xff]  }
 0x14e   : > { %v2636_v53 = vmax.f32 %v2187_v48, 0.0  ;;  %v2190_v54 = vadd.f32 %v4355_v58, %v1670_v49  ;;  %1881 = vmatmul.mubr.bf16.gmra.mrb[132].mxu1 %v3883_v43  ;;  %v3267_v58 = vpop.f32.mrb[41].mxu0  ;;  %v3899_v49 = vld [vmem:[%s4090_s16 + $0x378] ss:$12 sps:$4 sm:$0xff]  }
 0x14f   : > { %1888 = vmatprep.mubr.bf16.mxu1 %v3884_v46  ;;  %v4423_v2 = vpop.f32.mrb[42].mxu0  ;;  %3374 = vmatmul.mubr.bf16.gmra.mrb[148].mxu0 %v3898_v63 }
 0x150   : > { %2758 = vst.msk [vmem:[%s4309_s21 + $0x60] sm:$0xff] %vm2745_vm1, %v2636_v53  ;;  %v2637_v55 = vmax.f32 %v2190_v54, 0.0  ;;  %v3268_v8 = vpop.f32.mrb[43].mxu0  ;;  %3377 = vmatprep.mubr.msk.bf16.mxu0 %vm4003_vm0, %v4002_v3  ;;  %v3900_v53 = vld [vmem:[%s4090_s16 + $0x394] ss:$12 sps:$4 sm:$0xff]  }
 0x151   : > { %v1674_v50 = vpop.f32.mrb[28].mxu1 }
 0x152   : > { %2759 = vst.msk [vmem:[%s4309_s21 + $0x68] sm:$0xff] %vm2745_vm1, %v2637_v55  ;;  %v1675_v57 = vadd.f32 %v4292_v60, %v1674_v50  ;;  %v1676_v59 = vpop.f32.mrb[29].mxu1  ;;  %v4432_v11 = vpop.f32.mrb[44].mxu0 }
 0x153   : > { %v1677_v0 = vpop.f32.mrb[30].mxu1 }
 0x154   : > { %v2195_v4 = vadd.f32 %v4364_v5, %v1675_v57  ;;  %v1678_v62 = vadd.f32 %v4292_v60, %v1677_v0  ;;  %v1679_v6 = vpop.f32.mrb[31].mxu1 }
 0x155   : > { %v3914_v6 = vld [vmem:[%s4090_s16 + $0x3e0] ss:$12 sps:$4 sm:$0xff]  }
 0x156   : > { %v2638_v9 = vmax.f32 %v2195_v4, 0.0  ;;  %v2198_v7 = vadd.f32 %v4372_v13, %v1678_v62  ;;  %1889 = vmatmul.mubr.bf16.gmra.mrb[136].mxu1 %v3887_v61  ;;  %v3271_v13 = vpop.f32.mrb[45].mxu0  ;;  %v3903_v62 = vld [vmem:[%s4090_s16 + $0x390] ss:$12 sps:$4 sm:$0xff]  }
 0x157   : > { %1896 = vmatprep.mubr.bf16.mxu1 %v3888_v1  ;;  %v4440_v20 = vpop.f32.mrb[46].mxu0  ;;  %3378 = vmatmul.mubr.bf16.gmra.mrb[152].mxu0 %v3902_v17 }
 0x158   : > { %2760 = vst.msk [vmem:[%s4309_s21 + $0x70] sm:$0xff] %vm2745_vm1, %v2638_v9  ;;  %v2639_v10 = vmax.f32 %v2198_v7, 0.0  ;;  %v3272_v25 = vpop.f32.mrb[47].mxu0  ;;  %3381 = vmatprep.mubr.msk.bf16.mxu0 %vm4003_vm0, %v4002_v3  ;;  %v3904_v9 = vld [vmem:[%s4090_s16 + $0x3ac] ss:$12 sps:$4 sm:$0xff]  }
 0x159   : > { %v1682_v5 = vpop.f32.mrb[32].mxu1 }
 0x15a   : > { %2761 = vst.msk [vmem:[%s4309_s21 + $0x78] sm:$0xff] %vm2745_vm1, %v2639_v10  ;;  %v1683_v12 = vadd.f32 %v4292_v60, %v1682_v5  ;;  %v1684_v14 = vpop.f32.mrb[33].mxu1  ;;  %v4449_v28 = vpop.f32.mrb[48].mxu0 }
 0x15b   : > { %v1685_v18 = vpop.f32.mrb[34].mxu1 }
 0x15c   : > { %v2203_v21 = vadd.f32 %v4381_v22, %v1683_v12  ;;  %v1686_v16 = vadd.f32 %v4292_v60, %v1685_v18  ;;  %v1687_v23 = vpop.f32.mrb[35].mxu1 }
 0x15d   : > { %v3918_v23 = vld [vmem:[%s4090_s16 + $0x3f8] ss:$12 sps:$4 sm:$0xff]  }
 0x15e   : > { %v2640_v26 = vmax.f32 %v2203_v21, 0.0  ;;  %v2206_v24 = vadd.f32 %v4389_v30, %v1686_v16  ;;  %1897 = vmatmul.mubr.bf16.gmra.mrb[140].mxu1 %v3891_v15  ;;  %v3275_v30 = vpop.f32.mrb[49].mxu0  ;;  %v3907_v16 = vld [vmem:[%s4090_s16 + $0x3a8] ss:$12 sps:$4 sm:$0xff]  }
 0x15f   : > { %1904 = vmatprep.mubr.bf16.mxu1 %v3892_v19  ;;  %v4457_v37 = vpop.f32.mrb[50].mxu0  ;;  %3382 = vmatmul.mubr.bf16.gmra.mrb[156].mxu0 %v3906_v34 }
 0x160   : > { %2762 = vst.msk [vmem:[%s4309_s21 + $0x80] sm:$0xff] %vm2745_vm1, %v2640_v26  ;;  %v2641_v27 = vmax.f32 %v2206_v24, 0.0  ;;  %v3276_v42 = vpop.f32.mrb[51].mxu0  ;;  %3385 = vmatprep.mubr.msk.bf16.mxu0 %vm4003_vm0, %v4002_v3  ;;  %v3908_v26 = vld [vmem:[%s4090_s16 + $0x3c4] ss:$12 sps:$4 sm:$0xff]  }
 0x161   : > { %v1690_v22 = vpop.f32.mrb[36].mxu1 }
 0x162   : > { %2763 = vst.msk [vmem:[%s4309_s21 + $0x88] sm:$0xff] %vm2745_vm1, %v2641_v27  ;;  %v1691_v29 = vadd.f32 %v4292_v60, %v1690_v22  ;;  %v1692_v31 = vpop.f32.mrb[37].mxu1  ;;  %v4466_v45 = vpop.f32.mrb[52].mxu0 }
 0x163   : > { %v1693_v35 = vpop.f32.mrb[38].mxu1 }
 0x164   : > { %v2211_v38 = vadd.f32 %v4398_v39, %v1691_v29  ;;  %v1694_v33 = vadd.f32 %v4292_v60, %v1693_v35  ;;  %v1695_v40 = vpop.f32.mrb[39].mxu1 }
 0x165   : > { %v3922_v40 = vld [vmem:[%s4090_s16 + $0x410] ss:$12 sps:$4 sm:$0xff]  }
 0x166   : > { %v2642_v43 = vmax.f32 %v2211_v38, 0.0  ;;  %v2214_v41 = vadd.f32 %v4406_v47, %v1694_v33  ;;  %1905 = vmatmul.mubr.bf16.gmra.mrb[144].mxu1 %v3895_v32  ;;  %v3279_v47 = vpop.f32.mrb[53].mxu0  ;;  %v3911_v33 = vld [vmem:[%s4090_s16 + $0x3c0] ss:$12 sps:$4 sm:$0xff]  }
 0x167   : > { %1912 = vmatprep.mubr.bf16.mxu1 %v3896_v36  ;;  %v4474_v54 = vpop.f32.mrb[54].mxu0  ;;  %3386 = vmatmul.mubr.bf16.gmra.mrb[160].mxu0 %v3910_v51 }
 0x168   : > { %2764 = vst.msk [vmem:[%s4309_s21 + $0x90] sm:$0xff] %vm2745_vm1, %v2642_v43  ;;  %v2643_v44 = vmax.f32 %v2214_v41, 0.0  ;;  %v3280_v59 = vpop.f32.mrb[55].mxu0  ;;  %3389 = vmatprep.mubr.msk.bf16.mxu0 %vm4003_vm0, %v4002_v3  ;;  %v3912_v43 = vld [vmem:[%s4090_s16 + $0x3dc] ss:$12 sps:$4 sm:$0xff]  }
 0x169   : > { %v1698_v39 = vpop.f32.mrb[40].mxu1 }
 0x16a   : > { %2765 = vst.msk [vmem:[%s4309_s21 + $0x98] sm:$0xff] %vm2745_vm1, %v2643_v44  ;;  %v1699_v46 = vadd.f32 %v4292_v60, %v1698_v39  ;;  %v1700_v48 = vpop.f32.mrb[41].mxu1  ;;  %v4483_v0 = vpop.f32.mrb[56].mxu0 }
 0x16b   : > { %v1701_v52 = vpop.f32.mrb[42].mxu1 }
 0x16c   : > { %v2219_v55 = vadd.f32 %v4415_v56, %v1699_v46  ;;  %v1702_v50 = vadd.f32 %v4292_v60, %v1701_v52  ;;  %v1703_v57 = vpop.f32.mrb[43].mxu1 }
 0x16d   : > { %v3926_v57 = vld [vmem:[%s4090_s16 + $0x428] ss:$12 sps:$4 sm:$0xff]  }
 0x16e   : > { %v2644_v61 = vmax.f32 %v2219_v55, 0.0  ;;  %v2222_v58 = vadd.f32 %v4423_v2, %v1702_v50  ;;  %1913 = vmatmul.mubr.bf16.gmra.mrb[148].mxu1 %v3899_v49  ;;  %v3283_v2 = vpop.f32.mrb[57].mxu0  ;;  %v3915_v50 = vld [vmem:[%s4090_s16 + $0x3d8] ss:$12 sps:$4 sm:$0xff]  }
 0x16f   : > { %1920 = vmatprep.mubr.bf16.mxu1 %v3900_v53  ;;  %v4491_v7 = vpop.f32.mrb[58].mxu0  ;;  %3390 = vmatmul.mubr.bf16.gmra.mrb[164].mxu0 %v3914_v6 }
 0x170   : > { %2766 = vst.msk [vmem:[%s4309_s21 + $0xa0] sm:$0xff] %vm2745_vm1, %v2644_v61  ;;  %v2645_v63 = vmax.f32 %v2222_v58, 0.0  ;;  %v3284_v14 = vpop.f32.mrb[59].mxu0  ;;  %3393 = vmatprep.mubr.msk.bf16.mxu0 %vm4003_vm0, %v4002_v3  ;;  %v3916_v61 = vld [vmem:[%s4090_s16 + $0x3f4] ss:$12 sps:$4 sm:$0xff]  }
 0x171   : > { %v1706_v56 = vpop.f32.mrb[44].mxu1 }
 0x172   : > { %2767 = vst.msk [vmem:[%s4309_s21 + $0xa8] sm:$0xff] %vm2745_vm1, %v2645_v63  ;;  %v1707_v1 = vadd.f32 %v4292_v60, %v1706_v56  ;;  %v1708_v4 = vpop.f32.mrb[45].mxu1  ;;  %v4500_v18 = vpop.f32.mrb[60].mxu0 }
 0x173   : > { %v1709_v8 = vpop.f32.mrb[46].mxu1 }
 0x174   : > { %v2227_v10 = vadd.f32 %v4432_v11, %v1707_v1  ;;  %v1710_v5 = vadd.f32 %v4292_v60, %v1709_v8  ;;  %v1711_v12 = vpop.f32.mrb[47].mxu1 }
 0x175   : > { %v3930_v12 = vld [vmem:[%s4090_s16 + $0x440] ss:$12 sps:$4 sm:$0xff]  }
 0x176   : > { %v2646_v15 = vmax.f32 %v2227_v10, 0.0  ;;  %v2230_v13 = vadd.f32 %v4440_v20, %v1710_v5  ;;  %1921 = vmatmul.mubr.bf16.gmra.mrb[152].mxu1 %v3903_v62  ;;  %v3287_v20 = vpop.f32.mrb[61].mxu0  ;;  %v3919_v5 = vld [vmem:[%s4090_s16 + $0x3f0] ss:$12 sps:$4 sm:$0xff]  }
 0x177   : > { %1928 = vmatprep.mubr.bf16.mxu1 %v3904_v9  ;;  %v4508_v24 = vpop.f32.mrb[62].mxu0  ;;  %3394 = vmatmul.mubr.bf16.gmra.mrb[168].mxu0 %v3918_v23 }
 0x178   : > { %2768 = vst.msk [vmem:[%s4309_s21 + $0xb0] sm:$0xff] %vm2745_vm1, %v2646_v15  ;;  %v2647_v17 = vmax.f32 %v2230_v13, 0.0  ;;  %v3288_v31 = vpop.f32.mrb[63].mxu0  ;;  %3397 = vmatprep.mubr.msk.bf16.mxu0 %vm4003_vm0, %v4002_v3  ;;  %v3920_v15 = vld [vmem:[%s4090_s16 + $0x40c] ss:$12 sps:$4 sm:$0xff]  }
 0x179   : > { %v1714_v11 = vpop.f32.mrb[48].mxu1 }
 0x17a   : > { %2769 = vst.msk [vmem:[%s4309_s21 + $0xb8] sm:$0xff] %vm2745_vm1, %v2647_v17  ;;  %v1715_v19 = vadd.f32 %v4292_v60, %v1714_v11  ;;  %v1716_v21 = vpop.f32.mrb[49].mxu1  ;;  %v4517_v35 = vpop.f32.mrb[64].mxu0 }
 0x17b   : > { %v1717_v25 = vpop.f32.mrb[50].mxu1 }
 0x17c   : > { %v2235_v27 = vadd.f32 %v4449_v28, %v1715_v19  ;;  %v1718_v22 = vadd.f32 %v4292_v60, %v1717_v25  ;;  %v1719_v29 = vpop.f32.mrb[51].mxu1 }
 0x17d   : > { %v3934_v29 = vld [vmem:[%s4090_s16 + $0x458] ss:$12 sps:$4 sm:$0xff]  }
 0x17e   : > { %v2648_v32 = vmax.f32 %v2235_v27, 0.0  ;;  %v2238_v30 = vadd.f32 %v4457_v37, %v1718_v22  ;;  %1929 = vmatmul.mubr.bf16.gmra.mrb[156].mxu1 %v3907_v16  ;;  %v3291_v37 = vpop.f32.mrb[65].mxu0  ;;  %v3923_v22 = vld [vmem:[%s4090_s16 + $0x408] ss:$12 sps:$4 sm:$0xff]  }
 0x17f   : > { %1936 = vmatprep.mubr.bf16.mxu1 %v3908_v26  ;;  %v4525_v41 = vpop.f32.mrb[66].mxu0  ;;  %3398 = vmatmul.mubr.bf16.gmra.mrb[172].mxu0 %v3922_v40 }
 0x180   : > { %2770 = vst.msk [vmem:[%s4309_s21 + $0xc0] sm:$0xff] %vm2745_vm1, %v2648_v32  ;;  %v2649_v34 = vmax.f32 %v2238_v30, 0.0  ;;  %v3292_v48 = vpop.f32.mrb[67].mxu0  ;;  %3401 = vmatprep.mubr.msk.bf16.mxu0 %vm4003_vm0, %v4002_v3  ;;  %v3924_v32 = vld [vmem:[%s4090_s16 + $0x424] ss:$12 sps:$4 sm:$0xff]  }
 0x181   : > { %v1722_v28 = vpop.f32.mrb[52].mxu1 }
 0x182   : > { %2771 = vst.msk [vmem:[%s4309_s21 + $0xc8] sm:$0xff] %vm2745_vm1, %v2649_v34  ;;  %v1723_v36 = vadd.f32 %v4292_v60, %v1722_v28  ;;  %v1724_v38 = vpop.f32.mrb[53].mxu1  ;;  %v4534_v52 = vpop.f32.mrb[68].mxu0 }
 0x183   : > { %v1725_v42 = vpop.f32.mrb[54].mxu1 }
 0x184   : > { %v2243_v44 = vadd.f32 %v4466_v45, %v1723_v36  ;;  %v1726_v39 = vadd.f32 %v4292_v60, %v1725_v42  ;;  %v1727_v46 = vpop.f32.mrb[55].mxu1 }
 0x185   : > { %v3938_v46 = vld [vmem:[%s4090_s16 + $0x470] ss:$12 sps:$4 sm:$0xff]  }
 0x186   : > { %v2650_v49 = vmax.f32 %v2243_v44, 0.0  ;;  %v2246_v47 = vadd.f32 %v4474_v54, %v1726_v39  ;;  %1937 = vmatmul.mubr.bf16.gmra.mrb[160].mxu1 %v3911_v33  ;;  %v3295_v54 = vpop.f32.mrb[69].mxu0  ;;  %v3927_v39 = vld [vmem:[%s4090_s16 + $0x420] ss:$12 sps:$4 sm:$0xff]  }
 0x187   : > { %1944 = vmatprep.mubr.bf16.mxu1 %v3912_v43  ;;  %v4542_v58 = vpop.f32.mrb[70].mxu0  ;;  %3402 = vmatmul.mubr.bf16.gmra.mrb[176].mxu0 %v3926_v57 }
 0x188   : > { %2772 = vst.msk [vmem:[%s4309_s21 + $0xd0] sm:$0xff] %vm2745_vm1, %v2650_v49  ;;  %v2651_v51 = vmax.f32 %v2246_v47, 0.0  ;;  %v3296_v4 = vpop.f32.mrb[71].mxu0  ;;  %3405 = vmatprep.mubr.msk.bf16.mxu0 %vm4003_vm0, %v4002_v3  ;;  %v3928_v49 = vld [vmem:[%s4090_s16 + $0x43c] ss:$12 sps:$4 sm:$0xff]  }
 0x189   : > { %v1730_v45 = vpop.f32.mrb[56].mxu1 }
 0x18a   : > { %2773 = vst.msk [vmem:[%s4309_s21 + $0xd8] sm:$0xff] %vm2745_vm1, %v2651_v51  ;;  %v1731_v53 = vadd.f32 %v4292_v60, %v1730_v45  ;;  %v1732_v55 = vpop.f32.mrb[57].mxu1  ;;  %v4551_v8 = vpop.f32.mrb[72].mxu0 }
 0x18b   : > { %v1733_v59 = vpop.f32.mrb[58].mxu1 }
 0x18c   : > { %v2251_v63 = vadd.f32 %v4483_v0, %v1731_v53  ;;  %v1734_v56 = vadd.f32 %v4292_v60, %v1733_v59  ;;  %v1735_v1 = vpop.f32.mrb[59].mxu1 }
 0x18d   : > { %v3942_v1 = vld [vmem:[%s4090_s16 + $0x488] ss:$12 sps:$4 sm:$0xff]  }
 0x18e   : > { %v2652_v62 = vmax.f32 %v2251_v63, 0.0  ;;  %v2254_v2 = vadd.f32 %v4491_v7, %v1734_v56  ;;  %1945 = vmatmul.mubr.bf16.gmra.mrb[164].mxu1 %v3915_v50  ;;  %v3299_v7 = vpop.f32.mrb[73].mxu0  ;;  %v3931_v56 = vld [vmem:[%s4090_s16 + $0x438] ss:$12 sps:$4 sm:$0xff]  }
 0x18f   : > { %1952 = vmatprep.mubr.bf16.mxu1 %v3916_v61  ;;  %v4559_v13 = vpop.f32.mrb[74].mxu0  ;;  %3406 = vmatmul.mubr.bf16.gmra.mrb[180].mxu0 %v3930_v12 }
 0x190   : > { %2774 = vst.msk [vmem:[%s4309_s21 + $0xe0] sm:$0xff] %vm2745_vm1, %v2652_v62  ;;  %v2653_v6 = vmax.f32 %v2254_v2, 0.0  ;;  %v3300_v21 = vpop.f32.mrb[75].mxu0  ;;  %3409 = vmatprep.mubr.msk.bf16.mxu0 %vm4003_vm0, %v4002_v3  ;;  %v3932_v62 = vld [vmem:[%s4090_s16 + $0x454] ss:$12 sps:$4 sm:$0xff]  }
 0x191   : > { %v1738_v0 = vpop.f32.mrb[60].mxu1 }
 0x192   : > { %2775 = vst.msk [vmem:[%s4309_s21 + $0xe8] sm:$0xff] %vm2745_vm1, %v2653_v6  ;;  %v1739_v9 = vadd.f32 %v4292_v60, %v1738_v0  ;;  %v1740_v10 = vpop.f32.mrb[61].mxu1  ;;  %v4568_v25 = vpop.f32.mrb[76].mxu0 }
 0x193   : > { %v1741_v14 = vpop.f32.mrb[62].mxu1 }
 0x194   : > { %v2259_v17 = vadd.f32 %v4500_v18, %v1739_v9  ;;  %v1742_v11 = vadd.f32 %v4292_v60, %v1741_v14  ;;  %v1743_v19 = vpop.f32.mrb[63].mxu1 }
 0x195   : > { %v3946_v19 = vld [vmem:[%s4090_s16 + $0x4a0] ss:$12 sps:$4 sm:$0xff]  }
 0x196   : > { %v2654_v16 = vmax.f32 %v2259_v17, 0.0  ;;  %v2262_v20 = vadd.f32 %v4508_v24, %v1742_v11  ;;  %1953 = vmatmul.mubr.bf16.gmra.mrb[168].mxu1 %v3919_v5  ;;  %v3303_v24 = vpop.f32.mrb[77].mxu0  ;;  %v3935_v11 = vld [vmem:[%s4090_s16 + $0x450] ss:$12 sps:$4 sm:$0xff]  }
 0x197   : > { %1960 = vmatprep.mubr.bf16.mxu1 %v3920_v15  ;;  %v4576_v30 = vpop.f32.mrb[78].mxu0  ;;  %3410 = vmatmul.mubr.bf16.gmra.mrb[184].mxu0 %v3934_v29 }
 0x198   : > { %2776 = vst.msk [vmem:[%s4309_s21 + $0xf0] sm:$0xff] %vm2745_vm1, %v2654_v16  ;;  %v2655_v23 = vmax.f32 %v2262_v20, 0.0  ;;  %v3304_v38 = vpop.f32.mrb[79].mxu0  ;;  %3413 = vmatprep.mubr.msk.bf16.mxu0 %vm4003_vm0, %v4002_v3  ;;  %v3936_v16 = vld [vmem:[%s4090_s16 + $0x46c] ss:$12 sps:$4 sm:$0xff]  }
 0x199   : > { %v1746_v18 = vpop.f32.mrb[64].mxu1 }
 0x19a   : > { %2777 = vst.msk [vmem:[%s4309_s21 + $0xf8] sm:$0xff] %vm2745_vm1, %v2655_v23  ;;  %v1747_v26 = vadd.f32 %v4292_v60, %v1746_v18  ;;  %v1748_v27 = vpop.f32.mrb[65].mxu1  ;;  %v4585_v42 = vpop.f32.mrb[80].mxu0 }
 0x19b   : > { %v1749_v31 = vpop.f32.mrb[66].mxu1 }
 0x19c   : > { %v2267_v34 = vadd.f32 %v4517_v35, %v1747_v26  ;;  %v1750_v28 = vadd.f32 %v4292_v60, %v1749_v31  ;;  %v1751_v36 = vpop.f32.mrb[67].mxu1 }
 0x19d   : > { %v3950_v36 = vld [vmem:[%s4090_s16 + $0x4b8] ss:$12 sps:$4 sm:$0xff]  }
 0x19e   : > { %v2656_v33 = vmax.f32 %v2267_v34, 0.0  ;;  %v2270_v37 = vadd.f32 %v4525_v41, %v1750_v28  ;;  %1961 = vmatmul.mubr.bf16.gmra.mrb[172].mxu1 %v3923_v22  ;;  %v3307_v41 = vpop.f32.mrb[81].mxu0  ;;  %v3939_v28 = vld [vmem:[%s4090_s16 + $0x468] ss:$12 sps:$4 sm:$0xff]  }
 0x19f   : > { %1968 = vmatprep.mubr.bf16.mxu1 %v3924_v32  ;;  %v4593_v47 = vpop.f32.mrb[82].mxu0  ;;  %3414 = vmatmul.mubr.bf16.gmra.mrb[188].mxu0 %v3938_v46 }
 0x1a0   : > { %2778 = vst.msk [vmem:[%s4309_s21 + $0x100] sm:$0xff] %vm2745_vm1, %v2656_v33  ;;  %v2657_v40 = vmax.f32 %v2270_v37, 0.0  ;;  %v3308_v55 = vpop.f32.mrb[83].mxu0  ;;  %3417 = vmatprep.mubr.msk.bf16.mxu0 %vm4003_vm0, %v4002_v3  ;;  %v3940_v33 = vld [vmem:[%s4090_s16 + $0x484] ss:$12 sps:$4 sm:$0xff]  }
 0x1a1   : > { %v1754_v35 = vpop.f32.mrb[68].mxu1 }
 0x1a2   : > { %2779 = vst.msk [vmem:[%s4309_s21 + $0x108] sm:$0xff] %vm2745_vm1, %v2657_v40  ;;  %v1755_v43 = vadd.f32 %v4292_v60, %v1754_v35  ;;  %v1756_v44 = vpop.f32.mrb[69].mxu1  ;;  %v4602_v59 = vpop.f32.mrb[84].mxu0 }
 0x1a3   : > { %v1757_v48 = vpop.f32.mrb[70].mxu1 }
 0x1a4   : > { %v2275_v51 = vadd.f32 %v4534_v52, %v1755_v43  ;;  %v1758_v45 = vadd.f32 %v4292_v60, %v1757_v48  ;;  %v1759_v53 = vpop.f32.mrb[71].mxu1 }
 0x1a5   : > { %v3954_v53 = vld [vmem:[%s4090_s16 + $0x4d0] ss:$12 sps:$4 sm:$0xff]  }
 0x1a6   : > { %v2658_v50 = vmax.f32 %v2275_v51, 0.0  ;;  %v2278_v54 = vadd.f32 %v4542_v58, %v1758_v45  ;;  %1969 = vmatmul.mubr.bf16.gmra.mrb[176].mxu1 %v3927_v39  ;;  %v3311_v58 = vpop.f32.mrb[85].mxu0  ;;  %v3943_v45 = vld [vmem:[%s4090_s16 + $0x480] ss:$12 sps:$4 sm:$0xff]  }
 0x1a7   : > { %1976 = vmatprep.mubr.bf16.mxu1 %v3928_v49  ;;  %v4610_v2 = vpop.f32.mrb[86].mxu0  ;;  %3418 = vmatmul.mubr.bf16.gmra.mrb[192].mxu0 %v3942_v1 }
 0x1a8   : > { %2780 = vst.msk [vmem:[%s4309_s21 + $0x110] sm:$0xff] %vm2745_vm1, %v2658_v50  ;;  %v2659_v57 = vmax.f32 %v2278_v54, 0.0  ;;  %v3312_v10 = vpop.f32.mrb[87].mxu0  ;;  %3421 = vmatprep.mubr.msk.bf16.mxu0 %vm4003_vm0, %v4002_v3  ;;  %v3944_v50 = vld [vmem:[%s4090_s16 + $0x49c] ss:$12 sps:$4 sm:$0xff]  }
 0x1a9   : > { %v1762_v52 = vpop.f32.mrb[72].mxu1 }
 0x1aa   : > { %2781 = vst.msk [vmem:[%s4309_s21 + $0x118] sm:$0xff] %vm2745_vm1, %v2659_v57  ;;  %v1763_v61 = vadd.f32 %v4292_v60, %v1762_v52  ;;  %v1764_v63 = vpop.f32.mrb[73].mxu1  ;;  %v4619_v14 = vpop.f32.mrb[88].mxu0 }
 0x1ab   : > { %v1765_v4 = vpop.f32.mrb[74].mxu1 }
 0x1ac   : > { %v2283_v6 = vadd.f32 %v4551_v8, %v1763_v61  ;;  %v1766_v0 = vadd.f32 %v4292_v60, %v1765_v4  ;;  %v1767_v9 = vpop.f32.mrb[75].mxu1 }
 0x1ad   : > { %v3958_v9 = vld [vmem:[%s4090_s16 + $0x4e8] ss:$12 sps:$4 sm:$0xff]  }
 0x1ae   : > { %v2660_v5 = vmax.f32 %v2283_v6, 0.0  ;;  %v2286_v7 = vadd.f32 %v4559_v13, %v1766_v0  ;;  %1977 = vmatmul.mubr.bf16.gmra.mrb[180].mxu1 %v3931_v56  ;;  %v3315_v13 = vpop.f32.mrb[89].mxu0  ;;  %v3947_v6 = vld [vmem:[%s4090_s16 + $0x498] ss:$12 sps:$4 sm:$0xff]  }
 0x1af   : > { %1984 = vmatprep.mubr.bf16.mxu1 %v3932_v62  ;;  %v4627_v20 = vpop.f32.mrb[90].mxu0  ;;  %3422 = vmatmul.mubr.bf16.gmra.mrb[196].mxu0 %v3946_v19 }
 0x1b0   : > { %2782 = vst.msk [vmem:[%s4309_s21 + $0x120] sm:$0xff] %vm2745_vm1, %v2660_v5  ;;  %v2661_v12 = vmax.f32 %v2286_v7, 0.0  ;;  %v3316_v27 = vpop.f32.mrb[91].mxu0  ;;  %3425 = vmatprep.mubr.msk.bf16.mxu0 %vm4003_vm0, %v4002_v3  ;;  %v3948_v5 = vld [vmem:[%s4090_s16 + $0x4b4] ss:$12 sps:$4 sm:$0xff]  }
 0x1b1   : > { %v1770_v8 = vpop.f32.mrb[76].mxu1 }
 0x1b2   : > { %2783 = vst.msk [vmem:[%s4309_s21 + $0x128] sm:$0xff] %vm2745_vm1, %v2661_v12  ;;  %v1771_v15 = vadd.f32 %v4292_v60, %v1770_v8  ;;  %v1772_v17 = vpop.f32.mrb[77].mxu1  ;;  %v4636_v31 = vpop.f32.mrb[92].mxu0 }
 0x1b3   : > { %v1773_v21 = vpop.f32.mrb[78].mxu1 }
 0x1b4   : > { %v2291_v23 = vadd.f32 %v4568_v25, %v1771_v15  ;;  %v1774_v18 = vadd.f32 %v4292_v60, %v1773_v21  ;;  %v1775_v26 = vpop.f32.mrb[79].mxu1 }
 0x1b5   : > { %v3962_v26 = vld [vmem:[%s4090_s16 + $0x500] ss:$12 sps:$4 sm:$0xff]  }
 0x1b6   : > { %v2662_v22 = vmax.f32 %v2291_v23, 0.0  ;;  %v2294_v24 = vadd.f32 %v4576_v30, %v1774_v18  ;;  %1985 = vmatmul.mubr.bf16.gmra.mrb[184].mxu1 %v3935_v11  ;;  %v3319_v30 = vpop.f32.mrb[93].mxu0  ;;  %v3951_v18 = vld [vmem:[%s4090_s16 + $0x4b0] ss:$12 sps:$4 sm:$0xff]  }
 0x1b7   : > { %1992 = vmatprep.mubr.bf16.mxu1 %v3936_v16  ;;  %v4644_v37 = vpop.f32.mrb[94].mxu0  ;;  %3426 = vmatmul.mubr.bf16.gmra.mrb[200].mxu0 %v3950_v36 }
 0x1b8   : > { %2784 = vst.msk [vmem:[%s4309_s21 + $0x130] sm:$0xff] %vm2745_vm1, %v2662_v22  ;;  %v2663_v29 = vmax.f32 %v2294_v24, 0.0  ;;  %v3320_v44 = vpop.f32.mrb[95].mxu0  ;;  %3429 = vmatprep.mubr.msk.bf16.mxu0 %vm4003_vm0, %v4002_v3  ;;  %v3952_v22 = vld [vmem:[%s4090_s16 + $0x4cc] ss:$12 sps:$4 sm:$0xff]  }
 0x1b9   : > { %v1778_v25 = vpop.f32.mrb[80].mxu1 }
 0x1ba   : > { %2785 = vst.msk [vmem:[%s4309_s21 + $0x138] sm:$0xff] %vm2745_vm1, %v2663_v29  ;;  %v1779_v32 = vadd.f32 %v4292_v60, %v1778_v25  ;;  %v1780_v34 = vpop.f32.mrb[81].mxu1  ;;  %v4653_v48 = vpop.f32.mrb[96].mxu0 }
 0x1bb   : > { %v1781_v38 = vpop.f32.mrb[82].mxu1 }
 0x1bc   : > { %v2299_v40 = vadd.f32 %v4585_v42, %v1779_v32  ;;  %v1782_v35 = vadd.f32 %v4292_v60, %v1781_v38  ;;  %v1783_v43 = vpop.f32.mrb[83].mxu1 }
 0x1bd   : > { %v3966_v43 = vld [vmem:[%s4090_s16 + $0x518] ss:$12 sps:$4 sm:$0xff]  }
 0x1be   : > { %v2664_v39 = vmax.f32 %v2299_v40, 0.0  ;;  %v2302_v41 = vadd.f32 %v4593_v47, %v1782_v35  ;;  %1993 = vmatmul.mubr.bf16.gmra.mrb[188].mxu1 %v3939_v28  ;;  %v3323_v47 = vpop.f32.mrb[97].mxu0  ;;  %v3955_v35 = vld [vmem:[%s4090_s16 + $0x4c8] ss:$12 sps:$4 sm:$0xff]  }
 0x1bf   : > { %2000 = vmatprep.mubr.bf16.mxu1 %v3940_v33  ;;  %v4661_v54 = vpop.f32.mrb[98].mxu0  ;;  %3430 = vmatmul.mubr.bf16.gmra.mrb[204].mxu0 %v3954_v53 }
 0x1c0   : > { %2786 = vst.msk [vmem:[%s4309_s21 + $0x140] sm:$0xff] %vm2745_vm1, %v2664_v39  ;;  %v2665_v46 = vmax.f32 %v2302_v41, 0.0  ;;  %v3324_v63 = vpop.f32.mrb[99].mxu0  ;;  %3433 = vmatprep.mubr.msk.bf16.mxu0 %vm4003_vm0, %v4002_v3  ;;  %v3956_v39 = vld [vmem:[%s4090_s16 + $0x4e4] ss:$12 sps:$4 sm:$0xff]  }
 0x1c1   : > { %v1786_v42 = vpop.f32.mrb[84].mxu1 }
 0x1c2   : > { %2787 = vst.msk [vmem:[%s4309_s21 + $0x148] sm:$0xff] %vm2745_vm1, %v2665_v46  ;;  %v1787_v49 = vadd.f32 %v4292_v60, %v1786_v42  ;;  %v1788_v51 = vpop.f32.mrb[85].mxu1  ;;  %v4670_v4 = vpop.f32.mrb[100].mxu0 }
 0x1c3   : > { %v1789_v55 = vpop.f32.mrb[86].mxu1  ;;  %v3327_v0 = vpop.f32.mrb[101].mxu0 }
 0x1c4   : > { %v2307_v57 = vadd.f32 %v4602_v59, %v1787_v49  ;;  %v1790_v52 = vadd.f32 %v4292_v60, %v1789_v55  ;;  %v1791_v61 = vpop.f32.mrb[87].mxu1  ;;  %v4677_v60 = vld [vmem:[%s5030_s2] ss:$0 sm:$0xff]  ;;  %v4683_v7 = vpop.f32.mrb[102].mxu0 }
 0x1c5   : > { %v3328_v17 = vpop.f32.mrb[103].mxu0  ;;  %v3970_v61 = vld [vmem:[%s4090_s16 + $0x530] ss:$12 sps:$4 sm:$0xff]  }
 0x1c6   : > { %v2666_v56 = vmax.f32 %v2307_v57, 0.0  ;;  %v2310_v58 = vadd.f32 %v4610_v2, %v1790_v52  ;;  %2001 = vmatmul.mubr.bf16.gmra.mrb[192].mxu1 %v3943_v45  ;;  %v3959_v52 = vld [vmem:[%s4090_s16 + $0x4e0] ss:$12 sps:$4 sm:$0xff]  }
 0x1c7   : > { %2008 = vmatprep.mubr.bf16.mxu1 %v3944_v50  ;;  %3434 = vmatmul.mubr.bf16.gmra.mrb[208].mxu0 %v3958_v9 }
 0x1c8   : > { %2788 = vst.msk [vmem:[%s4309_s21 + $0x150] sm:$0xff] %vm2745_vm1, %v2666_v56  ;;  %v2667_v1 = vmax.f32 %v2310_v58, 0.0  ;;  %3437 = vmatprep.mubr.msk.bf16.mxu0 %vm4003_vm0, %v4002_v3  ;;  %v3960_v56 = vld [vmem:[%s4090_s16 + $0x4fc] ss:$12 sps:$4 sm:$0xff]  }
 0x1c9   : > { %v1794_v59 = vpop.f32.mrb[88].mxu1 }
 0x1ca   : > { %2789 = vst.msk [vmem:[%s4309_s21 + $0x158] sm:$0xff] %vm2745_vm1, %v2667_v1  ;;  %v1795_v62 = vadd.f32 %v4677_v60, %v1794_v59  ;;  %v1796_v2 = vpop.f32.mrb[89].mxu1  ;;  %v4692_v21 = vpop.f32.mrb[104].mxu0 }
 0x1cb   : > { %v1797_v10 = vpop.f32.mrb[90].mxu1 }
 0x1cc   : > { %v2315_v12 = vadd.f32 %v4619_v14, %v1795_v62  ;;  %v1798_v8 = vadd.f32 %v4677_v60, %v1797_v10  ;;  %v1799_v15 = vpop.f32.mrb[91].mxu1 }
 0x1cd   : > { %v3974_v15 = vld [vmem:[%s4090_s16 + $0x548] ss:$12 sps:$4 sm:$0xff]  }
 0x1ce   : > { %v2668_v11 = vmax.f32 %v2315_v12, 0.0  ;;  %v2318_v13 = vadd.f32 %v4627_v20, %v1798_v8  ;;  %2009 = vmatmul.mubr.bf16.gmra.mrb[196].mxu1 %v3947_v6  ;;  %v3331_v20 = vpop.f32.mrb[105].mxu0  ;;  %v3963_v8 = vld [vmem:[%s4090_s16 + $0x4f8] ss:$12 sps:$4 sm:$0xff]  }
 0x1cf   : > { %2016 = vmatprep.mubr.bf16.mxu1 %v3948_v5  ;;  %v4700_v24 = vpop.f32.mrb[106].mxu0  ;;  %3438 = vmatmul.mubr.bf16.gmra.mrb[212].mxu0 %v3962_v26 }
 0x1d0   : > { %2790 = vst.msk [vmem:[%s4309_s21 + $0x160] sm:$0xff] %vm2745_vm1, %v2668_v11  ;;  %v2669_v19 = vmax.f32 %v2318_v13, 0.0  ;;  %v3332_v34 = vpop.f32.mrb[107].mxu0  ;;  %3441 = vmatprep.mubr.msk.bf16.mxu0 %vm4003_vm0, %v4002_v3  ;;  %v3964_v11 = vld [vmem:[%s4090_s16 + $0x514] ss:$12 sps:$4 sm:$0xff]  }
 0x1d1   : > { %v1802_v14 = vpop.f32.mrb[92].mxu1 }
 0x1d2   : > { %2791 = vst.msk [vmem:[%s4309_s21 + $0x168] sm:$0xff] %vm2745_vm1, %v2669_v19  ;;  %v1803_v16 = vadd.f32 %v4677_v60, %v1802_v14  ;;  %v1804_v23 = vpop.f32.mrb[93].mxu1  ;;  %v4709_v38 = vpop.f32.mrb[108].mxu0 }
 0x1d3   : > { %v1805_v27 = vpop.f32.mrb[94].mxu1 }
 0x1d4   : > { %v2323_v29 = vadd.f32 %v4636_v31, %v1803_v16  ;;  %v1806_v25 = vadd.f32 %v4677_v60, %v1805_v27  ;;  %v1807_v32 = vpop.f32.mrb[95].mxu1 }
 0x1d5   : > { %v3978_v32 = vld [vmem:[%s4090_s16 + $0x560] ss:$12 sps:$4 sm:$0xff]  }
 0x1d6   : > { %v2670_v28 = vmax.f32 %v2323_v29, 0.0  ;;  %v2326_v30 = vadd.f32 %v4644_v37, %v1806_v25  ;;  %2017 = vmatmul.mubr.bf16.gmra.mrb[200].mxu1 %v3951_v18  ;;  %v3335_v37 = vpop.f32.mrb[109].mxu0  ;;  %v3967_v25 = vld [vmem:[%s4090_s16 + $0x510] ss:$12 sps:$4 sm:$0xff]  }
 0x1d7   : > { %2024 = vmatprep.mubr.bf16.mxu1 %v3952_v22  ;;  %v4717_v41 = vpop.f32.mrb[110].mxu0  ;;  %3442 = vmatmul.mubr.bf16.gmra.mrb[216].mxu0 %v3966_v43 }
 0x1d8   : > { %2792 = vst.msk [vmem:[%s4309_s21 + $0x170] sm:$0xff] %vm2745_vm1, %v2670_v28  ;;  %v2671_v36 = vmax.f32 %v2326_v30, 0.0  ;;  %v3336_v51 = vpop.f32.mrb[111].mxu0  ;;  %3445 = vmatprep.mubr.msk.bf16.mxu0 %vm4003_vm0, %v4002_v3  ;;  %v3968_v28 = vld [vmem:[%s4090_s16 + $0x52c] ss:$12 sps:$4 sm:$0xff]  }
 0x1d9   : > { %v1810_v31 = vpop.f32.mrb[96].mxu1 }
 0x1da   : > { %2793 = vst.msk [vmem:[%s4309_s21 + $0x178] sm:$0xff] %vm2745_vm1, %v2671_v36  ;;  %v1811_v33 = vadd.f32 %v4677_v60, %v1810_v31  ;;  %v1812_v40 = vpop.f32.mrb[97].mxu1  ;;  %v4726_v55 = vpop.f32.mrb[112].mxu0 }
 0x1db   : > { %v1813_v44 = vpop.f32.mrb[98].mxu1 }
 0x1dc   : > { %v2331_v46 = vadd.f32 %v4653_v48, %v1811_v33  ;;  %v1814_v42 = vadd.f32 %v4677_v60, %v1813_v44  ;;  %v1815_v49 = vpop.f32.mrb[99].mxu1 }
 0x1dd   : > { %v3982_v49 = vld [vmem:[%s4090_s16 + $0x578] ss:$12 sps:$4 sm:$0xff]  }
 0x1de   : > { %v2672_v45 = vmax.f32 %v2331_v46, 0.0  ;;  %v2334_v47 = vadd.f32 %v4661_v54, %v1814_v42  ;;  %2025 = vmatmul.mubr.bf16.gmra.mrb[204].mxu1 %v3955_v35  ;;  %v3339_v54 = vpop.f32.mrb[113].mxu0  ;;  %v3971_v42 = vld [vmem:[%s4090_s16 + $0x528] ss:$12 sps:$4 sm:$0xff]  }
 0x1df   : > { %2032 = vmatprep.mubr.bf16.mxu1 %v3956_v39  ;;  %v4734_v58 = vpop.f32.mrb[114].mxu0  ;;  %3446 = vmatmul.mubr.bf16.gmra.mrb[220].mxu0 %v3970_v61 }
 0x1e0   : > { %2794 = vst.msk [vmem:[%s4309_s21 + $0x180] sm:$0xff] %vm2745_vm1, %v2672_v45  ;;  %v2673_v53 = vmax.f32 %v2334_v47, 0.0  ;;  %v3340_v2 = vpop.f32.mrb[115].mxu0  ;;  %3449 = vmatprep.mubr.msk.bf16.mxu0 %vm4003_vm0, %v4002_v3  ;;  %v3972_v45 = vld [vmem:[%s4090_s16 + $0x544] ss:$12 sps:$4 sm:$0xff]  }
 0x1e1   : > { %v1818_v48 = vpop.f32.mrb[100].mxu1 }
 0x1e2   : > { %2795 = vst.msk [vmem:[%s4309_s21 + $0x188] sm:$0xff] %vm2745_vm1, %v2673_v53  ;;  %v1819_v50 = vadd.f32 %v4677_v60, %v1818_v48  ;;  %v1820_v57 = vpop.f32.mrb[101].mxu1  ;;  %v4743_v10 = vpop.f32.mrb[116].mxu0 }
 0x1e3   : > { %v1821_v63 = vpop.f32.mrb[102].mxu1 }
 0x1e4   : > { %v2339_v1 = vadd.f32 %v4670_v4, %v1819_v50  ;;  %v1822_v59 = vadd.f32 %v4677_v60, %v1821_v63  ;;  %v1823_v62 = vpop.f32.mrb[103].mxu1 }
 0x1e5   : > { %v3986_v62 = vld [vmem:[%s4090_s16 + $0x590] ss:$12 sps:$4 sm:$0xff]  }
 0x1e6   : > { %v2674_v6 = vmax.f32 %v2339_v1, 0.0  ;;  %v2342_v0 = vadd.f32 %v4683_v7, %v1822_v59  ;;  %2033 = vmatmul.mubr.bf16.gmra.mrb[208].mxu1 %v3959_v52  ;;  %v3343_v7 = vpop.f32.mrb[117].mxu0  ;;  %v3975_v59 = vld [vmem:[%s4090_s16 + $0x540] ss:$12 sps:$4 sm:$0xff]  }
 0x1e7   : > { %2040 = vmatprep.mubr.bf16.mxu1 %v3960_v56  ;;  %v4751_v13 = vpop.f32.mrb[118].mxu0  ;;  %3450 = vmatmul.mubr.bf16.gmra.mrb[224].mxu0 %v3974_v15 }
 0x1e8   : > { %2796 = vst.msk [vmem:[%s4309_s21 + $0x190] sm:$0xff] %vm2745_vm1, %v2674_v6  ;;  %v2675_v9 = vmax.f32 %v2342_v0, 0.0  ;;  %v3344_v23 = vpop.f32.mrb[119].mxu0  ;;  %3453 = vmatprep.mubr.msk.bf16.mxu0 %vm4003_vm0, %v4002_v3  ;;  %v3976_v6 = vld [vmem:[%s4090_s16 + $0x55c] ss:$12 sps:$4 sm:$0xff]  }
 0x1e9   : > { %v1826_v4 = vpop.f32.mrb[104].mxu1 }
 0x1ea   : > { %2797 = vst.msk [vmem:[%s4309_s21 + $0x198] sm:$0xff] %vm2745_vm1, %v2675_v9  ;;  %v1827_v5 = vadd.f32 %v4677_v60, %v1826_v4  ;;  %v1828_v12 = vpop.f32.mrb[105].mxu1  ;;  %v4760_v27 = vpop.f32.mrb[120].mxu0 }
 0x1eb   : > { %v1829_v17 = vpop.f32.mrb[106].mxu1 }
 0x1ec   : > { %v2347_v19 = vadd.f32 %v4692_v21, %v1827_v5  ;;  %v1830_v14 = vadd.f32 %v4677_v60, %v1829_v17  ;;  %v1831_v16 = vpop.f32.mrb[107].mxu1 }
 0x1ed   : > { %v3989_v16 = vld [vmem:[%s4090_s16 + $0x5a8] ss:$0 sps:$4 sm:$0x11]  }
 0x1ee   : > { %v2676_v18 = vmax.f32 %v2347_v19, 0.0  ;;  %v2350_v20 = vadd.f32 %v4700_v24, %v1830_v14  ;;  %2041 = vmatmul.mubr.bf16.gmra.mrb[212].mxu1 %v3963_v8  ;;  %v3347_v24 = vpop.f32.mrb[121].mxu0 }
 0x1ef   : > { %2048 = vmatprep.mubr.bf16.mxu1 %v3964_v11  ;;  %v4768_v30 = vpop.f32.mrb[122].mxu0  ;;  %3454 = vmatmul.mubr.bf16.gmra.mrb[228].mxu0 %v3978_v32 }
 0x1f0   : > { %2798 = vst.msk [vmem:[%s4309_s21 + $0x1a0] sm:$0xff] %vm2745_vm1, %v2676_v18  ;;  %v2677_v26 = vmax.f32 %v2350_v20, 0.0  ;;  %v3348_v40 = vpop.f32.mrb[123].mxu0  ;;  %3457 = vmatprep.mubr.msk.bf16.mxu0 %vm4003_vm0, %v4002_v3  ;;  %v3980_v18 = vld [vmem:[%s4090_s16 + $0x574] ss:$12 sps:$4 sm:$0xff]  }
 0x1f1   : > { %v1834_v21 = vpop.f32.mrb[108].mxu1 }
 0x1f2   : > { %2799 = vst.msk [vmem:[%s4309_s21 + $0x1a8] sm:$0xff] %vm2745_vm1, %v2677_v26  ;;  %v1835_v22 = vadd.f32 %v4677_v60, %v1834_v21  ;;  %v1836_v29 = vpop.f32.mrb[109].mxu1  ;;  %v4777_v44 = vpop.f32.mrb[124].mxu0 }
 0x1f3   : > { %v1837_v34 = vpop.f32.mrb[110].mxu1 }
 0x1f4   : > { %v2355_v36 = vadd.f32 %v4709_v38, %v1835_v22  ;;  %v1838_v31 = vadd.f32 %v4677_v60, %v1837_v34  ;;  %v1839_v33 = vpop.f32.mrb[111].mxu1 }
 0x1f6   : > { %v2678_v35 = vmax.f32 %v2355_v36, 0.0  ;;  %v2358_v37 = vadd.f32 %v4717_v41, %v1838_v31  ;;  %2049 = vmatmul.mubr.bf16.gmra.mrb[216].mxu1 %v3967_v25  ;;  %v3351_v41 = vpop.f32.mrb[125].mxu0  ;;  %v3983_v36 = vld [vmem:[%s4090_s16 + $0x570] ss:$12 sps:$4 sm:$0xff]  }
 0x1f7   : > { %2056 = vmatprep.mubr.bf16.mxu1 %v3968_v28  ;;  %v4785_v47 = vpop.f32.mrb[126].mxu0  ;;  %3458 = vmatmul.mubr.bf16.gmra.mrb[232].mxu0 %v3982_v49  ;;  %v412_v41 = vld [vmem:[%s4090_s16 + $0x5a0] sm:$0x11] }
 0x1f8   : > { %2800 = vst.msk [vmem:[%s4309_s21 + $0x1b0] sm:$0xff] %vm2745_vm1, %v2678_v35  ;;  %v2679_v43 = vmax.f32 %v2358_v37, 0.0  ;;  %v3352_v57 = vpop.f32.mrb[127].mxu0  ;;  %3461 = vmatprep.mubr.msk.bf16.mxu0 %vm4003_vm0, %v4002_v3 }
 0x1f9   : > { %v1842_v38 = vpop.f32.mrb[112].mxu1  ;;  %v3112_v57 = vcombine.high %v412_v41, %v412_v41 }
 0x1fa   : > { %2801 = vst.msk [vmem:[%s4309_s21 + $0x1b8] sm:$0xff] %vm2745_vm1, %v2679_v43  ;;  %v1843_v39 = vadd.f32 %v4677_v60, %v1842_v38  ;;  %v1844_v46 = vpop.f32.mrb[113].mxu1  ;;  %v4794_v63 = vpop.f32.mrb[128].mxu0 }
 0x1fb   : > { %v1845_v51 = vpop.f32.mrb[114].mxu1 }
 0x1fc   : > { %v2363_v53 = vadd.f32 %v4726_v55, %v1843_v39  ;;  %v1846_v48 = vadd.f32 %v4677_v60, %v1845_v51  ;;  %v1847_v50 = vpop.f32.mrb[115].mxu1 }
 0x1fe   : > { %v2680_v52 = vmax.f32 %v2363_v53, 0.0  ;;  %v2366_v54 = vadd.f32 %v4734_v58, %v1846_v48  ;;  %2057 = vmatmul.mubr.bf16.gmra.mrb[220].mxu1 %v3971_v42  ;;  %v3355_v58 = vpop.f32.mrb[129].mxu0  ;;  %v3987_v53 = vld [vmem:[%s4090_s16 + $0x588] ss:$12 sps:$4 sm:$0xff]  }
 0x1ff   : > { %2064 = vmatprep.mubr.bf16.mxu1 %v3972_v45  ;;  %v4802_v0 = vpop.f32.mrb[130].mxu0  ;;  %3462 = vmatmul.mubr.bf16.gmra.mrb[236].mxu0 %v3986_v62 }
 0x200   : > { %2802 = vst.msk [vmem:[%s4309_s21 + $0x1c0] sm:$0xff] %vm2745_vm1, %v2680_v52  ;;  %v2681_v61 = vmax.f32 %v2366_v54, 0.0  ;;  %v3356_v12 = vpop.f32.mrb[131].mxu0  ;;  %3465 = vmatprep.mubr.msk.bf16.mxu0 %vm4003_vm0, %v4002_v3 }
 0x201   : > { %v1850_v55 = vpop.f32.mrb[116].mxu1 }
 0x202   : > { %2803 = vst.msk [vmem:[%s4309_s21 + $0x1c8] sm:$0xff] %vm2745_vm1, %v2681_v61  ;;  %v1851_v56 = vadd.f32 %v4677_v60, %v1850_v55  ;;  %v1852_v1 = vpop.f32.mrb[117].mxu1  ;;  %v4812_v11 = vpop.f32.mrb[132].mxu0 }
 0x203   : > { %v1853_v2 = vpop.f32.mrb[118].mxu1  ;;  %v3359_v14 = vpop.f32.mrb[133].mxu0 }
 0x204   : > { %v2371_v9 = vadd.f32 %v4743_v10, %v1851_v56  ;;  %v1854_v4 = vadd.f32 %v4677_v60, %v1853_v2  ;;  %v1855_v5 = vpop.f32.mrb[119].mxu1  ;;  %v3979_v10 = vld [vmem:[%s4090_s16 + $0x558] ss:$12 sps:$4 sm:$0xff]   ;;  %v4819_v20 = vpop.f32.mrb[134].mxu0 }
 0x205   : > { %v3360_v22 = vpop.f32.mrb[135].mxu0 }
 0x206   : > { %v2682_v8 = vmax.f32 %v2371_v9, 0.0  ;;  %v2374_v7 = vadd.f32 %v4751_v13, %v1854_v4  ;;  %2065 = vmatmul.mubr.bf16.gmra.mrb[224].mxu1 %v3975_v59 }
 0x207   : > { %2072 = vmatprep.mubr.bf16.mxu1 %v3976_v6  ;;  %3466 = vmatmul.mubr.bf16.gmra.mrb[240].mxu0 %v3989_v16  ;;  %v3111_v6 = vcombine.low %v412_v41, %v412_v41 }
 0x208   : > { %2804 = vst.msk [vmem:[%s4309_s21 + $0x1d0] sm:$0xff] %vm2745_vm1, %v2682_v8  ;;  %v2683_v15 = vmax.f32 %v2374_v7, 0.0 }
 0x209   : > { %v1858_v17 = vpop.f32.mrb[120].mxu1 }
 0x20a   : > { %2805 = vst.msk [vmem:[%s4309_s21 + $0x1d8] sm:$0xff] %vm2745_vm1, %v2683_v15  ;;  %v1859_v19 = vadd.f32 %v4677_v60, %v1858_v17  ;;  %v1860_v13 = vpop.f32.mrb[121].mxu1  ;;  %v4826_v34 = vpop.f32.mrb[136].mxu0 }
 0x20b   : > { %v1861_v23 = vpop.f32.mrb[122].mxu1  ;;  %v3363_v31 = vpop.f32.mrb[137].mxu0 }
 0x20c   : > { %v2379_v3 = vadd.f32 %v4760_v27, %v1859_v19  ;;  %v1862_v26 = vadd.f32 %v4677_v60, %v1861_v23  ;;  %v1863_v21 = vpop.f32.mrb[123].mxu1  ;;  %v4833_v40 = vpop.f32.mrb[138].mxu0 }
 0x20d   : > { %v3364_v38 = vpop.f32.mrb[139].mxu0 }
 0x20e   : > { %v2684_v29 = vmax.f32 %v2379_v3, 0.0  ;;  %v2382_v25 = vadd.f32 %v4768_v30, %v1862_v26  ;;  %2073 = vmatmul.mubr.bf16.gmra.mrb[228].mxu1 %v3979_v10  ;;  %v3984_v30 = vld [vmem:[%s4090_s16 + $0x58c] ss:$12 sps:$4 sm:$0xff]  }
 0x20f   : > { %2080 = vmatprep.mubr.bf16.mxu1 %v3980_v18 }
 0x210   : > { %2806 = vst.msk [vmem:[%s4309_s21 + $0x1e0] sm:$0xff] %vm2745_vm1, %v2684_v29  ;;  %v2685_v24 = vmax.f32 %v2382_v25, 0.0 }
 0x211   : > { %v1866_v32 = vpop.f32.mrb[124].mxu1 }
 0x212   : > { %2807 = vst.msk [vmem:[%s4309_s21 + $0x1e8] sm:$0xff] %vm2745_vm1, %v2685_v24  ;;  %v1867_v27 = vadd.f32 %v4677_v60, %v1866_v32  ;;  %v1868_v28 = vpop.f32.mrb[125].mxu1  ;;  %v2418_v51 = vpop.f32.mrb[140].mxu0 }
 0x213   : > { %v1869_v33 = vpop.f32.mrb[126].mxu1  ;;  %v3367_v48 = vpop.f32.mrb[141].mxu0 }
 0x214   : > { %v2387_v35 = vadd.f32 %v4777_v44, %v1867_v27  ;;  %v1870_v37 = vadd.f32 %v4677_v60, %v1869_v33  ;;  %v1871_v43 = vpop.f32.mrb[127].mxu1 }
 0x216   : > { %v2686_v39 = vmax.f32 %v2387_v35, 0.0  ;;  %v2390_v46 = vadd.f32 %v4785_v47, %v1870_v37  ;;  %2081 = vmatmul.mubr.bf16.gmra.mrb[232].mxu1 %v3983_v36  ;;  %v2421_v47 = vpop.f32.mrb[142].mxu0 }
 0x217   : > { %2088 = vmatprep.mubr.bf16.mxu1 %v3984_v30  ;;  %v3368_v55 = vpop.f32.mrb[143].mxu0 }
 0x218   : > { %2808 = vst.msk [vmem:[%s4309_s21 + $0x1f0] sm:$0xff] %vm2745_vm1, %v2686_v39  ;;  %v2687_v42 = vmax.f32 %v2390_v46, 0.0 }
 0x219   : > { %v1874_v49 = vpop.f32.mrb[128].mxu1 }
 0x21a   : > { %2809 = vst.msk [vmem:[%s4309_s21 + $0x1f8] sm:$0xff] %vm2745_vm1, %v2687_v42  ;;  %v1875_v44 = vadd.f32 %v4677_v60, %v1874_v49  ;;  %v1876_v45 = vpop.f32.mrb[129].mxu1  ;;  %v2426_v62 = vpop.f32.mrb[144].mxu0 }
 0x21b   : > { %v1877_v50 = vpop.f32.mrb[130].mxu1  ;;  %v3371_v9 = vpop.f32.mrb[145].mxu0 }
 0x21c   : > { %v2395_v52 = vadd.f32 %v4794_v63, %v1875_v44  ;;  %v1878_v54 = vadd.f32 %v4677_v60, %v1877_v50  ;;  %v1879_v61 = vpop.f32.mrb[131].mxu1  ;;  %v2429_v5 = vpop.f32.mrb[146].mxu0 }
 0x21d   : > { %v3372_v7 = vpop.f32.mrb[147].mxu0 }
 0x21e   : > { %v2688_v56 = vmax.f32 %v2395_v52, 0.0  ;;  %v2398_v1 = vadd.f32 %v4802_v0, %v1878_v54  ;;  %2089 = vmatmul.mubr.bf16.gmra.mrb[236].mxu1 %v3987_v53 }
 0x21f   : > { %2096 = vmatprep.mubr.bf16.mxu1 %v3112_v57 }
 0x220   : > { %2810 = vst.msk [vmem:[%s4309_s21 + $0x200] sm:$0xff] %vm2745_vm1, %v2688_v56  ;;  %v2689_v59 = vmax.f32 %v2398_v1, 0.0 }
 0x221   : > { %v1882_v58 = vpop.f32.mrb[132].mxu1 }
 0x222   : > { %2811 = vst.msk [vmem:[%s4309_s21 + $0x208] sm:$0xff] %vm2745_vm1, %v2689_v59  ;;  %v1883_v2 = vadd.f32 %v4677_v60, %v1882_v58  ;;  %v1884_v63 = vpop.f32.mrb[133].mxu1  ;;  %v2434_v13 = vpop.f32.mrb[148].mxu0 }
 0x223   : > { %v1885_v4 = vpop.f32.mrb[134].mxu1  ;;  %v3375_v16 = vpop.f32.mrb[149].mxu0 }
 0x224   : > { %v2403_v0 = vadd.f32 %v4812_v11, %v1883_v2  ;;  %v1886_v12 = vadd.f32 %v4677_v60, %v1885_v4  ;;  %v1887_v8 = vpop.f32.mrb[135].mxu1  ;;  %v2437_v18 = vpop.f32.mrb[150].mxu0 }
 0x225   : > { %v3376_v21 = vpop.f32.mrb[151].mxu0 }
 0x226   : > { %v2690_v15 = vmax.f32 %v2403_v0, 0.0  ;;  %v2406_v17 = vadd.f32 %v4819_v20, %v1886_v12  ;;  %2097 = vmatmul.mubr.bf16.gmra.mrb[240].mxu1 %v3111_v6 }
 0x228   : > { %2812 = vst.msk [vmem:[%s4309_s21 + $0x210] sm:$0xff] %vm2745_vm1, %v2690_v15  ;;  %v2691_v10 = vmax.f32 %v2406_v17, 0.0 }
 0x229   : > { %v1890_v19 = vpop.f32.mrb[136].mxu1 }
 0x22a   : > { %2813 = vst.msk [vmem:[%s4309_s21 + $0x218] sm:$0xff] %vm2745_vm1, %v2691_v10  ;;  %v1891_v14 = vadd.f32 %v4677_v60, %v1890_v19  ;;  %v1892_v11 = vpop.f32.mrb[137].mxu1  ;;  %v2442_v32 = vpop.f32.mrb[152].mxu0 }
 0x22b   : > { %v1893_v23 = vpop.f32.mrb[138].mxu1 }
 0x22c   : > { %v2411_v3 = vadd.f32 %v4826_v34, %v1891_v14  ;;  %v1894_v20 = vadd.f32 %v4677_v60, %v1893_v23  ;;  %v1895_v26 = vpop.f32.mrb[139].mxu1  ;;  %v3379_v34 = vpop.f32.mrb[153].mxu0 }
 0x22d   : > { %v2445_v31 = vpop.f32.mrb[154].mxu0 }
 0x22e   : > { %v2692_v22 = vmax.f32 %v2411_v3, 0.0  ;;  %v2414_v29 = vadd.f32 %v4833_v40, %v1894_v20  ;;  %v3380_v40 = vpop.f32.mrb[155].mxu0 }
 0x230   : > { %2814 = vst.msk [vmem:[%s4309_s21 + $0x220] sm:$0xff] %vm2745_vm1, %v2692_v22  ;;  %v2693_v25 = vmax.f32 %v2414_v29, 0.0 }
 0x231   : > { %v1898_v24 = vpop.f32.mrb[140].mxu1 }
 0x232   : > { %2815 = vst.msk [vmem:[%s4309_s21 + $0x228] sm:$0xff] %vm2745_vm1, %v2693_v25  ;;  %v1899_v27 = vadd.f32 %v4677_v60, %v1898_v24  ;;  %v1900_v28 = vpop.f32.mrb[141].mxu1  ;;  %v2450_v46 = vpop.f32.mrb[156].mxu0 }
 0x233   : > { %v1901_v36 = vpop.f32.mrb[142].mxu1  ;;  %v3383_v49 = vpop.f32.mrb[157].mxu0 }
 0x234   : > { %v2419_v33 = vadd.f32 %v2418_v51, %v1899_v27  ;;  %v1902_v30 = vadd.f32 %v4677_v60, %v1901_v36  ;;  %v1903_v35 = vpop.f32.mrb[143].mxu1  ;;  %v2453_v44 = vpop.f32.mrb[158].mxu0 }
 0x235   : > { %v3384_v50 = vpop.f32.mrb[159].mxu0 }
 0x236   : > { %v2694_v37 = vmax.f32 %v2419_v33, 0.0  ;;  %v2422_v43 = vadd.f32 %v2421_v47, %v1902_v30 }
 0x238   : > { %2816 = vst.msk [vmem:[%s4309_s21 + $0x230] sm:$0xff] %vm2745_vm1, %v2694_v37  ;;  %v2695_v38 = vmax.f32 %v2422_v43, 0.0 }
 0x239   : > { %v1906_v39 = vpop.f32.mrb[144].mxu1 }
 0x23a   : > { %2817 = vst.msk [vmem:[%s4309_s21 + $0x238] sm:$0xff] %vm2745_vm1, %v2695_v38  ;;  %v1907_v42 = vadd.f32 %v4677_v60, %v1906_v39  ;;  %v1908_v41 = vpop.f32.mrb[145].mxu1  ;;  %v2458_v61 = vpop.f32.mrb[160].mxu0 }
 0x23b   : > { %v1909_v51 = vpop.f32.mrb[146].mxu1  ;;  %v3387_v1 = vpop.f32.mrb[161].mxu0 }
 0x23c   : > { %v2427_v45 = vadd.f32 %v2426_v62, %v1907_v42  ;;  %v1910_v53 = vadd.f32 %v4677_v60, %v1909_v51  ;;  %v1911_v48 = vpop.f32.mrb[147].mxu1  ;;  %v2461_v58 = vpop.f32.mrb[162].mxu0 }
 0x23d   : > { %v3388_v6 = vpop.f32.mrb[163].mxu0 }
 0x23e   : > { %v2696_v57 = vmax.f32 %v2427_v45, 0.0  ;;  %v2430_v47 = vadd.f32 %v2429_v5, %v1910_v53 }
 0x240   : > { %2818 = vst.msk [vmem:[%s4309_s21 + $0x240] sm:$0xff] %vm2745_vm1, %v2696_v57  ;;  %v2697_v52 = vmax.f32 %v2430_v47, 0.0 }
 0x241   : > { %v1914_v54 = vpop.f32.mrb[148].mxu1 }
 0x242   : > { %2819 = vst.msk [vmem:[%s4309_s21 + $0x248] sm:$0xff] %vm2745_vm1, %v2697_v52  ;;  %v1915_v55 = vadd.f32 %v4677_v60, %v1914_v54  ;;  %v1916_v56 = vpop.f32.mrb[149].mxu1  ;;  %v2466_v12 = vpop.f32.mrb[164].mxu0 }
 0x243   : > { %v1917_v59 = vpop.f32.mrb[150].mxu1  ;;  %v3391_v15 = vpop.f32.mrb[165].mxu0 }
 0x244   : > { %v2435_v62 = vadd.f32 %v2434_v13, %v1915_v55  ;;  %v1918_v2 = vadd.f32 %v4677_v60, %v1917_v59  ;;  %v1919_v63 = vpop.f32.mrb[151].mxu1  ;;  %v2469_v10 = vpop.f32.mrb[166].mxu0 }
 0x245   : > { %v3392_v11 = vpop.f32.mrb[167].mxu0 }
 0x246   : > { %v2698_v9 = vmax.f32 %v2435_v62, 0.0  ;;  %v2438_v4 = vadd.f32 %v2437_v18, %v1918_v2 }
 0x248   : > { %2820 = vst.msk [vmem:[%s4309_s21 + $0x250] sm:$0xff] %vm2745_vm1, %v2698_v9  ;;  %v2699_v5 = vmax.f32 %v2438_v4, 0.0 }
 0x249   : > { %v1922_v0 = vpop.f32.mrb[152].mxu1 }
 0x24a   : > { %2821 = vst.msk [vmem:[%s4309_s21 + $0x258] sm:$0xff] %vm2745_vm1, %v2699_v5  ;;  %v1923_v8 = vadd.f32 %v4677_v60, %v1922_v0  ;;  %v1924_v7 = vpop.f32.mrb[153].mxu1  ;;  %v2474_v20 = vpop.f32.mrb[168].mxu0 }
 0x24b   : > { %v1925_v17 = vpop.f32.mrb[154].mxu1  ;;  %v3395_v22 = vpop.f32.mrb[169].mxu0 }
 0x24c   : > { %v2443_v19 = vadd.f32 %v2442_v32, %v1923_v8  ;;  %v1926_v13 = vadd.f32 %v4677_v60, %v1925_v17  ;;  %v1927_v14 = vpop.f32.mrb[155].mxu1  ;;  %v2477_v25 = vpop.f32.mrb[170].mxu0 }
 0x24d   : > { %v3396_v28 = vpop.f32.mrb[171].mxu0 }
 0x24e   : > { %v2700_v16 = vmax.f32 %v2443_v19, 0.0  ;;  %v2446_v23 = vadd.f32 %v2445_v31, %v1926_v13 }
 0x250   : > { %2822 = vst.msk [vmem:[%s4309_s21 + $0x260] sm:$0xff] %vm2745_vm1, %v2700_v16  ;;  %v2701_v18 = vmax.f32 %v2446_v23, 0.0 }
 0x251   : > { %v1930_v3 = vpop.f32.mrb[156].mxu1 }
 0x252   : > { %2823 = vst.msk [vmem:[%s4309_s21 + $0x268] sm:$0xff] %vm2745_vm1, %v2701_v18  ;;  %v1931_v26 = vadd.f32 %v4677_v60, %v1930_v3  ;;  %v1932_v21 = vpop.f32.mrb[157].mxu1  ;;  %v2482_v30 = vpop.f32.mrb[172].mxu0 }
 0x253   : > { %v1933_v29 = vpop.f32.mrb[158].mxu1  ;;  %v3399_v37 = vpop.f32.mrb[173].mxu0 }
 0x254   : > { %v2451_v24 = vadd.f32 %v2450_v46, %v1931_v26  ;;  %v1934_v32 = vadd.f32 %v4677_v60, %v1933_v29  ;;  %v1935_v27 = vpop.f32.mrb[159].mxu1  ;;  %v2485_v38 = vpop.f32.mrb[174].mxu0 }
 0x255   : > { %v3400_v41 = vpop.f32.mrb[175].mxu0 }
 0x256   : > { %v2702_v34 = vmax.f32 %v2451_v24, 0.0  ;;  %v2454_v36 = vadd.f32 %v2453_v44, %v1934_v32 }
 0x258   : > { %2824 = vst.msk [vmem:[%s4309_s21 + $0x270] sm:$0xff] %vm2745_vm1, %v2702_v34  ;;  %v2703_v31 = vmax.f32 %v2454_v36, 0.0 }
 0x259   : > { %v1938_v33 = vpop.f32.mrb[160].mxu1 }
 0x25a   : > { %2825 = vst.msk [vmem:[%s4309_s21 + $0x278] sm:$0xff] %vm2745_vm1, %v2703_v31  ;;  %v1939_v35 = vadd.f32 %v4677_v60, %v1938_v33  ;;  %v1940_v40 = vpop.f32.mrb[161].mxu1  ;;  %v2490_v53 = vpop.f32.mrb[176].mxu0 }
 0x25b   : > { %v1941_v43 = vpop.f32.mrb[162].mxu1  ;;  %v3403_v57 = vpop.f32.mrb[177].mxu0 }
 0x25c   : > { %v2459_v39 = vadd.f32 %v2458_v61, %v1939_v35  ;;  %v1942_v46 = vadd.f32 %v4677_v60, %v1941_v43  ;;  %v1943_v42 = vpop.f32.mrb[163].mxu1  ;;  %v2493_v52 = vpop.f32.mrb[178].mxu0 }
 0x25d   : > { %v3404_v56 = vpop.f32.mrb[179].mxu0 }
 0x25e   : > { %v2704_v49 = vmax.f32 %v2459_v39, 0.0  ;;  %v2462_v51 = vadd.f32 %v2461_v58, %v1942_v46 }
 0x260   : > { %2826 = vst.msk [vmem:[%s4309_s21 + $0x280] sm:$0xff] %vm2745_vm1, %v2704_v49  ;;  %v2705_v44 = vmax.f32 %v2462_v51, 0.0 }
 0x261   : > { %v1946_v45 = vpop.f32.mrb[164].mxu1 }
 0x262   : > { %2827 = vst.msk [vmem:[%s4309_s21 + $0x288] sm:$0xff] %vm2745_vm1, %v2705_v44  ;;  %v1947_v48 = vadd.f32 %v4677_v60, %v1946_v45  ;;  %v1948_v50 = vpop.f32.mrb[165].mxu1  ;;  %v2498_v2 = vpop.f32.mrb[180].mxu0 }
 0x263   : > { %v1949_v47 = vpop.f32.mrb[166].mxu1  ;;  %v3407_v9 = vpop.f32.mrb[181].mxu0 }
 0x264   : > { %v2467_v54 = vadd.f32 %v2466_v12, %v1947_v48  ;;  %v1950_v61 = vadd.f32 %v4677_v60, %v1949_v47  ;;  %v1951_v55 = vpop.f32.mrb[167].mxu1  ;;  %v2501_v5 = vpop.f32.mrb[182].mxu0 }
 0x265   : > { %v3408_v7 = vpop.f32.mrb[183].mxu0 }
 0x266   : > { %v2706_v1 = vmax.f32 %v2467_v54, 0.0  ;;  %v2470_v59 = vadd.f32 %v2469_v10, %v1950_v61 }
 0x268   : > { %2828 = vst.msk [vmem:[%s4309_s21 + $0x290] sm:$0xff] %vm2745_vm1, %v2706_v1  ;;  %v2707_v58 = vmax.f32 %v2470_v59, 0.0 }
 0x269   : > { %v1954_v62 = vpop.f32.mrb[168].mxu1 }
 0x26a   : > { %2829 = vst.msk [vmem:[%s4309_s21 + $0x298] sm:$0xff] %vm2745_vm1, %v2707_v58  ;;  %v1955_v63 = vadd.f32 %v4677_v60, %v1954_v62  ;;  %v1956_v6 = vpop.f32.mrb[169].mxu1  ;;  %v2506_v13 = vpop.f32.mrb[184].mxu0 }
 0x26b   : > { %v1957_v4 = vpop.f32.mrb[170].mxu1  ;;  %v3411_v16 = vpop.f32.mrb[185].mxu0 }
 0x26c   : > { %v2475_v0 = vadd.f32 %v2474_v20, %v1955_v63  ;;  %v1958_v12 = vadd.f32 %v4677_v60, %v1957_v4  ;;  %v1959_v8 = vpop.f32.mrb[171].mxu1  ;;  %v2509_v18 = vpop.f32.mrb[186].mxu0 }
 0x26d   : > { %v3412_v21 = vpop.f32.mrb[187].mxu0 }
 0x26e   : > { %v2708_v15 = vmax.f32 %v2475_v0, 0.0  ;;  %v2478_v17 = vadd.f32 %v2477_v25, %v1958_v12 }
 0x270   : > { %2830 = vst.msk [vmem:[%s4309_s21 + $0x2a0] sm:$0xff] %vm2745_vm1, %v2708_v15  ;;  %v2709_v10 = vmax.f32 %v2478_v17, 0.0 }
 0x271   : > { %v1962_v19 = vpop.f32.mrb[172].mxu1 }
 0x272   : > { %2831 = vst.msk [vmem:[%s4309_s21 + $0x2a8] sm:$0xff] %vm2745_vm1, %v2709_v10  ;;  %v1963_v14 = vadd.f32 %v4677_v60, %v1962_v19  ;;  %v1964_v11 = vpop.f32.mrb[173].mxu1  ;;  %v2514_v32 = vpop.f32.mrb[188].mxu0 }
 0x273   : > { %v1965_v23 = vpop.f32.mrb[174].mxu1  ;;  %v3415_v34 = vpop.f32.mrb[189].mxu0 }
 0x274   : > { %v2483_v3 = vadd.f32 %v2482_v30, %v1963_v14  ;;  %v1966_v20 = vadd.f32 %v4677_v60, %v1965_v23  ;;  %v1967_v26 = vpop.f32.mrb[175].mxu1  ;;  %v2517_v31 = vpop.f32.mrb[190].mxu0 }
 0x275   : > { %v3416_v40 = vpop.f32.mrb[191].mxu0 }
 0x276   : > { %v2710_v22 = vmax.f32 %v2483_v3, 0.0  ;;  %v2486_v29 = vadd.f32 %v2485_v38, %v1966_v20 }
 0x278   : > { %2832 = vst.msk [vmem:[%s4309_s21 + $0x2b0] sm:$0xff] %vm2745_vm1, %v2710_v22  ;;  %v2711_v25 = vmax.f32 %v2486_v29, 0.0 }
 0x279   : > { %v1970_v24 = vpop.f32.mrb[176].mxu1 }
 0x27a   : > { %2833 = vst.msk [vmem:[%s4309_s21 + $0x2b8] sm:$0xff] %vm2745_vm1, %v2711_v25  ;;  %v1971_v27 = vadd.f32 %v4677_v60, %v1970_v24  ;;  %v1972_v28 = vpop.f32.mrb[177].mxu1  ;;  %v2522_v46 = vpop.f32.mrb[192].mxu0 }
 0x27b   : > { %v1973_v36 = vpop.f32.mrb[178].mxu1  ;;  %v3419_v49 = vpop.f32.mrb[193].mxu0 }
 0x27c   : > { %v2491_v33 = vadd.f32 %v2490_v53, %v1971_v27  ;;  %v1974_v30 = vadd.f32 %v4677_v60, %v1973_v36  ;;  %v1975_v35 = vpop.f32.mrb[179].mxu1  ;;  %v2525_v44 = vpop.f32.mrb[194].mxu0 }
 0x27d   : > { %v3420_v50 = vpop.f32.mrb[195].mxu0 }
 0x27e   : > { %v2712_v37 = vmax.f32 %v2491_v33, 0.0  ;;  %v2494_v43 = vadd.f32 %v2493_v52, %v1974_v30 }
 0x280   : > { %2834 = vst.msk [vmem:[%s4309_s21 + $0x2c0] sm:$0xff] %vm2745_vm1, %v2712_v37  ;;  %v2713_v38 = vmax.f32 %v2494_v43, 0.0 }
 0x281   : > { %v1978_v39 = vpop.f32.mrb[180].mxu1 }
 0x282   : > { %2835 = vst.msk [vmem:[%s4309_s21 + $0x2c8] sm:$0xff] %vm2745_vm1, %v2713_v38  ;;  %v1979_v42 = vadd.f32 %v4677_v60, %v1978_v39  ;;  %v1980_v41 = vpop.f32.mrb[181].mxu1  ;;  %v2530_v61 = vpop.f32.mrb[196].mxu0 }
 0x283   : > { %v1981_v51 = vpop.f32.mrb[182].mxu1  ;;  %v3423_v1 = vpop.f32.mrb[197].mxu0 }
 0x284   : > { %v2499_v45 = vadd.f32 %v2498_v2, %v1979_v42  ;;  %v1982_v53 = vadd.f32 %v4677_v60, %v1981_v51  ;;  %v1983_v48 = vpop.f32.mrb[183].mxu1  ;;  %v2533_v58 = vpop.f32.mrb[198].mxu0 }
 0x285   : > { %v3424_v6 = vpop.f32.mrb[199].mxu0  ;;  %v4961_v48 = vld [vmem:[%s5030_s2] ss:$0 sm:$0xff] }
 0x286   : > { %v2714_v57 = vmax.f32 %v2499_v45, 0.0  ;;  %v2502_v47 = vadd.f32 %v2501_v5, %v1982_v53 }
 0x288   : > { %2836 = vst.msk [vmem:[%s4309_s21 + $0x2d0] sm:$0xff] %vm2745_vm1, %v2714_v57  ;;  %v2715_v52 = vmax.f32 %v2502_v47, 0.0 }
 0x289   : > { %v1986_v54 = vpop.f32.mrb[184].mxu1 }
 0x28a   : > { %2837 = vst.msk [vmem:[%s4309_s21 + $0x2d8] sm:$0xff] %vm2745_vm1, %v2715_v52  ;;  %v1987_v55 = vadd.f32 %v4677_v60, %v1986_v54  ;;  %v1988_v56 = vpop.f32.mrb[185].mxu1  ;;  %v2538_v12 = vpop.f32.mrb[200].mxu0 }
 0x28b   : > { %v1989_v59 = vpop.f32.mrb[186].mxu1  ;;  %v3427_v15 = vpop.f32.mrb[201].mxu0 }
 0x28c   : > { %v2507_v62 = vadd.f32 %v2506_v13, %v1987_v55  ;;  %v1990_v2 = vadd.f32 %v4677_v60, %v1989_v59  ;;  %v1991_v63 = vpop.f32.mrb[187].mxu1  ;;  %v2541_v10 = vpop.f32.mrb[202].mxu0 }
 0x28d   : > { %v3428_v11 = vpop.f32.mrb[203].mxu0 }
 0x28e   : > { %v2716_v9 = vmax.f32 %v2507_v62, 0.0  ;;  %v2510_v4 = vadd.f32 %v2509_v18, %v1990_v2 }
 0x290   : > { %2838 = vst.msk [vmem:[%s4309_s21 + $0x2e0] sm:$0xff] %vm2745_vm1, %v2716_v9  ;;  %v2717_v5 = vmax.f32 %v2510_v4, 0.0 }
 0x291   : > { %v1994_v0 = vpop.f32.mrb[188].mxu1 }
 0x292   : > { %2839 = vst.msk [vmem:[%s4309_s21 + $0x2e8] sm:$0xff] %vm2745_vm1, %v2717_v5  ;;  %v1995_v8 = vadd.f32 %v4677_v60, %v1994_v0  ;;  %v1996_v7 = vpop.f32.mrb[189].mxu1  ;;  %v2546_v20 = vpop.f32.mrb[204].mxu0 }
 0x293   : > { %v1997_v17 = vpop.f32.mrb[190].mxu1  ;;  %v3431_v22 = vpop.f32.mrb[205].mxu0 }
 0x294   : > { %v2515_v19 = vadd.f32 %v2514_v32, %v1995_v8  ;;  %v1998_v13 = vadd.f32 %v4677_v60, %v1997_v17  ;;  %v1999_v14 = vpop.f32.mrb[191].mxu1  ;;  %v2549_v25 = vpop.f32.mrb[206].mxu0 }
 0x295   : > { %v3432_v28 = vpop.f32.mrb[207].mxu0 }
 0x296   : > { %v2718_v16 = vmax.f32 %v2515_v19, 0.0  ;;  %v2518_v23 = vadd.f32 %v2517_v31, %v1998_v13 }
 0x298   : > { %2840 = vst.msk [vmem:[%s4309_s21 + $0x2f0] sm:$0xff] %vm2745_vm1, %v2718_v16  ;;  %v2719_v18 = vmax.f32 %v2518_v23, 0.0 }
 0x299   : > { %v2002_v3 = vpop.f32.mrb[192].mxu1 }
 0x29a   : > { %2841 = vst.msk [vmem:[%s4309_s21 + $0x2f8] sm:$0xff] %vm2745_vm1, %v2719_v18  ;;  %v2003_v26 = vadd.f32 %v4677_v60, %v2002_v3  ;;  %v2004_v21 = vpop.f32.mrb[193].mxu1  ;;  %v2554_v30 = vpop.f32.mrb[208].mxu0 }
 0x29b   : > { %v2005_v29 = vpop.f32.mrb[194].mxu1  ;;  %v3435_v37 = vpop.f32.mrb[209].mxu0 }
 0x29c   : > { %v2523_v24 = vadd.f32 %v2522_v46, %v2003_v26  ;;  %v2006_v32 = vadd.f32 %v4677_v60, %v2005_v29  ;;  %v2007_v27 = vpop.f32.mrb[195].mxu1  ;;  %v2557_v38 = vpop.f32.mrb[210].mxu0 }
 0x29d   : > { %v3436_v41 = vpop.f32.mrb[211].mxu0 }
 0x29e   : > { %v2720_v34 = vmax.f32 %v2523_v24, 0.0  ;;  %v2526_v36 = vadd.f32 %v2525_v44, %v2006_v32 }
 0x2a0   : > { %2842 = vst.msk [vmem:[%s4309_s21 + $0x300] sm:$0xff] %vm2745_vm1, %v2720_v34  ;;  %v2721_v31 = vmax.f32 %v2526_v36, 0.0 }
 0x2a1   : > { %v2010_v33 = vpop.f32.mrb[196].mxu1 }
 0x2a2   : > { %2843 = vst.msk [vmem:[%s4309_s21 + $0x308] sm:$0xff] %vm2745_vm1, %v2721_v31  ;;  %v2011_v35 = vadd.f32 %v4677_v60, %v2010_v33  ;;  %v2012_v40 = vpop.f32.mrb[197].mxu1  ;;  %v2562_v53 = vpop.f32.mrb[212].mxu0 }
 0x2a3   : > { %v2013_v43 = vpop.f32.mrb[198].mxu1  ;;  %v3439_v57 = vpop.f32.mrb[213].mxu0 }
 0x2a4   : > { %v2531_v39 = vadd.f32 %v2530_v61, %v2011_v35  ;;  %v2014_v46 = vadd.f32 %v4677_v60, %v2013_v43  ;;  %v2015_v42 = vpop.f32.mrb[199].mxu1  ;;  %v2565_v52 = vpop.f32.mrb[214].mxu0 }
 0x2a5   : > { %v3440_v56 = vpop.f32.mrb[215].mxu0 }
 0x2a6   : > { %v2722_v49 = vmax.f32 %v2531_v39, 0.0  ;;  %v2534_v51 = vadd.f32 %v2533_v58, %v2014_v46 }
 0x2a8   : > { %2844 = vst.msk [vmem:[%s4309_s21 + $0x310] sm:$0xff] %vm2745_vm1, %v2722_v49  ;;  %v2723_v44 = vmax.f32 %v2534_v51, 0.0 }
 0x2a9   : > { %v2018_v45 = vpop.f32.mrb[200].mxu1 }
 0x2aa   : > { %2845 = vst.msk [vmem:[%s4309_s21 + $0x318] sm:$0xff] %vm2745_vm1, %v2723_v44  ;;  %v2019_v60 = vadd.f32 %v4961_v48, %v2018_v45  ;;  %v2020_v50 = vpop.f32.mrb[201].mxu1  ;;  %v2570_v2 = vpop.f32.mrb[216].mxu0 }
 0x2ab   : > { %v2021_v47 = vpop.f32.mrb[202].mxu1  ;;  %v3443_v9 = vpop.f32.mrb[217].mxu0 }
 0x2ac   : > { %v2539_v54 = vadd.f32 %v2538_v12, %v2019_v60  ;;  %v2022_v61 = vadd.f32 %v4961_v48, %v2021_v47  ;;  %v2023_v55 = vpop.f32.mrb[203].mxu1  ;;  %v2573_v5 = vpop.f32.mrb[218].mxu0 }
 0x2ad   : > { %v3444_v7 = vpop.f32.mrb[219].mxu0 }
 0x2ae   : > { %v2724_v1 = vmax.f32 %v2539_v54, 0.0  ;;  %v2542_v59 = vadd.f32 %v2541_v10, %v2022_v61 }
 0x2b0   : > { %2846 = vst.msk [vmem:[%s4309_s21 + $0x320] sm:$0xff] %vm2745_vm1, %v2724_v1  ;;  %v2725_v58 = vmax.f32 %v2542_v59, 0.0 }
 0x2b1   : > { %v2026_v62 = vpop.f32.mrb[204].mxu1 }
 0x2b2   : > { %2847 = vst.msk [vmem:[%s4309_s21 + $0x328] sm:$0xff] %vm2745_vm1, %v2725_v58  ;;  %v2027_v63 = vadd.f32 %v4961_v48, %v2026_v62  ;;  %v2028_v6 = vpop.f32.mrb[205].mxu1  ;;  %v2578_v13 = vpop.f32.mrb[220].mxu0 }
 0x2b3   : > { %v2029_v4 = vpop.f32.mrb[206].mxu1  ;;  %v3447_v16 = vpop.f32.mrb[221].mxu0 }
 0x2b4   : > { %v2547_v0 = vadd.f32 %v2546_v20, %v2027_v63  ;;  %v2030_v12 = vadd.f32 %v4961_v48, %v2029_v4  ;;  %v2031_v8 = vpop.f32.mrb[207].mxu1  ;;  %v2581_v18 = vpop.f32.mrb[222].mxu0 }
 0x2b5   : > { %v3448_v21 = vpop.f32.mrb[223].mxu0 }
 0x2b6   : > { %v2726_v15 = vmax.f32 %v2547_v0, 0.0  ;;  %v2550_v17 = vadd.f32 %v2549_v25, %v2030_v12 }
 0x2b8   : > { %2848 = vst.msk [vmem:[%s4309_s21 + $0x330] sm:$0xff] %vm2745_vm1, %v2726_v15  ;;  %v2727_v10 = vmax.f32 %v2550_v17, 0.0 }
 0x2b9   : > { %v2034_v19 = vpop.f32.mrb[208].mxu1 }
 0x2ba   : > { %2849 = vst.msk [vmem:[%s4309_s21 + $0x338] sm:$0xff] %vm2745_vm1, %v2727_v10  ;;  %v2035_v14 = vadd.f32 %v4961_v48, %v2034_v19  ;;  %v2036_v11 = vpop.f32.mrb[209].mxu1  ;;  %v2586_v32 = vpop.f32.mrb[224].mxu0 }
 0x2bb   : > { %v2037_v23 = vpop.f32.mrb[210].mxu1  ;;  %v3451_v34 = vpop.f32.mrb[225].mxu0 }
 0x2bc   : > { %v2555_v3 = vadd.f32 %v2554_v30, %v2035_v14  ;;  %v2038_v20 = vadd.f32 %v4961_v48, %v2037_v23  ;;  %v2039_v26 = vpop.f32.mrb[211].mxu1  ;;  %v2589_v31 = vpop.f32.mrb[226].mxu0 }
 0x2bd   : > { %v3452_v40 = vpop.f32.mrb[227].mxu0 }
 0x2be   : > { %v2728_v22 = vmax.f32 %v2555_v3, 0.0  ;;  %v2558_v29 = vadd.f32 %v2557_v38, %v2038_v20 }
 0x2c0   : > { %2850 = vst.msk [vmem:[%s4309_s21 + $0x340] sm:$0xff] %vm2745_vm1, %v2728_v22  ;;  %v2729_v25 = vmax.f32 %v2558_v29, 0.0 }
 0x2c1   : > { %v2042_v24 = vpop.f32.mrb[212].mxu1 }
 0x2c2   : > { %2851 = vst.msk [vmem:[%s4309_s21 + $0x348] sm:$0xff] %vm2745_vm1, %v2729_v25  ;;  %v2043_v27 = vadd.f32 %v4961_v48, %v2042_v24  ;;  %v2044_v28 = vpop.f32.mrb[213].mxu1  ;;  %v2594_v46 = vpop.f32.mrb[228].mxu0 }
 0x2c3   : > { %v2045_v36 = vpop.f32.mrb[214].mxu1  ;;  %v3455_v49 = vpop.f32.mrb[229].mxu0 }
 0x2c4   : > { %v2563_v33 = vadd.f32 %v2562_v53, %v2043_v27  ;;  %v2046_v30 = vadd.f32 %v4961_v48, %v2045_v36  ;;  %v2047_v35 = vpop.f32.mrb[215].mxu1  ;;  %v2597_v44 = vpop.f32.mrb[230].mxu0 }
 0x2c5   : > { %v3456_v50 = vpop.f32.mrb[231].mxu0 }
 0x2c6   : > { %v2730_v37 = vmax.f32 %v2563_v33, 0.0  ;;  %v2566_v43 = vadd.f32 %v2565_v52, %v2046_v30 }
 0x2c8   : > { %2852 = vst.msk [vmem:[%s4309_s21 + $0x350] sm:$0xff] %vm2745_vm1, %v2730_v37  ;;  %v2731_v38 = vmax.f32 %v2566_v43, 0.0 }
 0x2c9   : > { %v2050_v39 = vpop.f32.mrb[216].mxu1 }
 0x2ca   : > { %2853 = vst.msk [vmem:[%s4309_s21 + $0x358] sm:$0xff] %vm2745_vm1, %v2731_v38  ;;  %v2051_v42 = vadd.f32 %v4961_v48, %v2050_v39  ;;  %v2052_v41 = vpop.f32.mrb[217].mxu1  ;;  %v2602_v61 = vpop.f32.mrb[232].mxu0 }
 0x2cb   : > { %v2053_v51 = vpop.f32.mrb[218].mxu1  ;;  %v3459_v1 = vpop.f32.mrb[233].mxu0 }
 0x2cc   : > { %v2571_v45 = vadd.f32 %v2570_v2, %v2051_v42  ;;  %v2054_v53 = vadd.f32 %v4961_v48, %v2053_v51  ;;  %v2055_v60 = vpop.f32.mrb[219].mxu1  ;;  %v2605_v58 = vpop.f32.mrb[234].mxu0 }
 0x2cd   : > { %v3460_v6 = vpop.f32.mrb[235].mxu0 }
 0x2ce   : > { %v2732_v57 = vmax.f32 %v2571_v45, 0.0  ;;  %v2574_v47 = vadd.f32 %v2573_v5, %v2054_v53 }
 0x2d0   : > { %2854 = vst.msk [vmem:[%s4309_s21 + $0x360] sm:$0xff] %vm2745_vm1, %v2732_v57  ;;  %v2733_v52 = vmax.f32 %v2574_v47, 0.0 }
 0x2d1   : > { %v2058_v54 = vpop.f32.mrb[220].mxu1 }
 0x2d2   : > { %2855 = vst.msk [vmem:[%s4309_s21 + $0x368] sm:$0xff] %vm2745_vm1, %v2733_v52  ;;  %v2059_v55 = vadd.f32 %v4961_v48, %v2058_v54  ;;  %v2060_v56 = vpop.f32.mrb[221].mxu1  ;;  %v2610_v12 = vpop.f32.mrb[236].mxu0 }
 0x2d3   : > { %v2061_v59 = vpop.f32.mrb[222].mxu1  ;;  %v3463_v15 = vpop.f32.mrb[237].mxu0 }
 0x2d4   : > { %v2579_v62 = vadd.f32 %v2578_v13, %v2059_v55  ;;  %v2062_v2 = vadd.f32 %v4961_v48, %v2061_v59  ;;  %v2063_v63 = vpop.f32.mrb[223].mxu1  ;;  %v2613_v10 = vpop.f32.mrb[238].mxu0 }
 0x2d5   : > { %v3464_v11 = vpop.f32.mrb[239].mxu0 }
 0x2d6   : > { %v2734_v9 = vmax.f32 %v2579_v62, 0.0  ;;  %v2582_v4 = vadd.f32 %v2581_v18, %v2062_v2 }
 0x2d8   : > { %2856 = vst.msk [vmem:[%s4309_s21 + $0x370] sm:$0xff] %vm2745_vm1, %v2734_v9  ;;  %v2735_v5 = vmax.f32 %v2582_v4, 0.0 }
 0x2d9   : > { %v2066_v0 = vpop.f32.mrb[224].mxu1 }
 0x2da   : > { %2857 = vst.msk [vmem:[%s4309_s21 + $0x378] sm:$0xff] %vm2745_vm1, %v2735_v5  ;;  %v2067_v8 = vadd.f32 %v4961_v48, %v2066_v0  ;;  %v2068_v7 = vpop.f32.mrb[225].mxu1  ;;  %v2618_v20 = vpop.f32.mrb[240].mxu0 }
 0x2db   : > { %v2069_v17 = vpop.f32.mrb[226].mxu1  ;;  %v3467_v22 = vpop.f32.mrb[241].mxu0 }
 0x2dc   : > { %v2587_v19 = vadd.f32 %v2586_v32, %v2067_v8  ;;  %v2070_v13 = vadd.f32 %v4961_v48, %v2069_v17  ;;  %v2071_v14 = vpop.f32.mrb[227].mxu1  ;;  %v2621_v25 = vpop.f32.mrb[242].mxu0 }
 0x2dd   : > { %v3468_v28 = vpop.f32.mrb[243].mxu0 }
 0x2de   : > { %v2736_v16 = vmax.f32 %v2587_v19, 0.0  ;;  %v2590_v23 = vadd.f32 %v2589_v31, %v2070_v13 }
 0x2e0   : > { %2858 = vst.msk [vmem:[%s4309_s21 + $0x380] sm:$0xff] %vm2745_vm1, %v2736_v16  ;;  %v2737_v18 = vmax.f32 %v2590_v23, 0.0 }
 0x2e1   : > { %v2074_v3 = vpop.f32.mrb[228].mxu1 }
 0x2e2   : > { %2859 = vst.msk [vmem:[%s4309_s21 + $0x388] sm:$0xff] %vm2745_vm1, %v2737_v18  ;;  %v2075_v26 = vadd.f32 %v4961_v48, %v2074_v3  ;;  %v2076_v21 = vpop.f32.mrb[229].mxu1 }
 0x2e3   : > { %v2077_v29 = vpop.f32.mrb[230].mxu1 }
 0x2e4   : > { %v2595_v24 = vadd.f32 %v2594_v46, %v2075_v26  ;;  %v2078_v32 = vadd.f32 %v4961_v48, %v2077_v29  ;;  %v2079_v27 = vpop.f32.mrb[231].mxu1 }
 0x2e6   : > { %v2738_v34 = vmax.f32 %v2595_v24, 0.0  ;;  %v2598_v36 = vadd.f32 %v2597_v44, %v2078_v32 }
 0x2e8   : > { %2860 = vst.msk [vmem:[%s4309_s21 + $0x390] sm:$0xff] %vm2745_vm1, %v2738_v34  ;;  %v2739_v31 = vmax.f32 %v2598_v36, 0.0 }
 0x2e9   : > { %v2082_v33 = vpop.f32.mrb[232].mxu1 }
 0x2ea   : > { %2861 = vst.msk [vmem:[%s4309_s21 + $0x398] sm:$0xff] %vm2745_vm1, %v2739_v31  ;;  %v2083_v30 = vadd.f32 %v4961_v48, %v2082_v33  ;;  %v2084_v35 = vpop.f32.mrb[233].mxu1 }
 0x2eb   : > { %v2085_v40 = vpop.f32.mrb[234].mxu1 }
 0x2ec   : > { %v2603_v37 = vadd.f32 %v2602_v61, %v2083_v30  ;;  %v2086_v43 = vadd.f32 %v4961_v48, %v2085_v40  ;;  %v2087_v38 = vpop.f32.mrb[235].mxu1 }
 0x2ee   : > { %v2740_v39 = vmax.f32 %v2603_v37, 0.0  ;;  %v2606_v46 = vadd.f32 %v2605_v58, %v2086_v43 }
 0x2f0   : > { %2862 = vst.msk [vmem:[%s4309_s21 + $0x3a0] sm:$0xff] %vm2745_vm1, %v2740_v39  ;;  %v2741_v42 = vmax.f32 %v2606_v46, 0.0 }
 0x2f1   : > { %v2090_v41 = vpop.f32.mrb[236].mxu1 }
 0x2f2   : > { %2863 = vst.msk [vmem:[%s4309_s21 + $0x3a8] sm:$0xff] %vm2745_vm1, %v2741_v42  ;;  %v2091_v49 = vadd.f32 %v4961_v48, %v2090_v41  ;;  %v2092_v51 = vpop.f32.mrb[237].mxu1 }
 0x2f3   : > { %v2093_v44 = vpop.f32.mrb[238].mxu1 }
 0x2f4   : > { %v2611_v45 = vadd.f32 %v2610_v12, %v2091_v49  ;;  %v2094_v53 = vadd.f32 %v4961_v48, %v2093_v44  ;;  %v2095_v60 = vpop.f32.mrb[239].mxu1 }
 0x2f6   : > { %v2742_v50 = vmax.f32 %v2611_v45, 0.0  ;;  %v2614_v57 = vadd.f32 %v2613_v10, %v2094_v53 }
 0x2f8   : > { %2864 = vst.msk [vmem:[%s4309_s21 + $0x3b0] sm:$0xff] %vm2745_vm1, %v2742_v50  ;;  %v2743_v47 = vmax.f32 %v2614_v57, 0.0 }
 0x2f9   : > { %v2098_v52 = vpop.f32.mrb[240].mxu1 }
 0x2fa   : > { %2865 = vst.msk [vmem:[%s4309_s21 + $0x3b8] sm:$0xff] %vm2745_vm1, %v2743_v47  ;;  %v2099_v54 = vadd.f32 %v4961_v48, %v2098_v52  ;;  %v2100_v61 = vpop.f32.mrb[241].mxu1 }
 0x2fb   : > { %v2101_v55 = vpop.f32.mrb[242].mxu1 }
 0x2fc   : > { %v2619_v56 = vadd.f32 %v2618_v20, %v2099_v54  ;;  %v2102_v1 = vpop.f32.mrb[243].mxu1 }
 0x2fe   : > { %v2744_v59 = vmax.f32 %v2619_v56, 0.0 }
 0x300   : > { %2867 = vst.msk [vmem:[%s4309_s21 + $0x3c0] sm:$0x1] %vm2866_vm2, %v2744_v59 }
 0x301 PF: > { %s13_s12 = sadd.s32 1, %s3999_s12  }
 0x302   : > { %p10_p4 = scmp.ge.s32.totalorder %s13_s12, 4  }
 0x304   :  { %12 = sbr.rel (!%p10_p4) target bundleno = 1 (0x1), region = 62 }

// kernel: forward.7
= control target key start
LH: loop header
LB: loop body
LE: loop exit
PB: predicated region body
PF: predicated region fallthrough
CT: control target
= control target key end

     0   :  { %v2082_v0 = vmov 0   ;;  %vm1551_vm0 = vcmask 261120   ;;  %vm1608_vm1 = vcmask 254976   ;;  %s2862_s1 = inlined_call_operand.vmem [shape: bf16[512,32], index: 1, kind: input, shape index: {}]   ;;  %s2863_s0 = inlined_call_operand.vmem [shape: bf16[450,512], index: 0, kind: input, shape index: {}]   ;;  %s2864_s2 = inlined_call_operand.vmem [shape: f32[1,32], index: 2, kind: input, shape index: {}]   ;;  %s2865_s3 = inlined_call_operand.vmem [shape: f32[450,32], index: 3, kind: output, shape index: {}]  }
   0x1   :  { %966 = vmatprep.subr.bf16.mxu1 %v2082_v0  ;;  %1230 = vmatprep.subr.bf16.mxu0 %v2082_v0  ;;  %v1878_v1 = vld [vmem:[%s2862_s1] sm:$0xff]   ;;  %v1880_v3 = vld [vmem:[%s2862_s1 + $0x8] sm:$0xff]   ;;  %v1882_v5 = vld [vmem:[%s2862_s1 + $0x10] sm:$0xff]  }
   0x2   :  { %v1879_v2 = vld [vmem:[%s2862_s1 + $0x80] sm:$0xff]   ;;  %967 = vmatpush1.bf16.msra.mxu1 %v1878_v1  ;;  %v1881_v4 = vld [vmem:[%s2862_s1 + $0x88] sm:$0xff]   ;;  %v1883_v6 = vld [vmem:[%s2862_s1 + $0x90] sm:$0xff]  }
   0x3   :  { %1231 = vmatpush1.bf16.msra.mxu0 %v1879_v2  ;;  %968 = vmatprep.subr.bf16.mxu1 %v2082_v0  ;;  %v1884_v7 = vld [vmem:[%s2862_s1 + $0x18] sm:$0xff]   ;;  %v1886_v9 = vld [vmem:[%s2862_s1 + $0x20] sm:$0xff]   ;;  %v1888_v11 = vld [vmem:[%s2862_s1 + $0x28] sm:$0xff]  }
   0x4   :  { %1232 = vmatprep.subr.bf16.mxu0 %v2082_v0  ;;  %v1885_v8 = vld [vmem:[%s2862_s1 + $0x98] sm:$0xff]   ;;  %v1887_v10 = vld [vmem:[%s2862_s1 + $0xa0] sm:$0xff]   ;;  %v1889_v12 = vld [vmem:[%s2862_s1 + $0xa8] sm:$0xff]  }
   0x5   :  { %v1890_v13 = vld [vmem:[%s2862_s1 + $0x30] sm:$0xff]   ;;  %v1892_v15 = vld [vmem:[%s2862_s1 + $0x38] sm:$0xff]   ;;  %v1894_v17 = vld [vmem:[%s2862_s1 + $0x40] sm:$0xff]  }
   0x6   :  { %969 = vmatpush1.bf16.msra.mxu1 %v1880_v3  ;;  %v1891_v14 = vld [vmem:[%s2862_s1 + $0xb0] sm:$0xff]   ;;  %v1893_v16 = vld [vmem:[%s2862_s1 + $0xb8] sm:$0xff]   ;;  %v1895_v18 = vld [vmem:[%s2862_s1 + $0xc0] sm:$0xff]  }
   0x7   :  { %1233 = vmatpush1.bf16.msra.mxu0 %v1881_v4  ;;  %970 = vmatprep.subr.bf16.mxu1 %v2082_v0  ;;  %v1912_v19 = vld [vmem:[%s2863_s0 + $0x4] ss:$16 sps:$4 sm:$0xff]   ;;  %v1896_v20 = vld [vmem:[%s2862_s1 + $0x48] sm:$0xff]   ;;  %v1900_v25 = vld [vmem:[%s2862_s1 + $0x58] sm:$0xff]  }
   0x8   :  { %1234 = vmatprep.subr.bf16.mxu0 %v2082_v0  ;;  %v1915_v21 = vld [vmem:[%s2863_s0 + $0xc] ss:$16 sps:$4 sm:$0xff]   ;;  %998 = vmatprep.mubr.bf16.mxu1 %v1912_v19  ;;  %v1898_v23 = vld [vmem:[%s2862_s1 + $0x50] sm:$0xff]   ;;  %v1902_v27 = vld [vmem:[%s2862_s1 + $0x60] sm:$0xff]  }
   0x9   :  { %v1897_v22 = vld [vmem:[%s2862_s1 + $0xc8] sm:$0xff]   ;;  %1262 = vmatprep.mubr.bf16.mxu0 %v1915_v21  ;;  %v1899_v24 = vld [vmem:[%s2862_s1 + $0xd0] sm:$0xff]   ;;  %v1901_v26 = vld [vmem:[%s2862_s1 + $0xd8] sm:$0xff]  }
   0xa   :  { %971 = vmatpush1.bf16.msra.mxu1 %v1882_v5  ;;  %v1903_v28 = vld [vmem:[%s2862_s1 + $0xe0] sm:$0xff]   ;;  %v1904_v29 = vld [vmem:[%s2862_s1 + $0x68] sm:$0xff]   ;;  %v1906_v31 = vld [vmem:[%s2862_s1 + $0x70] sm:$0xff]  }
   0xb   :  { %1235 = vmatpush1.bf16.msra.mxu0 %v1883_v6  ;;  %972 = vmatprep.subr.bf16.mxu1 %v2082_v0  ;;  %v1905_v30 = vld [vmem:[%s2862_s1 + $0xe8] sm:$0xff]   ;;  %v1907_v32 = vld [vmem:[%s2862_s1 + $0xf0] sm:$0xff]   ;;  %v1908_v33 = vld [vmem:[%s2862_s1 + $0x78] sm:$0xff]  }
   0xc   :  { %1236 = vmatprep.subr.bf16.mxu0 %v2082_v0  ;;  %v1909_v34 = vld [vmem:[%s2862_s1 + $0xf8] sm:$0xff]   ;;  %v1910_v35 = vld [vmem:[%s2863_s0] ss:$16 sps:$4 sm:$0xff]   ;;  %v1916_v37 = vld [vmem:[%s2863_s0 + $0x24] ss:$16 sps:$4 sm:$0xff]  }
   0xd   :  { %v1913_v36 = vld [vmem:[%s2863_s0 + $0x8] ss:$16 sps:$4 sm:$0xff]   ;;  %v1918_v38 = vld [vmem:[%s2863_s0 + $0x2c] ss:$16 sps:$4 sm:$0xff]   ;;  %v1920_v39 = vld [vmem:[%s2863_s0 + $0x20] ss:$16 sps:$4 sm:$0xff]  }
   0xe   :  { %973 = vmatpush1.bf16.msra.mxu1 %v1884_v7  ;;  %v1921_v40 = vld [vmem:[%s2863_s0 + $0x28] ss:$16 sps:$4 sm:$0xff]   ;;  %v1922_v41 = vld [vmem:[%s2863_s0 + $0x44] ss:$16 sps:$4 sm:$0xff]   ;;  %v1924_v42 = vld [vmem:[%s2863_s0 + $0x4c] ss:$16 sps:$4 sm:$0xff]  }
   0xf   :  { %1237 = vmatpush1.bf16.msra.mxu0 %v1885_v8  ;;  %974 = vmatprep.subr.bf16.mxu1 %v2082_v0  ;;  %v1926_v43 = vld [vmem:[%s2863_s0 + $0x40] ss:$16 sps:$4 sm:$0xff]   ;;  %v1927_v44 = vld [vmem:[%s2863_s0 + $0x48] ss:$16 sps:$4 sm:$0xff]   ;;  %v1928_v45 = vld [vmem:[%s2863_s0 + $0x64] ss:$16 sps:$4 sm:$0xff]  }
  0x10   :  { %1238 = vmatprep.subr.bf16.mxu0 %v2082_v0  ;;  %v1930_v46 = vld [vmem:[%s2863_s0 + $0x6c] ss:$16 sps:$4 sm:$0xff]   ;;  %v1932_v47 = vld [vmem:[%s2863_s0 + $0x60] ss:$16 sps:$4 sm:$0xff]   ;;  %v1933_v48 = vld [vmem:[%s2863_s0 + $0x68] ss:$16 sps:$4 sm:$0xff]  }
  0x11   :  { %v1934_v49 = vld [vmem:[%s2863_s0 + $0x84] ss:$16 sps:$4 sm:$0xff]   ;;  %v1936_v50 = vld [vmem:[%s2863_s0 + $0x8c] ss:$16 sps:$4 sm:$0xff]   ;;  %v1938_v51 = vld [vmem:[%s2863_s0 + $0x80] ss:$16 sps:$4 sm:$0xff]  }
  0x12   :  { %975 = vmatpush1.bf16.msra.mxu1 %v1886_v9  ;;  %v1939_v52 = vld [vmem:[%s2863_s0 + $0x88] ss:$16 sps:$4 sm:$0xff]   ;;  %v1940_v53 = vld [vmem:[%s2863_s0 + $0xa4] ss:$16 sps:$4 sm:$0xff]   ;;  %v1942_v54 = vld [vmem:[%s2863_s0 + $0xac] ss:$16 sps:$4 sm:$0xff]  }
  0x13   :  { %1239 = vmatpush1.bf16.msra.mxu0 %v1887_v10  ;;  %976 = vmatprep.subr.bf16.mxu1 %v2082_v0  ;;  %v1944_v55 = vld [vmem:[%s2863_s0 + $0xa0] ss:$16 sps:$4 sm:$0xff]   ;;  %v1945_v56 = vld [vmem:[%s2863_s0 + $0xa8] ss:$16 sps:$4 sm:$0xff]   ;;  %v1946_v57 = vld [vmem:[%s2863_s0 + $0xc4] ss:$16 sps:$4 sm:$0xff]  }
  0x14   :  { %1240 = vmatprep.subr.bf16.mxu0 %v2082_v0  ;;  %v1948_v58 = vld [vmem:[%s2863_s0 + $0xcc] ss:$16 sps:$4 sm:$0xff]   ;;  %v1950_v59 = vld [vmem:[%s2863_s0 + $0xc0] ss:$16 sps:$4 sm:$0xff]   ;;  %v1951_v60 = vld [vmem:[%s2863_s0 + $0xc8] ss:$16 sps:$4 sm:$0xff]  }
  0x15   :  { %v1952_v61 = vld [vmem:[%s2863_s0 + $0xe4] ss:$16 sps:$4 sm:$0xff]   ;;  %v1954_v62 = vld [vmem:[%s2863_s0 + $0xec] ss:$16 sps:$4 sm:$0xff]   ;;  %v1956_v63 = vld [vmem:[%s2863_s0 + $0xe0] ss:$16 sps:$4 sm:$0xff]  }
  0x16   :  { %977 = vmatpush1.bf16.msra.mxu1 %v1888_v11  ;;  %v1958_v1 = vld [vmem:[%s2863_s0 + $0x104] ss:$16 sps:$4 sm:$0xff]   ;;  %v1960_v2 = vld [vmem:[%s2863_s0 + $0x10c] ss:$16 sps:$4 sm:$0xff]   ;;  %v1962_v3 = vld [vmem:[%s2863_s0 + $0x100] ss:$16 sps:$4 sm:$0xff]  }
  0x17   :  { %1241 = vmatpush1.bf16.msra.mxu0 %v1889_v12  ;;  %978 = vmatprep.subr.bf16.mxu1 %v2082_v0  ;;  %v1963_v4 = vld [vmem:[%s2863_s0 + $0x108] ss:$16 sps:$4 sm:$0xff]   ;;  %v1964_v5 = vld [vmem:[%s2863_s0 + $0x124] ss:$16 sps:$4 sm:$0xff]   ;;  %v1966_v6 = vld [vmem:[%s2863_s0 + $0x12c] ss:$16 sps:$4 sm:$0xff]  }
  0x18   :  { %1242 = vmatprep.subr.bf16.mxu0 %v2082_v0  ;;  %v1968_v7 = vld [vmem:[%s2863_s0 + $0x120] ss:$16 sps:$4 sm:$0xff]   ;;  %v1969_v8 = vld [vmem:[%s2863_s0 + $0x128] ss:$16 sps:$4 sm:$0xff]   ;;  %v1970_v9 = vld [vmem:[%s2863_s0 + $0x144] ss:$16 sps:$4 sm:$0xff]  }
  0x19   :  { %v1972_v10 = vld [vmem:[%s2863_s0 + $0x14c] ss:$16 sps:$4 sm:$0xff]   ;;  %v1974_v11 = vld [vmem:[%s2863_s0 + $0x140] ss:$16 sps:$4 sm:$0xff]   ;;  %v1975_v12 = vld [vmem:[%s2863_s0 + $0x148] ss:$16 sps:$4 sm:$0xff]  }
  0x1a   :  { %979 = vmatpush1.bf16.msra.mxu1 %v1890_v13  ;;  %v1976_v13 = vld [vmem:[%s2863_s0 + $0x164] ss:$16 sps:$4 sm:$0xff]   ;;  %v1986_v19 = vld [vmem:[%s2863_s0 + $0x180] ss:$16 sps:$4 sm:$0xff]  }
  0x1b   :  { %1243 = vmatpush1.bf16.msra.mxu0 %v1891_v14  ;;  %980 = vmatprep.subr.bf16.mxu1 %v2082_v0  ;;  %v1978_v14 = vld [vmem:[%s2863_s0 + $0x16c] ss:$16 sps:$4 sm:$0xff]   ;;  %v1988_v21 = vld [vmem:[%s2863_s0 + $0x1a4] ss:$16 sps:$4 sm:$0xff]  }
  0x1c   :  { %1244 = vmatprep.subr.bf16.mxu0 %v2082_v0 }
  0x1e   :  { %981 = vmatpush1.bf16.msra.mxu1 %v1892_v15  ;;  %v1980_v15 = vld [vmem:[%s2863_s0 + $0x160] ss:$16 sps:$4 sm:$0xff]  }
  0x1f   :  { %1245 = vmatpush1.bf16.msra.mxu0 %v1893_v16  ;;  %982 = vmatprep.subr.bf16.mxu1 %v2082_v0  ;;  %v1981_v16 = vld [vmem:[%s2863_s0 + $0x168] ss:$16 sps:$4 sm:$0xff]  }
  0x20   :  { %1246 = vmatprep.subr.bf16.mxu0 %v2082_v0 }
  0x22   :  { %983 = vmatpush1.bf16.msra.mxu1 %v1894_v17  ;;  %v1982_v17 = vld [vmem:[%s2863_s0 + $0x184] ss:$16 sps:$4 sm:$0xff]  }
  0x23   :  { %1247 = vmatpush1.bf16.msra.mxu0 %v1895_v18  ;;  %984 = vmatprep.subr.bf16.mxu1 %v2082_v0  ;;  %v1984_v18 = vld [vmem:[%s2863_s0 + $0x18c] ss:$16 sps:$4 sm:$0xff]  }
  0x24   :  { %1248 = vmatprep.subr.bf16.mxu0 %v2082_v0 }
  0x26   :  { %985 = vmatpush1.bf16.msra.mxu1 %v1896_v20  ;;  %v1987_v20 = vld [vmem:[%s2863_s0 + $0x188] ss:$16 sps:$4 sm:$0xff]  }
  0x27   :  { %1249 = vmatpush1.bf16.msra.mxu0 %v1897_v22  ;;  %986 = vmatprep.subr.bf16.mxu1 %v2082_v0  ;;  %v1990_v22 = vld [vmem:[%s2863_s0 + $0x1ac] ss:$16 sps:$4 sm:$0xff]  }
  0x28   :  { %1250 = vmatprep.subr.bf16.mxu0 %v2082_v0 }
  0x2a   :  { %987 = vmatpush1.bf16.msra.mxu1 %v1898_v23  ;;  %v1992_v23 = vld [vmem:[%s2863_s0 + $0x1a0] ss:$16 sps:$4 sm:$0xff]  }
  0x2b   :  { %1251 = vmatpush1.bf16.msra.mxu0 %v1899_v24  ;;  %988 = vmatprep.subr.bf16.mxu1 %v2082_v0  ;;  %v1993_v24 = vld [vmem:[%s2863_s0 + $0x1a8] ss:$16 sps:$4 sm:$0xff]  }
  0x2c   :  { %1252 = vmatprep.subr.bf16.mxu0 %v2082_v0 }
  0x2e   :  { %989 = vmatpush1.bf16.msra.mxu1 %v1900_v25  ;;  %v1994_v25 = vld [vmem:[%s2863_s0 + $0x1c4] ss:$16 sps:$4 sm:$0xff]  }
  0x2f   :  { %1253 = vmatpush1.bf16.msra.mxu0 %v1901_v26  ;;  %990 = vmatprep.subr.bf16.mxu1 %v2082_v0  ;;  %v1996_v26 = vld [vmem:[%s2863_s0 + $0x1cc] ss:$16 sps:$4 sm:$0xff]  }
  0x30   :  { %1254 = vmatprep.subr.bf16.mxu0 %v2082_v0 }
  0x32   :  { %991 = vmatpush1.bf16.msra.mxu1 %v1902_v27  ;;  %v1998_v27 = vld [vmem:[%s2863_s0 + $0x1c0] ss:$16 sps:$4 sm:$0xff]  }
  0x33   :  { %1255 = vmatpush1.bf16.msra.mxu0 %v1903_v28  ;;  %992 = vmatprep.subr.bf16.mxu1 %v2082_v0  ;;  %v1999_v28 = vld [vmem:[%s2863_s0 + $0x1c8] ss:$16 sps:$4 sm:$0xff]  }
  0x34   :  { %1256 = vmatprep.subr.bf16.mxu0 %v2082_v0 }
  0x36   :  { %993 = vmatpush1.bf16.msra.mxu1 %v1904_v29  ;;  %v2000_v29 = vld [vmem:[%s2863_s0 + $0x1e4] ss:$16 sps:$4 sm:$0xff]  }
  0x37   :  { %1257 = vmatpush1.bf16.msra.mxu0 %v1905_v30  ;;  %994 = vmatprep.subr.bf16.mxu1 %v2082_v0  ;;  %v2002_v30 = vld [vmem:[%s2863_s0 + $0x1ec] ss:$16 sps:$4 sm:$0xff]  }
  0x38   :  { %1258 = vmatprep.subr.bf16.mxu0 %v2082_v0 }
  0x3a   :  { %995 = vmatpush1.bf16.msra.mxu1 %v1906_v31  ;;  %v2004_v31 = vld [vmem:[%s2863_s0 + $0x1e0] ss:$16 sps:$4 sm:$0xff]  }
  0x3b   :  { %1259 = vmatpush1.bf16.msra.mxu0 %v1907_v32  ;;  %996 = vmatprep.subr.bf16.mxu1 %v2082_v0  ;;  %v2005_v32 = vld [vmem:[%s2863_s0 + $0x1e8] ss:$16 sps:$4 sm:$0xff]  }
  0x3c   :  { %1260 = vmatprep.subr.bf16.mxu0 %v2082_v0  ;;  %v1957_v0 = vld [vmem:[%s2863_s0 + $0xe8] ss:$16 sps:$4 sm:$0xff]  }
  0x3e   :  { %997 = vmatpush1.bf16.msra.mxu1 %v1908_v33  ;;  %v2006_v33 = vld [vmem:[%s2863_s0 + $0x204] ss:$16 sps:$4 sm:$0xff]  }
  0x3f   :  { %1261 = vmatpush1.bf16.msra.mxu0 %v1909_v34  ;;  %v2008_v34 = vld [vmem:[%s2863_s0 + $0x20c] ss:$16 sps:$4 sm:$0xff]  }
  0x41   :  { %999 = vmatmul.mubr.bf16.vlgmr.msra.gmra.mrb[0].mxu1 %v1910_v35  ;;  %v2010_v35 = vld [vmem:[%s2863_s0 + $0x200] ss:$16 sps:$4 sm:$0xff]  }
  0x42   :  { %1263 = vmatmul.mubr.bf16.vlgmr.msra.gmra.mrb[0].mxu0 %v1913_v36  ;;  %1006 = vmatprep.mubr.bf16.mxu1 %v1916_v37  ;;  %v2011_v36 = vld [vmem:[%s2863_s0 + $0x208] ss:$16 sps:$4 sm:$0xff]   ;;  %v2012_v37 = vld [vmem:[%s2863_s0 + $0x224] ss:$16 sps:$4 sm:$0xff]  }
  0x43   :  { %1270 = vmatprep.mubr.bf16.mxu0 %v1918_v38  ;;  %v2014_v38 = vld [vmem:[%s2863_s0 + $0x22c] ss:$16 sps:$4 sm:$0xff]  }
  0x49   :  { %1007 = vmatmul.mubr.bf16.gmra.mrb[4].mxu1 %v1920_v39  ;;  %v2016_v39 = vld [vmem:[%s2863_s0 + $0x220] ss:$16 sps:$4 sm:$0xff]  }
  0x4a   :  { %1271 = vmatmul.mubr.bf16.gmra.mrb[4].mxu0 %v1921_v40  ;;  %1014 = vmatprep.mubr.bf16.mxu1 %v1922_v41  ;;  %v2017_v40 = vld [vmem:[%s2863_s0 + $0x228] ss:$16 sps:$4 sm:$0xff]   ;;  %v2018_v41 = vld [vmem:[%s2863_s0 + $0x244] ss:$16 sps:$4 sm:$0xff]  }
  0x4b   :  { %1278 = vmatprep.mubr.bf16.mxu0 %v1924_v42  ;;  %v2020_v42 = vld [vmem:[%s2863_s0 + $0x24c] ss:$16 sps:$4 sm:$0xff]  }
  0x51   :  { %1015 = vmatmul.mubr.bf16.gmra.mrb[8].mxu1 %v1926_v43  ;;  %v2022_v43 = vld [vmem:[%s2863_s0 + $0x240] ss:$16 sps:$4 sm:$0xff]  }
  0x52   :  { %1279 = vmatmul.mubr.bf16.gmra.mrb[8].mxu0 %v1927_v44  ;;  %1022 = vmatprep.mubr.bf16.mxu1 %v1928_v45  ;;  %v2023_v44 = vld [vmem:[%s2863_s0 + $0x248] ss:$16 sps:$4 sm:$0xff]   ;;  %v2024_v45 = vld [vmem:[%s2863_s0 + $0x264] ss:$16 sps:$4 sm:$0xff]  }
  0x53   :  { %1286 = vmatprep.mubr.bf16.mxu0 %v1930_v46  ;;  %v2026_v46 = vld [vmem:[%s2863_s0 + $0x26c] ss:$16 sps:$4 sm:$0xff]  }
  0x59   :  { %1023 = vmatmul.mubr.bf16.gmra.mrb[12].mxu1 %v1932_v47  ;;  %v2028_v47 = vld [vmem:[%s2863_s0 + $0x260] ss:$16 sps:$4 sm:$0xff]  }
  0x5a   :  { %1287 = vmatmul.mubr.bf16.gmra.mrb[12].mxu0 %v1933_v48  ;;  %1030 = vmatprep.mubr.bf16.mxu1 %v1934_v49  ;;  %v2029_v48 = vld [vmem:[%s2863_s0 + $0x268] ss:$16 sps:$4 sm:$0xff]   ;;  %v2030_v49 = vld [vmem:[%s2863_s0 + $0x284] ss:$16 sps:$4 sm:$0xff]  }
  0x5b   :  { %1294 = vmatprep.mubr.bf16.mxu0 %v1936_v50  ;;  %v2032_v50 = vld [vmem:[%s2863_s0 + $0x28c] ss:$16 sps:$4 sm:$0xff]  }
  0x61   :  { %1031 = vmatmul.mubr.bf16.gmra.mrb[16].mxu1 %v1938_v51  ;;  %v2034_v51 = vld [vmem:[%s2863_s0 + $0x280] ss:$16 sps:$4 sm:$0xff]  }
  0x62   :  { %1295 = vmatmul.mubr.bf16.gmra.mrb[16].mxu0 %v1939_v52  ;;  %1038 = vmatprep.mubr.bf16.mxu1 %v1940_v53  ;;  %v2035_v52 = vld [vmem:[%s2863_s0 + $0x288] ss:$16 sps:$4 sm:$0xff]   ;;  %v2036_v53 = vld [vmem:[%s2863_s0 + $0x2a4] ss:$16 sps:$4 sm:$0xff]  }
  0x63   :  { %1302 = vmatprep.mubr.bf16.mxu0 %v1942_v54  ;;  %v2038_v54 = vld [vmem:[%s2863_s0 + $0x2ac] ss:$16 sps:$4 sm:$0xff]  }
  0x69   :  { %1039 = vmatmul.mubr.bf16.gmra.mrb[20].mxu1 %v1944_v55  ;;  %v2040_v55 = vld [vmem:[%s2863_s0 + $0x2a0] ss:$16 sps:$4 sm:$0xff]  }
  0x6a   :  { %1303 = vmatmul.mubr.bf16.gmra.mrb[20].mxu0 %v1945_v56  ;;  %1046 = vmatprep.mubr.bf16.mxu1 %v1946_v57  ;;  %v2041_v56 = vld [vmem:[%s2863_s0 + $0x2a8] ss:$16 sps:$4 sm:$0xff]   ;;  %v2042_v57 = vld [vmem:[%s2863_s0 + $0x2c4] ss:$16 sps:$4 sm:$0xff]  }
  0x6b   :  { %1310 = vmatprep.mubr.bf16.mxu0 %v1948_v58  ;;  %v2044_v58 = vld [vmem:[%s2863_s0 + $0x2cc] ss:$16 sps:$4 sm:$0xff]  }
  0x71   :  { %1047 = vmatmul.mubr.bf16.gmra.mrb[24].mxu1 %v1950_v59  ;;  %v2046_v59 = vld [vmem:[%s2863_s0 + $0x2c0] ss:$16 sps:$4 sm:$0xff]  }
  0x72   :  { %1311 = vmatmul.mubr.bf16.gmra.mrb[24].mxu0 %v1951_v60  ;;  %1054 = vmatprep.mubr.bf16.mxu1 %v1952_v61  ;;  %v2047_v60 = vld [vmem:[%s2863_s0 + $0x2c8] ss:$16 sps:$4 sm:$0xff]   ;;  %v2048_v61 = vld [vmem:[%s2863_s0 + $0x2e4] ss:$16 sps:$4 sm:$0xff]  }
  0x73   :  { %1318 = vmatprep.mubr.bf16.mxu0 %v1954_v62  ;;  %v2050_v62 = vld [vmem:[%s2863_s0 + $0x2ec] ss:$16 sps:$4 sm:$0xff]  }
  0x79   :  { %1055 = vmatmul.mubr.bf16.gmra.mrb[28].mxu1 %v1956_v63  ;;  %v2052_v63 = vld [vmem:[%s2863_s0 + $0x2e0] ss:$16 sps:$4 sm:$0xff]  }
  0x7a   :  { %1319 = vmatmul.mubr.bf16.gmra.mrb[28].mxu0 %v1957_v0  ;;  %1062 = vmatprep.mubr.bf16.mxu1 %v1958_v1  ;;  %v2053_v0 = vld [vmem:[%s2863_s0 + $0x2e8] ss:$16 sps:$4 sm:$0xff]   ;;  %v2054_v1 = vld [vmem:[%s2863_s0 + $0x304] ss:$16 sps:$4 sm:$0xff]  }
  0x7b   :  { %1326 = vmatprep.mubr.bf16.mxu0 %v1960_v2  ;;  %v2056_v2 = vld [vmem:[%s2863_s0 + $0x30c] ss:$16 sps:$4 sm:$0xff]  }
  0x81   :  { %1063 = vmatmul.mubr.bf16.gmra.mrb[32].mxu1 %v1962_v3  ;;  %v2058_v3 = vld [vmem:[%s2863_s0 + $0x300] ss:$16 sps:$4 sm:$0xff]  }
  0x82   :  { %1327 = vmatmul.mubr.bf16.gmra.mrb[32].mxu0 %v1963_v4  ;;  %1070 = vmatprep.mubr.bf16.mxu1 %v1964_v5  ;;  %v2059_v4 = vld [vmem:[%s2863_s0 + $0x308] ss:$16 sps:$4 sm:$0xff]   ;;  %v2060_v5 = vld [vmem:[%s2863_s0 + $0x324] ss:$16 sps:$4 sm:$0xff]  }
  0x83   :  { %1334 = vmatprep.mubr.bf16.mxu0 %v1966_v6  ;;  %v2062_v6 = vld [vmem:[%s2863_s0 + $0x32c] ss:$16 sps:$4 sm:$0xff]  }
  0x89   :  { %1071 = vmatmul.mubr.bf16.gmra.mrb[36].mxu1 %v1968_v7  ;;  %v2064_v7 = vld [vmem:[%s2863_s0 + $0x320] ss:$16 sps:$4 sm:$0xff]  }
  0x8a   :  { %1335 = vmatmul.mubr.bf16.gmra.mrb[36].mxu0 %v1969_v8  ;;  %1078 = vmatprep.mubr.bf16.mxu1 %v1970_v9  ;;  %v2065_v8 = vld [vmem:[%s2863_s0 + $0x328] ss:$16 sps:$4 sm:$0xff]   ;;  %v2066_v9 = vld [vmem:[%s2863_s0 + $0x344] ss:$16 sps:$4 sm:$0xff]  }
  0x8b   :  { %1342 = vmatprep.mubr.bf16.mxu0 %v1972_v10  ;;  %v2068_v10 = vld [vmem:[%s2863_s0 + $0x34c] ss:$16 sps:$4 sm:$0xff]  }
  0x91   :  { %1079 = vmatmul.mubr.bf16.gmra.mrb[40].mxu1 %v1974_v11  ;;  %v2070_v11 = vld [vmem:[%s2863_s0 + $0x340] ss:$16 sps:$4 sm:$0xff]  }
  0x92   :  { %1343 = vmatmul.mubr.bf16.gmra.mrb[40].mxu0 %v1975_v12  ;;  %1086 = vmatprep.mubr.bf16.mxu1 %v1976_v13  ;;  %v2071_v12 = vld [vmem:[%s2863_s0 + $0x348] ss:$16 sps:$4 sm:$0xff]   ;;  %v2072_v13 = vld [vmem:[%s2863_s0 + $0x364] ss:$16 sps:$4 sm:$0xff]  }
  0x93   :  { %1350 = vmatprep.mubr.bf16.mxu0 %v1978_v14  ;;  %v2074_v14 = vld [vmem:[%s2863_s0 + $0x36c] ss:$16 sps:$4 sm:$0xff]  }
  0x99   :  { %1087 = vmatmul.mubr.bf16.gmra.mrb[44].mxu1 %v1980_v15  ;;  %v2564_v15 = vld [vmem:[%s2864_s2] ss:$0 sm:$0xff] }
  0x9a   :  { %1351 = vmatmul.mubr.bf16.gmra.mrb[44].mxu0 %v1981_v16  ;;  %1094 = vmatprep.mubr.bf16.mxu1 %v1982_v17  ;;  %v127_v16 = vld [vmem:[%s2863_s0 + $0x380] sm:$0x11] }
  0x9b   :  { %1358 = vmatprep.mubr.bf16.mxu0 %v1984_v18  ;;  %v128_v18 = vld [vmem:[%s2863_s0 + $0x388] sm:$0x11] }
  0xa1   :  { %1095 = vmatmul.mubr.bf16.gmra.mrb[48].mxu1 %v1986_v19 }
  0xa2   :  { %1359 = vmatmul.mubr.bf16.gmra.mrb[48].mxu0 %v1987_v20  ;;  %1102 = vmatprep.mubr.bf16.mxu1 %v1988_v21 }
  0xa3   :  { %1366 = vmatprep.mubr.bf16.mxu0 %v1990_v22  ;;  %v2076_v22 = vld [vmem:[%s2863_s0 + $0x360] ss:$16 sps:$4 sm:$0xff]  }
  0xa9   :  { %1103 = vmatmul.mubr.bf16.gmra.mrb[52].mxu1 %v1992_v23 }
  0xaa   :  { %1367 = vmatmul.mubr.bf16.gmra.mrb[52].mxu0 %v1993_v24  ;;  %1110 = vmatprep.mubr.bf16.mxu1 %v1994_v25  ;;  %v2077_v25 = vld [vmem:[%s2863_s0 + $0x368] ss:$16 sps:$4 sm:$0xff]  }
  0xab   :  { %1374 = vmatprep.mubr.bf16.mxu0 %v1996_v26  ;;  %v1728_v26 = vcombine.high %v127_v16, %v127_v16 }
  0xb1   :  { %1111 = vmatmul.mubr.bf16.gmra.mrb[56].mxu1 %v1998_v27 }
  0xb2   :  { %1375 = vmatmul.mubr.bf16.gmra.mrb[56].mxu0 %v1999_v28  ;;  %1118 = vmatprep.mubr.bf16.mxu1 %v2000_v29 }
  0xb3   :  { %1382 = vmatprep.mubr.bf16.mxu0 %v2002_v30 }
  0xb9   :  { %1119 = vmatmul.mubr.bf16.gmra.mrb[60].mxu1 %v2004_v31  ;;  %v1730_v31 = vcombine.high %v128_v18, %v128_v18 }
  0xba   :  { %1383 = vmatmul.mubr.bf16.gmra.mrb[60].mxu0 %v2005_v32  ;;  %1126 = vmatprep.mubr.bf16.mxu1 %v2006_v33 }
  0xbb   :  { %1390 = vmatprep.mubr.bf16.mxu0 %v2008_v34 }
  0xc1   :  { %1127 = vmatmul.mubr.bf16.gmra.mrb[64].mxu1 %v2010_v35 }
  0xc2   :  { %1391 = vmatmul.mubr.bf16.gmra.mrb[64].mxu0 %v2011_v36  ;;  %1134 = vmatprep.mubr.bf16.mxu1 %v2012_v37 }
  0xc3   :  { %1398 = vmatprep.mubr.bf16.mxu0 %v2014_v38 }
  0xc9   :  { %1135 = vmatmul.mubr.bf16.gmra.mrb[68].mxu1 %v2016_v39 }
  0xca   :  { %1399 = vmatmul.mubr.bf16.gmra.mrb[68].mxu0 %v2017_v40  ;;  %1142 = vmatprep.mubr.bf16.mxu1 %v2018_v41  ;;  %v1727_v40 = vcombine.low %v127_v16, %v127_v16 }
  0xcb   :  { %1406 = vmatprep.mubr.bf16.mxu0 %v2020_v42 }
  0xd1   :  { %1143 = vmatmul.mubr.bf16.gmra.mrb[72].mxu1 %v2022_v43  ;;  %v1729_v43 = vcombine.low %v128_v18, %v128_v18 }
  0xd2   :  { %1407 = vmatmul.mubr.bf16.gmra.mrb[72].mxu0 %v2023_v44  ;;  %1150 = vmatprep.mubr.bf16.mxu1 %v2024_v45 }
  0xd3   :  { %1414 = vmatprep.mubr.bf16.mxu0 %v2026_v46 }
  0xd9   :  { %1151 = vmatmul.mubr.bf16.gmra.mrb[76].mxu1 %v2028_v47 }
  0xda   :  { %1415 = vmatmul.mubr.bf16.gmra.mrb[76].mxu0 %v2029_v48  ;;  %1158 = vmatprep.mubr.bf16.mxu1 %v2030_v49 }
  0xdb   :  { %1422 = vmatprep.mubr.bf16.mxu0 %v2032_v50 }
  0xe1   :  { %1159 = vmatmul.mubr.bf16.gmra.mrb[80].mxu1 %v2034_v51 }
  0xe2   :  { %1423 = vmatmul.mubr.bf16.gmra.mrb[80].mxu0 %v2035_v52  ;;  %1166 = vmatprep.mubr.bf16.mxu1 %v2036_v53 }
  0xe3   :  { %1430 = vmatprep.mubr.bf16.mxu0 %v2038_v54 }
  0xe9   :  { %1167 = vmatmul.mubr.bf16.gmra.mrb[84].mxu1 %v2040_v55 }
  0xea   :  { %1431 = vmatmul.mubr.bf16.gmra.mrb[84].mxu0 %v2041_v56  ;;  %1174 = vmatprep.mubr.bf16.mxu1 %v2042_v57 }
  0xeb   :  { %1438 = vmatprep.mubr.bf16.mxu0 %v2044_v58 }
  0xf1   :  { %1175 = vmatmul.mubr.bf16.gmra.mrb[88].mxu1 %v2046_v59 }
  0xf2   :  { %1439 = vmatmul.mubr.bf16.gmra.mrb[88].mxu0 %v2047_v60  ;;  %1182 = vmatprep.mubr.bf16.mxu1 %v2048_v61 }
  0xf3   :  { %1446 = vmatprep.mubr.bf16.mxu0 %v2050_v62 }
  0xf9   :  { %1183 = vmatmul.mubr.bf16.gmra.mrb[92].mxu1 %v2052_v63 }
  0xfa   :  { %1447 = vmatmul.mubr.bf16.gmra.mrb[92].mxu0 %v2053_v0  ;;  %1190 = vmatprep.mubr.bf16.mxu1 %v2054_v1 }
  0xfb   :  { %1454 = vmatprep.mubr.bf16.mxu0 %v2056_v2 }
 0x101   :  { %1191 = vmatmul.mubr.bf16.gmra.mrb[96].mxu1 %v2058_v3 }
 0x102   :  { %1455 = vmatmul.mubr.bf16.gmra.mrb[96].mxu0 %v2059_v4  ;;  %1198 = vmatprep.mubr.bf16.mxu1 %v2060_v5 }
 0x103   :  { %1462 = vmatprep.mubr.bf16.mxu0 %v2062_v6 }
 0x109   :  { %1199 = vmatmul.mubr.bf16.gmra.mrb[100].mxu1 %v2064_v7 }
 0x10a   :  { %1463 = vmatmul.mubr.bf16.gmra.mrb[100].mxu0 %v2065_v8  ;;  %1206 = vmatprep.mubr.bf16.mxu1 %v2066_v9 }
 0x10b   :  { %1470 = vmatprep.mubr.bf16.mxu0 %v2068_v10 }
 0x111   :  { %1207 = vmatmul.mubr.bf16.gmra.mrb[104].mxu1 %v2070_v11 }
 0x112   :  { %1471 = vmatmul.mubr.bf16.gmra.mrb[104].mxu0 %v2071_v12  ;;  %1214 = vmatprep.mubr.bf16.mxu1 %v2072_v13 }
 0x113   :  { %1478 = vmatprep.mubr.bf16.mxu0 %v2074_v14 }
 0x114   :  { %v1000_v17 = vpop.f32.mrb[0].mxu1 }
 0x115   :  { %v1001_v19 = vadd.f32 %v2564_v15, %v1000_v17  ;;  %v1264_v20 = vpop.f32.mrb[0].mxu0  ;;  %v1002_v21 = vpop.f32.mrb[1].mxu1 }
 0x116   :  { %v1266_v23 = vpop.f32.mrb[1].mxu0  ;;  %v1003_v24 = vpop.f32.mrb[2].mxu1 }
 0x117   :  { %v1265_v27 = vadd.f32 %v1264_v20, %v1001_v19  ;;  %v1004_v28 = vadd.f32 %v2564_v15, %v1003_v24  ;;  %v1267_v29 = vpop.f32.mrb[2].mxu0  ;;  %v1005_v30 = vpop.f32.mrb[3].mxu1 }
 0x118   :  { %v1269_v32 = vpop.f32.mrb[3].mxu0 }
 0x119   :  { %v1494_v33 = vmax.f32 %v1265_v27, 0.0  ;;  %v1268_v34 = vadd.f32 %v1267_v29, %v1004_v28  ;;  %1215 = vmatmul.mubr.bf16.gmra.mrb[108].mxu1 %v2076_v22 }
 0x11a   :  { %1479 = vmatmul.mubr.bf16.gmra.mrb[108].mxu0 %v2077_v25  ;;  %1222 = vmatprep.mubr.bf16.mxu1 %v1728_v26 }
 0x11b   :  { %1552 = vst.msk [vmem:[%s2865_s3] sm:$0xff] %vm1551_vm0, %v1494_v33  ;;  %v1495_v35 = vmax.f32 %v1268_v34, 0.0  ;;  %1486 = vmatprep.mubr.bf16.mxu0 %v1730_v31 }
 0x11c   :  { %v1008_v36 = vpop.f32.mrb[4].mxu1 }
 0x11d   :  { %1553 = vst.msk [vmem:[%s2865_s3 + $0x8] sm:$0xff] %vm1551_vm0, %v1495_v35  ;;  %v1009_v37 = vadd.f32 %v2564_v15, %v1008_v36  ;;  %v1272_v38 = vpop.f32.mrb[4].mxu0  ;;  %v1010_v39 = vpop.f32.mrb[5].mxu1 }
 0x11e   :  { %v1274_v41 = vpop.f32.mrb[5].mxu0  ;;  %v1011_v42 = vpop.f32.mrb[6].mxu1 }
 0x11f   :  { %v1273_v44 = vadd.f32 %v1272_v38, %v1009_v37  ;;  %v1012_v45 = vadd.f32 %v2564_v15, %v1011_v42  ;;  %v1275_v46 = vpop.f32.mrb[6].mxu0  ;;  %v1013_v47 = vpop.f32.mrb[7].mxu1 }
 0x120   :  { %v1277_v48 = vpop.f32.mrb[7].mxu0 }
 0x121   :  { %v1496_v49 = vmax.f32 %v1273_v44, 0.0  ;;  %v1276_v50 = vadd.f32 %v1275_v46, %v1012_v45  ;;  %1223 = vmatmul.mubr.bf16.gmra.mrb[112].mxu1 %v1727_v40 }
 0x122   :  { %1487 = vmatmul.mubr.bf16.gmra.mrb[112].mxu0 %v1729_v43 }
 0x123   :  { %1554 = vst.msk [vmem:[%s2865_s3 + $0x10] sm:$0xff] %vm1551_vm0, %v1496_v49  ;;  %v1497_v51 = vmax.f32 %v1276_v50, 0.0 }
 0x124   :  { %v1016_v52 = vpop.f32.mrb[8].mxu1 }
 0x125   :  { %1555 = vst.msk [vmem:[%s2865_s3 + $0x18] sm:$0xff] %vm1551_vm0, %v1497_v51  ;;  %v1017_v53 = vadd.f32 %v2564_v15, %v1016_v52  ;;  %v1280_v54 = vpop.f32.mrb[8].mxu0  ;;  %v1018_v55 = vpop.f32.mrb[9].mxu1 }
 0x126   :  { %v1282_v56 = vpop.f32.mrb[9].mxu0  ;;  %v1019_v57 = vpop.f32.mrb[10].mxu1 }
 0x127   :  { %v1281_v58 = vadd.f32 %v1280_v54, %v1017_v53  ;;  %v1020_v59 = vadd.f32 %v2564_v15, %v1019_v57  ;;  %v1283_v60 = vpop.f32.mrb[10].mxu0  ;;  %v1021_v61 = vpop.f32.mrb[11].mxu1 }
 0x128   :  { %v1285_v62 = vpop.f32.mrb[11].mxu0 }
 0x129   :  { %v1498_v63 = vmax.f32 %v1281_v58, 0.0  ;;  %v1284_v0 = vadd.f32 %v1283_v60, %v1020_v59 }
 0x12b   :  { %1556 = vst.msk [vmem:[%s2865_s3 + $0x20] sm:$0xff] %vm1551_vm0, %v1498_v63  ;;  %v1499_v1 = vmax.f32 %v1284_v0, 0.0 }
 0x12c   :  { %v1024_v2 = vpop.f32.mrb[12].mxu1 }
 0x12d   :  { %1557 = vst.msk [vmem:[%s2865_s3 + $0x28] sm:$0xff] %vm1551_vm0, %v1499_v1  ;;  %v1025_v3 = vadd.f32 %v2564_v15, %v1024_v2  ;;  %v1288_v4 = vpop.f32.mrb[12].mxu0  ;;  %v1026_v5 = vpop.f32.mrb[13].mxu1 }
 0x12e   :  { %v1290_v6 = vpop.f32.mrb[13].mxu0  ;;  %v1027_v7 = vpop.f32.mrb[14].mxu1 }
 0x12f   :  { %v1289_v8 = vadd.f32 %v1288_v4, %v1025_v3  ;;  %v1028_v9 = vadd.f32 %v2564_v15, %v1027_v7  ;;  %v1291_v10 = vpop.f32.mrb[14].mxu0  ;;  %v1029_v11 = vpop.f32.mrb[15].mxu1 }
 0x130   :  { %v1293_v12 = vpop.f32.mrb[15].mxu0 }
 0x131   :  { %v1500_v13 = vmax.f32 %v1289_v8, 0.0  ;;  %v1292_v14 = vadd.f32 %v1291_v10, %v1028_v9 }
 0x133   :  { %1558 = vst.msk [vmem:[%s2865_s3 + $0x30] sm:$0xff] %vm1551_vm0, %v1500_v13  ;;  %v1501_v16 = vmax.f32 %v1292_v14, 0.0 }
 0x134   :  { %v1032_v17 = vpop.f32.mrb[16].mxu1 }
 0x135   :  { %1559 = vst.msk [vmem:[%s2865_s3 + $0x38] sm:$0xff] %vm1551_vm0, %v1501_v16  ;;  %v1033_v18 = vadd.f32 %v2564_v15, %v1032_v17  ;;  %v1296_v19 = vpop.f32.mrb[16].mxu0  ;;  %v1034_v20 = vpop.f32.mrb[17].mxu1 }
 0x136   :  { %v1298_v21 = vpop.f32.mrb[17].mxu0  ;;  %v1035_v22 = vpop.f32.mrb[18].mxu1 }
 0x137   :  { %v1297_v23 = vadd.f32 %v1296_v19, %v1033_v18  ;;  %v1036_v24 = vadd.f32 %v2564_v15, %v1035_v22  ;;  %v1299_v25 = vpop.f32.mrb[18].mxu0  ;;  %v1037_v26 = vpop.f32.mrb[19].mxu1 }
 0x138   :  { %v1301_v27 = vpop.f32.mrb[19].mxu0 }
 0x139   :  { %v1502_v28 = vmax.f32 %v1297_v23, 0.0  ;;  %v1300_v29 = vadd.f32 %v1299_v25, %v1036_v24 }
 0x13b   :  { %1560 = vst.msk [vmem:[%s2865_s3 + $0x40] sm:$0xff] %vm1551_vm0, %v1502_v28  ;;  %v1503_v30 = vmax.f32 %v1300_v29, 0.0 }
 0x13c   :  { %v1040_v31 = vpop.f32.mrb[20].mxu1 }
 0x13d   :  { %1561 = vst.msk [vmem:[%s2865_s3 + $0x48] sm:$0xff] %vm1551_vm0, %v1503_v30  ;;  %v1041_v32 = vadd.f32 %v2564_v15, %v1040_v31  ;;  %v1304_v33 = vpop.f32.mrb[20].mxu0  ;;  %v1042_v34 = vpop.f32.mrb[21].mxu1 }
 0x13e   :  { %v1306_v35 = vpop.f32.mrb[21].mxu0  ;;  %v1043_v36 = vpop.f32.mrb[22].mxu1 }
 0x13f   :  { %v1305_v37 = vadd.f32 %v1304_v33, %v1041_v32  ;;  %v1044_v38 = vadd.f32 %v2564_v15, %v1043_v36  ;;  %v1307_v39 = vpop.f32.mrb[22].mxu0  ;;  %v1045_v40 = vpop.f32.mrb[23].mxu1 }
 0x140   :  { %v1309_v41 = vpop.f32.mrb[23].mxu0 }
 0x141   :  { %v1504_v42 = vmax.f32 %v1305_v37, 0.0  ;;  %v1308_v43 = vadd.f32 %v1307_v39, %v1044_v38 }
 0x143   :  { %1562 = vst.msk [vmem:[%s2865_s3 + $0x50] sm:$0xff] %vm1551_vm0, %v1504_v42  ;;  %v1505_v44 = vmax.f32 %v1308_v43, 0.0 }
 0x144   :  { %v1048_v45 = vpop.f32.mrb[24].mxu1 }
 0x145   :  { %1563 = vst.msk [vmem:[%s2865_s3 + $0x58] sm:$0xff] %vm1551_vm0, %v1505_v44  ;;  %v1049_v46 = vadd.f32 %v2564_v15, %v1048_v45  ;;  %v1312_v47 = vpop.f32.mrb[24].mxu0  ;;  %v1050_v48 = vpop.f32.mrb[25].mxu1 }
 0x146   :  { %v1314_v49 = vpop.f32.mrb[25].mxu0  ;;  %v1051_v50 = vpop.f32.mrb[26].mxu1 }
 0x147   :  { %v1313_v51 = vadd.f32 %v1312_v47, %v1049_v46  ;;  %v1052_v52 = vadd.f32 %v2564_v15, %v1051_v50  ;;  %v1315_v53 = vpop.f32.mrb[26].mxu0  ;;  %v1053_v54 = vpop.f32.mrb[27].mxu1 }
 0x148   :  { %v1317_v55 = vpop.f32.mrb[27].mxu0 }
 0x149   :  { %v1506_v56 = vmax.f32 %v1313_v51, 0.0  ;;  %v1316_v57 = vadd.f32 %v1315_v53, %v1052_v52 }
 0x14b   :  { %1564 = vst.msk [vmem:[%s2865_s3 + $0x60] sm:$0xff] %vm1551_vm0, %v1506_v56  ;;  %v1507_v58 = vmax.f32 %v1316_v57, 0.0 }
 0x14c   :  { %v1056_v59 = vpop.f32.mrb[28].mxu1 }
 0x14d   :  { %1565 = vst.msk [vmem:[%s2865_s3 + $0x68] sm:$0xff] %vm1551_vm0, %v1507_v58  ;;  %v1057_v60 = vadd.f32 %v2564_v15, %v1056_v59  ;;  %v1320_v61 = vpop.f32.mrb[28].mxu0  ;;  %v1058_v62 = vpop.f32.mrb[29].mxu1 }
 0x14e   :  { %v1322_v63 = vpop.f32.mrb[29].mxu0  ;;  %v1059_v0 = vpop.f32.mrb[30].mxu1 }
 0x14f   :  { %v1321_v1 = vadd.f32 %v1320_v61, %v1057_v60  ;;  %v1060_v2 = vadd.f32 %v2564_v15, %v1059_v0  ;;  %v1323_v3 = vpop.f32.mrb[30].mxu0  ;;  %v1061_v4 = vpop.f32.mrb[31].mxu1 }
 0x150   :  { %v1325_v5 = vpop.f32.mrb[31].mxu0 }
 0x151   :  { %v1508_v6 = vmax.f32 %v1321_v1, 0.0  ;;  %v1324_v7 = vadd.f32 %v1323_v3, %v1060_v2 }
 0x153   :  { %1566 = vst.msk [vmem:[%s2865_s3 + $0x70] sm:$0xff] %vm1551_vm0, %v1508_v6  ;;  %v1509_v8 = vmax.f32 %v1324_v7, 0.0 }
 0x154   :  { %v1064_v9 = vpop.f32.mrb[32].mxu1 }
 0x155   :  { %1567 = vst.msk [vmem:[%s2865_s3 + $0x78] sm:$0xff] %vm1551_vm0, %v1509_v8  ;;  %v1065_v10 = vadd.f32 %v2564_v15, %v1064_v9  ;;  %v1328_v11 = vpop.f32.mrb[32].mxu0  ;;  %v1066_v12 = vpop.f32.mrb[33].mxu1 }
 0x156   :  { %v1330_v13 = vpop.f32.mrb[33].mxu0  ;;  %v1067_v14 = vpop.f32.mrb[34].mxu1 }
 0x157   :  { %v1329_v16 = vadd.f32 %v1328_v11, %v1065_v10  ;;  %v1068_v17 = vadd.f32 %v2564_v15, %v1067_v14  ;;  %v1331_v18 = vpop.f32.mrb[34].mxu0  ;;  %v1069_v19 = vpop.f32.mrb[35].mxu1 }
 0x158   :  { %v1333_v20 = vpop.f32.mrb[35].mxu0 }
 0x159   :  { %v1510_v21 = vmax.f32 %v1329_v16, 0.0  ;;  %v1332_v22 = vadd.f32 %v1331_v18, %v1068_v17 }
 0x15b   :  { %1568 = vst.msk [vmem:[%s2865_s3 + $0x80] sm:$0xff] %vm1551_vm0, %v1510_v21  ;;  %v1511_v23 = vmax.f32 %v1332_v22, 0.0 }
 0x15c   :  { %v1072_v24 = vpop.f32.mrb[36].mxu1 }
 0x15d   :  { %1569 = vst.msk [vmem:[%s2865_s3 + $0x88] sm:$0xff] %vm1551_vm0, %v1511_v23  ;;  %v1073_v25 = vadd.f32 %v2564_v15, %v1072_v24  ;;  %v1336_v26 = vpop.f32.mrb[36].mxu0  ;;  %v1074_v27 = vpop.f32.mrb[37].mxu1 }
 0x15e   :  { %v1338_v28 = vpop.f32.mrb[37].mxu0  ;;  %v1075_v29 = vpop.f32.mrb[38].mxu1 }
 0x15f   :  { %v1337_v30 = vadd.f32 %v1336_v26, %v1073_v25  ;;  %v1076_v31 = vadd.f32 %v2564_v15, %v1075_v29  ;;  %v1339_v32 = vpop.f32.mrb[38].mxu0  ;;  %v1077_v33 = vpop.f32.mrb[39].mxu1 }
 0x160   :  { %v1341_v34 = vpop.f32.mrb[39].mxu0 }
 0x161   :  { %v1512_v35 = vmax.f32 %v1337_v30, 0.0  ;;  %v1340_v36 = vadd.f32 %v1339_v32, %v1076_v31 }
 0x163   :  { %1570 = vst.msk [vmem:[%s2865_s3 + $0x90] sm:$0xff] %vm1551_vm0, %v1512_v35  ;;  %v1513_v37 = vmax.f32 %v1340_v36, 0.0 }
 0x164   :  { %v1080_v38 = vpop.f32.mrb[40].mxu1 }
 0x165   :  { %1571 = vst.msk [vmem:[%s2865_s3 + $0x98] sm:$0xff] %vm1551_vm0, %v1513_v37  ;;  %v1081_v39 = vadd.f32 %v2564_v15, %v1080_v38  ;;  %v1344_v40 = vpop.f32.mrb[40].mxu0  ;;  %v1082_v41 = vpop.f32.mrb[41].mxu1 }
 0x166   :  { %v1346_v42 = vpop.f32.mrb[41].mxu0  ;;  %v1083_v43 = vpop.f32.mrb[42].mxu1 }
 0x167   :  { %v1345_v44 = vadd.f32 %v1344_v40, %v1081_v39  ;;  %v1084_v45 = vadd.f32 %v2564_v15, %v1083_v43  ;;  %v1347_v46 = vpop.f32.mrb[42].mxu0  ;;  %v1085_v47 = vpop.f32.mrb[43].mxu1 }
 0x168   :  { %v1349_v48 = vpop.f32.mrb[43].mxu0 }
 0x169   :  { %v1514_v49 = vmax.f32 %v1345_v44, 0.0  ;;  %v1348_v50 = vadd.f32 %v1347_v46, %v1084_v45 }
 0x16b   :  { %1572 = vst.msk [vmem:[%s2865_s3 + $0xa0] sm:$0xff] %vm1551_vm0, %v1514_v49  ;;  %v1515_v51 = vmax.f32 %v1348_v50, 0.0 }
 0x16c   :  { %v1088_v52 = vpop.f32.mrb[44].mxu1 }
 0x16d   :  { %1573 = vst.msk [vmem:[%s2865_s3 + $0xa8] sm:$0xff] %vm1551_vm0, %v1515_v51  ;;  %v1089_v53 = vadd.f32 %v2564_v15, %v1088_v52  ;;  %v1352_v54 = vpop.f32.mrb[44].mxu0  ;;  %v1090_v55 = vpop.f32.mrb[45].mxu1 }
 0x16e   :  { %v1354_v56 = vpop.f32.mrb[45].mxu0  ;;  %v1091_v57 = vpop.f32.mrb[46].mxu1 }
 0x16f   :  { %v1353_v58 = vadd.f32 %v1352_v54, %v1089_v53  ;;  %v1092_v59 = vadd.f32 %v2564_v15, %v1091_v57  ;;  %v1355_v60 = vpop.f32.mrb[46].mxu0  ;;  %v1093_v61 = vpop.f32.mrb[47].mxu1 }
 0x170   :  { %v1357_v62 = vpop.f32.mrb[47].mxu0 }
 0x171   :  { %v1516_v63 = vmax.f32 %v1353_v58, 0.0  ;;  %v1356_v0 = vadd.f32 %v1355_v60, %v1092_v59 }
 0x173   :  { %1574 = vst.msk [vmem:[%s2865_s3 + $0xb0] sm:$0xff] %vm1551_vm0, %v1516_v63  ;;  %v1517_v1 = vmax.f32 %v1356_v0, 0.0 }
 0x174   :  { %v1096_v2 = vpop.f32.mrb[48].mxu1 }
 0x175   :  { %1575 = vst.msk [vmem:[%s2865_s3 + $0xb8] sm:$0xff] %vm1551_vm0, %v1517_v1  ;;  %v1097_v3 = vadd.f32 %v2564_v15, %v1096_v2  ;;  %v1360_v4 = vpop.f32.mrb[48].mxu0  ;;  %v1098_v5 = vpop.f32.mrb[49].mxu1 }
 0x176   :  { %v1362_v6 = vpop.f32.mrb[49].mxu0  ;;  %v1099_v7 = vpop.f32.mrb[50].mxu1 }
 0x177   :  { %v1361_v8 = vadd.f32 %v1360_v4, %v1097_v3  ;;  %v1100_v9 = vadd.f32 %v2564_v15, %v1099_v7  ;;  %v1363_v10 = vpop.f32.mrb[50].mxu0  ;;  %v1101_v11 = vpop.f32.mrb[51].mxu1 }
 0x178   :  { %v1365_v12 = vpop.f32.mrb[51].mxu0 }
 0x179   :  { %v1518_v13 = vmax.f32 %v1361_v8, 0.0  ;;  %v1364_v14 = vadd.f32 %v1363_v10, %v1100_v9 }
 0x17b   :  { %1576 = vst.msk [vmem:[%s2865_s3 + $0xc0] sm:$0xff] %vm1551_vm0, %v1518_v13  ;;  %v1519_v16 = vmax.f32 %v1364_v14, 0.0 }
 0x17c   :  { %v1104_v17 = vpop.f32.mrb[52].mxu1 }
 0x17d   :  { %1577 = vst.msk [vmem:[%s2865_s3 + $0xc8] sm:$0xff] %vm1551_vm0, %v1519_v16  ;;  %v1105_v18 = vadd.f32 %v2564_v15, %v1104_v17  ;;  %v1368_v19 = vpop.f32.mrb[52].mxu0  ;;  %v1106_v20 = vpop.f32.mrb[53].mxu1 }
 0x17e   :  { %v1370_v21 = vpop.f32.mrb[53].mxu0  ;;  %v1107_v22 = vpop.f32.mrb[54].mxu1 }
 0x17f   :  { %v1369_v23 = vadd.f32 %v1368_v19, %v1105_v18  ;;  %v1108_v24 = vadd.f32 %v2564_v15, %v1107_v22  ;;  %v1371_v25 = vpop.f32.mrb[54].mxu0  ;;  %v1109_v26 = vpop.f32.mrb[55].mxu1 }
 0x180   :  { %v1373_v27 = vpop.f32.mrb[55].mxu0 }
 0x181   :  { %v1520_v28 = vmax.f32 %v1369_v23, 0.0  ;;  %v1372_v29 = vadd.f32 %v1371_v25, %v1108_v24 }
 0x183   :  { %1578 = vst.msk [vmem:[%s2865_s3 + $0xd0] sm:$0xff] %vm1551_vm0, %v1520_v28  ;;  %v1521_v30 = vmax.f32 %v1372_v29, 0.0 }
 0x184   :  { %v1112_v31 = vpop.f32.mrb[56].mxu1 }
 0x185   :  { %1579 = vst.msk [vmem:[%s2865_s3 + $0xd8] sm:$0xff] %vm1551_vm0, %v1521_v30  ;;  %v1113_v32 = vadd.f32 %v2564_v15, %v1112_v31  ;;  %v1376_v33 = vpop.f32.mrb[56].mxu0  ;;  %v1114_v34 = vpop.f32.mrb[57].mxu1 }
 0x186   :  { %v1378_v35 = vpop.f32.mrb[57].mxu0  ;;  %v1115_v36 = vpop.f32.mrb[58].mxu1 }
 0x187   :  { %v1377_v37 = vadd.f32 %v1376_v33, %v1113_v32  ;;  %v1116_v38 = vadd.f32 %v2564_v15, %v1115_v36  ;;  %v1379_v39 = vpop.f32.mrb[58].mxu0  ;;  %v1117_v40 = vpop.f32.mrb[59].mxu1 }
 0x188   :  { %v1381_v41 = vpop.f32.mrb[59].mxu0 }
 0x189   :  { %v1522_v42 = vmax.f32 %v1377_v37, 0.0  ;;  %v1380_v43 = vadd.f32 %v1379_v39, %v1116_v38 }
 0x18b   :  { %1580 = vst.msk [vmem:[%s2865_s3 + $0xe0] sm:$0xff] %vm1551_vm0, %v1522_v42  ;;  %v1523_v44 = vmax.f32 %v1380_v43, 0.0 }
 0x18c   :  { %v1120_v45 = vpop.f32.mrb[60].mxu1 }
 0x18d   :  { %1581 = vst.msk [vmem:[%s2865_s3 + $0xe8] sm:$0xff] %vm1551_vm0, %v1523_v44  ;;  %v1121_v46 = vadd.f32 %v2564_v15, %v1120_v45  ;;  %v1384_v47 = vpop.f32.mrb[60].mxu0  ;;  %v1122_v48 = vpop.f32.mrb[61].mxu1 }
 0x18e   :  { %v1386_v49 = vpop.f32.mrb[61].mxu0  ;;  %v1123_v50 = vpop.f32.mrb[62].mxu1 }
 0x18f   :  { %v1385_v51 = vadd.f32 %v1384_v47, %v1121_v46  ;;  %v1124_v52 = vadd.f32 %v2564_v15, %v1123_v50  ;;  %v1387_v53 = vpop.f32.mrb[62].mxu0  ;;  %v1125_v54 = vpop.f32.mrb[63].mxu1 }
 0x190   :  { %v1389_v55 = vpop.f32.mrb[63].mxu0 }
 0x191   :  { %v1524_v56 = vmax.f32 %v1385_v51, 0.0  ;;  %v1388_v57 = vadd.f32 %v1387_v53, %v1124_v52 }
 0x193   :  { %1582 = vst.msk [vmem:[%s2865_s3 + $0xf0] sm:$0xff] %vm1551_vm0, %v1524_v56  ;;  %v1525_v58 = vmax.f32 %v1388_v57, 0.0 }
 0x194   :  { %v1128_v59 = vpop.f32.mrb[64].mxu1 }
 0x195   :  { %1583 = vst.msk [vmem:[%s2865_s3 + $0xf8] sm:$0xff] %vm1551_vm0, %v1525_v58  ;;  %v1129_v60 = vadd.f32 %v2564_v15, %v1128_v59  ;;  %v1392_v61 = vpop.f32.mrb[64].mxu0  ;;  %v1130_v62 = vpop.f32.mrb[65].mxu1 }
 0x196   :  { %v1394_v63 = vpop.f32.mrb[65].mxu0  ;;  %v1131_v0 = vpop.f32.mrb[66].mxu1 }
 0x197   :  { %v1393_v1 = vadd.f32 %v1392_v61, %v1129_v60  ;;  %v1132_v2 = vadd.f32 %v2564_v15, %v1131_v0  ;;  %v1395_v3 = vpop.f32.mrb[66].mxu0  ;;  %v1133_v4 = vpop.f32.mrb[67].mxu1 }
 0x198   :  { %v1397_v5 = vpop.f32.mrb[67].mxu0 }
 0x199   :  { %v1526_v6 = vmax.f32 %v1393_v1, 0.0  ;;  %v1396_v7 = vadd.f32 %v1395_v3, %v1132_v2 }
 0x19b   :  { %1584 = vst.msk [vmem:[%s2865_s3 + $0x100] sm:$0xff] %vm1551_vm0, %v1526_v6  ;;  %v1527_v8 = vmax.f32 %v1396_v7, 0.0 }
 0x19c   :  { %v1136_v9 = vpop.f32.mrb[68].mxu1 }
 0x19d   :  { %1585 = vst.msk [vmem:[%s2865_s3 + $0x108] sm:$0xff] %vm1551_vm0, %v1527_v8  ;;  %v1137_v10 = vadd.f32 %v2564_v15, %v1136_v9  ;;  %v1400_v11 = vpop.f32.mrb[68].mxu0  ;;  %v1138_v12 = vpop.f32.mrb[69].mxu1 }
 0x19e   :  { %v1402_v13 = vpop.f32.mrb[69].mxu0  ;;  %v1139_v14 = vpop.f32.mrb[70].mxu1 }
 0x19f   :  { %v1401_v16 = vadd.f32 %v1400_v11, %v1137_v10  ;;  %v1140_v17 = vadd.f32 %v2564_v15, %v1139_v14  ;;  %v1403_v18 = vpop.f32.mrb[70].mxu0  ;;  %v1141_v19 = vpop.f32.mrb[71].mxu1 }
 0x1a0   :  { %v1405_v20 = vpop.f32.mrb[71].mxu0 }
 0x1a1   :  { %v1528_v21 = vmax.f32 %v1401_v16, 0.0  ;;  %v1404_v22 = vadd.f32 %v1403_v18, %v1140_v17 }
 0x1a3   :  { %1586 = vst.msk [vmem:[%s2865_s3 + $0x110] sm:$0xff] %vm1551_vm0, %v1528_v21  ;;  %v1529_v23 = vmax.f32 %v1404_v22, 0.0 }
 0x1a4   :  { %v1144_v24 = vpop.f32.mrb[72].mxu1 }
 0x1a5   :  { %1587 = vst.msk [vmem:[%s2865_s3 + $0x118] sm:$0xff] %vm1551_vm0, %v1529_v23  ;;  %v1145_v25 = vadd.f32 %v2564_v15, %v1144_v24  ;;  %v1408_v26 = vpop.f32.mrb[72].mxu0  ;;  %v1146_v27 = vpop.f32.mrb[73].mxu1 }
 0x1a6   :  { %v1410_v28 = vpop.f32.mrb[73].mxu0  ;;  %v1147_v29 = vpop.f32.mrb[74].mxu1 }
 0x1a7   :  { %v1409_v30 = vadd.f32 %v1408_v26, %v1145_v25  ;;  %v1148_v31 = vadd.f32 %v2564_v15, %v1147_v29  ;;  %v1411_v32 = vpop.f32.mrb[74].mxu0  ;;  %v1149_v33 = vpop.f32.mrb[75].mxu1 }
 0x1a8   :  { %v1413_v34 = vpop.f32.mrb[75].mxu0 }
 0x1a9   :  { %v1530_v35 = vmax.f32 %v1409_v30, 0.0  ;;  %v1412_v36 = vadd.f32 %v1411_v32, %v1148_v31 }
 0x1ab   :  { %1588 = vst.msk [vmem:[%s2865_s3 + $0x120] sm:$0xff] %vm1551_vm0, %v1530_v35  ;;  %v1531_v37 = vmax.f32 %v1412_v36, 0.0 }
 0x1ac   :  { %v1152_v38 = vpop.f32.mrb[76].mxu1 }
 0x1ad   :  { %1589 = vst.msk [vmem:[%s2865_s3 + $0x128] sm:$0xff] %vm1551_vm0, %v1531_v37  ;;  %v1153_v39 = vadd.f32 %v2564_v15, %v1152_v38  ;;  %v1416_v40 = vpop.f32.mrb[76].mxu0  ;;  %v1154_v41 = vpop.f32.mrb[77].mxu1 }
 0x1ae   :  { %v1418_v42 = vpop.f32.mrb[77].mxu0  ;;  %v1155_v43 = vpop.f32.mrb[78].mxu1 }
 0x1af   :  { %v1417_v44 = vadd.f32 %v1416_v40, %v1153_v39  ;;  %v1156_v45 = vadd.f32 %v2564_v15, %v1155_v43  ;;  %v1419_v46 = vpop.f32.mrb[78].mxu0  ;;  %v1157_v47 = vpop.f32.mrb[79].mxu1 }
 0x1b0   :  { %v1421_v48 = vpop.f32.mrb[79].mxu0 }
 0x1b1   :  { %v1532_v49 = vmax.f32 %v1417_v44, 0.0  ;;  %v1420_v50 = vadd.f32 %v1419_v46, %v1156_v45 }
 0x1b3   :  { %1590 = vst.msk [vmem:[%s2865_s3 + $0x130] sm:$0xff] %vm1551_vm0, %v1532_v49  ;;  %v1533_v51 = vmax.f32 %v1420_v50, 0.0 }
 0x1b4   :  { %v1160_v52 = vpop.f32.mrb[80].mxu1 }
 0x1b5   :  { %1591 = vst.msk [vmem:[%s2865_s3 + $0x138] sm:$0xff] %vm1551_vm0, %v1533_v51  ;;  %v1161_v53 = vadd.f32 %v2564_v15, %v1160_v52  ;;  %v1424_v54 = vpop.f32.mrb[80].mxu0  ;;  %v1162_v55 = vpop.f32.mrb[81].mxu1 }
 0x1b6   :  { %v1426_v56 = vpop.f32.mrb[81].mxu0  ;;  %v1163_v57 = vpop.f32.mrb[82].mxu1 }
 0x1b7   :  { %v1425_v58 = vadd.f32 %v1424_v54, %v1161_v53  ;;  %v1164_v59 = vadd.f32 %v2564_v15, %v1163_v57  ;;  %v1427_v60 = vpop.f32.mrb[82].mxu0  ;;  %v1165_v61 = vpop.f32.mrb[83].mxu1 }
 0x1b8   :  { %v1429_v62 = vpop.f32.mrb[83].mxu0 }
 0x1b9   :  { %v1534_v63 = vmax.f32 %v1425_v58, 0.0  ;;  %v1428_v0 = vadd.f32 %v1427_v60, %v1164_v59 }
 0x1bb   :  { %1592 = vst.msk [vmem:[%s2865_s3 + $0x140] sm:$0xff] %vm1551_vm0, %v1534_v63  ;;  %v1535_v1 = vmax.f32 %v1428_v0, 0.0 }
 0x1bc   :  { %v1168_v2 = vpop.f32.mrb[84].mxu1 }
 0x1bd   :  { %1593 = vst.msk [vmem:[%s2865_s3 + $0x148] sm:$0xff] %vm1551_vm0, %v1535_v1  ;;  %v1169_v3 = vadd.f32 %v2564_v15, %v1168_v2  ;;  %v1432_v4 = vpop.f32.mrb[84].mxu0  ;;  %v1170_v5 = vpop.f32.mrb[85].mxu1 }
 0x1be   :  { %v1434_v6 = vpop.f32.mrb[85].mxu0  ;;  %v1171_v7 = vpop.f32.mrb[86].mxu1 }
 0x1bf   :  { %v1433_v8 = vadd.f32 %v1432_v4, %v1169_v3  ;;  %v1172_v9 = vadd.f32 %v2564_v15, %v1171_v7  ;;  %v1435_v10 = vpop.f32.mrb[86].mxu0  ;;  %v1173_v11 = vpop.f32.mrb[87].mxu1 }
 0x1c0   :  { %v1437_v12 = vpop.f32.mrb[87].mxu0 }
 0x1c1   :  { %v1536_v13 = vmax.f32 %v1433_v8, 0.0  ;;  %v1436_v14 = vadd.f32 %v1435_v10, %v1172_v9 }
 0x1c3   :  { %1594 = vst.msk [vmem:[%s2865_s3 + $0x150] sm:$0xff] %vm1551_vm0, %v1536_v13  ;;  %v1537_v16 = vmax.f32 %v1436_v14, 0.0 }
 0x1c4   :  { %v1176_v17 = vpop.f32.mrb[88].mxu1 }
 0x1c5   :  { %1595 = vst.msk [vmem:[%s2865_s3 + $0x158] sm:$0xff] %vm1551_vm0, %v1537_v16  ;;  %v1177_v18 = vadd.f32 %v2564_v15, %v1176_v17  ;;  %v1440_v19 = vpop.f32.mrb[88].mxu0  ;;  %v1178_v20 = vpop.f32.mrb[89].mxu1 }
 0x1c6   :  { %v1442_v21 = vpop.f32.mrb[89].mxu0  ;;  %v1179_v22 = vpop.f32.mrb[90].mxu1 }
 0x1c7   :  { %v1441_v23 = vadd.f32 %v1440_v19, %v1177_v18  ;;  %v1180_v24 = vadd.f32 %v2564_v15, %v1179_v22  ;;  %v1443_v25 = vpop.f32.mrb[90].mxu0  ;;  %v1181_v26 = vpop.f32.mrb[91].mxu1 }
 0x1c8   :  { %v1445_v27 = vpop.f32.mrb[91].mxu0 }
 0x1c9   :  { %v1538_v28 = vmax.f32 %v1441_v23, 0.0  ;;  %v1444_v29 = vadd.f32 %v1443_v25, %v1180_v24 }
 0x1cb   :  { %1596 = vst.msk [vmem:[%s2865_s3 + $0x160] sm:$0xff] %vm1551_vm0, %v1538_v28  ;;  %v1539_v30 = vmax.f32 %v1444_v29, 0.0 }
 0x1cc   :  { %v1184_v31 = vpop.f32.mrb[92].mxu1 }
 0x1cd   :  { %1597 = vst.msk [vmem:[%s2865_s3 + $0x168] sm:$0xff] %vm1551_vm0, %v1539_v30  ;;  %v1185_v32 = vadd.f32 %v2564_v15, %v1184_v31  ;;  %v1448_v33 = vpop.f32.mrb[92].mxu0  ;;  %v1186_v34 = vpop.f32.mrb[93].mxu1 }
 0x1ce   :  { %v1450_v35 = vpop.f32.mrb[93].mxu0  ;;  %v1187_v36 = vpop.f32.mrb[94].mxu1 }
 0x1cf   :  { %v1449_v37 = vadd.f32 %v1448_v33, %v1185_v32  ;;  %v1188_v38 = vadd.f32 %v2564_v15, %v1187_v36  ;;  %v1451_v39 = vpop.f32.mrb[94].mxu0  ;;  %v1189_v40 = vpop.f32.mrb[95].mxu1 }
 0x1d0   :  { %v1453_v41 = vpop.f32.mrb[95].mxu0 }
 0x1d1   :  { %v1540_v42 = vmax.f32 %v1449_v37, 0.0  ;;  %v1452_v43 = vadd.f32 %v1451_v39, %v1188_v38 }
 0x1d3   :  { %1598 = vst.msk [vmem:[%s2865_s3 + $0x170] sm:$0xff] %vm1551_vm0, %v1540_v42  ;;  %v1541_v44 = vmax.f32 %v1452_v43, 0.0 }
 0x1d4   :  { %v1192_v45 = vpop.f32.mrb[96].mxu1 }
 0x1d5   :  { %1599 = vst.msk [vmem:[%s2865_s3 + $0x178] sm:$0xff] %vm1551_vm0, %v1541_v44  ;;  %v1193_v46 = vadd.f32 %v2564_v15, %v1192_v45  ;;  %v1456_v47 = vpop.f32.mrb[96].mxu0  ;;  %v1194_v48 = vpop.f32.mrb[97].mxu1 }
 0x1d6   :  { %v1458_v49 = vpop.f32.mrb[97].mxu0  ;;  %v1195_v50 = vpop.f32.mrb[98].mxu1 }
 0x1d7   :  { %v1457_v51 = vadd.f32 %v1456_v47, %v1193_v46  ;;  %v1196_v52 = vadd.f32 %v2564_v15, %v1195_v50  ;;  %v1459_v53 = vpop.f32.mrb[98].mxu0  ;;  %v1197_v54 = vpop.f32.mrb[99].mxu1 }
 0x1d8   :  { %v1461_v55 = vpop.f32.mrb[99].mxu0 }
 0x1d9   :  { %v1542_v56 = vmax.f32 %v1457_v51, 0.0  ;;  %v1460_v57 = vadd.f32 %v1459_v53, %v1196_v52 }
 0x1db   :  { %1600 = vst.msk [vmem:[%s2865_s3 + $0x180] sm:$0xff] %vm1551_vm0, %v1542_v56  ;;  %v1543_v58 = vmax.f32 %v1460_v57, 0.0 }
 0x1dc   :  { %v1200_v59 = vpop.f32.mrb[100].mxu1 }
 0x1dd   :  { %1601 = vst.msk [vmem:[%s2865_s3 + $0x188] sm:$0xff] %vm1551_vm0, %v1543_v58  ;;  %v1201_v60 = vadd.f32 %v2564_v15, %v1200_v59  ;;  %v1464_v61 = vpop.f32.mrb[100].mxu0  ;;  %v1202_v62 = vpop.f32.mrb[101].mxu1 }
 0x1de   :  { %v1466_v63 = vpop.f32.mrb[101].mxu0  ;;  %v1203_v0 = vpop.f32.mrb[102].mxu1 }
 0x1df   :  { %v1465_v1 = vadd.f32 %v1464_v61, %v1201_v60  ;;  %v1204_v2 = vadd.f32 %v2564_v15, %v1203_v0  ;;  %v1467_v3 = vpop.f32.mrb[102].mxu0  ;;  %v1205_v4 = vpop.f32.mrb[103].mxu1 }
 0x1e0   :  { %v1469_v5 = vpop.f32.mrb[103].mxu0 }
 0x1e1   :  { %v1544_v6 = vmax.f32 %v1465_v1, 0.0  ;;  %v1468_v7 = vadd.f32 %v1467_v3, %v1204_v2 }
 0x1e3   :  { %1602 = vst.msk [vmem:[%s2865_s3 + $0x190] sm:$0xff] %vm1551_vm0, %v1544_v6  ;;  %v1545_v8 = vmax.f32 %v1468_v7, 0.0 }
 0x1e4   :  { %v1208_v9 = vpop.f32.mrb[104].mxu1 }
 0x1e5   :  { %1603 = vst.msk [vmem:[%s2865_s3 + $0x198] sm:$0xff] %vm1551_vm0, %v1545_v8  ;;  %v1209_v10 = vadd.f32 %v2564_v15, %v1208_v9  ;;  %v1472_v11 = vpop.f32.mrb[104].mxu0  ;;  %v1210_v12 = vpop.f32.mrb[105].mxu1 }
 0x1e6   :  { %v1474_v13 = vpop.f32.mrb[105].mxu0  ;;  %v1211_v14 = vpop.f32.mrb[106].mxu1 }
 0x1e7   :  { %v1473_v16 = vadd.f32 %v1472_v11, %v1209_v10  ;;  %v1212_v17 = vadd.f32 %v2564_v15, %v1211_v14  ;;  %v1475_v18 = vpop.f32.mrb[106].mxu0  ;;  %v1213_v19 = vpop.f32.mrb[107].mxu1 }
 0x1e8   :  { %v1477_v20 = vpop.f32.mrb[107].mxu0 }
 0x1e9   :  { %v1546_v21 = vmax.f32 %v1473_v16, 0.0  ;;  %v1476_v22 = vadd.f32 %v1475_v18, %v1212_v17 }
 0x1eb   :  { %1604 = vst.msk [vmem:[%s2865_s3 + $0x1a0] sm:$0xff] %vm1551_vm0, %v1546_v21  ;;  %v1547_v23 = vmax.f32 %v1476_v22, 0.0 }
 0x1ec   :  { %v1216_v24 = vpop.f32.mrb[108].mxu1 }
 0x1ed   :  { %1605 = vst.msk [vmem:[%s2865_s3 + $0x1a8] sm:$0xff] %vm1551_vm0, %v1547_v23  ;;  %v1217_v25 = vadd.f32 %v2564_v15, %v1216_v24  ;;  %v1480_v26 = vpop.f32.mrb[108].mxu0  ;;  %v1218_v27 = vpop.f32.mrb[109].mxu1 }
 0x1ee   :  { %v1482_v28 = vpop.f32.mrb[109].mxu0  ;;  %v1219_v29 = vpop.f32.mrb[110].mxu1 }
 0x1ef   :  { %v1481_v30 = vadd.f32 %v1480_v26, %v1217_v25  ;;  %v1220_v31 = vadd.f32 %v2564_v15, %v1219_v29  ;;  %v1483_v32 = vpop.f32.mrb[110].mxu0  ;;  %v1221_v33 = vpop.f32.mrb[111].mxu1 }
 0x1f0   :  { %v1485_v34 = vpop.f32.mrb[111].mxu0 }
 0x1f1   :  { %v1548_v35 = vmax.f32 %v1481_v30, 0.0  ;;  %v1484_v36 = vadd.f32 %v1483_v32, %v1220_v31 }
 0x1f3   :  { %1606 = vst.msk [vmem:[%s2865_s3 + $0x1b0] sm:$0xff] %vm1551_vm0, %v1548_v35  ;;  %v1549_v37 = vmax.f32 %v1484_v36, 0.0 }
 0x1f4   :  { %v1224_v38 = vpop.f32.mrb[112].mxu1 }
 0x1f5   :  { %1607 = vst.msk [vmem:[%s2865_s3 + $0x1b8] sm:$0xff] %vm1551_vm0, %v1549_v37  ;;  %v1225_v39 = vadd.f32 %v2564_v15, %v1224_v38  ;;  %v1488_v40 = vpop.f32.mrb[112].mxu0  ;;  %v1226_v41 = vpop.f32.mrb[113].mxu1 }
 0x1f6   :  { %v1490_v42 = vpop.f32.mrb[113].mxu0  ;;  %v1227_v43 = vpop.f32.mrb[114].mxu1 }
 0x1f7   :  { %v1489_v44 = vadd.f32 %v1488_v40, %v1225_v39  ;;  %v1491_v45 = vpop.f32.mrb[114].mxu0  ;;  %v1228_v46 = vpop.f32.mrb[115].mxu1 }
 0x1f8   :  { %v1492_v47 = vpop.f32.mrb[115].mxu0 }
 0x1f9   :  { %v1550_v48 = vmax.f32 %v1489_v44, 0.0 }
 0x1fb   :  { %1609 = vst.msk [vmem:[%s2865_s3 + $0x1c0] sm:$0x3] %vm1608_vm1, %v1550_v48 }

// kernel: forward.8
= control target key start
LH: loop header
LB: loop body
LE: loop exit
PB: predicated region body
PF: predicated region fallthrough
CT: control target
= control target key end

     0   :  { %v771_v1 = vmov 0.0   ;;  %vm772_vm0 = vmmov 0   ;;  %vm536_vm1 = vcmask 392192   ;;  %vm549_vm2 = vcmask 386048   ;;  %s1016_s1 = inlined_call_operand.vmem [shape: bf16[384,48], index: 1, kind: input, shape index: {}]   ;;  %s1017_s0 = inlined_call_operand.vmem [shape: bf16[98,384], index: 0, kind: input, shape index: {}]   ;;  %s1018_s2 = inlined_call_operand.vmem [shape: f32[1,48], index: 2, kind: input, shape index: {}]   ;;  %s1019_s3 = inlined_call_operand.vmem [shape: f32[98,48], index: 3, kind: output, shape index: {}]  }
   0x1   :  { %v720_v0 = vld [vmem:[%s1016_s1 + $0x40] sm:$0xff]   ;;  %674 = vmatprep.subr.bf16.mxu1 %v771_v1  ;;  %690 = vmatprep.mubr.msk.bf16.mxu1 %vm772_vm0, %v771_v1  ;;  %v723_v4 = vld [vmem:[%s1016_s1 + $0x48] sm:$0xff]   ;;  %v726_v7 = vld [vmem:[%s1016_s1 + $0x50] sm:$0xff]  }
   0x2   :  { %v721_v2 = vld [vmem:[%s1016_s1] sm:$0xff]   ;;  %601 = vmatprep.subr.bf16.mxu0 %v720_v0  ;;  %v724_v5 = vld [vmem:[%s1016_s1 + $0x8] sm:$0xff]   ;;  %v727_v8 = vld [vmem:[%s1016_s1 + $0x10] sm:$0xff]  }
   0x3   :  { %v722_v3 = vld [vmem:[%s1016_s1 + $0x80] sm:$0xff]   ;;  %602 = vmatpush3.bf16.msra.mxu0 %v721_v2  ;;  %v725_v6 = vld [vmem:[%s1016_s1 + $0x88] sm:$0xff]   ;;  %v728_v9 = vld [vmem:[%s1016_s1 + $0x90] sm:$0xff]  }
   0x4   :  { %675 = vmatpush3.bf16.msra.mxu1 %v722_v3  ;;  %603 = vmatprep.subr.bf16.mxu0 %v723_v4  ;;  %v729_v10 = vld [vmem:[%s1016_s1 + $0x58] sm:$0xff]   ;;  %v732_v13 = vld [vmem:[%s1016_s1 + $0x60] sm:$0xff]   ;;  %v735_v16 = vld [vmem:[%s1016_s1 + $0x68] sm:$0xff]  }
   0x5   :  { %676 = vmatprep.subr.bf16.mxu1 %v771_v1  ;;  %v730_v11 = vld [vmem:[%s1016_s1 + $0x18] sm:$0xff]   ;;  %v733_v14 = vld [vmem:[%s1016_s1 + $0x20] sm:$0xff]   ;;  %v736_v17 = vld [vmem:[%s1016_s1 + $0x28] sm:$0xff]  }
   0x6   :  { %v731_v12 = vld [vmem:[%s1016_s1 + $0x98] sm:$0xff]   ;;  %v734_v15 = vld [vmem:[%s1016_s1 + $0xa0] sm:$0xff]   ;;  %v737_v18 = vld [vmem:[%s1016_s1 + $0xa8] sm:$0xff]  }
   0x7   :  { %604 = vmatpush3.bf16.msra.mxu0 %v724_v5  ;;  %v738_v19 = vld [vmem:[%s1016_s1 + $0x70] sm:$0xff]   ;;  %v741_v22 = vld [vmem:[%s1016_s1 + $0x78] sm:$0xff]   ;;  %v743_v26 = vld [vmem:[%s1017_s0] ss:$12 sps:$4 sm:$0xff]  }
   0x8   :  { %677 = vmatpush3.bf16.msra.mxu1 %v725_v6  ;;  %605 = vmatprep.subr.bf16.mxu0 %v726_v7  ;;  %v739_v20 = vld [vmem:[%s1016_s1 + $0x30] sm:$0xff]   ;;  %v742_v24 = vld [vmem:[%s1016_s1 + $0x38] sm:$0xff]   ;;  %v751_v30 = vld [vmem:[%s1017_s0 + $0x20] ss:$12 sps:$4 sm:$0xff]  }
   0x9   :  { %678 = vmatprep.subr.bf16.mxu1 %v771_v1  ;;  %v740_v21 = vld [vmem:[%s1016_s1 + $0xb0] sm:$0xff]   ;;  %v746_v25 = vld [vmem:[%s1016_s1 + $0xb8] sm:$0xff]   ;;  %v762_v38 = vld [vmem:[%s1017_s0 + $0x60] ss:$12 sps:$4 sm:$0xff]  }
   0xa   :  { %v745_v23 = vld [vmem:[%s1017_s0 + $0x4] ss:$12 sps:$4 sm:$0xff]   ;;  %v747_v27 = vld [vmem:[%s1017_s0 + $0x8] ss:$12 sps:$4 sm:$0xff]   ;;  %v756_v34 = vld [vmem:[%s1017_s0 + $0x4c] ss:$12 sps:$4 sm:$0xff]  }
   0xb   :  { %606 = vmatpush3.bf16.msra.mxu0 %v727_v8  ;;  %379 = vmatprep.mubr.bf16.mxu0 %v745_v23  ;;  %v748_v28 = vld [vmem:[%s1017_s0 + $0x1c] ss:$12 sps:$4 sm:$0xff]   ;;  %v750_v29 = vld [vmem:[%s1017_s0 + $0x18] ss:$12 sps:$4 sm:$0xff]   ;;  %v752_v31 = vld [vmem:[%s1017_s0 + $0x34] ss:$12 sps:$4 sm:$0xff]  }
   0xc   :  { %679 = vmatpush3.bf16.msra.mxu1 %v728_v9  ;;  %607 = vmatprep.subr.bf16.mxu0 %v729_v10  ;;  %v754_v32 = vld [vmem:[%s1017_s0 + $0x30] ss:$12 sps:$4 sm:$0xff]   ;;  %v755_v33 = vld [vmem:[%s1017_s0 + $0x38] ss:$12 sps:$4 sm:$0xff]   ;;  %v758_v35 = vld [vmem:[%s1017_s0 + $0x48] ss:$12 sps:$4 sm:$0xff]  }
   0xd   :  { %680 = vmatprep.subr.bf16.mxu1 %v771_v1  ;;  %v759_v36 = vld [vmem:[%s1017_s0 + $0x50] ss:$12 sps:$4 sm:$0xff]   ;;  %v763_v39 = vld [vmem:[%s1017_s0 + $0x68] ss:$12 sps:$4 sm:$0xff]   ;;  %v766_v42 = vld [vmem:[%s1017_s0 + $0x78] ss:$12 sps:$4 sm:$0xff]  }
   0xe   :  { %v760_v37 = vld [vmem:[%s1017_s0 + $0x64] ss:$12 sps:$4 sm:$0xff]   ;;  %v764_v40 = vld [vmem:[%s1017_s0 + $0x7c] ss:$12 sps:$4 sm:$0xff]   ;;  %v767_v43 = vld [vmem:[%s1017_s0 + $0x80] ss:$12 sps:$4 sm:$0xff]  }
   0xf   :  { %608 = vmatpush3.bf16.msra.mxu0 %v730_v11  ;;  %v39_v41 = vld [vmem:[%s1017_s0 + $0x90] sm:$0x11]  ;;  %v770_v46 = vld [vmem:[%s1017_s0 + $0x98] ss:$0 sps:$4 sm:$0x11]  }
  0x10   :  { %681 = vmatpush3.bf16.msra.mxu1 %v731_v12  ;;  %609 = vmatprep.subr.bf16.mxu0 %v732_v13  ;;  %v575_v44 = vcombine.high %v39_v41, %v39_v41  ;;  %v574_v45 = vcombine.low %v39_v41, %v39_v41  ;;  %v950_v49 = vld [vmem:[%s1018_s2] ss:$0 sm:$0xff] }
  0x11   :  { %682 = vmatprep.subr.bf16.mxu1 %v771_v1 }
  0x13   :  { %610 = vmatpush3.bf16.msra.mxu0 %v733_v14 }
  0x14   :  { %683 = vmatpush3.bf16.msra.mxu1 %v734_v15  ;;  %611 = vmatprep.subr.bf16.mxu0 %v735_v16 }
  0x15   :  { %684 = vmatprep.subr.bf16.mxu1 %v771_v1 }
  0x17   :  { %612 = vmatpush3.bf16.msra.mxu0 %v736_v17 }
  0x18   :  { %685 = vmatpush3.bf16.msra.mxu1 %v737_v18  ;;  %613 = vmatprep.subr.bf16.mxu0 %v738_v19 }
  0x19   :  { %686 = vmatprep.subr.bf16.mxu1 %v771_v1 }
  0x1b   :  { %614 = vmatpush3.bf16.msra.mxu0 %v739_v20 }
  0x1c   :  { %687 = vmatpush3.bf16.msra.mxu1 %v740_v21  ;;  %615 = vmatprep.subr.bf16.mxu0 %v741_v22 }
  0x1d   :  { %688 = vmatprep.subr.bf16.mxu1 %v771_v1 }
  0x1f   :  { %616 = vmatpush3.bf16.msra.mxu0 %v742_v24 }
  0x20   :  { %689 = vmatpush3.bf16.msra.mxu1 %v746_v25 }
  0x22   :  { %380 = vmatmul.mubr.bf16.vlgmr.msra.gmra.mrb[0].mxu0 %v743_v26 }
  0x23   :  { %691 = vmatmul.mubr.bf16.vlgmr.msra.gmra.mrb[0].mxu1 %v747_v27  ;;  %387 = vmatprep.mubr.bf16.mxu0 %v748_v28 }
  0x24   :  { %694 = vmatprep.mubr.msk.bf16.mxu1 %vm772_vm0, %v771_v1 }
  0x2a   :  { %388 = vmatmul.mubr.bf16.gmra.mrb[4].mxu0 %v750_v29 }
  0x2b   :  { %695 = vmatmul.mubr.bf16.gmra.mrb[4].mxu1 %v751_v30  ;;  %395 = vmatprep.mubr.bf16.mxu0 %v752_v31 }
  0x2c   :  { %698 = vmatprep.mubr.msk.bf16.mxu1 %vm772_vm0, %v771_v1 }
  0x32   :  { %396 = vmatmul.mubr.bf16.gmra.mrb[8].mxu0 %v754_v32 }
  0x33   :  { %699 = vmatmul.mubr.bf16.gmra.mrb[8].mxu1 %v755_v33  ;;  %403 = vmatprep.mubr.bf16.mxu0 %v756_v34 }
  0x34   :  { %702 = vmatprep.mubr.msk.bf16.mxu1 %vm772_vm0, %v771_v1 }
  0x3a   :  { %404 = vmatmul.mubr.bf16.gmra.mrb[12].mxu0 %v758_v35 }
  0x3b   :  { %703 = vmatmul.mubr.bf16.gmra.mrb[12].mxu1 %v759_v36  ;;  %411 = vmatprep.mubr.bf16.mxu0 %v760_v37 }
  0x3c   :  { %706 = vmatprep.mubr.msk.bf16.mxu1 %vm772_vm0, %v771_v1 }
  0x42   :  { %412 = vmatmul.mubr.bf16.gmra.mrb[16].mxu0 %v762_v38 }
  0x43   :  { %707 = vmatmul.mubr.bf16.gmra.mrb[16].mxu1 %v763_v39  ;;  %419 = vmatprep.mubr.bf16.mxu0 %v764_v40 }
  0x44   :  { %710 = vmatprep.mubr.msk.bf16.mxu1 %vm772_vm0, %v771_v1 }
  0x4a   :  { %420 = vmatmul.mubr.bf16.gmra.mrb[20].mxu0 %v766_v42 }
  0x4b   :  { %711 = vmatmul.mubr.bf16.gmra.mrb[20].mxu1 %v767_v43  ;;  %427 = vmatprep.mubr.bf16.mxu0 %v575_v44 }
  0x4c   :  { %714 = vmatprep.mubr.msk.bf16.mxu1 %vm772_vm0, %v771_v1 }
  0x52   :  { %428 = vmatmul.mubr.bf16.gmra.mrb[24].mxu0 %v574_v45 }
  0x53   :  { %715 = vmatmul.mubr.bf16.gmra.mrb[24].mxu1 %v770_v46 }
  0xf5   :  { %v617_v47 = vpop.f32.mrb[0].mxu0 }
  0xf6   :  { %v618_v48 = vpop.f32.mrb[1].mxu0  ;;  %v469_v50 = vpop.f32.mrb[0].mxu1 }
  0xf7   :  { %v619_v51 = vadd.f32 %v618_v48, %v617_v47  ;;  %v620_v52 = vpop.f32.mrb[2].mxu0  ;;  %v692_v53 = vpop.f32.mrb[1].mxu1 }
  0xf8   :  { %v621_v54 = vpop.f32.mrb[3].mxu0  ;;  %v472_v55 = vpop.f32.mrb[2].mxu1 }
  0xf9   :  { %v382_v56 = vadd.f32 %v619_v51, %v950_v49  ;;  %v622_v57 = vadd.f32 %v621_v54, %v620_v52  ;;  %v693_v58 = vpop.f32.mrb[3].mxu1 }
  0xfb   :  { %v470_v59 = vadd.f32 %v469_v50, %v382_v56  ;;  %v385_v60 = vadd.f32 %v622_v57, %v950_v49 }
  0xfd   :  { %v523_v61 = vmax.f32 %v470_v59, 0.0  ;;  %v473_v62 = vadd.f32 %v472_v55, %v385_v60  ;;  %v623_v63 = vpop.f32.mrb[4].mxu0 }
  0xfe   :  { %v624_v0 = vpop.f32.mrb[5].mxu0  ;;  %v477_v1 = vpop.f32.mrb[4].mxu1 }
  0xff   :  { %537 = vst.msk [vmem:[%s1019_s3] sm:$0xff] %vm536_vm1, %v523_v61  ;;  %v524_v2 = vmax.f32 %v473_v62, 0.0  ;;  %v625_v3 = vadd.f32 %v624_v0, %v623_v63  ;;  %v626_v4 = vpop.f32.mrb[6].mxu0  ;;  %v696_v5 = vpop.f32.mrb[5].mxu1 }
 0x100   :  { %v627_v6 = vpop.f32.mrb[7].mxu0  ;;  %v480_v7 = vpop.f32.mrb[6].mxu1 }
 0x101   :  { %538 = vst.msk [vmem:[%s1019_s3 + $0x8] sm:$0xff] %vm536_vm1, %v524_v2  ;;  %v390_v8 = vadd.f32 %v625_v3, %v950_v49  ;;  %v628_v9 = vadd.f32 %v627_v6, %v626_v4  ;;  %v697_v10 = vpop.f32.mrb[7].mxu1 }
 0x103   :  { %v478_v11 = vadd.f32 %v477_v1, %v390_v8  ;;  %v393_v12 = vadd.f32 %v628_v9, %v950_v49 }
 0x105   :  { %v525_v13 = vmax.f32 %v478_v11, 0.0  ;;  %v481_v14 = vadd.f32 %v480_v7, %v393_v12  ;;  %v629_v15 = vpop.f32.mrb[8].mxu0 }
 0x106   :  { %v630_v16 = vpop.f32.mrb[9].mxu0  ;;  %v485_v17 = vpop.f32.mrb[8].mxu1 }
 0x107   :  { %539 = vst.msk [vmem:[%s1019_s3 + $0x10] sm:$0xff] %vm536_vm1, %v525_v13  ;;  %v526_v18 = vmax.f32 %v481_v14, 0.0  ;;  %v631_v19 = vadd.f32 %v630_v16, %v629_v15  ;;  %v632_v20 = vpop.f32.mrb[10].mxu0  ;;  %v700_v21 = vpop.f32.mrb[9].mxu1 }
 0x108   :  { %v633_v22 = vpop.f32.mrb[11].mxu0  ;;  %v488_v23 = vpop.f32.mrb[10].mxu1 }
 0x109   :  { %540 = vst.msk [vmem:[%s1019_s3 + $0x18] sm:$0xff] %vm536_vm1, %v526_v18  ;;  %v398_v24 = vadd.f32 %v631_v19, %v950_v49  ;;  %v634_v25 = vadd.f32 %v633_v22, %v632_v20  ;;  %v701_v26 = vpop.f32.mrb[11].mxu1 }
 0x10b   :  { %v486_v27 = vadd.f32 %v485_v17, %v398_v24  ;;  %v401_v28 = vadd.f32 %v634_v25, %v950_v49 }
 0x10d   :  { %v527_v29 = vmax.f32 %v486_v27, 0.0  ;;  %v489_v30 = vadd.f32 %v488_v23, %v401_v28  ;;  %v635_v31 = vpop.f32.mrb[12].mxu0 }
 0x10e   :  { %v636_v32 = vpop.f32.mrb[13].mxu0  ;;  %v493_v33 = vpop.f32.mrb[12].mxu1 }
 0x10f   :  { %541 = vst.msk [vmem:[%s1019_s3 + $0x20] sm:$0xff] %vm536_vm1, %v527_v29  ;;  %v528_v34 = vmax.f32 %v489_v30, 0.0  ;;  %v637_v35 = vadd.f32 %v636_v32, %v635_v31  ;;  %v638_v36 = vpop.f32.mrb[14].mxu0  ;;  %v704_v37 = vpop.f32.mrb[13].mxu1 }
 0x110   :  { %v639_v38 = vpop.f32.mrb[15].mxu0  ;;  %v496_v39 = vpop.f32.mrb[14].mxu1 }
 0x111   :  { %542 = vst.msk [vmem:[%s1019_s3 + $0x28] sm:$0xff] %vm536_vm1, %v528_v34  ;;  %v406_v40 = vadd.f32 %v637_v35, %v950_v49  ;;  %v640_v41 = vadd.f32 %v639_v38, %v638_v36  ;;  %v705_v42 = vpop.f32.mrb[15].mxu1 }
 0x113   :  { %v494_v43 = vadd.f32 %v493_v33, %v406_v40  ;;  %v409_v44 = vadd.f32 %v640_v41, %v950_v49 }
 0x115   :  { %v529_v45 = vmax.f32 %v494_v43, 0.0  ;;  %v497_v46 = vadd.f32 %v496_v39, %v409_v44  ;;  %v641_v47 = vpop.f32.mrb[16].mxu0 }
 0x116   :  { %v642_v48 = vpop.f32.mrb[17].mxu0  ;;  %v501_v50 = vpop.f32.mrb[16].mxu1 }
 0x117   :  { %543 = vst.msk [vmem:[%s1019_s3 + $0x30] sm:$0xff] %vm536_vm1, %v529_v45  ;;  %v530_v51 = vmax.f32 %v497_v46, 0.0  ;;  %v643_v52 = vadd.f32 %v642_v48, %v641_v47  ;;  %v644_v53 = vpop.f32.mrb[18].mxu0  ;;  %v708_v54 = vpop.f32.mrb[17].mxu1 }
 0x118   :  { %v645_v55 = vpop.f32.mrb[19].mxu0  ;;  %v504_v56 = vpop.f32.mrb[18].mxu1 }
 0x119   :  { %544 = vst.msk [vmem:[%s1019_s3 + $0x38] sm:$0xff] %vm536_vm1, %v530_v51  ;;  %v414_v57 = vadd.f32 %v643_v52, %v950_v49  ;;  %v646_v58 = vadd.f32 %v645_v55, %v644_v53  ;;  %v709_v59 = vpop.f32.mrb[19].mxu1 }
 0x11b   :  { %v502_v60 = vadd.f32 %v501_v50, %v414_v57  ;;  %v417_v61 = vadd.f32 %v646_v58, %v950_v49 }
 0x11d   :  { %v531_v62 = vmax.f32 %v502_v60, 0.0  ;;  %v505_v63 = vadd.f32 %v504_v56, %v417_v61  ;;  %v647_v0 = vpop.f32.mrb[20].mxu0 }
 0x11e   :  { %v648_v1 = vpop.f32.mrb[21].mxu0  ;;  %v509_v2 = vpop.f32.mrb[20].mxu1 }
 0x11f   :  { %545 = vst.msk [vmem:[%s1019_s3 + $0x40] sm:$0xff] %vm536_vm1, %v531_v62  ;;  %v532_v3 = vmax.f32 %v505_v63, 0.0  ;;  %v649_v4 = vadd.f32 %v648_v1, %v647_v0  ;;  %v650_v5 = vpop.f32.mrb[22].mxu0  ;;  %v712_v6 = vpop.f32.mrb[21].mxu1 }
 0x120   :  { %v651_v7 = vpop.f32.mrb[23].mxu0  ;;  %v512_v8 = vpop.f32.mrb[22].mxu1 }
 0x121   :  { %546 = vst.msk [vmem:[%s1019_s3 + $0x48] sm:$0xff] %vm536_vm1, %v532_v3  ;;  %v422_v9 = vadd.f32 %v649_v4, %v950_v49  ;;  %v652_v10 = vadd.f32 %v651_v7, %v650_v5  ;;  %v713_v11 = vpop.f32.mrb[23].mxu1 }
 0x123   :  { %v510_v12 = vadd.f32 %v509_v2, %v422_v9  ;;  %v425_v13 = vadd.f32 %v652_v10, %v950_v49 }
 0x125   :  { %v533_v14 = vmax.f32 %v510_v12, 0.0  ;;  %v513_v15 = vadd.f32 %v512_v8, %v425_v13  ;;  %v653_v16 = vpop.f32.mrb[24].mxu0 }
 0x126   :  { %v654_v17 = vpop.f32.mrb[25].mxu0  ;;  %v517_v18 = vpop.f32.mrb[24].mxu1 }
 0x127   :  { %547 = vst.msk [vmem:[%s1019_s3 + $0x50] sm:$0xff] %vm536_vm1, %v533_v14  ;;  %v534_v19 = vmax.f32 %v513_v15, 0.0  ;;  %v655_v20 = vadd.f32 %v654_v17, %v653_v16  ;;  %v656_v21 = vpop.f32.mrb[26].mxu0  ;;  %v716_v22 = vpop.f32.mrb[25].mxu1 }
 0x128   :  { %v657_v23 = vpop.f32.mrb[27].mxu0  ;;  %v520_v24 = vpop.f32.mrb[26].mxu1 }
 0x129   :  { %548 = vst.msk [vmem:[%s1019_s3 + $0x58] sm:$0xff] %vm536_vm1, %v534_v19  ;;  %v430_v25 = vadd.f32 %v655_v20, %v950_v49  ;;  %v717_v26 = vpop.f32.mrb[27].mxu1 }
 0x12b   :  { %v518_v27 = vadd.f32 %v517_v18, %v430_v25 }
 0x12d   :  { %v535_v28 = vmax.f32 %v518_v27, 0.0 }
 0x12f   :  { %550 = vst.msk [vmem:[%s1019_s3 + $0x60] sm:$0x3] %vm549_vm2, %v535_v28 }

// kernel: forward.9
= control target key start
LH: loop header
LB: loop body
LE: loop exit
PB: predicated region body
PF: predicated region fallthrough
CT: control target
= control target key end

     0   :  { %vm627_vm0 = vcmask 261120   ;;  %vm640_vm1 = vcmask 254976   ;;  %s1158_s1 = inlined_call_operand.vmem [shape: bf16[512,32], index: 1, kind: input, shape index: {}]   ;;  %s1159_s0 = inlined_call_operand.vmem [shape: bf16[98,512], index: 0, kind: input, shape index: {}]   ;;  %s1160_s2 = inlined_call_operand.vmem [shape: f32[1,32], index: 2, kind: input, shape index: {}]   ;;  %s1161_s3 = inlined_call_operand.vmem [shape: f32[98,32], index: 3, kind: output, shape index: {}]  }
   0x1   :  { %v823_v0 = vld [vmem:[%s1158_s1 + $0x40] sm:$0xff]   ;;  %v827_v4 = vld [vmem:[%s1158_s1 + $0x48] sm:$0xff]   ;;  %v831_v8 = vld [vmem:[%s1158_s1 + $0x50] sm:$0xff]  }
   0x2   :  { %v824_v1 = vld [vmem:[%s1158_s1 + $0xc0] sm:$0xff]   ;;  %707 = vmatprep.subr.bf16.mxu0 %v823_v0  ;;  %v828_v5 = vld [vmem:[%s1158_s1 + $0xc8] sm:$0xff]   ;;  %v832_v9 = vld [vmem:[%s1158_s1 + $0xd0] sm:$0xff]  }
   0x3   :  { %v825_v2 = vld [vmem:[%s1158_s1] sm:$0xff]   ;;  %765 = vmatprep.subr.bf16.mxu1 %v824_v1  ;;  %v829_v6 = vld [vmem:[%s1158_s1 + $0x8] sm:$0xff]   ;;  %v833_v10 = vld [vmem:[%s1158_s1 + $0x10] sm:$0xff]  }
   0x4   :  { %v826_v3 = vld [vmem:[%s1158_s1 + $0x80] sm:$0xff]   ;;  %708 = vmatpush3.bf16.msra.mxu0 %v825_v2  ;;  %v830_v7 = vld [vmem:[%s1158_s1 + $0x88] sm:$0xff]   ;;  %v834_v11 = vld [vmem:[%s1158_s1 + $0x90] sm:$0xff]  }
   0x5   :  { %766 = vmatpush3.bf16.msra.mxu1 %v826_v3  ;;  %709 = vmatprep.subr.bf16.mxu0 %v827_v4  ;;  %v835_v12 = vld [vmem:[%s1158_s1 + $0x58] sm:$0xff]   ;;  %v839_v16 = vld [vmem:[%s1158_s1 + $0x60] sm:$0xff]   ;;  %v843_v20 = vld [vmem:[%s1158_s1 + $0x68] sm:$0xff]  }
   0x6   :  { %767 = vmatprep.subr.bf16.mxu1 %v828_v5  ;;  %v836_v13 = vld [vmem:[%s1158_s1 + $0xd8] sm:$0xff]   ;;  %v840_v17 = vld [vmem:[%s1158_s1 + $0xe0] sm:$0xff]   ;;  %v844_v21 = vld [vmem:[%s1158_s1 + $0xe8] sm:$0xff]  }
   0x7   :  { %v837_v14 = vld [vmem:[%s1158_s1 + $0x18] sm:$0xff]   ;;  %v841_v18 = vld [vmem:[%s1158_s1 + $0x20] sm:$0xff]   ;;  %v845_v22 = vld [vmem:[%s1158_s1 + $0x28] sm:$0xff]  }
   0x8   :  { %710 = vmatpush3.bf16.msra.mxu0 %v829_v6  ;;  %v838_v15 = vld [vmem:[%s1158_s1 + $0x98] sm:$0xff]   ;;  %v842_v19 = vld [vmem:[%s1158_s1 + $0xa0] sm:$0xff]   ;;  %v846_v23 = vld [vmem:[%s1158_s1 + $0xa8] sm:$0xff]  }
   0x9   :  { %768 = vmatpush3.bf16.msra.mxu1 %v830_v7  ;;  %711 = vmatprep.subr.bf16.mxu0 %v831_v8  ;;  %v847_v24 = vld [vmem:[%s1158_s1 + $0x70] sm:$0xff]   ;;  %v851_v28 = vld [vmem:[%s1158_s1 + $0x78] sm:$0xff]   ;;  %v39_v54 = vld [vmem:[%s1159_s0 + $0xc0] sm:$0x11] }
   0xa   :  { %769 = vmatprep.subr.bf16.mxu1 %v832_v9  ;;  %v848_v25 = vld [vmem:[%s1158_s1 + $0xf0] sm:$0xff]   ;;  %v852_v29 = vld [vmem:[%s1158_s1 + $0xf8] sm:$0xff]   ;;  %v40_v55 = vld [vmem:[%s1159_s0 + $0xc8] sm:$0x11]  ;;  %v672_v58 = vcombine.high %v39_v54, %v39_v54  ;;  %v671_v60 = vcombine.low %v39_v54, %v39_v54 }
   0xb   :  { %v849_v26 = vld [vmem:[%s1158_s1 + $0x30] sm:$0xff]   ;;  %v853_v30 = vld [vmem:[%s1158_s1 + $0x38] sm:$0xff]   ;;  %v674_v59 = vcombine.high %v40_v55, %v40_v55  ;;  %v673_v61 = vcombine.low %v40_v55, %v40_v55  ;;  %v1092_v0 = vld [vmem:[%s1160_s2] ss:$0 sm:$0xff] }
   0xc   :  { %712 = vmatpush3.bf16.msra.mxu0 %v833_v10  ;;  %v850_v27 = vld [vmem:[%s1158_s1 + $0xb0] sm:$0xff]   ;;  %v854_v31 = vld [vmem:[%s1158_s1 + $0xb8] sm:$0xff]  }
   0xd   :  { %770 = vmatpush3.bf16.msra.mxu1 %v834_v11  ;;  %713 = vmatprep.subr.bf16.mxu0 %v835_v12  ;;  %v855_v32 = vld [vmem:[%s1159_s0] ss:$16 sps:$4 sm:$0xff]   ;;  %v857_v33 = vld [vmem:[%s1159_s0 + $0x4] ss:$16 sps:$4 sm:$0xff]   ;;  %v858_v34 = vld [vmem:[%s1159_s0 + $0x8] ss:$16 sps:$4 sm:$0xff]  }
   0xe   :  { %771 = vmatprep.subr.bf16.mxu1 %v836_v13  ;;  %v860_v35 = vld [vmem:[%s1159_s0 + $0xc] ss:$16 sps:$4 sm:$0xff]   ;;  %470 = vmatprep.mubr.bf16.mxu0 %v857_v33  ;;  %v861_v36 = vld [vmem:[%s1159_s0 + $0x24] ss:$16 sps:$4 sm:$0xff]   ;;  %v865_v38 = vld [vmem:[%s1159_s0 + $0x20] ss:$16 sps:$4 sm:$0xff]  }
   0xf   :  { %558 = vmatprep.mubr.bf16.mxu1 %v860_v35  ;;  %v863_v37 = vld [vmem:[%s1159_s0 + $0x2c] ss:$16 sps:$4 sm:$0xff]   ;;  %v866_v39 = vld [vmem:[%s1159_s0 + $0x28] ss:$16 sps:$4 sm:$0xff]   ;;  %v867_v40 = vld [vmem:[%s1159_s0 + $0x44] ss:$16 sps:$4 sm:$0xff]  }
  0x10   :  { %714 = vmatpush3.bf16.msra.mxu0 %v837_v14  ;;  %v869_v41 = vld [vmem:[%s1159_s0 + $0x4c] ss:$16 sps:$4 sm:$0xff]   ;;  %v871_v42 = vld [vmem:[%s1159_s0 + $0x40] ss:$16 sps:$4 sm:$0xff]   ;;  %v872_v43 = vld [vmem:[%s1159_s0 + $0x48] ss:$16 sps:$4 sm:$0xff]  }
  0x11   :  { %772 = vmatpush3.bf16.msra.mxu1 %v838_v15  ;;  %715 = vmatprep.subr.bf16.mxu0 %v839_v16  ;;  %v873_v44 = vld [vmem:[%s1159_s0 + $0x64] ss:$16 sps:$4 sm:$0xff]   ;;  %v875_v45 = vld [vmem:[%s1159_s0 + $0x6c] ss:$16 sps:$4 sm:$0xff]   ;;  %v877_v46 = vld [vmem:[%s1159_s0 + $0x60] ss:$16 sps:$4 sm:$0xff]  }
  0x12   :  { %773 = vmatprep.subr.bf16.mxu1 %v840_v17  ;;  %v878_v47 = vld [vmem:[%s1159_s0 + $0x68] ss:$16 sps:$4 sm:$0xff]   ;;  %v879_v48 = vld [vmem:[%s1159_s0 + $0x84] ss:$16 sps:$4 sm:$0xff]   ;;  %v881_v49 = vld [vmem:[%s1159_s0 + $0x8c] ss:$16 sps:$4 sm:$0xff]  }
  0x13   :  { %v883_v50 = vld [vmem:[%s1159_s0 + $0x80] ss:$16 sps:$4 sm:$0xff]   ;;  %v884_v51 = vld [vmem:[%s1159_s0 + $0x88] ss:$16 sps:$4 sm:$0xff]   ;;  %v885_v52 = vld [vmem:[%s1159_s0 + $0xa4] ss:$16 sps:$4 sm:$0xff]  }
  0x14   :  { %716 = vmatpush3.bf16.msra.mxu0 %v841_v18  ;;  %v887_v53 = vld [vmem:[%s1159_s0 + $0xac] ss:$16 sps:$4 sm:$0xff]   ;;  %v889_v56 = vld [vmem:[%s1159_s0 + $0xa0] ss:$16 sps:$4 sm:$0xff]   ;;  %v890_v57 = vld [vmem:[%s1159_s0 + $0xa8] ss:$16 sps:$4 sm:$0xff]  }
  0x15   :  { %774 = vmatpush3.bf16.msra.mxu1 %v842_v19  ;;  %717 = vmatprep.subr.bf16.mxu0 %v843_v20 }
  0x16   :  { %775 = vmatprep.subr.bf16.mxu1 %v844_v21 }
  0x18   :  { %718 = vmatpush3.bf16.msra.mxu0 %v845_v22 }
  0x19   :  { %776 = vmatpush3.bf16.msra.mxu1 %v846_v23  ;;  %719 = vmatprep.subr.bf16.mxu0 %v847_v24 }
  0x1a   :  { %777 = vmatprep.subr.bf16.mxu1 %v848_v25 }
  0x1c   :  { %720 = vmatpush3.bf16.msra.mxu0 %v849_v26 }
  0x1d   :  { %778 = vmatpush3.bf16.msra.mxu1 %v850_v27  ;;  %721 = vmatprep.subr.bf16.mxu0 %v851_v28 }
  0x1e   :  { %779 = vmatprep.subr.bf16.mxu1 %v852_v29 }
  0x20   :  { %722 = vmatpush3.bf16.msra.mxu0 %v853_v30 }
  0x21   :  { %780 = vmatpush3.bf16.msra.mxu1 %v854_v31 }
  0x23   :  { %471 = vmatmul.mubr.bf16.vlgmr.msra.gmra.mrb[0].mxu0 %v855_v32 }
  0x24   :  { %559 = vmatmul.mubr.bf16.vlgmr.msra.gmra.mrb[0].mxu1 %v858_v34  ;;  %478 = vmatprep.mubr.bf16.mxu0 %v861_v36 }
  0x25   :  { %566 = vmatprep.mubr.bf16.mxu1 %v863_v37 }
  0x2b   :  { %479 = vmatmul.mubr.bf16.gmra.mrb[4].mxu0 %v865_v38 }
  0x2c   :  { %567 = vmatmul.mubr.bf16.gmra.mrb[4].mxu1 %v866_v39  ;;  %486 = vmatprep.mubr.bf16.mxu0 %v867_v40 }
  0x2d   :  { %574 = vmatprep.mubr.bf16.mxu1 %v869_v41 }
  0x33   :  { %487 = vmatmul.mubr.bf16.gmra.mrb[8].mxu0 %v871_v42 }
  0x34   :  { %575 = vmatmul.mubr.bf16.gmra.mrb[8].mxu1 %v872_v43  ;;  %494 = vmatprep.mubr.bf16.mxu0 %v873_v44 }
  0x35   :  { %582 = vmatprep.mubr.bf16.mxu1 %v875_v45 }
  0x3b   :  { %495 = vmatmul.mubr.bf16.gmra.mrb[12].mxu0 %v877_v46 }
  0x3c   :  { %583 = vmatmul.mubr.bf16.gmra.mrb[12].mxu1 %v878_v47  ;;  %502 = vmatprep.mubr.bf16.mxu0 %v879_v48 }
  0x3d   :  { %590 = vmatprep.mubr.bf16.mxu1 %v881_v49 }
  0x43   :  { %503 = vmatmul.mubr.bf16.gmra.mrb[16].mxu0 %v883_v50 }
  0x44   :  { %591 = vmatmul.mubr.bf16.gmra.mrb[16].mxu1 %v884_v51  ;;  %510 = vmatprep.mubr.bf16.mxu0 %v885_v52 }
  0x45   :  { %598 = vmatprep.mubr.bf16.mxu1 %v887_v53 }
  0x4b   :  { %511 = vmatmul.mubr.bf16.gmra.mrb[20].mxu0 %v889_v56 }
  0x4c   :  { %599 = vmatmul.mubr.bf16.gmra.mrb[20].mxu1 %v890_v57  ;;  %518 = vmatprep.mubr.bf16.mxu0 %v672_v58 }
  0x4d   :  { %606 = vmatprep.mubr.bf16.mxu1 %v674_v59 }
  0x53   :  { %519 = vmatmul.mubr.bf16.gmra.mrb[24].mxu0 %v671_v60 }
  0x54   :  { %607 = vmatmul.mubr.bf16.gmra.mrb[24].mxu1 %v673_v61 }
  0xf6   :  { %v723_v62 = vpop.f32.mrb[0].mxu0 }
  0xf7   :  { %v781_v63 = vpop.f32.mrb[0].mxu1  ;;  %v724_v1 = vpop.f32.mrb[1].mxu0 }
  0xf8   :  { %v725_v2 = vadd.f32 %v724_v1, %v723_v62  ;;  %v782_v3 = vpop.f32.mrb[1].mxu1  ;;  %v726_v4 = vpop.f32.mrb[2].mxu0 }
  0xf9   :  { %v783_v5 = vadd.f32 %v782_v3, %v781_v63  ;;  %v784_v6 = vpop.f32.mrb[2].mxu1  ;;  %v727_v7 = vpop.f32.mrb[3].mxu0 }
  0xfa   :  { %v473_v8 = vadd.f32 %v725_v2, %v1092_v0  ;;  %v728_v9 = vadd.f32 %v727_v7, %v726_v4  ;;  %v785_v10 = vpop.f32.mrb[3].mxu1 }
  0xfb   :  { %v786_v11 = vadd.f32 %v785_v10, %v784_v6 }
  0xfc   :  { %v561_v12 = vadd.f32 %v783_v5, %v473_v8  ;;  %v476_v13 = vadd.f32 %v728_v9, %v1092_v0 }
  0xfe   :  { %v614_v14 = vmax.f32 %v561_v12, 0.0  ;;  %v564_v15 = vadd.f32 %v786_v11, %v476_v13  ;;  %v729_v16 = vpop.f32.mrb[4].mxu0 }
  0xff   :  { %v787_v17 = vpop.f32.mrb[4].mxu1  ;;  %v730_v18 = vpop.f32.mrb[5].mxu0 }
 0x100   :  { %628 = vst.msk [vmem:[%s1161_s3] sm:$0xff] %vm627_vm0, %v614_v14  ;;  %v615_v19 = vmax.f32 %v564_v15, 0.0  ;;  %v731_v20 = vadd.f32 %v730_v18, %v729_v16  ;;  %v788_v21 = vpop.f32.mrb[5].mxu1  ;;  %v732_v22 = vpop.f32.mrb[6].mxu0 }
 0x101   :  { %v789_v23 = vadd.f32 %v788_v21, %v787_v17  ;;  %v790_v24 = vpop.f32.mrb[6].mxu1  ;;  %v733_v25 = vpop.f32.mrb[7].mxu0 }
 0x102   :  { %629 = vst.msk [vmem:[%s1161_s3 + $0x8] sm:$0xff] %vm627_vm0, %v615_v19  ;;  %v481_v26 = vadd.f32 %v731_v20, %v1092_v0  ;;  %v734_v27 = vadd.f32 %v733_v25, %v732_v22  ;;  %v791_v28 = vpop.f32.mrb[7].mxu1 }
 0x103   :  { %v792_v29 = vadd.f32 %v791_v28, %v790_v24 }
 0x104   :  { %v569_v30 = vadd.f32 %v789_v23, %v481_v26  ;;  %v484_v31 = vadd.f32 %v734_v27, %v1092_v0 }
 0x106   :  { %v616_v32 = vmax.f32 %v569_v30, 0.0  ;;  %v572_v33 = vadd.f32 %v792_v29, %v484_v31  ;;  %v735_v34 = vpop.f32.mrb[8].mxu0 }
 0x107   :  { %v793_v35 = vpop.f32.mrb[8].mxu1  ;;  %v736_v36 = vpop.f32.mrb[9].mxu0 }
 0x108   :  { %630 = vst.msk [vmem:[%s1161_s3 + $0x10] sm:$0xff] %vm627_vm0, %v616_v32  ;;  %v617_v37 = vmax.f32 %v572_v33, 0.0  ;;  %v737_v38 = vadd.f32 %v736_v36, %v735_v34  ;;  %v794_v39 = vpop.f32.mrb[9].mxu1  ;;  %v738_v40 = vpop.f32.mrb[10].mxu0 }
 0x109   :  { %v795_v41 = vadd.f32 %v794_v39, %v793_v35  ;;  %v796_v42 = vpop.f32.mrb[10].mxu1  ;;  %v739_v43 = vpop.f32.mrb[11].mxu0 }
 0x10a   :  { %631 = vst.msk [vmem:[%s1161_s3 + $0x18] sm:$0xff] %vm627_vm0, %v617_v37  ;;  %v489_v44 = vadd.f32 %v737_v38, %v1092_v0  ;;  %v740_v45 = vadd.f32 %v739_v43, %v738_v40  ;;  %v797_v46 = vpop.f32.mrb[11].mxu1 }
 0x10b   :  { %v798_v47 = vadd.f32 %v797_v46, %v796_v42 }
 0x10c   :  { %v577_v48 = vadd.f32 %v795_v41, %v489_v44  ;;  %v492_v49 = vadd.f32 %v740_v45, %v1092_v0 }
 0x10e   :  { %v618_v50 = vmax.f32 %v577_v48, 0.0  ;;  %v580_v51 = vadd.f32 %v798_v47, %v492_v49  ;;  %v741_v52 = vpop.f32.mrb[12].mxu0 }
 0x10f   :  { %v799_v53 = vpop.f32.mrb[12].mxu1  ;;  %v742_v54 = vpop.f32.mrb[13].mxu0 }
 0x110   :  { %632 = vst.msk [vmem:[%s1161_s3 + $0x20] sm:$0xff] %vm627_vm0, %v618_v50  ;;  %v619_v55 = vmax.f32 %v580_v51, 0.0  ;;  %v743_v56 = vadd.f32 %v742_v54, %v741_v52  ;;  %v800_v57 = vpop.f32.mrb[13].mxu1  ;;  %v744_v58 = vpop.f32.mrb[14].mxu0 }
 0x111   :  { %v801_v59 = vadd.f32 %v800_v57, %v799_v53  ;;  %v802_v60 = vpop.f32.mrb[14].mxu1  ;;  %v745_v61 = vpop.f32.mrb[15].mxu0 }
 0x112   :  { %633 = vst.msk [vmem:[%s1161_s3 + $0x28] sm:$0xff] %vm627_vm0, %v619_v55  ;;  %v497_v62 = vadd.f32 %v743_v56, %v1092_v0  ;;  %v746_v63 = vadd.f32 %v745_v61, %v744_v58  ;;  %v803_v1 = vpop.f32.mrb[15].mxu1 }
 0x113   :  { %v804_v2 = vadd.f32 %v803_v1, %v802_v60 }
 0x114   :  { %v585_v3 = vadd.f32 %v801_v59, %v497_v62  ;;  %v500_v4 = vadd.f32 %v746_v63, %v1092_v0 }
 0x116   :  { %v620_v5 = vmax.f32 %v585_v3, 0.0  ;;  %v588_v6 = vadd.f32 %v804_v2, %v500_v4  ;;  %v747_v7 = vpop.f32.mrb[16].mxu0 }
 0x117   :  { %v805_v8 = vpop.f32.mrb[16].mxu1  ;;  %v748_v9 = vpop.f32.mrb[17].mxu0 }
 0x118   :  { %634 = vst.msk [vmem:[%s1161_s3 + $0x30] sm:$0xff] %vm627_vm0, %v620_v5  ;;  %v621_v10 = vmax.f32 %v588_v6, 0.0  ;;  %v749_v11 = vadd.f32 %v748_v9, %v747_v7  ;;  %v806_v12 = vpop.f32.mrb[17].mxu1  ;;  %v750_v13 = vpop.f32.mrb[18].mxu0 }
 0x119   :  { %v807_v14 = vadd.f32 %v806_v12, %v805_v8  ;;  %v808_v15 = vpop.f32.mrb[18].mxu1  ;;  %v751_v16 = vpop.f32.mrb[19].mxu0 }
 0x11a   :  { %635 = vst.msk [vmem:[%s1161_s3 + $0x38] sm:$0xff] %vm627_vm0, %v621_v10  ;;  %v505_v17 = vadd.f32 %v749_v11, %v1092_v0  ;;  %v752_v18 = vadd.f32 %v751_v16, %v750_v13  ;;  %v809_v19 = vpop.f32.mrb[19].mxu1 }
 0x11b   :  { %v810_v20 = vadd.f32 %v809_v19, %v808_v15 }
 0x11c   :  { %v593_v21 = vadd.f32 %v807_v14, %v505_v17  ;;  %v508_v22 = vadd.f32 %v752_v18, %v1092_v0 }
 0x11e   :  { %v622_v23 = vmax.f32 %v593_v21, 0.0  ;;  %v596_v24 = vadd.f32 %v810_v20, %v508_v22  ;;  %v753_v25 = vpop.f32.mrb[20].mxu0 }
 0x11f   :  { %v811_v26 = vpop.f32.mrb[20].mxu1  ;;  %v754_v27 = vpop.f32.mrb[21].mxu0 }
 0x120   :  { %636 = vst.msk [vmem:[%s1161_s3 + $0x40] sm:$0xff] %vm627_vm0, %v622_v23  ;;  %v623_v28 = vmax.f32 %v596_v24, 0.0  ;;  %v755_v29 = vadd.f32 %v754_v27, %v753_v25  ;;  %v812_v30 = vpop.f32.mrb[21].mxu1  ;;  %v756_v31 = vpop.f32.mrb[22].mxu0 }
 0x121   :  { %v813_v32 = vadd.f32 %v812_v30, %v811_v26  ;;  %v814_v33 = vpop.f32.mrb[22].mxu1  ;;  %v757_v34 = vpop.f32.mrb[23].mxu0 }
 0x122   :  { %637 = vst.msk [vmem:[%s1161_s3 + $0x48] sm:$0xff] %vm627_vm0, %v623_v28  ;;  %v513_v35 = vadd.f32 %v755_v29, %v1092_v0  ;;  %v758_v36 = vadd.f32 %v757_v34, %v756_v31  ;;  %v815_v37 = vpop.f32.mrb[23].mxu1 }
 0x123   :  { %v816_v38 = vadd.f32 %v815_v37, %v814_v33 }
 0x124   :  { %v601_v39 = vadd.f32 %v813_v32, %v513_v35  ;;  %v516_v40 = vadd.f32 %v758_v36, %v1092_v0 }
 0x126   :  { %v624_v41 = vmax.f32 %v601_v39, 0.0  ;;  %v604_v42 = vadd.f32 %v816_v38, %v516_v40  ;;  %v759_v43 = vpop.f32.mrb[24].mxu0 }
 0x127   :  { %v817_v44 = vpop.f32.mrb[24].mxu1  ;;  %v760_v45 = vpop.f32.mrb[25].mxu0 }
 0x128   :  { %638 = vst.msk [vmem:[%s1161_s3 + $0x50] sm:$0xff] %vm627_vm0, %v624_v41  ;;  %v625_v46 = vmax.f32 %v604_v42, 0.0  ;;  %v761_v47 = vadd.f32 %v760_v45, %v759_v43  ;;  %v818_v48 = vpop.f32.mrb[25].mxu1  ;;  %v762_v49 = vpop.f32.mrb[26].mxu0 }
 0x129   :  { %v819_v50 = vadd.f32 %v818_v48, %v817_v44  ;;  %v820_v51 = vpop.f32.mrb[26].mxu1  ;;  %v763_v52 = vpop.f32.mrb[27].mxu0 }
 0x12a   :  { %639 = vst.msk [vmem:[%s1161_s3 + $0x58] sm:$0xff] %vm627_vm0, %v625_v46  ;;  %v521_v53 = vadd.f32 %v761_v47, %v1092_v0  ;;  %v821_v54 = vpop.f32.mrb[27].mxu1 }
 0x12c   :  { %v609_v55 = vadd.f32 %v819_v50, %v521_v53 }
 0x12e   :  { %v626_v56 = vmax.f32 %v609_v55, 0.0 }
 0x130   :  { %641 = vst.msk [vmem:[%s1161_s3 + $0x60] sm:$0x3] %vm640_vm1, %v626_v56 }

// kernel: forward.10
= control target key start
LH: loop header
LB: loop body
LE: loop exit
PB: predicated region body
PF: predicated region fallthrough
CT: control target
= control target key end

     0   :  { %v771_v1 = vmov 0.0   ;;  %vm772_vm0 = vmmov 0   ;;  %vm536_vm1 = vcmask 261120   ;;  %vm549_vm2 = vcmask 254976   ;;  %s1016_s1 = inlined_call_operand.vmem [shape: bf16[384,32], index: 1, kind: input, shape index: {}]   ;;  %s1017_s0 = inlined_call_operand.vmem [shape: bf16[98,384], index: 0, kind: input, shape index: {}]   ;;  %s1018_s2 = inlined_call_operand.vmem [shape: f32[1,32], index: 2, kind: input, shape index: {}]   ;;  %s1019_s3 = inlined_call_operand.vmem [shape: f32[98,32], index: 3, kind: output, shape index: {}]  }
   0x1   :  { %v720_v0 = vld [vmem:[%s1016_s1 + $0x40] sm:$0xff]   ;;  %674 = vmatprep.subr.bf16.mxu1 %v771_v1  ;;  %690 = vmatprep.mubr.msk.bf16.mxu1 %vm772_vm0, %v771_v1  ;;  %v723_v4 = vld [vmem:[%s1016_s1 + $0x48] sm:$0xff]   ;;  %v726_v7 = vld [vmem:[%s1016_s1 + $0x50] sm:$0xff]  }
   0x2   :  { %v721_v2 = vld [vmem:[%s1016_s1] sm:$0xff]   ;;  %601 = vmatprep.subr.bf16.mxu0 %v720_v0  ;;  %v724_v5 = vld [vmem:[%s1016_s1 + $0x8] sm:$0xff]   ;;  %v727_v8 = vld [vmem:[%s1016_s1 + $0x10] sm:$0xff]  }
   0x3   :  { %v722_v3 = vld [vmem:[%s1016_s1 + $0x80] sm:$0xff]   ;;  %602 = vmatpush3.bf16.msra.mxu0 %v721_v2  ;;  %v725_v6 = vld [vmem:[%s1016_s1 + $0x88] sm:$0xff]   ;;  %v728_v9 = vld [vmem:[%s1016_s1 + $0x90] sm:$0xff]  }
   0x4   :  { %675 = vmatpush3.bf16.msra.mxu1 %v722_v3  ;;  %603 = vmatprep.subr.bf16.mxu0 %v723_v4  ;;  %v729_v10 = vld [vmem:[%s1016_s1 + $0x58] sm:$0xff]   ;;  %v732_v13 = vld [vmem:[%s1016_s1 + $0x60] sm:$0xff]   ;;  %v735_v16 = vld [vmem:[%s1016_s1 + $0x68] sm:$0xff]  }
   0x5   :  { %676 = vmatprep.subr.bf16.mxu1 %v771_v1  ;;  %v730_v11 = vld [vmem:[%s1016_s1 + $0x18] sm:$0xff]   ;;  %v733_v14 = vld [vmem:[%s1016_s1 + $0x20] sm:$0xff]   ;;  %v736_v17 = vld [vmem:[%s1016_s1 + $0x28] sm:$0xff]  }
   0x6   :  { %v731_v12 = vld [vmem:[%s1016_s1 + $0x98] sm:$0xff]   ;;  %v734_v15 = vld [vmem:[%s1016_s1 + $0xa0] sm:$0xff]   ;;  %v737_v18 = vld [vmem:[%s1016_s1 + $0xa8] sm:$0xff]  }
   0x7   :  { %604 = vmatpush3.bf16.msra.mxu0 %v724_v5  ;;  %v738_v19 = vld [vmem:[%s1016_s1 + $0x70] sm:$0xff]   ;;  %v741_v22 = vld [vmem:[%s1016_s1 + $0x78] sm:$0xff]   ;;  %v743_v26 = vld [vmem:[%s1017_s0] ss:$12 sps:$4 sm:$0xff]  }
   0x8   :  { %677 = vmatpush3.bf16.msra.mxu1 %v725_v6  ;;  %605 = vmatprep.subr.bf16.mxu0 %v726_v7  ;;  %v739_v20 = vld [vmem:[%s1016_s1 + $0x30] sm:$0xff]   ;;  %v742_v24 = vld [vmem:[%s1016_s1 + $0x38] sm:$0xff]   ;;  %v751_v30 = vld [vmem:[%s1017_s0 + $0x20] ss:$12 sps:$4 sm:$0xff]  }
   0x9   :  { %678 = vmatprep.subr.bf16.mxu1 %v771_v1  ;;  %v740_v21 = vld [vmem:[%s1016_s1 + $0xb0] sm:$0xff]   ;;  %v746_v25 = vld [vmem:[%s1016_s1 + $0xb8] sm:$0xff]   ;;  %v762_v38 = vld [vmem:[%s1017_s0 + $0x60] ss:$12 sps:$4 sm:$0xff]  }
   0xa   :  { %v745_v23 = vld [vmem:[%s1017_s0 + $0x4] ss:$12 sps:$4 sm:$0xff]   ;;  %v747_v27 = vld [vmem:[%s1017_s0 + $0x8] ss:$12 sps:$4 sm:$0xff]   ;;  %v756_v34 = vld [vmem:[%s1017_s0 + $0x4c] ss:$12 sps:$4 sm:$0xff]  }
   0xb   :  { %606 = vmatpush3.bf16.msra.mxu0 %v727_v8  ;;  %379 = vmatprep.mubr.bf16.mxu0 %v745_v23  ;;  %v748_v28 = vld [vmem:[%s1017_s0 + $0x1c] ss:$12 sps:$4 sm:$0xff]   ;;  %v750_v29 = vld [vmem:[%s1017_s0 + $0x18] ss:$12 sps:$4 sm:$0xff]   ;;  %v752_v31 = vld [vmem:[%s1017_s0 + $0x34] ss:$12 sps:$4 sm:$0xff]  }
   0xc   :  { %679 = vmatpush3.bf16.msra.mxu1 %v728_v9  ;;  %607 = vmatprep.subr.bf16.mxu0 %v729_v10  ;;  %v754_v32 = vld [vmem:[%s1017_s0 + $0x30] ss:$12 sps:$4 sm:$0xff]   ;;  %v755_v33 = vld [vmem:[%s1017_s0 + $0x38] ss:$12 sps:$4 sm:$0xff]   ;;  %v758_v35 = vld [vmem:[%s1017_s0 + $0x48] ss:$12 sps:$4 sm:$0xff]  }
   0xd   :  { %680 = vmatprep.subr.bf16.mxu1 %v771_v1  ;;  %v759_v36 = vld [vmem:[%s1017_s0 + $0x50] ss:$12 sps:$4 sm:$0xff]   ;;  %v763_v39 = vld [vmem:[%s1017_s0 + $0x68] ss:$12 sps:$4 sm:$0xff]   ;;  %v766_v42 = vld [vmem:[%s1017_s0 + $0x78] ss:$12 sps:$4 sm:$0xff]  }
   0xe   :  { %v760_v37 = vld [vmem:[%s1017_s0 + $0x64] ss:$12 sps:$4 sm:$0xff]   ;;  %v764_v40 = vld [vmem:[%s1017_s0 + $0x7c] ss:$12 sps:$4 sm:$0xff]   ;;  %v767_v43 = vld [vmem:[%s1017_s0 + $0x80] ss:$12 sps:$4 sm:$0xff]  }
   0xf   :  { %608 = vmatpush3.bf16.msra.mxu0 %v730_v11  ;;  %v39_v41 = vld [vmem:[%s1017_s0 + $0x90] sm:$0x11]  ;;  %v770_v46 = vld [vmem:[%s1017_s0 + $0x98] ss:$0 sps:$4 sm:$0x11]  }
  0x10   :  { %681 = vmatpush3.bf16.msra.mxu1 %v731_v12  ;;  %609 = vmatprep.subr.bf16.mxu0 %v732_v13  ;;  %v575_v44 = vcombine.high %v39_v41, %v39_v41  ;;  %v574_v45 = vcombine.low %v39_v41, %v39_v41  ;;  %v950_v49 = vld [vmem:[%s1018_s2] ss:$0 sm:$0xff] }
  0x11   :  { %682 = vmatprep.subr.bf16.mxu1 %v771_v1 }
  0x13   :  { %610 = vmatpush3.bf16.msra.mxu0 %v733_v14 }
  0x14   :  { %683 = vmatpush3.bf16.msra.mxu1 %v734_v15  ;;  %611 = vmatprep.subr.bf16.mxu0 %v735_v16 }
  0x15   :  { %684 = vmatprep.subr.bf16.mxu1 %v771_v1 }
  0x17   :  { %612 = vmatpush3.bf16.msra.mxu0 %v736_v17 }
  0x18   :  { %685 = vmatpush3.bf16.msra.mxu1 %v737_v18  ;;  %613 = vmatprep.subr.bf16.mxu0 %v738_v19 }
  0x19   :  { %686 = vmatprep.subr.bf16.mxu1 %v771_v1 }
  0x1b   :  { %614 = vmatpush3.bf16.msra.mxu0 %v739_v20 }
  0x1c   :  { %687 = vmatpush3.bf16.msra.mxu1 %v740_v21  ;;  %615 = vmatprep.subr.bf16.mxu0 %v741_v22 }
  0x1d   :  { %688 = vmatprep.subr.bf16.mxu1 %v771_v1 }
  0x1f   :  { %616 = vmatpush3.bf16.msra.mxu0 %v742_v24 }
  0x20   :  { %689 = vmatpush3.bf16.msra.mxu1 %v746_v25 }
  0x22   :  { %380 = vmatmul.mubr.bf16.vlgmr.msra.gmra.mrb[0].mxu0 %v743_v26 }
  0x23   :  { %691 = vmatmul.mubr.bf16.vlgmr.msra.gmra.mrb[0].mxu1 %v747_v27  ;;  %387 = vmatprep.mubr.bf16.mxu0 %v748_v28 }
  0x24   :  { %694 = vmatprep.mubr.msk.bf16.mxu1 %vm772_vm0, %v771_v1 }
  0x2a   :  { %388 = vmatmul.mubr.bf16.gmra.mrb[4].mxu0 %v750_v29 }
  0x2b   :  { %695 = vmatmul.mubr.bf16.gmra.mrb[4].mxu1 %v751_v30  ;;  %395 = vmatprep.mubr.bf16.mxu0 %v752_v31 }
  0x2c   :  { %698 = vmatprep.mubr.msk.bf16.mxu1 %vm772_vm0, %v771_v1 }
  0x32   :  { %396 = vmatmul.mubr.bf16.gmra.mrb[8].mxu0 %v754_v32 }
  0x33   :  { %699 = vmatmul.mubr.bf16.gmra.mrb[8].mxu1 %v755_v33  ;;  %403 = vmatprep.mubr.bf16.mxu0 %v756_v34 }
  0x34   :  { %702 = vmatprep.mubr.msk.bf16.mxu1 %vm772_vm0, %v771_v1 }
  0x3a   :  { %404 = vmatmul.mubr.bf16.gmra.mrb[12].mxu0 %v758_v35 }
  0x3b   :  { %703 = vmatmul.mubr.bf16.gmra.mrb[12].mxu1 %v759_v36  ;;  %411 = vmatprep.mubr.bf16.mxu0 %v760_v37 }
  0x3c   :  { %706 = vmatprep.mubr.msk.bf16.mxu1 %vm772_vm0, %v771_v1 }
  0x42   :  { %412 = vmatmul.mubr.bf16.gmra.mrb[16].mxu0 %v762_v38 }
  0x43   :  { %707 = vmatmul.mubr.bf16.gmra.mrb[16].mxu1 %v763_v39  ;;  %419 = vmatprep.mubr.bf16.mxu0 %v764_v40 }
  0x44   :  { %710 = vmatprep.mubr.msk.bf16.mxu1 %vm772_vm0, %v771_v1 }
  0x4a   :  { %420 = vmatmul.mubr.bf16.gmra.mrb[20].mxu0 %v766_v42 }
  0x4b   :  { %711 = vmatmul.mubr.bf16.gmra.mrb[20].mxu1 %v767_v43  ;;  %427 = vmatprep.mubr.bf16.mxu0 %v575_v44 }
  0x4c   :  { %714 = vmatprep.mubr.msk.bf16.mxu1 %vm772_vm0, %v771_v1 }
  0x52   :  { %428 = vmatmul.mubr.bf16.gmra.mrb[24].mxu0 %v574_v45 }
  0x53   :  { %715 = vmatmul.mubr.bf16.gmra.mrb[24].mxu1 %v770_v46 }
  0xf5   :  { %v617_v47 = vpop.f32.mrb[0].mxu0 }
  0xf6   :  { %v618_v48 = vpop.f32.mrb[1].mxu0  ;;  %v469_v50 = vpop.f32.mrb[0].mxu1 }
  0xf7   :  { %v619_v51 = vadd.f32 %v618_v48, %v617_v47  ;;  %v620_v52 = vpop.f32.mrb[2].mxu0  ;;  %v692_v53 = vpop.f32.mrb[1].mxu1 }
  0xf8   :  { %v621_v54 = vpop.f32.mrb[3].mxu0  ;;  %v472_v55 = vpop.f32.mrb[2].mxu1 }
  0xf9   :  { %v382_v56 = vadd.f32 %v619_v51, %v950_v49  ;;  %v622_v57 = vadd.f32 %v621_v54, %v620_v52  ;;  %v693_v58 = vpop.f32.mrb[3].mxu1 }
  0xfb   :  { %v470_v59 = vadd.f32 %v469_v50, %v382_v56  ;;  %v385_v60 = vadd.f32 %v622_v57, %v950_v49 }
  0xfd   :  { %v523_v61 = vmax.f32 %v470_v59, 0.0  ;;  %v473_v62 = vadd.f32 %v472_v55, %v385_v60  ;;  %v623_v63 = vpop.f32.mrb[4].mxu0 }
  0xfe   :  { %v624_v0 = vpop.f32.mrb[5].mxu0  ;;  %v477_v1 = vpop.f32.mrb[4].mxu1 }
  0xff   :  { %537 = vst.msk [vmem:[%s1019_s3] sm:$0xff] %vm536_vm1, %v523_v61  ;;  %v524_v2 = vmax.f32 %v473_v62, 0.0  ;;  %v625_v3 = vadd.f32 %v624_v0, %v623_v63  ;;  %v626_v4 = vpop.f32.mrb[6].mxu0  ;;  %v696_v5 = vpop.f32.mrb[5].mxu1 }
 0x100   :  { %v627_v6 = vpop.f32.mrb[7].mxu0  ;;  %v480_v7 = vpop.f32.mrb[6].mxu1 }
 0x101   :  { %538 = vst.msk [vmem:[%s1019_s3 + $0x8] sm:$0xff] %vm536_vm1, %v524_v2  ;;  %v390_v8 = vadd.f32 %v625_v3, %v950_v49  ;;  %v628_v9 = vadd.f32 %v627_v6, %v626_v4  ;;  %v697_v10 = vpop.f32.mrb[7].mxu1 }
 0x103   :  { %v478_v11 = vadd.f32 %v477_v1, %v390_v8  ;;  %v393_v12 = vadd.f32 %v628_v9, %v950_v49 }
 0x105   :  { %v525_v13 = vmax.f32 %v478_v11, 0.0  ;;  %v481_v14 = vadd.f32 %v480_v7, %v393_v12  ;;  %v629_v15 = vpop.f32.mrb[8].mxu0 }
 0x106   :  { %v630_v16 = vpop.f32.mrb[9].mxu0  ;;  %v485_v17 = vpop.f32.mrb[8].mxu1 }
 0x107   :  { %539 = vst.msk [vmem:[%s1019_s3 + $0x10] sm:$0xff] %vm536_vm1, %v525_v13  ;;  %v526_v18 = vmax.f32 %v481_v14, 0.0  ;;  %v631_v19 = vadd.f32 %v630_v16, %v629_v15  ;;  %v632_v20 = vpop.f32.mrb[10].mxu0  ;;  %v700_v21 = vpop.f32.mrb[9].mxu1 }
 0x108   :  { %v633_v22 = vpop.f32.mrb[11].mxu0  ;;  %v488_v23 = vpop.f32.mrb[10].mxu1 }
 0x109   :  { %540 = vst.msk [vmem:[%s1019_s3 + $0x18] sm:$0xff] %vm536_vm1, %v526_v18  ;;  %v398_v24 = vadd.f32 %v631_v19, %v950_v49  ;;  %v634_v25 = vadd.f32 %v633_v22, %v632_v20  ;;  %v701_v26 = vpop.f32.mrb[11].mxu1 }
 0x10b   :  { %v486_v27 = vadd.f32 %v485_v17, %v398_v24  ;;  %v401_v28 = vadd.f32 %v634_v25, %v950_v49 }
 0x10d   :  { %v527_v29 = vmax.f32 %v486_v27, 0.0  ;;  %v489_v30 = vadd.f32 %v488_v23, %v401_v28  ;;  %v635_v31 = vpop.f32.mrb[12].mxu0 }
 0x10e   :  { %v636_v32 = vpop.f32.mrb[13].mxu0  ;;  %v493_v33 = vpop.f32.mrb[12].mxu1 }
 0x10f   :  { %541 = vst.msk [vmem:[%s1019_s3 + $0x20] sm:$0xff] %vm536_vm1, %v527_v29  ;;  %v528_v34 = vmax.f32 %v489_v30, 0.0  ;;  %v637_v35 = vadd.f32 %v636_v32, %v635_v31  ;;  %v638_v36 = vpop.f32.mrb[14].mxu0  ;;  %v704_v37 = vpop.f32.mrb[13].mxu1 }
 0x110   :  { %v639_v38 = vpop.f32.mrb[15].mxu0  ;;  %v496_v39 = vpop.f32.mrb[14].mxu1 }
 0x111   :  { %542 = vst.msk [vmem:[%s1019_s3 + $0x28] sm:$0xff] %vm536_vm1, %v528_v34  ;;  %v406_v40 = vadd.f32 %v637_v35, %v950_v49  ;;  %v640_v41 = vadd.f32 %v639_v38, %v638_v36  ;;  %v705_v42 = vpop.f32.mrb[15].mxu1 }
 0x113   :  { %v494_v43 = vadd.f32 %v493_v33, %v406_v40  ;;  %v409_v44 = vadd.f32 %v640_v41, %v950_v49 }
 0x115   :  { %v529_v45 = vmax.f32 %v494_v43, 0.0  ;;  %v497_v46 = vadd.f32 %v496_v39, %v409_v44  ;;  %v641_v47 = vpop.f32.mrb[16].mxu0 }
 0x116   :  { %v642_v48 = vpop.f32.mrb[17].mxu0  ;;  %v501_v50 = vpop.f32.mrb[16].mxu1 }
 0x117   :  { %543 = vst.msk [vmem:[%s1019_s3 + $0x30] sm:$0xff] %vm536_vm1, %v529_v45  ;;  %v530_v51 = vmax.f32 %v497_v46, 0.0  ;;  %v643_v52 = vadd.f32 %v642_v48, %v641_v47  ;;  %v644_v53 = vpop.f32.mrb[18].mxu0  ;;  %v708_v54 = vpop.f32.mrb[17].mxu1 }
 0x118   :  { %v645_v55 = vpop.f32.mrb[19].mxu0  ;;  %v504_v56 = vpop.f32.mrb[18].mxu1 }
 0x119   :  { %544 = vst.msk [vmem:[%s1019_s3 + $0x38] sm:$0xff] %vm536_vm1, %v530_v51  ;;  %v414_v57 = vadd.f32 %v643_v52, %v950_v49  ;;  %v646_v58 = vadd.f32 %v645_v55, %v644_v53  ;;  %v709_v59 = vpop.f32.mrb[19].mxu1 }
 0x11b   :  { %v502_v60 = vadd.f32 %v501_v50, %v414_v57  ;;  %v417_v61 = vadd.f32 %v646_v58, %v950_v49 }
 0x11d   :  { %v531_v62 = vmax.f32 %v502_v60, 0.0  ;;  %v505_v63 = vadd.f32 %v504_v56, %v417_v61  ;;  %v647_v0 = vpop.f32.mrb[20].mxu0 }
 0x11e   :  { %v648_v1 = vpop.f32.mrb[21].mxu0  ;;  %v509_v2 = vpop.f32.mrb[20].mxu1 }
 0x11f   :  { %545 = vst.msk [vmem:[%s1019_s3 + $0x40] sm:$0xff] %vm536_vm1, %v531_v62  ;;  %v532_v3 = vmax.f32 %v505_v63, 0.0  ;;  %v649_v4 = vadd.f32 %v648_v1, %v647_v0  ;;  %v650_v5 = vpop.f32.mrb[22].mxu0  ;;  %v712_v6 = vpop.f32.mrb[21].mxu1 }
 0x120   :  { %v651_v7 = vpop.f32.mrb[23].mxu0  ;;  %v512_v8 = vpop.f32.mrb[22].mxu1 }
 0x121   :  { %546 = vst.msk [vmem:[%s1019_s3 + $0x48] sm:$0xff] %vm536_vm1, %v532_v3  ;;  %v422_v9 = vadd.f32 %v649_v4, %v950_v49  ;;  %v652_v10 = vadd.f32 %v651_v7, %v650_v5  ;;  %v713_v11 = vpop.f32.mrb[23].mxu1 }
 0x123   :  { %v510_v12 = vadd.f32 %v509_v2, %v422_v9  ;;  %v425_v13 = vadd.f32 %v652_v10, %v950_v49 }
 0x125   :  { %v533_v14 = vmax.f32 %v510_v12, 0.0  ;;  %v513_v15 = vadd.f32 %v512_v8, %v425_v13  ;;  %v653_v16 = vpop.f32.mrb[24].mxu0 }
 0x126   :  { %v654_v17 = vpop.f32.mrb[25].mxu0  ;;  %v517_v18 = vpop.f32.mrb[24].mxu1 }
 0x127   :  { %547 = vst.msk [vmem:[%s1019_s3 + $0x50] sm:$0xff] %vm536_vm1, %v533_v14  ;;  %v534_v19 = vmax.f32 %v513_v15, 0.0  ;;  %v655_v20 = vadd.f32 %v654_v17, %v653_v16  ;;  %v656_v21 = vpop.f32.mrb[26].mxu0  ;;  %v716_v22 = vpop.f32.mrb[25].mxu1 }
 0x128   :  { %v657_v23 = vpop.f32.mrb[27].mxu0  ;;  %v520_v24 = vpop.f32.mrb[26].mxu1 }
 0x129   :  { %548 = vst.msk [vmem:[%s1019_s3 + $0x58] sm:$0xff] %vm536_vm1, %v534_v19  ;;  %v430_v25 = vadd.f32 %v655_v20, %v950_v49  ;;  %v717_v26 = vpop.f32.mrb[27].mxu1 }
 0x12b   :  { %v518_v27 = vadd.f32 %v517_v18, %v430_v25 }
 0x12d   :  { %v535_v28 = vmax.f32 %v518_v27, 0.0 }
 0x12f   :  { %550 = vst.msk [vmem:[%s1019_s3 + $0x60] sm:$0x3] %vm549_vm2, %v535_v28 }

// kernel: forward.11
= control target key start
LH: loop header
LB: loop body
LE: loop exit
PB: predicated region body
PF: predicated region fallthrough
CT: control target
= control target key end

     0   :  { %v5755_v2 = vmov 0   ;;  %v88_v10 = vlaneseq  ;;  %v5756_v11 = vmov 1966171168   ;;  %vm304_vm0 = vcmask 261120   ;;  %s7423_s0 = inlined_call_operand.vmem [shape: bf16[2,288], index: 0, kind: input, shape index: {}]   ;;  %s7424_s1 = inlined_call_operand.vmem [shape: bf16[288,256], index: 1, kind: input, shape index: {}]   ;;  %s7425_s2 = inlined_call_operand.vmem [shape: f32[1,256], index: 2, kind: input, shape index: {}]   ;;  %s7426_s3 = inlined_call_operand.vmem [shape: bf16[256,256], index: 3, kind: input, shape index: {}]   ;;  %s7427_s4 = inlined_call_operand.vmem [shape: f32[1,256], index: 4, kind: input, shape index: {}]   ;;  %s7428_s5 = inlined_call_operand.vmem [shape: bf16[256,64], index: 5, kind: input, shape index: {}]   ;;  %s7429_s6 = inlined_call_operand.vmem [shape: f32[1,64], index: 6, kind: input, shape index: {}]   ;;  %s7430_s7 = inlined_call_operand.vmem [shape: bf16[64,16], index: 7, kind: input, shape index: {}]   ;;  %s7431_s8 = inlined_call_operand.vmem [shape: f32[1,16], index: 8, kind: input, shape index: {}]   ;;  %s7432_s9 = inlined_call_operand.vmem [shape: f32[1,512], index: 9, kind: input, shape index: {}]   ;;  %s7433_s10 = inlined_call_operand.vmem [shape: f32[1,512], index: 10, kind: input, shape index: {}]   ;;  %s7434_s11 = inlined_call_operand.vmem [shape: f32[128,512], index: 11, kind: input, shape index: {}]   ;;  %s7435_s12 = inlined_call_operand.vmem [shape: f32[128,2], index: 12, kind: input, shape index: {}]   ;;  %s7436_s13 = inlined_call_operand.vmem [shape: f32[1,2], index: 13, kind: input, shape index: {}]   ;;  %s7437_s14 = inlined_call_operand.hbm [shape: f32[2,2], index: 14, kind: output, shape index: {}]  }
   0x1   :  { %v5353_v0 = vld [vmem:[%s7424_s1 + $0x4] ss:$8 sps:$4 sm:$0xff]   ;;  %v5355_v1 = vld [vmem:[%s7424_s1] ss:$8 sps:$4 sm:$0xff]   ;;  %381 = vmatprep.mubr.bf16.mxu1 %v5755_v2  ;;  %5336 = vset.pattern.permute.xlu0 %v5755_v2  ;;  %v5356_v3 = vld [vmem:[%s7424_s1 + $0x14] ss:$8 sps:$4 sm:$0xff]   ;;  %v108_v12 = vunpack.c.l.s4 %v5756_v11 }
   0x2   :  { %308 = vmatprep.subr.bf16.mxu0 %v5353_v0  ;;  %v5358_v4 = vld [vmem:[%s7424_s1 + $0x10] ss:$8 sps:$4 sm:$0xff]   ;;  %v5359_v5 = vld [vmem:[%s7424_s1 + $0x24] ss:$8 sps:$4 sm:$0xff]   ;;  %v5361_v6 = vld [vmem:[%s7424_s1 + $0x20] ss:$8 sps:$4 sm:$0xff]  }
   0x3   :  { %309 = vmatpush1.bf16.msra.mxu0 %v5355_v1  ;;  %v5362_v7 = vld [vmem:[%s7424_s1 + $0x34] ss:$8 sps:$4 sm:$0xff]   ;;  %v5364_v8 = vld [vmem:[%s7424_s1 + $0x30] ss:$8 sps:$4 sm:$0xff]   ;;  %v5365_v9 = vld [vmem:[%s7424_s1 + $0x44] ss:$8 sps:$4 sm:$0xff]   ;;  %v109_v16 = vunpack.c.0.s8 %v108_v12 }
   0x4   :  { %310 = vmatprep.subr.bf16.mxu0 %v5356_v3  ;;  %v5367_v13 = vld [vmem:[%s7424_s1 + $0x40] ss:$8 sps:$4 sm:$0xff]   ;;  %v5368_v14 = vld [vmem:[%s7424_s1 + $0x54] ss:$8 sps:$4 sm:$0xff]   ;;  %v5884_v15 = vshrl.u32 %v88_v10, 7 }
   0x5   :  { %v5370_v17 = vld [vmem:[%s7424_s1 + $0x50] ss:$8 sps:$4 sm:$0xff]   ;;  %v5395_v18 = vld [vmem:[%s7424_s1 + $0x104] ss:$8 sps:$4 sm:$0xff]   ;;  %v5399_v20 = vld [vmem:[%s7424_s1 + $0x100] ss:$8 sps:$4 sm:$0xff]  }
   0x6   :  { %v5371_v19 = vld [vmem:[%s7424_s1 + $0x64] ss:$8 sps:$4 sm:$0xff]   ;;  %349 = vmatprep.subr.bf16.mxu1 %v5395_v18  ;;  %v112_v21 = vsub.s32 %v109_v16, %v5884_v15  ;;  %v5401_v22 = vld [vmem:[%s7424_s1 + $0x114] ss:$8 sps:$4 sm:$0xff]   ;;  %v5373_v23 = vld [vmem:[%s7424_s1 + $0x60] ss:$8 sps:$4 sm:$0xff]  }
   0x7   :  { %311 = vmatpush1.bf16.msra.mxu0 %v5358_v4  ;;  %350 = vmatpush1.bf16.msra.mxu1 %v5399_v20  ;;  %v5405_v24 = vld [vmem:[%s7424_s1 + $0x110] ss:$8 sps:$4 sm:$0xff]   ;;  %v5374_v25 = vld [vmem:[%s7424_s1 + $0x74] ss:$8 sps:$4 sm:$0xff]   ;;  %v5407_v29 = vld [vmem:[%s7426_s3] ss:$8 sps:$4 sm:$0xff]  }
   0x8   :  { %312 = vmatprep.subr.bf16.mxu0 %v5359_v5  ;;  %351 = vmatprep.subr.bf16.mxu1 %v5401_v22  ;;  %v4030_v26 = vld.sshfl [vmem:[%s7423_s0] sm:$0x13 pattern:$0x75316420]  ;;  %v5409_v30 = vld [vmem:[%s7426_s3 + $0x4] ss:$8 sps:$4 sm:$0xff]  }
   0x9   :  { %v106_v27 = vcombine.high %v4030_v26, %v4030_v26  ;;  %v5914_v28 = vrot.slane %v4030_v26, %v112_v21  ;;  %v5376_v31 = vld [vmem:[%s7424_s1 + $0x70] ss:$8 sps:$4 sm:$0xff]   ;;  %v5412_v34 = vld [vmem:[%s7426_s3 + $0x14] ss:$8 sps:$4 sm:$0xff]   ;;  %v5377_v35 = vld [vmem:[%s7424_s1 + $0x84] ss:$8 sps:$4 sm:$0xff]  }
   0xa   :  { %v5410_v36 = vld [vmem:[%s7426_s3 + $0x10] ss:$8 sps:$4 sm:$0xff]   ;;  %v5379_v37 = vld [vmem:[%s7424_s1 + $0x80] ss:$8 sps:$4 sm:$0xff]   ;;  %v5415_v38 = vld [vmem:[%s7426_s3 + $0x24] ss:$8 sps:$4 sm:$0xff]  }
   0xb   :  { %313 = vmatpush1.bf16.msra.mxu0 %v5361_v6  ;;  %352 = vmatpush1.bf16.msra.mxu1 %v5405_v24  ;;  %v120_v32 = vrot.slane %v106_v27, %v112_v21  ;;  %v121_v33 = vcombine.high %v5914_v28, %v5914_v28  ;;  %v5380_v39 = vld [vmem:[%s7424_s1 + $0x94] ss:$8 sps:$4 sm:$0xff]   ;;  %v5413_v40 = vld [vmem:[%s7426_s3 + $0x20] ss:$8 sps:$4 sm:$0xff]   ;;  %v5382_v41 = vld [vmem:[%s7424_s1 + $0x90] ss:$8 sps:$4 sm:$0xff]  }
   0xc   :  { %314 = vmatprep.subr.bf16.mxu0 %v5362_v7  ;;  %598 = vmatprep.subr.bf16.mxu1 %v5409_v30  ;;  %v5418_v42 = vld [vmem:[%s7426_s3 + $0x34] ss:$8 sps:$4 sm:$0xff]   ;;  %v5383_v43 = vld [vmem:[%s7424_s1 + $0xa4] ss:$8 sps:$4 sm:$0xff]   ;;  %v5416_v44 = vld [vmem:[%s7426_s3 + $0x30] ss:$8 sps:$4 sm:$0xff]  }
   0xd   :  { %340 = vmatprep.mubr.bf16.mxu0 %v120_v32  ;;  %v5385_v45 = vld [vmem:[%s7424_s1 + $0xa0] ss:$8 sps:$4 sm:$0xff]   ;;  %v5421_v46 = vld [vmem:[%s7426_s3 + $0x44] ss:$8 sps:$4 sm:$0xff]   ;;  %v5386_v47 = vld [vmem:[%s7424_s1 + $0xb4] ss:$8 sps:$4 sm:$0xff]  }
   0xe   :  { %4067 = vmatmul.mubr.msk.bf16.vlgmr.msra.gmra.mrb[0].mxu1 %vm304_vm0, %v121_v33  ;;  %v5388_v48 = vld [vmem:[%s7424_s1 + $0xb0] ss:$8 sps:$4 sm:$0xff]   ;;  %v5389_v49 = vld [vmem:[%s7424_s1 + $0xc4] ss:$8 sps:$4 sm:$0xff]   ;;  %v5419_v50 = vld [vmem:[%s7426_s3 + $0x40] ss:$8 sps:$4 sm:$0xff]  }
   0xf   :  { %315 = vmatpush1.bf16.msra.mxu0 %v5364_v8  ;;  %599 = vmatpush1.bf16.msra.mxu1 %v5407_v29  ;;  %v5424_v51 = vld [vmem:[%s7426_s3 + $0x54] ss:$8 sps:$4 sm:$0xff]   ;;  %v5422_v52 = vld [vmem:[%s7426_s3 + $0x50] ss:$8 sps:$4 sm:$0xff]   ;;  %v5391_v53 = vld [vmem:[%s7424_s1 + $0xc0] ss:$8 sps:$4 sm:$0xff]  }
  0x10   :  { %316 = vmatprep.subr.bf16.mxu0 %v5365_v9  ;;  %600 = vmatprep.subr.bf16.mxu1 %v5412_v34  ;;  %v5427_v54 = vld [vmem:[%s7426_s3 + $0x64] ss:$8 sps:$4 sm:$0xff]   ;;  %v5392_v55 = vld [vmem:[%s7424_s1 + $0xd4] ss:$8 sps:$4 sm:$0xff]   ;;  %v5425_v56 = vld [vmem:[%s7426_s3 + $0x60] ss:$8 sps:$4 sm:$0xff]  }
  0x11   :  { %v5394_v57 = vld [vmem:[%s7424_s1 + $0xd0] ss:$8 sps:$4 sm:$0xff]   ;;  %v5430_v58 = vld [vmem:[%s7426_s3 + $0x74] ss:$8 sps:$4 sm:$0xff]   ;;  %v5397_v59 = vld [vmem:[%s7424_s1 + $0xe4] ss:$8 sps:$4 sm:$0xff]  }
  0x12   :  { %v5428_v60 = vld [vmem:[%s7426_s3 + $0x70] ss:$8 sps:$4 sm:$0xff]   ;;  %v5400_v61 = vld [vmem:[%s7424_s1 + $0xe0] ss:$8 sps:$4 sm:$0xff]   ;;  %v5433_v62 = vld [vmem:[%s7426_s3 + $0x84] ss:$8 sps:$4 sm:$0xff]  }
  0x13   :  { %317 = vmatpush1.bf16.msra.mxu0 %v5367_v13  ;;  %601 = vmatpush1.bf16.msra.mxu1 %v5410_v36  ;;  %v5403_v63 = vld [vmem:[%s7424_s1 + $0xf4] ss:$8 sps:$4 sm:$0xff]   ;;  %v5431_v0 = vld [vmem:[%s7426_s3 + $0x80] ss:$8 sps:$4 sm:$0xff]  }
  0x14   :  { %318 = vmatprep.subr.bf16.mxu0 %v5368_v14  ;;  %602 = vmatprep.subr.bf16.mxu1 %v5415_v38 }
  0x17   :  { %319 = vmatpush1.bf16.msra.mxu0 %v5370_v17  ;;  %603 = vmatpush1.bf16.msra.mxu1 %v5413_v40 }
  0x18   :  { %320 = vmatprep.subr.bf16.mxu0 %v5371_v19  ;;  %604 = vmatprep.subr.bf16.mxu1 %v5418_v42 }
  0x1b   :  { %321 = vmatpush1.bf16.msra.mxu0 %v5373_v23  ;;  %605 = vmatpush1.bf16.msra.mxu1 %v5416_v44 }
  0x1c   :  { %322 = vmatprep.subr.bf16.mxu0 %v5374_v25  ;;  %606 = vmatprep.subr.bf16.mxu1 %v5421_v46 }
  0x1f   :  { %323 = vmatpush1.bf16.msra.mxu0 %v5376_v31  ;;  %607 = vmatpush1.bf16.msra.mxu1 %v5419_v50 }
  0x20   :  { %324 = vmatprep.subr.bf16.mxu0 %v5377_v35  ;;  %608 = vmatprep.subr.bf16.mxu1 %v5424_v51 }
  0x23   :  { %325 = vmatpush1.bf16.msra.mxu0 %v5379_v37  ;;  %609 = vmatpush1.bf16.msra.mxu1 %v5422_v52 }
  0x24   :  { %326 = vmatprep.subr.bf16.mxu0 %v5380_v39  ;;  %610 = vmatprep.subr.bf16.mxu1 %v5427_v54 }
  0x27   :  { %327 = vmatpush1.bf16.msra.mxu0 %v5382_v41  ;;  %611 = vmatpush1.bf16.msra.mxu1 %v5425_v56 }
  0x28   :  { %328 = vmatprep.subr.bf16.mxu0 %v5383_v43  ;;  %612 = vmatprep.subr.bf16.mxu1 %v5430_v58 }
  0x2b   :  { %329 = vmatpush1.bf16.msra.mxu0 %v5385_v45  ;;  %613 = vmatpush1.bf16.msra.mxu1 %v5428_v60 }
  0x2c   :  { %330 = vmatprep.subr.bf16.mxu0 %v5386_v47 }
  0x2f   :  { %331 = vmatpush1.bf16.msra.mxu0 %v5388_v48 }
  0x30   :  { %332 = vmatprep.subr.bf16.mxu0 %v5389_v49 }
  0x33   :  { %333 = vmatpush1.bf16.msra.mxu0 %v5391_v53 }
  0x34   :  { %334 = vmatprep.subr.bf16.mxu0 %v5392_v55 }
  0x37   :  { %335 = vmatpush1.bf16.msra.mxu0 %v5394_v57 }
  0x38   :  { %336 = vmatprep.subr.bf16.mxu0 %v5397_v59 }
  0x39   :  { %19 = vsyncpa [#allocation3], 0  ;;  %v5406_v1 = vld [vmem:[%s7424_s1 + $0xf0] ss:$8 sps:$4 sm:$0xff]   ;;  %614 = vmatprep.subr.bf16.mxu1 %v5433_v62  ;;  %v5436_v2 = vld [vmem:[%s7426_s3 + $0x94] ss:$8 sps:$4 sm:$0xff]  }
  0x3a   :  { %615 = vmatpush1.bf16.msra.mxu1 %v5431_v0  ;;  %v5434_v3 = vld [vmem:[%s7426_s3 + $0x90] ss:$8 sps:$4 sm:$0xff]   ;;  %v5439_v4 = vld [vmem:[%s7426_s3 + $0xa4] ss:$8 sps:$4 sm:$0xff]   ;;  %v5437_v5 = vld [vmem:[%s7426_s3 + $0xa0] ss:$8 sps:$4 sm:$0xff]  }
  0x3b   :  { %337 = vmatpush1.bf16.msra.mxu0 %v5400_v61  ;;  %616 = vmatprep.subr.bf16.mxu1 %v5436_v2  ;;  %v5442_v6 = vld [vmem:[%s7426_s3 + $0xb4] ss:$8 sps:$4 sm:$0xff]   ;;  %v5440_v7 = vld [vmem:[%s7426_s3 + $0xb0] ss:$8 sps:$4 sm:$0xff]   ;;  %v5445_v8 = vld [vmem:[%s7426_s3 + $0xc4] ss:$8 sps:$4 sm:$0xff]  }
  0x3c   :  { %338 = vmatprep.subr.bf16.mxu0 %v5403_v63  ;;  %v5443_v9 = vld [vmem:[%s7426_s3 + $0xc0] ss:$8 sps:$4 sm:$0xff]   ;;  %v5446_v10 = vld [vmem:[%s7426_s3 + $0xd0] ss:$8 sps:$4 sm:$0xff]   ;;  %v5448_v11 = vld [vmem:[%s7426_s3 + $0xd4] ss:$8 sps:$4 sm:$0xff]  }
  0x3d   :  { %v5451_v12 = vld [vmem:[%s7426_s3 + $0xe4] ss:$8 sps:$4 sm:$0xff]   ;;  %v5449_v13 = vld [vmem:[%s7426_s3 + $0xe0] ss:$8 sps:$4 sm:$0xff]   ;;  %v5454_v14 = vld [vmem:[%s7426_s3 + $0xf4] ss:$8 sps:$4 sm:$0xff]  }
  0x3e   :  { %617 = vmatpush1.bf16.msra.mxu1 %v5434_v3  ;;  %v5452_v16 = vld [vmem:[%s7426_s3 + $0xf0] ss:$8 sps:$4 sm:$0xff]   ;;  %v5455_v17 = vld [vmem:[%s7428_s5 + $0x40] sm:$0xff]   ;;  %v6070_v22 = vsub.s32 0, %v5884_v15  ;;  %v6076_v24 = vsub.s32 1, %v5884_v15  ;;  %v5457_v40 = vld [vmem:[%s7428_s5 + $0x48] sm:$0xff]  }
  0x3f   :  { %339 = vmatpush1.bf16.msra.mxu0 %v5406_v1  ;;  %618 = vmatprep.subr.bf16.mxu1 %v5439_v4  ;;  %v86_v23 = vld [vmem:[%s7425_s2] sm:$0x3]  ;;  %v5458_v41 = vld [vmem:[%s7428_s5 + $0x8] sm:$0xff]   ;;  %v5459_v42 = vld [vmem:[%s7428_s5 + $0x50] sm:$0xff]   ;;  %v7438_v55 = vmov 0.0   ;;  %vm5758_vm1 = vmmov 0  }
  0x40   :  { %v91_v25 = vrot.slane %v86_v23, %v6070_v22  ;;  %v95_v26 = vrot.slane %v86_v23, %v6076_v24  ;;  %v5456_v38 = vld [vmem:[%s7428_s5] sm:$0xff]   ;;  %v5460_v43 = vld [vmem:[%s7428_s5 + $0x10] sm:$0xff]   ;;  %v5461_v44 = vld [vmem:[%s7428_s5 + $0x58] sm:$0xff]   ;;  %4216 = vmatprep.subr.bf16.mxu0 %v7438_v55  ;;  %vm856_vm2 = vcmask 523264   ;;  %s5775_s30 = smov [#allocation2]   ;;  %vm4014_vm3 = vcmask 9216  }
  0x41   :  { %v5462_v45 = vld [vmem:[%s7428_s5 + $0x18] sm:$0xff]   ;;  %v5463_v46 = vld [vmem:[%s7428_s5 + $0x60] sm:$0xff]   ;;  %v5465_v48 = vld [vmem:[%s7428_s5 + $0x68] sm:$0xff]   ;;  %s4022_s15 = sshll.u32 %s5775_s30, 4  ;;  %s4023_s15 = int_to_ptr.vmem [resolvable:$true] %s4022_s15 }
  0x42   :  { %341 = vmatmul.mubr.bf16.vlgmr.msra.gmra.mrb[0].mxu0 %v5914_v28  ;;  %619 = vmatpush1.bf16.msra.mxu1 %v5437_v5  ;;  %v5464_v47 = vld [vmem:[%s7428_s5 + $0x20] sm:$0xff]   ;;  %v5466_v49 = vld [vmem:[%s7428_s5 + $0x28] sm:$0xff]   ;;  %v5467_v50 = vld [vmem:[%s7428_s5 + $0x70] sm:$0xff]   ;;  %p5736_p1 = scmp.lt.s32.totalorder %s4023_s15, %s4023_s15 }
  0x43   :  { %620 = vmatprep.subr.bf16.mxu1 %v5442_v6  ;;  %v5468_v51 = vld [vmem:[%s7428_s5 + $0x30] sm:$0xff]   ;;  %v5469_v52 = vld [vmem:[%s7428_s5 + $0x78] sm:$0xff]   ;;  %v5471_v54 = vld [vmem:[%s7430_s7] sm:$0xff]   ;;  %4224 = vmatprep.mubr.msk.bf16.mxu0 %vm5758_vm1, %v7438_v55 }
  0x44   :  { %v5470_v53 = vld [vmem:[%s7428_s5 + $0x38] sm:$0xff]   ;;  %4217 = vmatpush3.bf16.msra.mxu0 %v5471_v54  ;;  %v5472_v56 = vld [vmem:[%s7430_s7 + $0x8] sm:$0xff]   ;;  %v426_v57 = vld [vmem:[%s7427_s4] sm:$0x3]  ;;  %s5731_s4 = scalar_lea.vmem %s4023_s15, 32 }
  0x45   :  { %4218 = vmatprep.subr.bf16.mxu0 %v7438_v55  ;;  %v431_v58 = vrot.slane %v426_v57, %v6070_v22  ;;  %v435_v59 = vrot.slane %v426_v57, %v6076_v24  ;;  %v5473_v4 = vld [vmem:[%s7430_s7 + $0x10] sm:$0xff]   ;;  %v5474_v5 = vld [vmem:[%s7430_s7 + $0x18] sm:$0xff]   ;;  %v903_v6 = vld [vmem:[%s7434_s11 + $0x8] sm:$0xff]  ;;  %p5732_p0 = scmp.ne.s32.totalorder %s4023_s15, %s5731_s4  ;;  %p5737_p2 = scmp.lt.s32.totalorder %s5731_s4, %s5731_s4 }
  0x46   :  { %621 = vmatpush1.bf16.msra.mxu1 %v5440_v7  ;;  %v907_v7 = vld [vmem:[%s7434_s11 + $0x28] sm:$0xff]  ;;  %v921_v23 = vld [vmem:[%s7434_s11 + $0x98] sm:$0xff]  ;;  %v960_v57 = vld [vmem:[%s7434_s11 + $0x1d0] sm:$0xff] }
  0x47   :  { %622 = vmatprep.subr.bf16.mxu1 %v5445_v8  ;;  %v6155_v8 = vpack.c.bf16 %v907_v7, %v903_v6  ;;  %v961_v54 = vld [vmem:[%s7434_s11 + $0x1d8] sm:$0xff]  ;;  %v915_v6 = vld [vmem:[%s7434_s11 + $0x68] sm:$0xff]  ;;  %p5738_p3 = por %p5737_p2, %p5736_p1 }
  0x48   :  { %4219 = vmatpush3.bf16.msra.mxu0 %v5472_v56  ;;  %v965_v56 = vld [vmem:[%s7434_s11 + $0x1f8] sm:$0xff] }
  0x49   :  { %4220 = vmatprep.subr.bf16.mxu0 %v7438_v55  ;;  %p5739_p4 = pnand %p5738_p3, %p5732_p0 }
  0x4a   :  { %623 = vmatpush1.bf16.msra.mxu1 %v5443_v9  ;;  %v905_v9 = vld [vmem:[%s7434_s11 + $0x18] sm:$0xff] }
  0x4b   :  { %624 = vmatprep.subr.bf16.mxu1 %v5448_v11 }
  0x4c   :  { %4221 = vmatpush3.bf16.msra.mxu0 %v5473_v4 }
  0x4d   :  { %4222 = vmatprep.subr.bf16.mxu0 %v7438_v55 }
  0x4e   :  { %625 = vmatpush1.bf16.msra.mxu1 %v5446_v10  ;;  %v909_v10 = vld [vmem:[%s7434_s11 + $0x38] sm:$0xff] }
  0x4f   :  { %626 = vmatprep.subr.bf16.mxu1 %v5451_v12  ;;  %v6163_v11 = vpack.c.bf16 %v909_v10, %v905_v9  ;;  %v904_v12 = vld [vmem:[%s7434_s11 + $0x10] sm:$0xff] }
  0x50   :  { %4223 = vmatpush3.bf16.msra.mxu0 %v5474_v5  ;;  %v911_v5 = vld [vmem:[%s7434_s11 + $0x48] sm:$0xff] }
  0x51   :  { %4264 = vmatprep.subr.bf16.mxu0 %v6155_v8 }
  0x52   :  { %627 = vmatpush1.bf16.msra.mxu1 %v5449_v13  ;;  %v908_v13 = vld [vmem:[%s7434_s11 + $0x30] sm:$0xff] }
  0x53   :  { %628 = vmatprep.subr.bf16.mxu1 %v5454_v14  ;;  %v6172_v14 = vpack.c.bf16 %v908_v13, %v904_v12  ;;  %v6338_v12 = vpack.c.bf16 %v915_v6, %v911_v5  ;;  %v910_v13 = vld [vmem:[%s7434_s11 + $0x40] sm:$0xff] }
  0x54   :  { %v962_v5 = vld [vmem:[%s7434_s11 + $0x1e0] sm:$0xff] }
  0x56   :  { %629 = vmatpush1.bf16.msra.mxu1 %v5452_v16  ;;  %v913_v16 = vld [vmem:[%s7434_s11 + $0x58] sm:$0xff] }
  0x57   :  { %4172 = vmatprep.subr.bf16.mxu1 %v5455_v17  ;;  %v917_v17 = vld [vmem:[%s7434_s11 + $0x78] sm:$0xff] }
  0xe1   :  { %v383_v18 = vpop.f32.mrb[0].mxu1 }
  0xe2   :  { %v385_v19 = vpop.f32.mrb[1].mxu1 }
  0xe3   :  { %v387_v20 = vpop.f32.mrb[2].mxu1 }
  0xe4   :  { %v388_v21 = vpop.f32.mrb[3].mxu1  ;;  %v916_v20 = vld [vmem:[%s7434_s11 + $0x70] sm:$0xff] }
 0x115   :  { %v342_v27 = vpop.f32.mrb[0].mxu0 }
 0x116   :  { %v343_v28 = vadd.f32 %v342_v27, %v91_v25  ;;  %v344_v29 = vpop.f32.mrb[1].mxu0  ;;  %v925_v25 = vld [vmem:[%s7434_s11 + $0xb8] sm:$0xff] }
 0x117   :  { %v345_v30 = vadd.f32 %v344_v29, %v95_v26  ;;  %v346_v31 = vpop.f32.mrb[2].mxu0  ;;  %v920_v26 = vld [vmem:[%s7434_s11 + $0x90] sm:$0xff]  ;;  %v6203_v27 = vpack.c.bf16 %v925_v25, %v921_v23  ;;  %v918_v25 = vld [vmem:[%s7434_s11 + $0x80] sm:$0xff] }
 0x118   :  { %v384_v32 = vadd.f32 %v383_v18, %v343_v28  ;;  %v347_v33 = vpop.f32.mrb[3].mxu0  ;;  %v912_v18 = vld [vmem:[%s7434_s11 + $0x50] sm:$0xff]  ;;  %v933_v31 = vld [vmem:[%s7434_s11 + $0xf8] sm:$0xff] }
 0x119   :  { %v386_v34 = vadd.f32 %v385_v19, %v345_v30  ;;  %v6185_v19 = vpack.c.bf16 %v917_v17, %v913_v16  ;;  %v6190_v21 = vpack.c.bf16 %v916_v20, %v912_v18  ;;  %v924_v28 = vld [vmem:[%s7434_s11 + $0xb0] sm:$0xff]  ;;  %v929_v30 = vld [vmem:[%s7434_s11 + $0xd8] sm:$0xff]  ;;  %v914_v16 = vld [vmem:[%s7434_s11 + $0x60] sm:$0xff] }
 0x11a   :  { %v390_v35 = vmax.f32 %v384_v32, 0.0  ;;  %v6208_v29 = vpack.c.bf16 %v924_v28, %v920_v26  ;;  %v928_v32 = vld [vmem:[%s7434_s11 + $0xd0] sm:$0xff]  ;;  %v6221_v33 = vpack.c.bf16 %v933_v31, %v929_v30  ;;  %v919_v17 = vld [vmem:[%s7434_s11 + $0x88] sm:$0xff]  ;;  %v6353_v20 = vpack.c.bf16 %v914_v16, %v910_v13  ;;  %v922_v26 = vld [vmem:[%s7434_s11 + $0xa0] sm:$0xff] }
 0x11b   :  { %v391_v36 = vmax.f32 %v386_v34, 0.0  ;;  %v932_v34 = vld [vmem:[%s7434_s11 + $0xf0] sm:$0xff]  ;;  %v923_v18 = vld [vmem:[%s7434_s11 + $0xa8] sm:$0xff]  ;;  %v6372_v31 = vpack.c.bf16 %v922_v26, %v918_v25 }
 0x11c   :  { %v392_v39 = vpack.c.bf16 %v390_v35, %v390_v35  ;;  %v6226_v35 = vpack.c.bf16 %v932_v34, %v928_v32  ;;  %v6357_v23 = vpack.c.bf16 %v923_v18, %v919_v17  ;;  %v927_v28 = vld [vmem:[%s7434_s11 + $0xc8] sm:$0xff]  ;;  %v926_v34 = vld [vmem:[%s7434_s11 + $0xc0] sm:$0xff] }
 0x11d   :  { %v393_v37 = vpack.c.bf16 %v391_v36, %v391_v36  ;;  %v937_v36 = vld [vmem:[%s7434_s11 + $0x118] sm:$0xff]  ;;  %v931_v30 = vld [vmem:[%s7434_s11 + $0xe8] sm:$0xff] }
 0x11e   :  { %v6375_v32 = vpack.c.bf16 %v931_v30, %v927_v28  ;;  %v5760_v28 = vmov 3   ;;  %v5761_v30 = vmov 1  }
 0x11f   :  { %630 = vmatprep.mubr.bf16.mxu1 %v393_v37  ;;  %v941_v37 = vld [vmem:[%s7434_s11 + $0x138] sm:$0xff] }
 0x120   :  { %631 = vmatmul.mubr.bf16.vlgmr.msra.gmra.mrb[4].mxu1 %v392_v39  ;;  %v6239_v39 = vpack.c.bf16 %v941_v37, %v937_v36  ;;  %v930_v36 = vld [vmem:[%s7434_s11 + $0xe0] sm:$0xff]  ;;  %v935_v37 = vld [vmem:[%s7434_s11 + $0x108] sm:$0xff] }
 0x121   :  { %4173 = vmatpush3.bf16.msra.mxu1 %v5456_v38  ;;  %v936_v38 = vld [vmem:[%s7434_s11 + $0x110] sm:$0xff] }
 0x122   :  { %4174 = vmatprep.subr.bf16.mxu1 %v5457_v40  ;;  %v940_v40 = vld [vmem:[%s7434_s11 + $0x130] sm:$0xff] }
 0x125   :  { %4175 = vmatpush3.bf16.msra.mxu1 %v5458_v41  ;;  %v6244_v41 = vpack.c.bf16 %v940_v40, %v936_v38  ;;  %v939_v38 = vld [vmem:[%s7434_s11 + $0x128] sm:$0xff]  ;;  %v6390_v40 = vpack.c.bf16 %v930_v36, %v926_v34  ;;  %v5762_v36 = vmov 4  }
 0x126   :  { %4176 = vmatprep.subr.bf16.mxu1 %v5459_v42  ;;  %v945_v42 = vld [vmem:[%s7434_s11 + $0x158] sm:$0xff] }
 0x129   :  { %4177 = vmatpush3.bf16.msra.mxu1 %v5460_v43  ;;  %v949_v43 = vld [vmem:[%s7434_s11 + $0x178] sm:$0xff] }
 0x12a   :  { %4178 = vmatprep.subr.bf16.mxu1 %v5461_v44  ;;  %v944_v44 = vld [vmem:[%s7434_s11 + $0x150] sm:$0xff] }
 0x12d   :  { %4179 = vmatpush3.bf16.msra.mxu1 %v5462_v45  ;;  %v6257_v45 = vpack.c.bf16 %v949_v43, %v945_v42  ;;  %v6393_v42 = vpack.c.bf16 %v939_v38, %v935_v37  ;;  %v934_v43 = vld [vmem:[%s7434_s11 + $0x100] sm:$0xff]  ;;  %v5763_v37 = vmov 5   ;;  %v5764_v38 = vmov 6  }
 0x12e   :  { %4180 = vmatprep.subr.bf16.mxu1 %v5463_v46  ;;  %v948_v46 = vld [vmem:[%s7434_s11 + $0x170] sm:$0xff] }
 0x131   :  { %4181 = vmatpush3.bf16.msra.mxu1 %v5464_v47  ;;  %v6262_v47 = vpack.c.bf16 %v948_v46, %v944_v44  ;;  %v938_v44 = vld [vmem:[%s7434_s11 + $0x120] sm:$0xff]  ;;  %v943_v46 = vld [vmem:[%s7434_s11 + $0x148] sm:$0xff] }
 0x132   :  { %4182 = vmatprep.subr.bf16.mxu1 %v5465_v48  ;;  %v953_v48 = vld [vmem:[%s7434_s11 + $0x198] sm:$0xff] }
 0x135   :  { %4183 = vmatpush3.bf16.msra.mxu1 %v5466_v49  ;;  %v957_v49 = vld [vmem:[%s7434_s11 + $0x1b8] sm:$0xff] }
 0x136   :  { %4184 = vmatprep.subr.bf16.mxu1 %v5467_v50  ;;  %v952_v50 = vld [vmem:[%s7434_s11 + $0x190] sm:$0xff] }
 0x139   :  { %4185 = vmatpush3.bf16.msra.mxu1 %v5468_v51  ;;  %v6275_v51 = vpack.c.bf16 %v957_v49, %v953_v48  ;;  %v947_v48 = vld [vmem:[%s7434_s11 + $0x168] sm:$0xff]  ;;  %v6408_v49 = vpack.c.bf16 %v938_v44, %v934_v43  ;;  %v5765_v43 = vmov 8   ;;  %v5766_v44 = vmov 7  }
 0x13a   :  { %4186 = vmatprep.subr.bf16.mxu1 %v5469_v52  ;;  %v956_v52 = vld [vmem:[%s7434_s11 + $0x1b0] sm:$0xff] }
 0x13d   :  { %4187 = vmatpush3.bf16.msra.mxu1 %v5470_v53  ;;  %v6280_v53 = vpack.c.bf16 %v956_v52, %v952_v50  ;;  %v6411_v50 = vpack.c.bf16 %v947_v48, %v943_v46  ;;  %v942_v52 = vld [vmem:[%s7434_s11 + $0x140] sm:$0xff]  ;;  %v5767_v46 = vmov 11   ;;  %v5768_v48 = vmov 9  }
 0x13e   :  { %4296 = vmatprep.subr.bf16.mxu1 %v6163_v11 }
 0x1f3   :  { %v632_v60 = vpop.f32.mrb[4].mxu1 }
 0x1f4   :  { %v633_v61 = vadd.f32 %v632_v60, %v431_v58  ;;  %v634_v62 = vpop.f32.mrb[5].mxu1  ;;  %v6293_v58 = vpack.c.bf16 %v965_v56, %v961_v54  ;;  %v946_v54 = vld [vmem:[%s7434_s11 + $0x160] sm:$0xff]  ;;  %v951_v56 = vld [vmem:[%s7434_s11 + $0x188] sm:$0xff] }
 0x1f5   :  { %v635_v63 = vadd.f32 %v634_v62, %v435_v59  ;;  %v636_v0 = vpop.f32.mrb[6].mxu1  ;;  %v964_v59 = vld [vmem:[%s7434_s11 + $0x1f0] sm:$0xff]  ;;  %v4100_v62 = vld [vmem:[%s7429_s6] ss:$0 sm:$0xff] }
 0x1f6   :  { %v637_v1 = vpop.f32.mrb[7].mxu1  ;;  %v639_v3 = vpack.c.bf16 %v633_v61, %v633_v61  ;;  %v6298_v60 = vpack.c.bf16 %v964_v59, %v960_v57  ;;  %v955_v57 = vld [vmem:[%s7434_s11 + $0x1a8] sm:$0xff]  ;;  %v6426_v59 = vpack.c.bf16 %v946_v54, %v942_v52  ;;  %v5769_v52 = vmov 14  }
 0x1f7   :  { %v640_v2 = vpack.c.bf16 %v635_v63, %v635_v63  ;;  %v5770_v54 = vmov 10  }
 0x1f9   :  { %808 = vmatprep.mubr.bf16.mxu1 %v640_v2  ;;  %v902_v2 = vld [vmem:[%s7434_s11] sm:$0xff] }
 0x1fa   :  { %809 = vmatmul.mubr.bf16.vlgmr.msra.gmra.mrb[8].mxu1 %v639_v3  ;;  %v906_v3 = vld [vmem:[%s7434_s11 + $0x20] sm:$0xff] }
 0x1fb   :  { %1336 = vmatprep.mubr.f32.mxu1 %v7438_v55  ;;  %4298 = vmatpush1.bf16.msra.mxu1 %v6172_v14  ;;  %v6336_v9 = vpack.c.bf16 %v906_v3, %v902_v2 }
 0x1fc   :  { %4300 = vmatprep.subr.bf16.mxu1 %v6185_v19 }
 0x1ff   :  { %4302 = vmatpush1.bf16.msra.mxu1 %v6190_v21 }
 0x200   :  { %4304 = vmatprep.subr.bf16.mxu1 %v6203_v27 }
 0x203   :  { %4306 = vmatpush1.bf16.msra.mxu1 %v6208_v29 }
 0x204   :  { %4308 = vmatprep.subr.bf16.mxu1 %v6221_v33 }
 0x207   :  { %4310 = vmatpush1.bf16.msra.mxu1 %v6226_v35 }
 0x208   :  { %4312 = vmatprep.subr.bf16.mxu1 %v6239_v39 }
 0x20b   :  { %4314 = vmatpush1.bf16.msra.mxu1 %v6244_v41 }
 0x20c   :  { %4316 = vmatprep.subr.bf16.mxu1 %v6257_v45 }
 0x20f   :  { %4318 = vmatpush1.bf16.msra.mxu1 %v6262_v47 }
 0x210   :  { %4320 = vmatprep.subr.bf16.mxu1 %v6275_v51 }
 0x213   :  { %4322 = vmatpush1.bf16.msra.mxu1 %v6280_v53 }
 0x214   :  { %4324 = vmatprep.subr.bf16.mxu1 %v6293_v58 }
 0x217   :  { %4326 = vmatpush1.bf16.msra.mxu1 %v6298_v60 }
 0x218   :  { %4360 = vmatprep.subr.bf16.mxu1 %v6163_v11 }
 0x21a   :  { %1337 = vmatmul.mubr.f32.vlgmr.msra.gmra.mrb[12].mxu1 %v7438_v55 }
 0x21b   :  { %4362 = vmatpush1.bf16.msra.mxu1 %v6172_v14  ;;  %1506 = vmatprep.mubr.f32.mxu1 %v7438_v55 }
 0x21c   :  { %4364 = vmatprep.subr.bf16.mxu1 %v6185_v19 }
 0x21f   :  { %4366 = vmatpush1.bf16.msra.mxu1 %v6190_v21 }
 0x220   :  { %4368 = vmatprep.subr.bf16.mxu1 %v6203_v27 }
 0x223   :  { %4370 = vmatpush1.bf16.msra.mxu1 %v6208_v29 }
 0x224   :  { %4372 = vmatprep.subr.bf16.mxu1 %v6221_v33 }
 0x227   :  { %4374 = vmatpush1.bf16.msra.mxu1 %v6226_v35 }
 0x228   :  { %4376 = vmatprep.subr.bf16.mxu1 %v6239_v39 }
 0x22b   :  { %4378 = vmatpush1.bf16.msra.mxu1 %v6244_v41 }
 0x22c   :  { %4380 = vmatprep.subr.bf16.mxu1 %v6257_v45 }
 0x22f   :  { %4382 = vmatpush1.bf16.msra.mxu1 %v6262_v47 }
 0x230   :  { %4384 = vmatprep.subr.bf16.mxu1 %v6275_v51 }
 0x233   :  { %4386 = vmatpush1.bf16.msra.mxu1 %v6280_v53 }
 0x234   :  { %4388 = vmatprep.subr.bf16.mxu1 %v6293_v58 }
 0x237   :  { %4390 = vmatpush1.bf16.msra.mxu1 %v6298_v60 }
 0x238   :  { %4424 = vmatprep.subr.bf16.mxu1 %v6163_v11 }
 0x2cd   :  { %v4188_v61 = vpop.f32.mrb[8].mxu1 }
 0x2ce   :  { %v4189_v63 = vpop.f32.mrb[9].mxu1 }
 0x2cf   :  { %v4190_v0 = vadd.f32 %v4189_v63, %v4188_v61  ;;  %v4191_v1 = vpop.f32.mrb[10].mxu1  ;;  %v6429_v61 = vpack.c.bf16 %v955_v57, %v951_v56  ;;  %v954_v63 = vld [vmem:[%s7434_s11 + $0x1a0] sm:$0xff]  ;;  %v5771_v57 = vmov 15  }
 0x2d0   :  { %v4192_v4 = vpop.f32.mrb[11].mxu1  ;;  %v963_v1 = vld [vmem:[%s7434_s11 + $0x1e8] sm:$0xff] }
 0x2d1   :  { %v811_v7 = vadd.f32 %v4190_v0, %v4100_v62  ;;  %v950_v62 = vld [vmem:[%s7434_s11 + $0x180] sm:$0xff]  ;;  %v959_v0 = vld [vmem:[%s7434_s11 + $0x1c8] sm:$0xff] }
 0x2d2   :  { %v6444_v2 = vpack.c.bf16 %v954_v63, %v950_v62  ;;  %v6447_v3 = vpack.c.bf16 %v963_v1, %v959_v0  ;;  %v958_v4 = vld [vmem:[%s7434_s11 + $0x1c0] sm:$0xff]  ;;  %v5772_v63 = vmov 12   ;;  %v5773_v0 = vmov 13  }
 0x2d3   :  { %v816_v10 = vpack.c.bf16 %v811_v7, %v811_v7  ;;  %v6456_v6 = vpack.c.bf16 %v962_v5, %v958_v4  ;;  %v5759_v7 = vmov 2   ;;  %v982_v1 = vsub.s32 2, %v5884_v15  ;;  %v900_v5 = vld [vmem:[%s7432_s9] sm:$0xf] }
 0x2d4   :  { %5338 = vset.pattern.permute.xlu1 %v5759_v7  ;;  %v986_v4 = vsub.s32 3, %v5884_v15  ;;  %v901_v7 = vld [vmem:[%s7433_s10] sm:$0xf] }
 0x2d5   :  { %4225 = vmatmul.mubr.msk.bf16.vlgmr.msra.gmra.mrb[4].mxu0 %vm856_vm2, %v816_v10  ;;  %v4117_v10 = vld [vmem:[%s7431_s8] ss:$0 sm:$0xff]  ;;  %v6507_v15 = vrot.slane %v901_v7, %v6070_v22 }
 0x2d6   :  { %4266 = vmatpush1.bf16.msra.mxu0 %v6336_v9  ;;  %1265 = vmatprep.mubr.f32.mxu0 %v7438_v55 }
 0x2d7   :  { %4268 = vmatprep.subr.bf16.mxu0 %v6338_v12 }
 0x2da   :  { %4270 = vmatpush1.bf16.msra.mxu0 %v6353_v20 }
 0x2db   :  { %4272 = vmatprep.subr.bf16.mxu0 %v6357_v23 }
 0x2de   :  { %4274 = vmatpush1.bf16.msra.mxu0 %v6372_v31 }
 0x2df   :  { %4276 = vmatprep.subr.bf16.mxu0 %v6375_v32 }
 0x2e2   :  { %4278 = vmatpush1.bf16.msra.mxu0 %v6390_v40 }
 0x2e3   :  { %4280 = vmatprep.subr.bf16.mxu0 %v6393_v42 }
 0x2e6   :  { %4282 = vmatpush1.bf16.msra.mxu0 %v6408_v49 }
 0x2e7   :  { %4284 = vmatprep.subr.bf16.mxu0 %v6411_v50 }
 0x2ea   :  { %4286 = vmatpush1.bf16.msra.mxu0 %v6426_v59 }
 0x2eb   :  { %4288 = vmatprep.subr.bf16.mxu0 %v6429_v61 }
 0x2ed   :  { %v6482_v26 = vpop.f32.mrb[12].mxu1 }
 0x2ee   :  { %4290 = vmatpush1.bf16.msra.mxu0 %v6444_v2  ;;  %v6484_v34 = vpop.f32.mrb[13].mxu1 }
 0x2ef   :  { %4292 = vmatprep.subr.bf16.mxu0 %v6447_v3 }
 0x2f2   :  { %4294 = vmatpush1.bf16.msra.mxu0 %v6456_v6 }
 0x2f3   :  { %4328 = vmatprep.subr.bf16.mxu0 %v6155_v8 }
 0x2f5   :  { %1266 = vmatmul.mubr.f32.vlgmr.msra.gmra.mrb[8].mxu0 %v7438_v55 }
 0x2f6   :  { %4330 = vmatpush1.bf16.msra.mxu0 %v6336_v9  ;;  %1435 = vmatprep.mubr.f32.mxu0 %v7438_v55 }
 0x2f7   :  { %4332 = vmatprep.subr.bf16.mxu0 %v6338_v12 }
 0x2fa   :  { %4334 = vmatpush1.bf16.msra.mxu0 %v6353_v20 }
 0x2fb   :  { %4336 = vmatprep.subr.bf16.mxu0 %v6357_v23 }
 0x2fe   :  { %4338 = vmatpush1.bf16.msra.mxu0 %v6372_v31 }
 0x2ff   :  { %4340 = vmatprep.subr.bf16.mxu0 %v6375_v32 }
 0x302   :  { %4342 = vmatpush1.bf16.msra.mxu0 %v6390_v40 }
 0x303   :  { %4344 = vmatprep.subr.bf16.mxu0 %v6393_v42 }
 0x306   :  { %4346 = vmatpush1.bf16.msra.mxu0 %v6408_v49 }
 0x307   :  { %4348 = vmatprep.subr.bf16.mxu0 %v6411_v50 }
 0x30a   :  { %4350 = vmatpush1.bf16.msra.mxu0 %v6426_v59 }
 0x30b   :  { %4352 = vmatprep.subr.bf16.mxu0 %v6429_v61 }
 0x30e   :  { %4354 = vmatpush1.bf16.msra.mxu0 %v6444_v2 }
 0x30f   :  { %4356 = vmatprep.subr.bf16.mxu0 %v6447_v3 }
 0x312   :  { %4358 = vmatpush1.bf16.msra.mxu0 %v6456_v6 }
 0x313   :  { %4392 = vmatprep.subr.bf16.mxu0 %v6155_v8 }
 0x3a8   :  { %v894_v13 = vpop.f32.mrb[4].mxu0 }
 0x3a9   :  { %v895_v16 = vadd.f32 %v4117_v10, %v894_v13  ;;  %v4226_v17 = vpop.f32.mrb[5].mxu0  ;;  %v6494_v10 = vrot.slane %v900_v5, %v982_v1  ;;  %v6496_v13 = vrot.slane %v900_v5, %v986_v4 }
 0x3aa   :  { %v897_v18 = vpop.f32.mrb[6].mxu0  ;;  %v6499_v17 = vrot.slane %v900_v5, %v6070_v22 }
 0x3ab   :  { %1034 = vperm.xlu1 %5338, %v895_v16   ;;  %968 = vperm.xlu0 %5336, %v895_v16   ;;  %v4227_v25 = vpop.f32.mrb[7].mxu0  ;;  %v6504_v18 = vrot.slane %v901_v7, %v986_v4 }
 0x3ac   :  { %v6510_v25 = vrot.slane %v901_v7, %v6076_v24 }
 0x3af   :  { %5339 = vset.pattern.permute.xlu1 %v5760_v28  ;;  %5337 = vset.pattern.permute.xlu0 %v5761_v30  ;;  %v6512_v28 = vrot.slane %v901_v7, %v982_v1 }
 0x3b0   :  { %1046 = vperm.xlu1 %5339, %v895_v16   ;;  %1022 = vperm.xlu0 %5337, %v895_v16  }
 0x3b4   :  { %5340 = vset.pattern.permute.xlu1 %v5762_v36  ;;  %5341 = vset.pattern.permute.xlu0 %v5763_v37 }
 0x3b5   :  { %1058 = vperm.xlu1 %5340, %v895_v16   ;;  %1070 = vperm.xlu0 %5341, %v895_v16  }
 0x3b9   :  { %5342 = vset.pattern.permute.xlu1 %v5764_v38  ;;  %5344 = vset.pattern.permute.xlu0 %v5765_v43 }
 0x3ba   :  { %1082 = vperm.xlu1 %5342, %v895_v16   ;;  %1106 = vperm.xlu0 %5344, %v895_v16  }
 0x3be   :  { %5343 = vset.pattern.permute.xlu1 %v5766_v44  ;;  %5347 = vset.pattern.permute.xlu0 %v5767_v46 }
 0x3bf   :  { %1094 = vperm.xlu1 %5343, %v895_v16   ;;  %1142 = vperm.xlu0 %5347, %v895_v16  }
 0x3c3   :  { %5345 = vset.pattern.permute.xlu1 %v5768_v48  ;;  %5350 = vset.pattern.permute.xlu0 %v5769_v52 }
 0x3c4   :  { %1118 = vperm.xlu1 %5345, %v895_v16   ;;  %1178 = vperm.xlu0 %5350, %v895_v16  }
 0x3c8   :  { %5346 = vset.pattern.permute.xlu1 %v5770_v54  ;;  %v1267_v56 = vpop.f32.mrb[8].mxu0  ;;  %5352 = vset.pattern.permute.xlu0 %v5771_v57 }
 0x3c9   :  { %1130 = vperm.xlu1 %5346, %v895_v16   ;;  %v1269_v62 = vpop.f32.mrb[9].mxu0 }
 0x3cd   :  { %5348 = vset.pattern.permute.xlu1 %v5772_v63 }
 0x3ce   :  { %1154 = vperm.xlu1 %5348, %v895_v16  }
 0x3d2   :  { %5349 = vset.pattern.permute.xlu1 %v5773_v0 }
 0x3d3   :  { %1166 = vperm.xlu1 %5349, %v895_v16  }
 0x3d7   :  { %5351 = vset.pattern.permute.xlu1 %v5771_v57 }
 0x3d8   :  { %1190 = vperm.xlu1 %5351, %v895_v16   ;;  %v6502_v16 = vrot.slane %v900_v5, %v6076_v24 }
 0x42a   :  { %v1035_v30 = vpop.permute.xlu1 %1034  ;;  %v969_v36 = vpop.permute.xlu0 %968 }
 0x42b   :  { %v992_v37 = vmul.f32 %v6499_v17, %v969_v36  ;;  %v993_v38 = vmul.f32 %v6502_v16, %v969_v36  ;;  %v994_v43 = vmul.f32 %v6494_v10, %v969_v36  ;;  %v995_v44 = vmul.f32 %v6496_v13, %v969_v36 }
 0x42c   :  { %v1037_v46 = vmul.f32 %v1035_v30, %v6499_v17  ;;  %v1039_v22 = vmul.f32 %v1035_v30, %v6494_v10  ;;  %v1038_v48 = vmul.f32 %v1035_v30, %v6502_v16  ;;  %v1040_v24 = vmul.f32 %v1035_v30, %v6496_v13 }
 0x42d   :  { %v1017_v52 = vadd.f32 %v6507_v15, %v992_v37  ;;  %v1018_v54 = vadd.f32 %v6510_v25, %v993_v38  ;;  %v1020_v57 = vadd.f32 %v6504_v18, %v995_v44  ;;  %v1019_v30 = vadd.f32 %v6512_v28, %v994_v43 }
 0x42e   :  { %v6526_v63 = vadd.f32 %v1037_v46, %v6507_v15  ;;  %v6529_v0 = vadd.f32 %v1039_v22, %v6512_v28  ;;  %v6532_v1 = vadd.f32 %v1038_v48, %v6510_v25  ;;  %v6535_v4 = vadd.f32 %v1040_v24, %v6504_v18 }
 0x42f   :  { %v1343_v5 = vadd.f32 %v1267_v56, %v1017_v52  ;;  %v1344_v7 = vadd.f32 %v1269_v62, %v1018_v54  ;;  %v1346_v36 = vadd.f32 %v6484_v34, %v1020_v57  ;;  %v1047_v37 = vpop.permute.xlu1 %1046  ;;  %v1023_v38 = vpop.permute.xlu0 %1022 }
 0x430   :  { %7440 = vst [vmem:[#allocation5_spill] sm:$0xff] %v6529_v0  ;;  %7441 = vst [vmem:[#allocation6_spill] sm:$0xff] %v6532_v1  ;;  %v1025_v44 = vmul.f32 %v1023_v38, %v6499_v17  ;;  %v1027_v46 = vmul.f32 %v1023_v38, %v6494_v10  ;;  %v1026_v22 = vmul.f32 %v1023_v38, %v6502_v16 }
 0x431   :  { %7442 = vst [vmem:[#allocation7_spill] sm:$0xff] %v6535_v4  ;;  %v1028_v48 = vmul.f32 %v1023_v38, %v6496_v13  ;;  %v4123_v55 = vmul.f32 -1.442695, %v1343_v5  ;;  %v4124_v1 = vmul.f32 -1.442695, %v1344_v7  ;;  %v1049_v52 = vmul.f32 %v1047_v37, %v6499_v17 }
 0x432   :  { %v4125_v24 = vmul.f32 -1.442695, %v1346_v36  ;;  %v6544_v56 = vadd.f32 %v1025_v44, %v6507_v15  ;;  %v6547_v62 = vadd.f32 %v1027_v46, %v6512_v28  ;;  %v6550_v34 = vadd.f32 %v1026_v22, %v6510_v25 }
 0x433   :  { %v6553_v43 = vadd.f32 %v1028_v48, %v6504_v18  ;;  %5475 = vpow2.f32 %v4123_v55  ;;  %v1051_v54 = vmul.f32 %v1047_v37, %v6494_v10  ;;  %v1050_v57 = vmul.f32 %v1047_v37, %v6502_v16 }
 0x434   :  { %5477 = vpow2.f32 %v4124_v1  ;;  %v1345_v5 = vadd.f32 %v6482_v26, %v1019_v30  ;;  %v1059_v7 = vpop.permute.xlu1 %1058  ;;  %v1071_v36 = vpop.permute.xlu0 %1070  ;;  %v1052_v38 = vmul.f32 %v1047_v37, %v6496_v13  ;;  %v6561_v44 = vadd.f32 %v1049_v52, %v6507_v15 }
 0x435   :  { %5479 = vpow2.f32 %v4125_v24  ;;  %v6564_v46 = vadd.f32 %v1051_v54, %v6512_v28  ;;  %v6567_v55 = vadd.f32 %v1050_v57, %v6510_v25  ;;  %v1061_v1 = vmul.f32 %v1059_v7, %v6499_v17 }
 0x436   :  { %7443 = vst [vmem:[#allocation8_spill] sm:$0xff] %v6561_v44  ;;  %v6570_v22 = vadd.f32 %v1052_v38, %v6504_v18  ;;  %v1063_v26 = vmul.f32 %v1059_v7, %v6494_v10  ;;  %v1062_v30 = vmul.f32 %v1059_v7, %v6502_v16  ;;  %v1064_v37 = vmul.f32 %v1059_v7, %v6496_v13 }
 0x437   :  { %7444 = vst [vmem:[#allocation9_spill] sm:$0xff] %v6564_v46  ;;  %7445 = vst [vmem:[#allocation10_spill] sm:$0xff] %v6567_v55  ;;  %v1073_v48 = vmul.f32 %v1071_v36, %v6499_v17  ;;  %v1075_v24 = vmul.f32 %v1071_v36, %v6494_v10  ;;  %v1074_v52 = vmul.f32 %v1071_v36, %v6502_v16  ;;  %5481 = vtanh.f32 %v1345_v5 }
 0x438   :  { %7446 = vst [vmem:[#allocation11_spill] sm:$0xff] %v6570_v22  ;;  %v6580_v54 = vadd.f32 %v1061_v1, %v6507_v15  ;;  %v6583_v57 = vadd.f32 %v1063_v26, %v6512_v28  ;;  %v6586_v38 = vadd.f32 %v1062_v30, %v6510_v25  ;;  %v1076_v22 = vmul.f32 %v1071_v36, %v6496_v13 }
 0x439   :  { %v1083_v55 = vpop.permute.xlu1 %1082  ;;  %v1107_v46 = vpop.permute.xlu0 %1106  ;;  %v6590_v7 = vadd.f32 %v1064_v37, %v6504_v18  ;;  %v6593_v44 = vadd.f32 %v1073_v48, %v6507_v15  ;;  %v6596_v4 = vadd.f32 %v1075_v24, %v6512_v28  ;;  %v6599_v1 = vadd.f32 %v1074_v52, %v6510_v25 }
 0x43a   :  { %7447 = vst [vmem:[#allocation12_spill] sm:$0xff] %v6580_v54  ;;  %7448 = vst [vmem:[#allocation13_spill] sm:$0xff] %v6583_v57  ;;  %v6602_v26 = vadd.f32 %v1076_v22, %v6504_v18  ;;  %v1085_v30 = vmul.f32 %v1083_v55, %v6499_v17  ;;  %v1087_v36 = vmul.f32 %v1083_v55, %v6494_v10 }
 0x43b   :  { %7449 = vst [vmem:[#allocation14_spill] sm:$0xff] %v6586_v38  ;;  %7450 = vst [vmem:[#allocation15_spill] sm:$0xff] %v6590_v7  ;;  %v1086_v38 = vmul.f32 %v1083_v55, %v6502_v16  ;;  %v1088_v37 = vmul.f32 %v1083_v55, %v6496_v13  ;;  %v1109_v48 = vmul.f32 %v1107_v46, %v6499_v17 }
 0x43c   :  { %7451 = vst [vmem:[#allocation16_spill] sm:$0xff] %v6593_v44  ;;  %7452 = vst [vmem:[#allocation17_spill] sm:$0xff] %v6596_v4  ;;  %v1111_v44 = vmul.f32 %v1107_v46, %v6494_v10  ;;  %v1110_v24 = vmul.f32 %v1107_v46, %v6502_v16  ;;  %v6612_v52 = vadd.f32 %v1085_v30, %v6507_v15 }
 0x43d   :  { %7453 = vst [vmem:[#allocation18_spill] sm:$0xff] %v6599_v1  ;;  %7454 = vst [vmem:[#allocation19_spill] sm:$0xff] %v6602_v26  ;;  %v6615_v22 = vadd.f32 %v1087_v36, %v6512_v28  ;;  %v6618_v26 = vadd.f32 %v1086_v38, %v6510_v25  ;;  %v1112_v1 = vmul.f32 %v1107_v46, %v6496_v13  ;;  %v5476_v4 = vpop.eup %5475 }
 0x43e   :  { %7455 = vst [vmem:[#allocation20_spill] sm:$0xff] %v6612_v52  ;;  %v6622_v55 = vadd.f32 %v1088_v37, %v6504_v18  ;;  %v6625_v7 = vadd.f32 %v1109_v48, %v6507_v15  ;;  %v6628_v57 = vadd.f32 %v1111_v44, %v6512_v28  ;;  %v6631_v30 = vadd.f32 %v1110_v24, %v6510_v25  ;;  %v5478_v36 = vpop.eup %5477  ;;  %v1095_v38 = vpop.permute.xlu1 %1094 }
 0x43f   :  { %7456 = vst [vmem:[#allocation21_spill] sm:$0xff] %v6615_v22  ;;  %7457 = vst [vmem:[#allocation22_spill] sm:$0xff] %v6618_v26  ;;  %v1350_v22 = vadd.f32 1.0, %v5476_v4  ;;  %v1143_v26 = vpop.permute.xlu0 %1142  ;;  %v6634_v46 = vadd.f32 %v1112_v1, %v6504_v18  ;;  %v5480_v52 = vpop.eup %5479  ;;  %v1356_v37 = vadd.f32 1.0, %v5478_v36  ;;  %v1099_v48 = vmul.f32 %v1095_v38, %v6494_v10 }
 0x440   :  { %7458 = vst [vmem:[#allocation23_spill] sm:$0xff] %v6622_v55  ;;  %7459 = vst [vmem:[#allocation24_spill] sm:$0xff] %v6625_v7  ;;  %v1097_v55 = vmul.f32 %v1095_v38, %v6499_v17  ;;  %v1098_v44 = vmul.f32 %v1095_v38, %v6502_v16  ;;  %v1100_v24 = vmul.f32 %v1095_v38, %v6496_v13 }
 0x441   :  { %7460 = vst [vmem:[#allocation25_spill] sm:$0xff] %v6628_v57  ;;  %7461 = vst [vmem:[#allocation26_spill] sm:$0xff] %v6631_v30  ;;  %5483 = vrcp.f32 %v1350_v22  ;;  %v1145_v30 = vmul.f32 %v1143_v26, %v6499_v17  ;;  %v6645_v5 = vadd.f32 %v1099_v48, %v6512_v28  ;;  %v1147_v22 = vmul.f32 %v1143_v26, %v6494_v10 }
 0x442   :  { %7462 = vst [vmem:[#allocation27_spill] sm:$0xff] %v6634_v46  ;;  %5485 = vrcp.f32 %v1356_v37  ;;  %v6642_v4 = vadd.f32 %v1097_v55, %v6507_v15  ;;  %v6648_v1 = vadd.f32 %v1098_v44, %v6510_v25  ;;  %v6651_v36 = vadd.f32 %v1100_v24, %v6504_v18 }
 0x443   :  { %7464 = vst [vmem:[#allocation29_spill] sm:$0xff] %v6645_v5  ;;  %v6654_v46 = vadd.f32 %v1145_v30, %v6507_v15  ;;  %v1119_v38 = vpop.permute.xlu1 %1118  ;;  %v1179_v57 = vpop.permute.xlu0 %1178  ;;  %v1146_v37 = vmul.f32 %v1143_v26, %v6502_v16  ;;  %v1148_v55 = vmul.f32 %v1143_v26, %v6496_v13  ;;  %v6668_v5 = vadd.f32 %v1147_v22, %v6512_v28 }
 0x444   :  { %7463 = vst [vmem:[#allocation28_spill] sm:$0xff] %v6642_v4  ;;  %7465 = vst [vmem:[#allocation30_spill] sm:$0xff] %v6648_v1  ;;  %v1181_v48 = vmul.f32 %v1179_v57, %v6499_v17  ;;  %v1182_v7 = vmul.f32 %v1179_v57, %v6502_v16  ;;  %v1183_v44 = vmul.f32 %v1179_v57, %v6494_v10 }
 0x445   :  { %7466 = vst [vmem:[#allocation31_spill] sm:$0xff] %v6651_v36  ;;  %7467 = vst [vmem:[#allocation32_spill] sm:$0xff] %v6654_v46  ;;  %v1184_v24 = vmul.f32 %v1179_v57, %v6496_v13  ;;  %v1121_v36 = vmul.f32 %v1119_v38, %v6499_v17  ;;  %v1123_v30 = vmul.f32 %v1119_v38, %v6494_v10 }
 0x446   :  { %v1122_v46 = vmul.f32 %v1119_v38, %v6502_v16  ;;  %v1124_v1 = vmul.f32 %v1119_v38, %v6496_v13  ;;  %7468 = vst [vmem:[#allocation33_spill] sm:$0xff] %v6668_v5  ;;  %v6671_v26 = vadd.f32 %v1146_v37, %v6510_v25  ;;  %v6674_v4 = vadd.f32 %v1148_v55, %v6504_v18  ;;  %v5482_v37 = vpop.eup %5481 }
 0x447   :  { %v6677_v54 = vadd.f32 %v1181_v48, %v6507_v15  ;;  %v6680_v57 = vadd.f32 %v1121_v36, %v6507_v15  ;;  %v6683_v0 = vadd.f32 %v1123_v30, %v6512_v28  ;;  %v6692_v55 = vadd.f32 %v1183_v44, %v6512_v28 }
 0x448   :  { %7469 = vst [vmem:[#allocation34_spill] sm:$0xff] %v6671_v26  ;;  %7470 = vst [vmem:[#allocation35_spill] sm:$0xff] %v6674_v4  ;;  %v6686_v38 = vadd.f32 %v1122_v46, %v6510_v25  ;;  %v6689_v22 = vadd.f32 %v1124_v1, %v6504_v18  ;;  %v1131_v26 = vpop.permute.xlu1 %1130  ;;  %v6695_v48 = vadd.f32 %v1182_v7, %v6510_v25  ;;  %v1363_v5 = vadd.f32 1.0, %v5480_v52 }
 0x449   :  { %7471 = vst [vmem:[#allocation36_spill] sm:$0xff] %v6677_v54  ;;  %7472 = vst [vmem:[#allocation37_spill] sm:$0xff] %v6683_v0  ;;  %v6698_v36 = vadd.f32 %v1184_v24, %v6504_v18  ;;  %v1133_v30 = vmul.f32 %v1131_v26, %v6499_v17  ;;  %v1135_v54 = vmul.f32 %v1131_v26, %v6494_v10 }
 0x44a   :  { %7473 = vst [vmem:[#allocation38_spill] sm:$0xff] %v6686_v38  ;;  %7474 = vst [vmem:[#allocation39_spill] sm:$0xff] %v6689_v22  ;;  %v1134_v46 = vmul.f32 %v1131_v26, %v6502_v16  ;;  %v1136_v1 = vmul.f32 %v1131_v26, %v6496_v13  ;;  %5487 = vrcp.f32 %v1363_v5 }
 0x44b   :  { %7475 = vst [vmem:[#allocation40_spill] sm:$0xff] %v6692_v55  ;;  %7476 = vst [vmem:[#allocation41_spill] sm:$0xff] %v6695_v48  ;;  %v5484_v4 = vpop.eup %5483  ;;  %v6705_v44 = vadd.f32 %v1133_v30, %v6507_v15  ;;  %v6708_v7 = vadd.f32 %v1135_v54, %v6512_v28 }
 0x44c   :  { %7477 = vst [vmem:[#allocation42_spill] sm:$0xff] %v6698_v36  ;;  %v5486_v22 = vpop.eup %5485  ;;  %v1367_v38 = vmul.f32 %v5484_v4, %v5482_v37  ;;  %v6711_v24 = vadd.f32 %v1134_v46, %v6510_v25  ;;  %v6714_v48 = vadd.f32 %v1136_v1, %v6504_v18 }
 0x44d   :  { %v1366_v36 = vmul.f32 0.0, %v5486_v22  ;;  %v1155_v55 = vpop.permute.xlu1 %1154 }
 0x44e   :  { %v1157_v52 = vmul.f32 %v1155_v55, %v6499_v17  ;;  %v1159_v4 = vmul.f32 %v1155_v55, %v6494_v10  ;;  %v1158_v26 = vmul.f32 %v1155_v55, %v6502_v16  ;;  %v1160_v54 = vmul.f32 %v1155_v55, %v6496_v13 }
 0x44f   :  { %v6716_v0 = vadd.f32 %v1367_v38, %v1366_v36 }
 0x450   :  { %v6724_v37 = vadd.f32 %v1157_v52, %v6507_v15  ;;  %v6727_v22 = vadd.f32 %v1159_v4, %v6512_v28  ;;  %v6730_v38 = vadd.f32 %v1158_v26, %v6510_v25  ;;  %v6733_v36 = vadd.f32 %v1160_v54, %v6504_v18 }
 0x451   :  { %5489 = vtanh.f32 %v6716_v0 }
 0x452   :  { %7478 = vst [vmem:[#allocation43_spill] sm:$0xff] %v6724_v37  ;;  %7479 = vst [vmem:[#allocation44_spill] sm:$0xff] %v6727_v22  ;;  %v1167_v30 = vpop.permute.xlu1 %1166 }
 0x453   :  { %7480 = vst [vmem:[#allocation45_spill] sm:$0xff] %v6730_v38  ;;  %7481 = vst [vmem:[#allocation46_spill] sm:$0xff] %v6733_v36  ;;  %v1169_v46 = vmul.f32 %v1167_v30, %v6499_v17  ;;  %v1171_v5 = vmul.f32 %v1167_v30, %v6494_v10  ;;  %v1170_v55 = vmul.f32 %v1167_v30, %v6502_v16 }
 0x454   :  { %v1172_v1 = vmul.f32 %v1167_v30, %v6496_v13 }
 0x455   :  { %v6740_v52 = vadd.f32 %v1169_v46, %v6507_v15  ;;  %v6743_v4 = vadd.f32 %v1171_v5, %v6512_v28  ;;  %v6746_v26 = vadd.f32 %v1170_v55, %v6510_v25  ;;  %v5488_v46 = vpop.eup %5487 }
 0x456   :  { %v6749_v54 = vadd.f32 %v1172_v1, %v6504_v18 }
 0x457   :  { %7482 = vst [vmem:[#allocation47_spill] sm:$0xff] %v6740_v52  ;;  %v1191_v36 = vpop.permute.xlu1 %1190 }
 0x458   :  { %7483 = vst [vmem:[#allocation48_spill] sm:$0xff] %v6749_v54  ;;  %v1193_v38 = vmul.f32 %v1191_v36, %v6499_v17  ;;  %v1194_v22 = vmul.f32 %v1191_v36, %v6502_v16  ;;  %v1195_v37 = vmul.f32 %v1191_v36, %v6494_v10  ;;  %v1196_v30 = vmul.f32 %v1191_v36, %v6496_v13 }
 0x459   :  { %v7485_v10 = vmov 0.0  }
 0x45a   :  { %v6756_v5 = vadd.f32 %v1193_v38, %v6507_v15  ;;  %v6759_v55 = vadd.f32 %v1195_v37, %v6512_v28  ;;  %v6762_v1 = vadd.f32 %v1194_v22, %v6510_v25  ;;  %v6765_v54 = vadd.f32 %v1196_v30, %v6504_v18 }
 0x45b   :  { %v5490_v52 = vpop.eup %5489 }
 0x45c   :  { %7484 = vst [vmem:[#allocation49_spill] sm:$0xff] %v6765_v54  ;;  %v1370_v17 = vmul.f32 %v5490_v52, %v5488_v46 }
 0x45e   :  { %1436 = vmatmul.mubr.f32.vlgmr.msra.gmra.mrb[10].mxu0 %v1370_v17  ;;  %1507 = vmatmul.mubr.f32.vlgmr.msra.gmra.mrb[14].mxu1 %v1370_v17 }
 0x45f   :  { %4394 = vmatpush1.bf16.msra.mxu0 %v6336_v9  ;;  %4426 = vmatpush1.bf16.msra.mxu1 %v6172_v14 }
 0x460   :  { %4396 = vmatprep.subr.bf16.mxu0 %v6338_v12  ;;  %4428 = vmatprep.subr.bf16.mxu1 %v6185_v19 }
 0x461   :  { %1605 = vmatprep.mubr.f32.mxu0 %v7485_v10  ;;  %1676 = vmatprep.mubr.f32.mxu1 %v7485_v10 }
 0x463   :  { %4398 = vmatpush1.bf16.msra.mxu0 %v6353_v20  ;;  %4430 = vmatpush1.bf16.msra.mxu1 %v6190_v21 }
 0x464   :  { %4400 = vmatprep.subr.bf16.mxu0 %v6357_v23  ;;  %4432 = vmatprep.subr.bf16.mxu1 %v6203_v27 }
 0x467   :  { %4402 = vmatpush1.bf16.msra.mxu0 %v6372_v31  ;;  %4434 = vmatpush1.bf16.msra.mxu1 %v6208_v29 }
 0x468   :  { %4404 = vmatprep.subr.bf16.mxu0 %v6375_v32  ;;  %4436 = vmatprep.subr.bf16.mxu1 %v6221_v33 }
 0x46b   :  { %4406 = vmatpush1.bf16.msra.mxu0 %v6390_v40  ;;  %4438 = vmatpush1.bf16.msra.mxu1 %v6226_v35 }
 0x46c   :  { %4408 = vmatprep.subr.bf16.mxu0 %v6393_v42  ;;  %4440 = vmatprep.subr.bf16.mxu1 %v6239_v39 }
 0x46f   :  { %4410 = vmatpush1.bf16.msra.mxu0 %v6408_v49  ;;  %4442 = vmatpush1.bf16.msra.mxu1 %v6244_v41 }
 0x470   :  { %4412 = vmatprep.subr.bf16.mxu0 %v6411_v50  ;;  %4444 = vmatprep.subr.bf16.mxu1 %v6257_v45 }
 0x473   :  { %4414 = vmatpush1.bf16.msra.mxu0 %v6426_v59  ;;  %4446 = vmatpush1.bf16.msra.mxu1 %v6262_v47 }
 0x474   :  { %4416 = vmatprep.subr.bf16.mxu0 %v6429_v61  ;;  %4448 = vmatprep.subr.bf16.mxu1 %v6275_v51 }
 0x477   :  { %4418 = vmatpush1.bf16.msra.mxu0 %v6444_v2  ;;  %4450 = vmatpush1.bf16.msra.mxu1 %v6280_v53 }
 0x478   :  { %4420 = vmatprep.subr.bf16.mxu0 %v6447_v3  ;;  %4452 = vmatprep.subr.bf16.mxu1 %v6293_v58 }
 0x47b   :  { %4422 = vmatpush1.bf16.msra.mxu0 %v6456_v6  ;;  %4454 = vmatpush1.bf16.msra.mxu1 %v6298_v60 }
 0x47c   :  { %4456 = vmatprep.subr.bf16.mxu0 %v6155_v8  ;;  %4488 = vmatprep.subr.bf16.mxu1 %v6163_v11 }
 0x531   :  { %v1437_v13 = vpop.f32.mrb[10].mxu0  ;;  %v1508_v16 = vpop.f32.mrb[14].mxu1 }
 0x532   :  { %v1513_v18 = vadd.f32 %v1437_v13, %v6544_v56  ;;  %v1515_v15 = vadd.f32 %v1508_v16, %v6547_v62  ;;  %v1439_v25 = vpop.f32.mrb[11].mxu0  ;;  %v1510_v28 = vpop.f32.mrb[15].mxu1 }
 0x533   :  { %v1514_v37 = vadd.f32 %v1439_v25, %v6550_v34  ;;  %v1516_v22 = vadd.f32 %v1510_v28, %v6553_v43 }
 0x534   :  { %v4126_v38 = vmul.f32 -1.442695, %v1513_v18 }
 0x535   :  { %v4127_v36 = vmul.f32 -1.442695, %v1514_v37  ;;  %v4128_v52 = vmul.f32 -1.442695, %v1516_v22 }
 0x536   :  { %5491 = vpow2.f32 %v4126_v38  ;;  %v7486_v38 = vld [vmem:[#allocation5_spill] sm:$0xff] }
 0x537   :  { %5493 = vpow2.f32 %v4127_v36 }
 0x538   :  { %5495 = vpow2.f32 %v4128_v52 }
 0x539   :  { %5497 = vtanh.f32 %v1515_v15 }
 0x540   :  { %v5492_v30 = vpop.eup %5491 }
 0x541   :  { %v5494_v46 = vpop.eup %5493  ;;  %v1520_v17 = vadd.f32 1.0, %v5492_v30 }
 0x542   :  { %v1526_v54 = vadd.f32 1.0, %v5494_v46  ;;  %v5496_v56 = vpop.eup %5495  ;;  %v7487_v46 = vld [vmem:[#allocation6_spill] sm:$0xff] }
 0x543   :  { %5499 = vrcp.f32 %v1520_v17  ;;  %v5498_v62 = vpop.eup %5497  ;;  %v1533_v25 = vadd.f32 1.0, %v5496_v56  ;;  %v7488_v56 = vld [vmem:[#allocation7_spill] sm:$0xff] }
 0x544   :  { %5501 = vrcp.f32 %v1526_v54 }
 0x545   :  { %5503 = vrcp.f32 %v1533_v25 }
 0x54d   :  { %v5500_v13 = vpop.eup %5499 }
 0x54e   :  { %v5502_v16 = vpop.eup %5501  ;;  %v1537_v34 = vmul.f32 %v5500_v13, %v5498_v62 }
 0x54f   :  { %v1536_v43 = vmul.f32 %v5502_v16, %v6716_v0  ;;  %v5504_v28 = vpop.eup %5503 }
 0x551   :  { %v6806_v18 = vadd.f32 %v1537_v34, %v1536_v43 }
 0x553   :  { %5505 = vtanh.f32 %v6806_v18 }
 0x55d   :  { %v5506_v37 = vpop.eup %5505 }
 0x55e   :  { %v1540_v22 = vmul.f32 %v5506_v37, %v5504_v28 }
 0x560   :  { %1606 = vmatmul.mubr.f32.vlgmr.msra.gmra.mrb[12].mxu0 %v1540_v22  ;;  %1677 = vmatmul.mubr.f32.vlgmr.msra.gmra.mrb[16].mxu1 %v1540_v22 }
 0x561   :  { %4458 = vmatpush1.bf16.msra.mxu0 %v6336_v9  ;;  %4490 = vmatpush1.bf16.msra.mxu1 %v6172_v14 }
 0x562   :  { %4460 = vmatprep.subr.bf16.mxu0 %v6338_v12  ;;  %4492 = vmatprep.subr.bf16.mxu1 %v6185_v19 }
 0x563   :  { %1775 = vmatprep.mubr.f32.mxu0 %v7485_v10  ;;  %1846 = vmatprep.mubr.f32.mxu1 %v7485_v10 }
 0x565   :  { %4462 = vmatpush1.bf16.msra.mxu0 %v6353_v20  ;;  %4494 = vmatpush1.bf16.msra.mxu1 %v6190_v21 }
 0x566   :  { %4464 = vmatprep.subr.bf16.mxu0 %v6357_v23  ;;  %4496 = vmatprep.subr.bf16.mxu1 %v6203_v27 }
 0x569   :  { %4466 = vmatpush1.bf16.msra.mxu0 %v6372_v31  ;;  %4498 = vmatpush1.bf16.msra.mxu1 %v6208_v29 }
 0x56a   :  { %4468 = vmatprep.subr.bf16.mxu0 %v6375_v32  ;;  %4500 = vmatprep.subr.bf16.mxu1 %v6221_v33 }
 0x56d   :  { %4470 = vmatpush1.bf16.msra.mxu0 %v6390_v40  ;;  %4502 = vmatpush1.bf16.msra.mxu1 %v6226_v35 }
 0x56e   :  { %4472 = vmatprep.subr.bf16.mxu0 %v6393_v42  ;;  %4504 = vmatprep.subr.bf16.mxu1 %v6239_v39 }
 0x571   :  { %4474 = vmatpush1.bf16.msra.mxu0 %v6408_v49  ;;  %4506 = vmatpush1.bf16.msra.mxu1 %v6244_v41 }
 0x572   :  { %4476 = vmatprep.subr.bf16.mxu0 %v6411_v50  ;;  %4508 = vmatprep.subr.bf16.mxu1 %v6257_v45 }
 0x575   :  { %4478 = vmatpush1.bf16.msra.mxu0 %v6426_v59  ;;  %4510 = vmatpush1.bf16.msra.mxu1 %v6262_v47 }
 0x576   :  { %4480 = vmatprep.subr.bf16.mxu0 %v6429_v61  ;;  %4512 = vmatprep.subr.bf16.mxu1 %v6275_v51 }
 0x579   :  { %4482 = vmatpush1.bf16.msra.mxu0 %v6444_v2  ;;  %4514 = vmatpush1.bf16.msra.mxu1 %v6280_v53 }
 0x57a   :  { %4484 = vmatprep.subr.bf16.mxu0 %v6447_v3  ;;  %4516 = vmatprep.subr.bf16.mxu1 %v6293_v58 }
 0x57d   :  { %4486 = vmatpush1.bf16.msra.mxu0 %v6456_v6  ;;  %4518 = vmatpush1.bf16.msra.mxu1 %v6298_v60 }
 0x57e   :  { %4520 = vmatprep.subr.bf16.mxu0 %v6155_v8  ;;  %4552 = vmatprep.subr.bf16.mxu1 %v6163_v11 }
 0x633   :  { %v1607_v0 = vpop.f32.mrb[12].mxu0  ;;  %v1678_v54 = vpop.f32.mrb[16].mxu1 }
 0x634   :  { %v1683_v15 = vadd.f32 %v1607_v0, %v6526_v63  ;;  %v1685_v36 = vadd.f32 %v1678_v54, %v7486_v38  ;;  %v1609_v52 = vpop.f32.mrb[13].mxu0  ;;  %v1680_v30 = vpop.f32.mrb[17].mxu1 }
 0x635   :  { %v1684_v17 = vadd.f32 %v1609_v52, %v7487_v46  ;;  %v1686_v62 = vadd.f32 %v1680_v30, %v7488_v56 }
 0x636   :  { %v4129_v13 = vmul.f32 -1.442695, %v1683_v15 }
 0x637   :  { %v4130_v16 = vmul.f32 -1.442695, %v1684_v17  ;;  %v4131_v34 = vmul.f32 -1.442695, %v1686_v62  ;;  %v7489_v62 = vld [vmem:[#allocation8_spill] sm:$0xff] }
 0x638   :  { %5507 = vpow2.f32 %v4129_v13 }
 0x639   :  { %5509 = vpow2.f32 %v4130_v16  ;;  %v7490_v16 = vld [vmem:[#allocation9_spill] sm:$0xff] }
 0x63a   :  { %5511 = vpow2.f32 %v4131_v34 }
 0x63b   :  { %5513 = vtanh.f32 %v1685_v36 }
 0x642   :  { %v5508_v25 = vpop.eup %5507 }
 0x643   :  { %v5510_v43 = vpop.eup %5509  ;;  %v1690_v28 = vadd.f32 1.0, %v5508_v25 }
 0x644   :  { %v1696_v37 = vadd.f32 1.0, %v5510_v43  ;;  %v5512_v63 = vpop.eup %5511 }
 0x645   :  { %5515 = vrcp.f32 %v1690_v28  ;;  %v5514_v22 = vpop.eup %5513  ;;  %v1703_v52 = vadd.f32 1.0, %v5512_v63  ;;  %v7491_v28 = vld [vmem:[#allocation10_spill] sm:$0xff]  ;;  %v7492_v63 = vld [vmem:[#allocation11_spill] sm:$0xff] }
 0x646   :  { %5517 = vrcp.f32 %v1696_v37 }
 0x647   :  { %5519 = vrcp.f32 %v1703_v52 }
 0x64f   :  { %v5516_v0 = vpop.eup %5515 }
 0x650   :  { %v5518_v54 = vpop.eup %5517  ;;  %v1707_v38 = vmul.f32 %v5516_v0, %v5514_v22 }
 0x651   :  { %v1706_v15 = vmul.f32 %v5518_v54, %v6806_v18  ;;  %v5520_v46 = vpop.eup %5519 }
 0x653   :  { %v6848_v30 = vadd.f32 %v1707_v38, %v1706_v15 }
 0x655   :  { %5521 = vtanh.f32 %v6848_v30 }
 0x65f   :  { %v5522_v17 = vpop.eup %5521 }
 0x660   :  { %v1710_v56 = vmul.f32 %v5522_v17, %v5520_v46 }
 0x662   :  { %1776 = vmatmul.mubr.f32.vlgmr.msra.gmra.mrb[14].mxu0 %v1710_v56  ;;  %1847 = vmatmul.mubr.f32.vlgmr.msra.gmra.mrb[18].mxu1 %v1710_v56 }
 0x663   :  { %4522 = vmatpush1.bf16.msra.mxu0 %v6336_v9  ;;  %4554 = vmatpush1.bf16.msra.mxu1 %v6172_v14 }
 0x664   :  { %4524 = vmatprep.subr.bf16.mxu0 %v6338_v12  ;;  %4556 = vmatprep.subr.bf16.mxu1 %v6185_v19 }
 0x665   :  { %1945 = vmatprep.mubr.f32.mxu0 %v7485_v10  ;;  %2016 = vmatprep.mubr.f32.mxu1 %v7485_v10 }
 0x667   :  { %4526 = vmatpush1.bf16.msra.mxu0 %v6353_v20  ;;  %4558 = vmatpush1.bf16.msra.mxu1 %v6190_v21 }
 0x668   :  { %4528 = vmatprep.subr.bf16.mxu0 %v6357_v23  ;;  %4560 = vmatprep.subr.bf16.mxu1 %v6203_v27 }
 0x66b   :  { %4530 = vmatpush1.bf16.msra.mxu0 %v6372_v31  ;;  %4562 = vmatpush1.bf16.msra.mxu1 %v6208_v29 }
 0x66c   :  { %4532 = vmatprep.subr.bf16.mxu0 %v6375_v32  ;;  %4564 = vmatprep.subr.bf16.mxu1 %v6221_v33 }
 0x66f   :  { %4534 = vmatpush1.bf16.msra.mxu0 %v6390_v40  ;;  %4566 = vmatpush1.bf16.msra.mxu1 %v6226_v35 }
 0x670   :  { %4536 = vmatprep.subr.bf16.mxu0 %v6393_v42  ;;  %4568 = vmatprep.subr.bf16.mxu1 %v6239_v39 }
 0x673   :  { %4538 = vmatpush1.bf16.msra.mxu0 %v6408_v49  ;;  %4570 = vmatpush1.bf16.msra.mxu1 %v6244_v41 }
 0x674   :  { %4540 = vmatprep.subr.bf16.mxu0 %v6411_v50  ;;  %4572 = vmatprep.subr.bf16.mxu1 %v6257_v45 }
 0x677   :  { %4542 = vmatpush1.bf16.msra.mxu0 %v6426_v59  ;;  %4574 = vmatpush1.bf16.msra.mxu1 %v6262_v47 }
 0x678   :  { %4544 = vmatprep.subr.bf16.mxu0 %v6429_v61  ;;  %4576 = vmatprep.subr.bf16.mxu1 %v6275_v51 }
 0x67b   :  { %4546 = vmatpush1.bf16.msra.mxu0 %v6444_v2  ;;  %4578 = vmatpush1.bf16.msra.mxu1 %v6280_v53 }
 0x67c   :  { %4548 = vmatprep.subr.bf16.mxu0 %v6447_v3  ;;  %4580 = vmatprep.subr.bf16.mxu1 %v6293_v58 }
 0x67f   :  { %4550 = vmatpush1.bf16.msra.mxu0 %v6456_v6  ;;  %4582 = vmatpush1.bf16.msra.mxu1 %v6298_v60 }
 0x680   :  { %4584 = vmatprep.subr.bf16.mxu0 %v6155_v8  ;;  %4616 = vmatprep.subr.bf16.mxu1 %v6163_v11 }
 0x735   :  { %v1777_v18 = vpop.f32.mrb[14].mxu0  ;;  %v1848_v36 = vpop.f32.mrb[18].mxu1 }
 0x736   :  { %v1853_v13 = vadd.f32 %v1777_v18, %v7489_v62  ;;  %v1855_v34 = vadd.f32 %v1848_v36, %v7490_v16  ;;  %v1779_v25 = vpop.f32.mrb[15].mxu0  ;;  %v1850_v43 = vpop.f32.mrb[19].mxu1 }
 0x737   :  { %v1854_v37 = vadd.f32 %v1779_v25, %v7491_v28  ;;  %v1856_v22 = vadd.f32 %v1850_v43, %v7492_v63 }
 0x738   :  { %v4132_v0 = vmul.f32 -1.442695, %v1853_v13 }
 0x739   :  { %v4133_v54 = vmul.f32 -1.442695, %v1854_v37  ;;  %v4134_v38 = vmul.f32 -1.442695, %v1856_v22  ;;  %v7493_v22 = vld [vmem:[#allocation12_spill] sm:$0xff] }
 0x73a   :  { %5523 = vpow2.f32 %v4132_v0 }
 0x73b   :  { %5525 = vpow2.f32 %v4133_v54  ;;  %v7494_v54 = vld [vmem:[#allocation13_spill] sm:$0xff] }
 0x73c   :  { %5527 = vpow2.f32 %v4134_v38 }
 0x73d   :  { %5529 = vtanh.f32 %v1855_v34 }
 0x744   :  { %v5524_v52 = vpop.eup %5523 }
 0x745   :  { %v5526_v15 = vpop.eup %5525  ;;  %v1860_v46 = vadd.f32 1.0, %v5524_v52 }
 0x746   :  { %v1866_v17 = vadd.f32 1.0, %v5526_v15  ;;  %v5528_v56 = vpop.eup %5527 }
 0x747   :  { %5531 = vrcp.f32 %v1860_v46  ;;  %v5530_v18 = vpop.eup %5529  ;;  %v1873_v25 = vadd.f32 1.0, %v5528_v56  ;;  %v7495_v46 = vld [vmem:[#allocation14_spill] sm:$0xff]  ;;  %v7496_v56 = vld [vmem:[#allocation15_spill] sm:$0xff] }
 0x748   :  { %5533 = vrcp.f32 %v1866_v17 }
 0x749   :  { %5535 = vrcp.f32 %v1873_v25 }
 0x751   :  { %v5532_v36 = vpop.eup %5531 }
 0x752   :  { %v5534_v62 = vpop.eup %5533  ;;  %v1877_v16 = vmul.f32 %v5532_v36, %v5530_v18 }
 0x753   :  { %v1876_v13 = vmul.f32 %v5534_v62, %v6848_v30  ;;  %v5536_v28 = vpop.eup %5535 }
 0x755   :  { %v6890_v43 = vadd.f32 %v1877_v16, %v1876_v13 }
 0x757   :  { %5537 = vtanh.f32 %v6890_v43 }
 0x761   :  { %v5538_v37 = vpop.eup %5537 }
 0x762   :  { %v1880_v63 = vmul.f32 %v5538_v37, %v5536_v28 }
 0x764   :  { %1946 = vmatmul.mubr.f32.vlgmr.msra.gmra.mrb[16].mxu0 %v1880_v63  ;;  %2017 = vmatmul.mubr.f32.vlgmr.msra.gmra.mrb[20].mxu1 %v1880_v63 }
 0x765   :  { %4586 = vmatpush1.bf16.msra.mxu0 %v6336_v9  ;;  %4618 = vmatpush1.bf16.msra.mxu1 %v6172_v14 }
 0x766   :  { %4588 = vmatprep.subr.bf16.mxu0 %v6338_v12  ;;  %4620 = vmatprep.subr.bf16.mxu1 %v6185_v19 }
 0x767   :  { %2115 = vmatprep.mubr.f32.mxu0 %v7485_v10  ;;  %2186 = vmatprep.mubr.f32.mxu1 %v7485_v10 }
 0x769   :  { %4590 = vmatpush1.bf16.msra.mxu0 %v6353_v20  ;;  %4622 = vmatpush1.bf16.msra.mxu1 %v6190_v21 }
 0x76a   :  { %4592 = vmatprep.subr.bf16.mxu0 %v6357_v23  ;;  %4624 = vmatprep.subr.bf16.mxu1 %v6203_v27 }
 0x76d   :  { %4594 = vmatpush1.bf16.msra.mxu0 %v6372_v31  ;;  %4626 = vmatpush1.bf16.msra.mxu1 %v6208_v29 }
 0x76e   :  { %4596 = vmatprep.subr.bf16.mxu0 %v6375_v32  ;;  %4628 = vmatprep.subr.bf16.mxu1 %v6221_v33 }
 0x771   :  { %4598 = vmatpush1.bf16.msra.mxu0 %v6390_v40  ;;  %4630 = vmatpush1.bf16.msra.mxu1 %v6226_v35 }
 0x772   :  { %4600 = vmatprep.subr.bf16.mxu0 %v6393_v42  ;;  %4632 = vmatprep.subr.bf16.mxu1 %v6239_v39 }
 0x775   :  { %4602 = vmatpush1.bf16.msra.mxu0 %v6408_v49  ;;  %4634 = vmatpush1.bf16.msra.mxu1 %v6244_v41 }
 0x776   :  { %4604 = vmatprep.subr.bf16.mxu0 %v6411_v50  ;;  %4636 = vmatprep.subr.bf16.mxu1 %v6257_v45 }
 0x779   :  { %4606 = vmatpush1.bf16.msra.mxu0 %v6426_v59  ;;  %4638 = vmatpush1.bf16.msra.mxu1 %v6262_v47 }
 0x77a   :  { %4608 = vmatprep.subr.bf16.mxu0 %v6429_v61  ;;  %4640 = vmatprep.subr.bf16.mxu1 %v6275_v51 }
 0x77d   :  { %4610 = vmatpush1.bf16.msra.mxu0 %v6444_v2  ;;  %4642 = vmatpush1.bf16.msra.mxu1 %v6280_v53 }
 0x77e   :  { %4612 = vmatprep.subr.bf16.mxu0 %v6447_v3  ;;  %4644 = vmatprep.subr.bf16.mxu1 %v6293_v58 }
 0x781   :  { %4614 = vmatpush1.bf16.msra.mxu0 %v6456_v6  ;;  %4646 = vmatpush1.bf16.msra.mxu1 %v6298_v60 }
 0x782   :  { %4648 = vmatprep.subr.bf16.mxu0 %v6155_v8  ;;  %4680 = vmatprep.subr.bf16.mxu1 %v6163_v11 }
 0x837   :  { %v1947_v30 = vpop.f32.mrb[16].mxu0  ;;  %v2018_v34 = vpop.f32.mrb[20].mxu1 }
 0x838   :  { %v2023_v0 = vadd.f32 %v1947_v30, %v7493_v22  ;;  %v2025_v38 = vadd.f32 %v2018_v34, %v7494_v54  ;;  %v1949_v52 = vpop.f32.mrb[17].mxu0  ;;  %v2020_v15 = vpop.f32.mrb[21].mxu1 }
 0x839   :  { %v2024_v17 = vadd.f32 %v1949_v52, %v7495_v46  ;;  %v2026_v18 = vadd.f32 %v2020_v15, %v7496_v56 }
 0x83a   :  { %v4135_v36 = vmul.f32 -1.442695, %v2023_v0 }
 0x83b   :  { %v4136_v62 = vmul.f32 -1.442695, %v2024_v17  ;;  %v4137_v16 = vmul.f32 -1.442695, %v2026_v18  ;;  %v7497_v18 = vld [vmem:[#allocation16_spill] sm:$0xff] }
 0x83c   :  { %5539 = vpow2.f32 %v4135_v36 }
 0x83d   :  { %5541 = vpow2.f32 %v4136_v62  ;;  %v7498_v62 = vld [vmem:[#allocation17_spill] sm:$0xff] }
 0x83e   :  { %5543 = vpow2.f32 %v4137_v16 }
 0x83f   :  { %5545 = vtanh.f32 %v2025_v38 }
 0x846   :  { %v5540_v25 = vpop.eup %5539 }
 0x847   :  { %v5542_v13 = vpop.eup %5541  ;;  %v2030_v28 = vadd.f32 1.0, %v5540_v25 }
 0x848   :  { %v2036_v37 = vadd.f32 1.0, %v5542_v13  ;;  %v5544_v63 = vpop.eup %5543 }
 0x849   :  { %5547 = vrcp.f32 %v2030_v28  ;;  %v5546_v30 = vpop.eup %5545  ;;  %v2043_v52 = vadd.f32 1.0, %v5544_v63  ;;  %v7499_v28 = vld [vmem:[#allocation18_spill] sm:$0xff]  ;;  %v7500_v63 = vld [vmem:[#allocation19_spill] sm:$0xff] }
 0x84a   :  { %5549 = vrcp.f32 %v2036_v37 }
 0x84b   :  { %5551 = vrcp.f32 %v2043_v52 }
 0x853   :  { %v5548_v34 = vpop.eup %5547 }
 0x854   :  { %v5550_v22 = vpop.eup %5549  ;;  %v2047_v54 = vmul.f32 %v5548_v34, %v5546_v30 }
 0x855   :  { %v2046_v0 = vmul.f32 %v5550_v22, %v6890_v43  ;;  %v5552_v46 = vpop.eup %5551 }
 0x857   :  { %v6932_v15 = vadd.f32 %v2047_v54, %v2046_v0 }
 0x859   :  { %5553 = vtanh.f32 %v6932_v15 }
 0x863   :  { %v5554_v17 = vpop.eup %5553 }
 0x864   :  { %v2050_v56 = vmul.f32 %v5554_v17, %v5552_v46 }
 0x866   :  { %2116 = vmatmul.mubr.f32.vlgmr.msra.gmra.mrb[18].mxu0 %v2050_v56  ;;  %2187 = vmatmul.mubr.f32.vlgmr.msra.gmra.mrb[22].mxu1 %v2050_v56 }
 0x867   :  { %4650 = vmatpush1.bf16.msra.mxu0 %v6336_v9  ;;  %4682 = vmatpush1.bf16.msra.mxu1 %v6172_v14 }
 0x868   :  { %4652 = vmatprep.subr.bf16.mxu0 %v6338_v12  ;;  %4684 = vmatprep.subr.bf16.mxu1 %v6185_v19 }
 0x869   :  { %2285 = vmatprep.mubr.f32.mxu0 %v7485_v10  ;;  %2356 = vmatprep.mubr.f32.mxu1 %v7485_v10 }
 0x86b   :  { %4654 = vmatpush1.bf16.msra.mxu0 %v6353_v20  ;;  %4686 = vmatpush1.bf16.msra.mxu1 %v6190_v21 }
 0x86c   :  { %4656 = vmatprep.subr.bf16.mxu0 %v6357_v23  ;;  %4688 = vmatprep.subr.bf16.mxu1 %v6203_v27 }
 0x86f   :  { %4658 = vmatpush1.bf16.msra.mxu0 %v6372_v31  ;;  %4690 = vmatpush1.bf16.msra.mxu1 %v6208_v29 }
 0x870   :  { %4660 = vmatprep.subr.bf16.mxu0 %v6375_v32  ;;  %4692 = vmatprep.subr.bf16.mxu1 %v6221_v33 }
 0x873   :  { %4662 = vmatpush1.bf16.msra.mxu0 %v6390_v40  ;;  %4694 = vmatpush1.bf16.msra.mxu1 %v6226_v35 }
 0x874   :  { %4664 = vmatprep.subr.bf16.mxu0 %v6393_v42  ;;  %4696 = vmatprep.subr.bf16.mxu1 %v6239_v39 }
 0x877   :  { %4666 = vmatpush1.bf16.msra.mxu0 %v6408_v49  ;;  %4698 = vmatpush1.bf16.msra.mxu1 %v6244_v41 }
 0x878   :  { %4668 = vmatprep.subr.bf16.mxu0 %v6411_v50  ;;  %4700 = vmatprep.subr.bf16.mxu1 %v6257_v45 }
 0x87b   :  { %4670 = vmatpush1.bf16.msra.mxu0 %v6426_v59  ;;  %4702 = vmatpush1.bf16.msra.mxu1 %v6262_v47 }
 0x87c   :  { %4672 = vmatprep.subr.bf16.mxu0 %v6429_v61  ;;  %4704 = vmatprep.subr.bf16.mxu1 %v6275_v51 }
 0x87f   :  { %4674 = vmatpush1.bf16.msra.mxu0 %v6444_v2  ;;  %4706 = vmatpush1.bf16.msra.mxu1 %v6280_v53 }
 0x880   :  { %4676 = vmatprep.subr.bf16.mxu0 %v6447_v3  ;;  %4708 = vmatprep.subr.bf16.mxu1 %v6293_v58 }
 0x883   :  { %4678 = vmatpush1.bf16.msra.mxu0 %v6456_v6  ;;  %4710 = vmatpush1.bf16.msra.mxu1 %v6298_v60 }
 0x884   :  { %4712 = vmatprep.subr.bf16.mxu0 %v6155_v8  ;;  %4744 = vmatprep.subr.bf16.mxu1 %v6163_v11 }
 0x939   :  { %v2117_v43 = vpop.f32.mrb[18].mxu0  ;;  %v2188_v38 = vpop.f32.mrb[22].mxu1 }
 0x93a   :  { %v2193_v36 = vadd.f32 %v2117_v43, %v7497_v18  ;;  %v2195_v16 = vadd.f32 %v2188_v38, %v7498_v62  ;;  %v2119_v25 = vpop.f32.mrb[19].mxu0  ;;  %v2190_v13 = vpop.f32.mrb[23].mxu1 }
 0x93b   :  { %v2194_v37 = vadd.f32 %v2119_v25, %v7499_v28  ;;  %v2196_v30 = vadd.f32 %v2190_v13, %v7500_v63 }
 0x93c   :  { %v4138_v34 = vmul.f32 -1.442695, %v2193_v36 }
 0x93d   :  { %v4139_v22 = vmul.f32 -1.442695, %v2194_v37  ;;  %v4140_v54 = vmul.f32 -1.442695, %v2196_v30  ;;  %v7501_v30 = vld [vmem:[#allocation20_spill] sm:$0xff] }
 0x93e   :  { %5555 = vpow2.f32 %v4138_v34 }
 0x93f   :  { %5557 = vpow2.f32 %v4139_v22  ;;  %v7502_v22 = vld [vmem:[#allocation21_spill] sm:$0xff] }
 0x940   :  { %5559 = vpow2.f32 %v4140_v54 }
 0x941   :  { %5561 = vtanh.f32 %v2195_v16 }
 0x948   :  { %v5556_v52 = vpop.eup %5555 }
 0x949   :  { %v5558_v0 = vpop.eup %5557  ;;  %v2200_v46 = vadd.f32 1.0, %v5556_v52 }
 0x94a   :  { %v2206_v17 = vadd.f32 1.0, %v5558_v0  ;;  %v5560_v56 = vpop.eup %5559 }
 0x94b   :  { %5563 = vrcp.f32 %v2200_v46  ;;  %v5562_v43 = vpop.eup %5561  ;;  %v2213_v25 = vadd.f32 1.0, %v5560_v56  ;;  %v7503_v46 = vld [vmem:[#allocation22_spill] sm:$0xff]  ;;  %v7504_v56 = vld [vmem:[#allocation23_spill] sm:$0xff] }
 0x94c   :  { %5565 = vrcp.f32 %v2206_v17 }
 0x94d   :  { %5567 = vrcp.f32 %v2213_v25 }
 0x955   :  { %v5564_v38 = vpop.eup %5563 }
 0x956   :  { %v5566_v18 = vpop.eup %5565  ;;  %v2217_v62 = vmul.f32 %v5564_v38, %v5562_v43 }
 0x957   :  { %v2216_v36 = vmul.f32 %v5566_v18, %v6932_v15  ;;  %v5568_v28 = vpop.eup %5567 }
 0x959   :  { %v6974_v13 = vadd.f32 %v2217_v62, %v2216_v36 }
 0x95b   :  { %5569 = vtanh.f32 %v6974_v13 }
 0x965   :  { %v5570_v37 = vpop.eup %5569 }
 0x966   :  { %v2220_v63 = vmul.f32 %v5570_v37, %v5568_v28 }
 0x968   :  { %2286 = vmatmul.mubr.f32.vlgmr.msra.gmra.mrb[20].mxu0 %v2220_v63  ;;  %2357 = vmatmul.mubr.f32.vlgmr.msra.gmra.mrb[24].mxu1 %v2220_v63 }
 0x969   :  { %4714 = vmatpush1.bf16.msra.mxu0 %v6336_v9  ;;  %4746 = vmatpush1.bf16.msra.mxu1 %v6172_v14 }
 0x96a   :  { %4716 = vmatprep.subr.bf16.mxu0 %v6338_v12  ;;  %4748 = vmatprep.subr.bf16.mxu1 %v6185_v19 }
 0x96b   :  { %2455 = vmatprep.mubr.f32.mxu0 %v7485_v10  ;;  %2526 = vmatprep.mubr.f32.mxu1 %v7485_v10 }
 0x96d   :  { %4718 = vmatpush1.bf16.msra.mxu0 %v6353_v20  ;;  %4750 = vmatpush1.bf16.msra.mxu1 %v6190_v21 }
 0x96e   :  { %4720 = vmatprep.subr.bf16.mxu0 %v6357_v23  ;;  %4752 = vmatprep.subr.bf16.mxu1 %v6203_v27 }
 0x971   :  { %4722 = vmatpush1.bf16.msra.mxu0 %v6372_v31  ;;  %4754 = vmatpush1.bf16.msra.mxu1 %v6208_v29 }
 0x972   :  { %4724 = vmatprep.subr.bf16.mxu0 %v6375_v32  ;;  %4756 = vmatprep.subr.bf16.mxu1 %v6221_v33 }
 0x975   :  { %4726 = vmatpush1.bf16.msra.mxu0 %v6390_v40  ;;  %4758 = vmatpush1.bf16.msra.mxu1 %v6226_v35 }
 0x976   :  { %4728 = vmatprep.subr.bf16.mxu0 %v6393_v42  ;;  %4760 = vmatprep.subr.bf16.mxu1 %v6239_v39 }
 0x979   :  { %4730 = vmatpush1.bf16.msra.mxu0 %v6408_v49  ;;  %4762 = vmatpush1.bf16.msra.mxu1 %v6244_v41 }
 0x97a   :  { %4732 = vmatprep.subr.bf16.mxu0 %v6411_v50  ;;  %4764 = vmatprep.subr.bf16.mxu1 %v6257_v45 }
 0x97d   :  { %4734 = vmatpush1.bf16.msra.mxu0 %v6426_v59  ;;  %4766 = vmatpush1.bf16.msra.mxu1 %v6262_v47 }
 0x97e   :  { %4736 = vmatprep.subr.bf16.mxu0 %v6429_v61  ;;  %4768 = vmatprep.subr.bf16.mxu1 %v6275_v51 }
 0x981   :  { %4738 = vmatpush1.bf16.msra.mxu0 %v6444_v2  ;;  %4770 = vmatpush1.bf16.msra.mxu1 %v6280_v53 }
 0x982   :  { %4740 = vmatprep.subr.bf16.mxu0 %v6447_v3  ;;  %4772 = vmatprep.subr.bf16.mxu1 %v6293_v58 }
 0x985   :  { %4742 = vmatpush1.bf16.msra.mxu0 %v6456_v6  ;;  %4774 = vmatpush1.bf16.msra.mxu1 %v6298_v60 }
 0x986   :  { %4776 = vmatprep.subr.bf16.mxu0 %v6155_v8  ;;  %4808 = vmatprep.subr.bf16.mxu1 %v6163_v11 }
 0xa3b   :  { %v2287_v15 = vpop.f32.mrb[20].mxu0  ;;  %v2358_v16 = vpop.f32.mrb[24].mxu1 }
 0xa3c   :  { %v2363_v34 = vadd.f32 %v2287_v15, %v7501_v30  ;;  %v2365_v54 = vadd.f32 %v2358_v16, %v7502_v22  ;;  %v2289_v52 = vpop.f32.mrb[21].mxu0  ;;  %v2360_v0 = vpop.f32.mrb[25].mxu1 }
 0xa3d   :  { %v2364_v17 = vadd.f32 %v2289_v52, %v7503_v46  ;;  %v2366_v43 = vadd.f32 %v2360_v0, %v7504_v56 }
 0xa3e   :  { %v4141_v38 = vmul.f32 -1.442695, %v2363_v34 }
 0xa3f   :  { %v4142_v18 = vmul.f32 -1.442695, %v2364_v17  ;;  %v4143_v62 = vmul.f32 -1.442695, %v2366_v43  ;;  %v7505_v43 = vld [vmem:[#allocation28_spill] sm:$0xff] }
 0xa40   :  { %5571 = vpow2.f32 %v4141_v38 }
 0xa41   :  { %5573 = vpow2.f32 %v4142_v18  ;;  %v7506_v18 = vld [vmem:[#allocation29_spill] sm:$0xff] }
 0xa42   :  { %5575 = vpow2.f32 %v4143_v62 }
 0xa43   :  { %5577 = vtanh.f32 %v2365_v54 }
 0xa4a   :  { %v5572_v25 = vpop.eup %5571 }
 0xa4b   :  { %v5574_v36 = vpop.eup %5573  ;;  %v2370_v28 = vadd.f32 1.0, %v5572_v25 }
 0xa4c   :  { %v2376_v37 = vadd.f32 1.0, %v5574_v36  ;;  %v5576_v63 = vpop.eup %5575 }
 0xa4d   :  { %5579 = vrcp.f32 %v2370_v28  ;;  %v5578_v15 = vpop.eup %5577  ;;  %v2383_v52 = vadd.f32 1.0, %v5576_v63  ;;  %v7507_v28 = vld [vmem:[#allocation30_spill] sm:$0xff]  ;;  %v7508_v63 = vld [vmem:[#allocation31_spill] sm:$0xff] }
 0xa4e   :  { %5581 = vrcp.f32 %v2376_v37 }
 0xa4f   :  { %5583 = vrcp.f32 %v2383_v52 }
 0xa57   :  { %v5580_v16 = vpop.eup %5579 }
 0xa58   :  { %v5582_v30 = vpop.eup %5581  ;;  %v2387_v22 = vmul.f32 %v5580_v16, %v5578_v15 }
 0xa59   :  { %v2386_v34 = vmul.f32 %v5582_v30, %v6974_v13  ;;  %v5584_v46 = vpop.eup %5583 }
 0xa5b   :  { %v7016_v0 = vadd.f32 %v2387_v22, %v2386_v34 }
 0xa5d   :  { %5585 = vtanh.f32 %v7016_v0 }
 0xa67   :  { %v5586_v17 = vpop.eup %5585 }
 0xa68   :  { %v2390_v56 = vmul.f32 %v5586_v17, %v5584_v46 }
 0xa6a   :  { %2456 = vmatmul.mubr.f32.vlgmr.msra.gmra.mrb[22].mxu0 %v2390_v56  ;;  %2527 = vmatmul.mubr.f32.vlgmr.msra.gmra.mrb[26].mxu1 %v2390_v56 }
 0xa6b   :  { %4778 = vmatpush1.bf16.msra.mxu0 %v6336_v9  ;;  %4810 = vmatpush1.bf16.msra.mxu1 %v6172_v14 }
 0xa6c   :  { %4780 = vmatprep.subr.bf16.mxu0 %v6338_v12  ;;  %4812 = vmatprep.subr.bf16.mxu1 %v6185_v19 }
 0xa6d   :  { %2625 = vmatprep.mubr.f32.mxu0 %v7485_v10  ;;  %2696 = vmatprep.mubr.f32.mxu1 %v7485_v10 }
 0xa6f   :  { %4782 = vmatpush1.bf16.msra.mxu0 %v6353_v20  ;;  %4814 = vmatpush1.bf16.msra.mxu1 %v6190_v21 }
 0xa70   :  { %4784 = vmatprep.subr.bf16.mxu0 %v6357_v23  ;;  %4816 = vmatprep.subr.bf16.mxu1 %v6203_v27 }
 0xa73   :  { %4786 = vmatpush1.bf16.msra.mxu0 %v6372_v31  ;;  %4818 = vmatpush1.bf16.msra.mxu1 %v6208_v29 }
 0xa74   :  { %4788 = vmatprep.subr.bf16.mxu0 %v6375_v32  ;;  %4820 = vmatprep.subr.bf16.mxu1 %v6221_v33 }
 0xa77   :  { %4790 = vmatpush1.bf16.msra.mxu0 %v6390_v40  ;;  %4822 = vmatpush1.bf16.msra.mxu1 %v6226_v35 }
 0xa78   :  { %4792 = vmatprep.subr.bf16.mxu0 %v6393_v42  ;;  %4824 = vmatprep.subr.bf16.mxu1 %v6239_v39 }
 0xa7b   :  { %4794 = vmatpush1.bf16.msra.mxu0 %v6408_v49  ;;  %4826 = vmatpush1.bf16.msra.mxu1 %v6244_v41 }
 0xa7c   :  { %4796 = vmatprep.subr.bf16.mxu0 %v6411_v50  ;;  %4828 = vmatprep.subr.bf16.mxu1 %v6257_v45 }
 0xa7f   :  { %4798 = vmatpush1.bf16.msra.mxu0 %v6426_v59  ;;  %4830 = vmatpush1.bf16.msra.mxu1 %v6262_v47 }
 0xa80   :  { %4800 = vmatprep.subr.bf16.mxu0 %v6429_v61  ;;  %4832 = vmatprep.subr.bf16.mxu1 %v6275_v51 }
 0xa83   :  { %4802 = vmatpush1.bf16.msra.mxu0 %v6444_v2  ;;  %4834 = vmatpush1.bf16.msra.mxu1 %v6280_v53 }
 0xa84   :  { %4804 = vmatprep.subr.bf16.mxu0 %v6447_v3  ;;  %4836 = vmatprep.subr.bf16.mxu1 %v6293_v58 }
 0xa87   :  { %4806 = vmatpush1.bf16.msra.mxu0 %v6456_v6  ;;  %4838 = vmatpush1.bf16.msra.mxu1 %v6298_v60 }
 0xa88   :  { %4840 = vmatprep.subr.bf16.mxu0 %v6155_v8  ;;  %4872 = vmatprep.subr.bf16.mxu1 %v6163_v11 }
 0xb3d   :  { %v2457_v13 = vpop.f32.mrb[22].mxu0  ;;  %v2528_v54 = vpop.f32.mrb[26].mxu1 }
 0xb3e   :  { %v2533_v38 = vadd.f32 %v2457_v13, %v7505_v43  ;;  %v2535_v62 = vadd.f32 %v2528_v54, %v7506_v18  ;;  %v2459_v25 = vpop.f32.mrb[23].mxu0  ;;  %v2530_v36 = vpop.f32.mrb[27].mxu1 }
 0xb3f   :  { %v2534_v37 = vadd.f32 %v2459_v25, %v7507_v28  ;;  %v2536_v15 = vadd.f32 %v2530_v36, %v7508_v63 }
 0xb40   :  { %v4144_v16 = vmul.f32 -1.442695, %v2533_v38 }
 0xb41   :  { %v4145_v30 = vmul.f32 -1.442695, %v2534_v37  ;;  %v4146_v22 = vmul.f32 -1.442695, %v2536_v15  ;;  %v7509_v15 = vld [vmem:[#allocation24_spill] sm:$0xff] }
 0xb42   :  { %5587 = vpow2.f32 %v4144_v16 }
 0xb43   :  { %5589 = vpow2.f32 %v4145_v30  ;;  %v7510_v30 = vld [vmem:[#allocation25_spill] sm:$0xff] }
 0xb44   :  { %5591 = vpow2.f32 %v4146_v22 }
 0xb45   :  { %5593 = vtanh.f32 %v2535_v62 }
 0xb4c   :  { %v5588_v52 = vpop.eup %5587 }
 0xb4d   :  { %v5590_v34 = vpop.eup %5589  ;;  %v2540_v46 = vadd.f32 1.0, %v5588_v52 }
 0xb4e   :  { %v2546_v17 = vadd.f32 1.0, %v5590_v34  ;;  %v5592_v56 = vpop.eup %5591 }
 0xb4f   :  { %5595 = vrcp.f32 %v2540_v46  ;;  %v5594_v13 = vpop.eup %5593  ;;  %v2553_v25 = vadd.f32 1.0, %v5592_v56  ;;  %v7511_v46 = vld [vmem:[#allocation26_spill] sm:$0xff]  ;;  %v7512_v56 = vld [vmem:[#allocation27_spill] sm:$0xff] }
 0xb50   :  { %5597 = vrcp.f32 %v2546_v17 }
 0xb51   :  { %5599 = vrcp.f32 %v2553_v25 }
 0xb59   :  { %v5596_v54 = vpop.eup %5595 }
 0xb5a   :  { %v5598_v43 = vpop.eup %5597  ;;  %v2557_v18 = vmul.f32 %v5596_v54, %v5594_v13 }
 0xb5b   :  { %v2556_v38 = vmul.f32 %v5598_v43, %v7016_v0  ;;  %v5600_v28 = vpop.eup %5599 }
 0xb5d   :  { %v7058_v36 = vadd.f32 %v2557_v18, %v2556_v38 }
 0xb5f   :  { %5601 = vtanh.f32 %v7058_v36 }
 0xb69   :  { %v5602_v37 = vpop.eup %5601 }
 0xb6a   :  { %v2560_v63 = vmul.f32 %v5602_v37, %v5600_v28 }
 0xb6c   :  { %2626 = vmatmul.mubr.f32.vlgmr.msra.gmra.mrb[24].mxu0 %v2560_v63  ;;  %2697 = vmatmul.mubr.f32.vlgmr.msra.gmra.mrb[28].mxu1 %v2560_v63 }
 0xb6d   :  { %4842 = vmatpush1.bf16.msra.mxu0 %v6336_v9  ;;  %4874 = vmatpush1.bf16.msra.mxu1 %v6172_v14 }
 0xb6e   :  { %4844 = vmatprep.subr.bf16.mxu0 %v6338_v12  ;;  %4876 = vmatprep.subr.bf16.mxu1 %v6185_v19 }
 0xb6f   :  { %2795 = vmatprep.mubr.f32.mxu0 %v7485_v10  ;;  %2866 = vmatprep.mubr.f32.mxu1 %v7485_v10 }
 0xb71   :  { %4846 = vmatpush1.bf16.msra.mxu0 %v6353_v20  ;;  %4878 = vmatpush1.bf16.msra.mxu1 %v6190_v21 }
 0xb72   :  { %4848 = vmatprep.subr.bf16.mxu0 %v6357_v23  ;;  %4880 = vmatprep.subr.bf16.mxu1 %v6203_v27 }
 0xb75   :  { %4850 = vmatpush1.bf16.msra.mxu0 %v6372_v31  ;;  %4882 = vmatpush1.bf16.msra.mxu1 %v6208_v29 }
 0xb76   :  { %4852 = vmatprep.subr.bf16.mxu0 %v6375_v32  ;;  %4884 = vmatprep.subr.bf16.mxu1 %v6221_v33 }
 0xb79   :  { %4854 = vmatpush1.bf16.msra.mxu0 %v6390_v40  ;;  %4886 = vmatpush1.bf16.msra.mxu1 %v6226_v35 }
 0xb7a   :  { %4856 = vmatprep.subr.bf16.mxu0 %v6393_v42  ;;  %4888 = vmatprep.subr.bf16.mxu1 %v6239_v39 }
 0xb7d   :  { %4858 = vmatpush1.bf16.msra.mxu0 %v6408_v49  ;;  %4890 = vmatpush1.bf16.msra.mxu1 %v6244_v41 }
 0xb7e   :  { %4860 = vmatprep.subr.bf16.mxu0 %v6411_v50  ;;  %4892 = vmatprep.subr.bf16.mxu1 %v6257_v45 }
 0xb81   :  { %4862 = vmatpush1.bf16.msra.mxu0 %v6426_v59  ;;  %4894 = vmatpush1.bf16.msra.mxu1 %v6262_v47 }
 0xb82   :  { %4864 = vmatprep.subr.bf16.mxu0 %v6429_v61  ;;  %4896 = vmatprep.subr.bf16.mxu1 %v6275_v51 }
 0xb85   :  { %4866 = vmatpush1.bf16.msra.mxu0 %v6444_v2  ;;  %4898 = vmatpush1.bf16.msra.mxu1 %v6280_v53 }
 0xb86   :  { %4868 = vmatprep.subr.bf16.mxu0 %v6447_v3  ;;  %4900 = vmatprep.subr.bf16.mxu1 %v6293_v58 }
 0xb89   :  { %4870 = vmatpush1.bf16.msra.mxu0 %v6456_v6  ;;  %4902 = vmatpush1.bf16.msra.mxu1 %v6298_v60 }
 0xb8a   :  { %4904 = vmatprep.subr.bf16.mxu0 %v6155_v8  ;;  %4936 = vmatprep.subr.bf16.mxu1 %v6163_v11 }
 0xc3f   :  { %v2627_v0 = vpop.f32.mrb[24].mxu0  ;;  %v2698_v62 = vpop.f32.mrb[28].mxu1 }
 0xc40   :  { %v2703_v16 = vadd.f32 %v2627_v0, %v7509_v15  ;;  %v2705_v22 = vadd.f32 %v2698_v62, %v7510_v30  ;;  %v2629_v52 = vpop.f32.mrb[25].mxu0  ;;  %v2700_v34 = vpop.f32.mrb[29].mxu1 }
 0xc41   :  { %v2704_v17 = vadd.f32 %v2629_v52, %v7511_v46  ;;  %v2706_v13 = vadd.f32 %v2700_v34, %v7512_v56 }
 0xc42   :  { %v4147_v54 = vmul.f32 -1.442695, %v2703_v16 }
 0xc43   :  { %v4148_v43 = vmul.f32 -1.442695, %v2704_v17  ;;  %v4149_v18 = vmul.f32 -1.442695, %v2706_v13 }
 0xc44   :  { %5603 = vpow2.f32 %v4147_v54  ;;  %v7513_v54 = vld [vmem:[#allocation37_spill] sm:$0xff] }
 0xc45   :  { %5605 = vpow2.f32 %v4148_v43 }
 0xc46   :  { %5607 = vpow2.f32 %v4149_v18 }
 0xc47   :  { %5609 = vtanh.f32 %v2705_v22 }
 0xc4e   :  { %v5604_v25 = vpop.eup %5603 }
 0xc4f   :  { %v5606_v38 = vpop.eup %5605  ;;  %v2710_v28 = vadd.f32 1.0, %v5604_v25 }
 0xc50   :  { %v2716_v37 = vadd.f32 1.0, %v5606_v38  ;;  %v5608_v63 = vpop.eup %5607  ;;  %v7514_v38 = vld [vmem:[#allocation38_spill] sm:$0xff] }
 0xc51   :  { %5611 = vrcp.f32 %v2710_v28  ;;  %v5610_v0 = vpop.eup %5609  ;;  %v2723_v52 = vadd.f32 1.0, %v5608_v63 }
 0xc52   :  { %5613 = vrcp.f32 %v2716_v37  ;;  %v7515_v37 = vld [vmem:[#allocation39_spill] sm:$0xff] }
 0xc53   :  { %5615 = vrcp.f32 %v2723_v52 }
 0xc5b   :  { %v5612_v62 = vpop.eup %5611 }
 0xc5c   :  { %v5614_v15 = vpop.eup %5613  ;;  %v2727_v30 = vmul.f32 %v5612_v62, %v5610_v0 }
 0xc5d   :  { %v2726_v16 = vmul.f32 %v5614_v15, %v7058_v36  ;;  %v5616_v46 = vpop.eup %5615 }
 0xc5f   :  { %v7100_v34 = vadd.f32 %v2727_v30, %v2726_v16 }
 0xc61   :  { %5617 = vtanh.f32 %v7100_v34 }
 0xc6b   :  { %v5618_v17 = vpop.eup %5617 }
 0xc6c   :  { %v2730_v56 = vmul.f32 %v5618_v17, %v5616_v46 }
 0xc6e   :  { %2796 = vmatmul.mubr.f32.vlgmr.msra.gmra.mrb[26].mxu0 %v2730_v56  ;;  %2867 = vmatmul.mubr.f32.vlgmr.msra.gmra.mrb[30].mxu1 %v2730_v56 }
 0xc6f   :  { %4906 = vmatpush1.bf16.msra.mxu0 %v6336_v9  ;;  %4938 = vmatpush1.bf16.msra.mxu1 %v6172_v14 }
 0xc70   :  { %4908 = vmatprep.subr.bf16.mxu0 %v6338_v12  ;;  %4940 = vmatprep.subr.bf16.mxu1 %v6185_v19 }
 0xc71   :  { %2965 = vmatprep.mubr.f32.mxu0 %v7485_v10  ;;  %3036 = vmatprep.mubr.f32.mxu1 %v7485_v10 }
 0xc73   :  { %4910 = vmatpush1.bf16.msra.mxu0 %v6353_v20  ;;  %4942 = vmatpush1.bf16.msra.mxu1 %v6190_v21 }
 0xc74   :  { %4912 = vmatprep.subr.bf16.mxu0 %v6357_v23  ;;  %4944 = vmatprep.subr.bf16.mxu1 %v6203_v27 }
 0xc77   :  { %4914 = vmatpush1.bf16.msra.mxu0 %v6372_v31  ;;  %4946 = vmatpush1.bf16.msra.mxu1 %v6208_v29 }
 0xc78   :  { %4916 = vmatprep.subr.bf16.mxu0 %v6375_v32  ;;  %4948 = vmatprep.subr.bf16.mxu1 %v6221_v33 }
 0xc7b   :  { %4918 = vmatpush1.bf16.msra.mxu0 %v6390_v40  ;;  %4950 = vmatpush1.bf16.msra.mxu1 %v6226_v35 }
 0xc7c   :  { %4920 = vmatprep.subr.bf16.mxu0 %v6393_v42  ;;  %4952 = vmatprep.subr.bf16.mxu1 %v6239_v39 }
 0xc7f   :  { %4922 = vmatpush1.bf16.msra.mxu0 %v6408_v49  ;;  %4954 = vmatpush1.bf16.msra.mxu1 %v6244_v41 }
 0xc80   :  { %4924 = vmatprep.subr.bf16.mxu0 %v6411_v50  ;;  %4956 = vmatprep.subr.bf16.mxu1 %v6257_v45 }
 0xc83   :  { %4926 = vmatpush1.bf16.msra.mxu0 %v6426_v59  ;;  %4958 = vmatpush1.bf16.msra.mxu1 %v6262_v47 }
 0xc84   :  { %4928 = vmatprep.subr.bf16.mxu0 %v6429_v61  ;;  %4960 = vmatprep.subr.bf16.mxu1 %v6275_v51 }
 0xc87   :  { %4930 = vmatpush1.bf16.msra.mxu0 %v6444_v2  ;;  %4962 = vmatpush1.bf16.msra.mxu1 %v6280_v53 }
 0xc88   :  { %4932 = vmatprep.subr.bf16.mxu0 %v6447_v3  ;;  %4964 = vmatprep.subr.bf16.mxu1 %v6293_v58 }
 0xc8b   :  { %4934 = vmatpush1.bf16.msra.mxu0 %v6456_v6  ;;  %4966 = vmatpush1.bf16.msra.mxu1 %v6298_v60 }
 0xc8c   :  { %4968 = vmatprep.subr.bf16.mxu0 %v6155_v8  ;;  %5000 = vmatprep.subr.bf16.mxu1 %v6163_v11 }
 0xd41   :  { %v2797_v36 = vpop.f32.mrb[26].mxu0  ;;  %v2868_v22 = vpop.f32.mrb[30].mxu1 }
 0xd42   :  { %v2873_v13 = vadd.f32 %v2797_v36, %v6680_v57  ;;  %v2875_v43 = vadd.f32 %v2868_v22, %v7513_v54  ;;  %v2799_v18 = vpop.f32.mrb[27].mxu0  ;;  %v2870_v25 = vpop.f32.mrb[31].mxu1 }
 0xd43   :  { %v2874_v28 = vadd.f32 %v2799_v18, %v7514_v38  ;;  %v2876_v63 = vadd.f32 %v2870_v25, %v7515_v37 }
 0xd44   :  { %v4150_v0 = vmul.f32 -1.442695, %v2873_v13 }
 0xd45   :  { %v4151_v62 = vmul.f32 -1.442695, %v2874_v28  ;;  %v4152_v15 = vmul.f32 -1.442695, %v2876_v63 }
 0xd46   :  { %5619 = vpow2.f32 %v4150_v0 }
 0xd47   :  { %5621 = vpow2.f32 %v4151_v62 }
 0xd48   :  { %5623 = vpow2.f32 %v4152_v15 }
 0xd49   :  { %5625 = vtanh.f32 %v2875_v43 }
 0xd50   :  { %v5620_v30 = vpop.eup %5619 }
 0xd51   :  { %v5622_v52 = vpop.eup %5621  ;;  %v2880_v16 = vadd.f32 1.0, %v5620_v30 }
 0xd52   :  { %v2886_v46 = vadd.f32 1.0, %v5622_v52  ;;  %v5624_v57 = vpop.eup %5623 }
 0xd53   :  { %5627 = vrcp.f32 %v2880_v16  ;;  %v5626_v17 = vpop.eup %5625  ;;  %v2893_v54 = vadd.f32 1.0, %v5624_v57 }
 0xd54   :  { %5629 = vrcp.f32 %v2886_v46 }
 0xd55   :  { %5631 = vrcp.f32 %v2893_v54 }
 0xd5d   :  { %v5628_v56 = vpop.eup %5627 }
 0xd5e   :  { %v5630_v36 = vpop.eup %5629  ;;  %v2897_v22 = vmul.f32 %v5628_v56, %v5626_v17 }
 0xd5f   :  { %v2896_v13 = vmul.f32 %v5630_v36, %v7100_v34  ;;  %v5632_v25 = vpop.eup %5631 }
 0xd61   :  { %v7142_v18 = vadd.f32 %v2897_v22, %v2896_v13 }
 0xd63   :  { %5633 = vtanh.f32 %v7142_v18 }
 0xd6d   :  { %v5634_v38 = vpop.eup %5633 }
 0xd6e   :  { %v2900_v28 = vmul.f32 %v5634_v38, %v5632_v25 }
 0xd70   :  { %2966 = vmatmul.mubr.f32.vlgmr.msra.gmra.mrb[28].mxu0 %v2900_v28  ;;  %3037 = vmatmul.mubr.f32.vlgmr.msra.gmra.mrb[32].mxu1 %v2900_v28 }
 0xd71   :  { %4970 = vmatpush1.bf16.msra.mxu0 %v6336_v9  ;;  %5002 = vmatpush1.bf16.msra.mxu1 %v6172_v14 }
 0xd72   :  { %4972 = vmatprep.subr.bf16.mxu0 %v6338_v12  ;;  %5004 = vmatprep.subr.bf16.mxu1 %v6185_v19 }
 0xd73   :  { %3135 = vmatprep.mubr.f32.mxu0 %v7485_v10  ;;  %3206 = vmatprep.mubr.f32.mxu1 %v7485_v10 }
 0xd75   :  { %4974 = vmatpush1.bf16.msra.mxu0 %v6353_v20  ;;  %5006 = vmatpush1.bf16.msra.mxu1 %v6190_v21 }
 0xd76   :  { %4976 = vmatprep.subr.bf16.mxu0 %v6357_v23  ;;  %5008 = vmatprep.subr.bf16.mxu1 %v6203_v27 }
 0xd79   :  { %4978 = vmatpush1.bf16.msra.mxu0 %v6372_v31  ;;  %5010 = vmatpush1.bf16.msra.mxu1 %v6208_v29 }
 0xd7a   :  { %4980 = vmatprep.subr.bf16.mxu0 %v6375_v32  ;;  %5012 = vmatprep.subr.bf16.mxu1 %v6221_v33 }
 0xd7d   :  { %4982 = vmatpush1.bf16.msra.mxu0 %v6390_v40  ;;  %5014 = vmatpush1.bf16.msra.mxu1 %v6226_v35 }
 0xd7e   :  { %4984 = vmatprep.subr.bf16.mxu0 %v6393_v42  ;;  %5016 = vmatprep.subr.bf16.mxu1 %v6239_v39 }
 0xd81   :  { %4986 = vmatpush1.bf16.msra.mxu0 %v6408_v49  ;;  %5018 = vmatpush1.bf16.msra.mxu1 %v6244_v41 }
 0xd82   :  { %4988 = vmatprep.subr.bf16.mxu0 %v6411_v50  ;;  %5020 = vmatprep.subr.bf16.mxu1 %v6257_v45 }
 0xd85   :  { %4990 = vmatpush1.bf16.msra.mxu0 %v6426_v59  ;;  %5022 = vmatpush1.bf16.msra.mxu1 %v6262_v47 }
 0xd86   :  { %4992 = vmatprep.subr.bf16.mxu0 %v6429_v61  ;;  %5024 = vmatprep.subr.bf16.mxu1 %v6275_v51 }
 0xd89   :  { %4994 = vmatpush1.bf16.msra.mxu0 %v6444_v2  ;;  %5026 = vmatpush1.bf16.msra.mxu1 %v6280_v53 }
 0xd8a   :  { %4996 = vmatprep.subr.bf16.mxu0 %v6447_v3  ;;  %5028 = vmatprep.subr.bf16.mxu1 %v6293_v58 }
 0xd8d   :  { %4998 = vmatpush1.bf16.msra.mxu0 %v6456_v6  ;;  %5030 = vmatpush1.bf16.msra.mxu1 %v6298_v60 }
 0xd8e   :  { %5032 = vmatprep.subr.bf16.mxu0 %v6155_v8  ;;  %5064 = vmatprep.subr.bf16.mxu1 %v6163_v11 }
 0xe43   :  { %v2967_v34 = vpop.f32.mrb[28].mxu0  ;;  %v3038_v43 = vpop.f32.mrb[32].mxu1 }
 0xe44   :  { %v3043_v37 = vadd.f32 %v2967_v34, %v6705_v44  ;;  %v3045_v63 = vadd.f32 %v3038_v43, %v6708_v7  ;;  %v2969_v0 = vpop.f32.mrb[29].mxu0  ;;  %v3040_v62 = vpop.f32.mrb[33].mxu1 }
 0xe45   :  { %v3044_v15 = vadd.f32 %v2969_v0, %v6711_v24  ;;  %v3046_v30 = vadd.f32 %v3040_v62, %v6714_v48  ;;  %v7517_v0 = vld [vmem:[#allocation33_spill] sm:$0xff] }
 0xe46   :  { %v4153_v52 = vmul.f32 -1.442695, %v3043_v37  ;;  %v7516_v37 = vld [vmem:[#allocation32_spill] sm:$0xff] }
 0xe47   :  { %v4154_v16 = vmul.f32 -1.442695, %v3044_v15  ;;  %v4155_v46 = vmul.f32 -1.442695, %v3046_v30 }
 0xe48   :  { %5635 = vpow2.f32 %v4153_v52  ;;  %v7518_v52 = vld [vmem:[#allocation34_spill] sm:$0xff] }
 0xe49   :  { %5637 = vpow2.f32 %v4154_v16 }
 0xe4a   :  { %5639 = vpow2.f32 %v4155_v46  ;;  %v7519_v46 = vld [vmem:[#allocation35_spill] sm:$0xff] }
 0xe4b   :  { %5641 = vtanh.f32 %v3045_v63 }
 0xe52   :  { %v5636_v57 = vpop.eup %5635 }
 0xe53   :  { %v5638_v17 = vpop.eup %5637  ;;  %v3050_v56 = vadd.f32 1.0, %v5636_v57 }
 0xe54   :  { %v3056_v36 = vadd.f32 1.0, %v5638_v17  ;;  %v5640_v44 = vpop.eup %5639 }
 0xe55   :  { %5643 = vrcp.f32 %v3050_v56  ;;  %v5642_v7 = vpop.eup %5641  ;;  %v3063_v13 = vadd.f32 1.0, %v5640_v44 }
 0xe56   :  { %5645 = vrcp.f32 %v3056_v36 }
 0xe57   :  { %5647 = vrcp.f32 %v3063_v13 }
 0xe5f   :  { %v5644_v22 = vpop.eup %5643 }
 0xe60   :  { %v5646_v54 = vpop.eup %5645  ;;  %v3067_v24 = vmul.f32 %v5644_v22, %v5642_v7 }
 0xe61   :  { %v3066_v48 = vmul.f32 %v5646_v54, %v7142_v18  ;;  %v5648_v38 = vpop.eup %5647 }
 0xe63   :  { %v7184_v25 = vadd.f32 %v3067_v24, %v3066_v48 }
 0xe65   :  { %5649 = vtanh.f32 %v7184_v25 }
 0xe6f   :  { %v5650_v28 = vpop.eup %5649 }
 0xe70   :  { %v3070_v34 = vmul.f32 %v5650_v28, %v5648_v38 }
 0xe72   :  { %3136 = vmatmul.mubr.f32.vlgmr.msra.gmra.mrb[30].mxu0 %v3070_v34  ;;  %3207 = vmatmul.mubr.f32.vlgmr.msra.gmra.mrb[34].mxu1 %v3070_v34 }
 0xe73   :  { %5034 = vmatpush1.bf16.msra.mxu0 %v6336_v9  ;;  %5066 = vmatpush1.bf16.msra.mxu1 %v6172_v14 }
 0xe74   :  { %5036 = vmatprep.subr.bf16.mxu0 %v6338_v12  ;;  %5068 = vmatprep.subr.bf16.mxu1 %v6185_v19 }
 0xe75   :  { %3305 = vmatprep.mubr.f32.mxu0 %v7485_v10  ;;  %3376 = vmatprep.mubr.f32.mxu1 %v7485_v10 }
 0xe77   :  { %5038 = vmatpush1.bf16.msra.mxu0 %v6353_v20  ;;  %5070 = vmatpush1.bf16.msra.mxu1 %v6190_v21 }
 0xe78   :  { %5040 = vmatprep.subr.bf16.mxu0 %v6357_v23  ;;  %5072 = vmatprep.subr.bf16.mxu1 %v6203_v27 }
 0xe7b   :  { %5042 = vmatpush1.bf16.msra.mxu0 %v6372_v31  ;;  %5074 = vmatpush1.bf16.msra.mxu1 %v6208_v29 }
 0xe7c   :  { %5044 = vmatprep.subr.bf16.mxu0 %v6375_v32  ;;  %5076 = vmatprep.subr.bf16.mxu1 %v6221_v33 }
 0xe7f   :  { %5046 = vmatpush1.bf16.msra.mxu0 %v6390_v40  ;;  %5078 = vmatpush1.bf16.msra.mxu1 %v6226_v35 }
 0xe80   :  { %5048 = vmatprep.subr.bf16.mxu0 %v6393_v42  ;;  %5080 = vmatprep.subr.bf16.mxu1 %v6239_v39 }
 0xe83   :  { %5050 = vmatpush1.bf16.msra.mxu0 %v6408_v49  ;;  %5082 = vmatpush1.bf16.msra.mxu1 %v6244_v41 }
 0xe84   :  { %5052 = vmatprep.subr.bf16.mxu0 %v6411_v50  ;;  %5084 = vmatprep.subr.bf16.mxu1 %v6257_v45 }
 0xe87   :  { %5054 = vmatpush1.bf16.msra.mxu0 %v6426_v59  ;;  %5086 = vmatpush1.bf16.msra.mxu1 %v6262_v47 }
 0xe88   :  { %5056 = vmatprep.subr.bf16.mxu0 %v6429_v61  ;;  %5088 = vmatprep.subr.bf16.mxu1 %v6275_v51 }
 0xe8b   :  { %5058 = vmatpush1.bf16.msra.mxu0 %v6444_v2  ;;  %5090 = vmatpush1.bf16.msra.mxu1 %v6280_v53 }
 0xe8c   :  { %5060 = vmatprep.subr.bf16.mxu0 %v6447_v3  ;;  %5092 = vmatprep.subr.bf16.mxu1 %v6293_v58 }
 0xe8f   :  { %5062 = vmatpush1.bf16.msra.mxu0 %v6456_v6  ;;  %5094 = vmatpush1.bf16.msra.mxu1 %v6298_v60 }
 0xe90   :  { %5096 = vmatprep.subr.bf16.mxu0 %v6155_v8  ;;  %5128 = vmatprep.subr.bf16.mxu1 %v6163_v11 }
 0xf45   :  { %v3137_v18 = vpop.f32.mrb[30].mxu0  ;;  %v3208_v43 = vpop.f32.mrb[34].mxu1 }
 0xf46   :  { %v3213_v63 = vadd.f32 %v3137_v18, %v7516_v37  ;;  %v3215_v62 = vadd.f32 %v3208_v43, %v7517_v0  ;;  %v3139_v15 = vpop.f32.mrb[31].mxu0  ;;  %v3210_v30 = vpop.f32.mrb[35].mxu1 }
 0xf47   :  { %v3214_v16 = vadd.f32 %v3139_v15, %v7518_v52  ;;  %v3216_v57 = vadd.f32 %v3210_v30, %v7519_v46  ;;  %v7520_v15 = vld [vmem:[#allocation43_spill] sm:$0xff]  ;;  %v7521_v52 = vld [vmem:[#allocation44_spill] sm:$0xff] }
 0xf48   :  { %v4156_v17 = vmul.f32 -1.442695, %v3213_v63 }
 0xf49   :  { %v4157_v56 = vmul.f32 -1.442695, %v3214_v16  ;;  %v4158_v36 = vmul.f32 -1.442695, %v3216_v57 }
 0xf4a   :  { %5651 = vpow2.f32 %v4156_v17  ;;  %v7522_v17 = vld [vmem:[#allocation45_spill] sm:$0xff] }
 0xf4b   :  { %5653 = vpow2.f32 %v4157_v56 }
 0xf4c   :  { %5655 = vpow2.f32 %v4158_v36  ;;  %v7523_v36 = vld [vmem:[#allocation46_spill] sm:$0xff] }
 0xf4d   :  { %5657 = vtanh.f32 %v3215_v62 }
 0xf54   :  { %v5652_v44 = vpop.eup %5651 }
 0xf55   :  { %v5654_v7 = vpop.eup %5653  ;;  %v3220_v22 = vadd.f32 1.0, %v5652_v44 }
 0xf56   :  { %v3226_v54 = vadd.f32 1.0, %v5654_v7  ;;  %v5656_v24 = vpop.eup %5655 }
 0xf57   :  { %5659 = vrcp.f32 %v3220_v22  ;;  %v5658_v13 = vpop.eup %5657  ;;  %v3233_v34 = vadd.f32 1.0, %v5656_v24 }
 0xf58   :  { %5661 = vrcp.f32 %v3226_v54 }
 0xf59   :  { %5663 = vrcp.f32 %v3233_v34 }
 0xf61   :  { %v5660_v48 = vpop.eup %5659 }
 0xf62   :  { %v5662_v38 = vpop.eup %5661  ;;  %v3237_v28 = vmul.f32 %v5660_v48, %v5658_v13 }
 0xf63   :  { %v3236_v18 = vmul.f32 %v5662_v38, %v7184_v25  ;;  %v5664_v37 = vpop.eup %5663 }
 0xf65   :  { %v7226_v43 = vadd.f32 %v3237_v28, %v3236_v18 }
 0xf67   :  { %5665 = vtanh.f32 %v7226_v43 }
 0xf71   :  { %v5666_v63 = vpop.eup %5665 }
 0xf72   :  { %v3240_v0 = vmul.f32 %v5666_v63, %v5664_v37 }
 0xf74   :  { %3306 = vmatmul.mubr.f32.vlgmr.msra.gmra.mrb[32].mxu0 %v3240_v0  ;;  %3377 = vmatmul.mubr.f32.vlgmr.msra.gmra.mrb[36].mxu1 %v3240_v0 }
 0xf75   :  { %5098 = vmatpush1.bf16.msra.mxu0 %v6336_v9  ;;  %5130 = vmatpush1.bf16.msra.mxu1 %v6172_v14 }
 0xf76   :  { %5100 = vmatprep.subr.bf16.mxu0 %v6338_v12  ;;  %5132 = vmatprep.subr.bf16.mxu1 %v6185_v19 }
 0xf77   :  { %3475 = vmatprep.mubr.f32.mxu0 %v7485_v10  ;;  %3546 = vmatprep.mubr.f32.mxu1 %v7485_v10 }
 0xf79   :  { %5102 = vmatpush1.bf16.msra.mxu0 %v6353_v20  ;;  %5134 = vmatpush1.bf16.msra.mxu1 %v6190_v21 }
 0xf7a   :  { %5104 = vmatprep.subr.bf16.mxu0 %v6357_v23  ;;  %5136 = vmatprep.subr.bf16.mxu1 %v6203_v27 }
 0xf7d   :  { %5106 = vmatpush1.bf16.msra.mxu0 %v6372_v31  ;;  %5138 = vmatpush1.bf16.msra.mxu1 %v6208_v29 }
 0xf7e   :  { %5108 = vmatprep.subr.bf16.mxu0 %v6375_v32  ;;  %5140 = vmatprep.subr.bf16.mxu1 %v6221_v33 }
 0xf81   :  { %5110 = vmatpush1.bf16.msra.mxu0 %v6390_v40  ;;  %5142 = vmatpush1.bf16.msra.mxu1 %v6226_v35 }
 0xf82   :  { %5112 = vmatprep.subr.bf16.mxu0 %v6393_v42  ;;  %5144 = vmatprep.subr.bf16.mxu1 %v6239_v39 }
 0xf85   :  { %5114 = vmatpush1.bf16.msra.mxu0 %v6408_v49  ;;  %5146 = vmatpush1.bf16.msra.mxu1 %v6244_v41 }
 0xf86   :  { %5116 = vmatprep.subr.bf16.mxu0 %v6411_v50  ;;  %5148 = vmatprep.subr.bf16.mxu1 %v6257_v45 }
 0xf89   :  { %5118 = vmatpush1.bf16.msra.mxu0 %v6426_v59  ;;  %5150 = vmatpush1.bf16.msra.mxu1 %v6262_v47 }
 0xf8a   :  { %5120 = vmatprep.subr.bf16.mxu0 %v6429_v61  ;;  %5152 = vmatprep.subr.bf16.mxu1 %v6275_v51 }
 0xf8d   :  { %5122 = vmatpush1.bf16.msra.mxu0 %v6444_v2  ;;  %5154 = vmatpush1.bf16.msra.mxu1 %v6280_v53 }
 0xf8e   :  { %5124 = vmatprep.subr.bf16.mxu0 %v6447_v3  ;;  %5156 = vmatprep.subr.bf16.mxu1 %v6293_v58 }
 0xf91   :  { %5126 = vmatpush1.bf16.msra.mxu0 %v6456_v6  ;;  %5158 = vmatpush1.bf16.msra.mxu1 %v6298_v60 }
 0xf92   :  { %5160 = vmatprep.subr.bf16.mxu0 %v6155_v8  ;;  %5192 = vmatprep.subr.bf16.mxu1 %v6163_v11 }
0x1047   :  { %v3307_v25 = vpop.f32.mrb[32].mxu0  ;;  %v3378_v62 = vpop.f32.mrb[36].mxu1 }
0x1048   :  { %v3383_v30 = vadd.f32 %v3307_v25, %v7520_v15  ;;  %v3385_v16 = vadd.f32 %v3378_v62, %v7521_v52  ;;  %v3309_v46 = vpop.f32.mrb[33].mxu0  ;;  %v3380_v57 = vpop.f32.mrb[37].mxu1 }
0x1049   :  { %v3384_v56 = vadd.f32 %v3309_v46, %v7522_v17  ;;  %v3386_v44 = vadd.f32 %v3380_v57, %v7523_v36  ;;  %v7524_v46 = vld [vmem:[#allocation47_spill] sm:$0xff] }
0x104a   :  { %v4159_v7 = vmul.f32 -1.442695, %v3383_v30 }
0x104b   :  { %v4160_v22 = vmul.f32 -1.442695, %v3384_v56  ;;  %v4161_v54 = vmul.f32 -1.442695, %v3386_v44 }
0x104c   :  { %5667 = vpow2.f32 %v4159_v7  ;;  %v7525_v7 = vld [vmem:[#allocation48_spill] sm:$0xff] }
0x104d   :  { %5669 = vpow2.f32 %v4160_v22 }
0x104e   :  { %5671 = vpow2.f32 %v4161_v54 }
0x104f   :  { %5673 = vtanh.f32 %v3385_v16 }
0x1056   :  { %v5668_v24 = vpop.eup %5667 }
0x1057   :  { %v5670_v13 = vpop.eup %5669  ;;  %v3390_v48 = vadd.f32 1.0, %v5668_v24 }
0x1058   :  { %v3396_v38 = vadd.f32 1.0, %v5670_v13  ;;  %v5672_v28 = vpop.eup %5671 }
0x1059   :  { %5675 = vrcp.f32 %v3390_v48  ;;  %v5674_v34 = vpop.eup %5673  ;;  %v3403_v0 = vadd.f32 1.0, %v5672_v28 }
0x105a   :  { %5677 = vrcp.f32 %v3396_v38 }
0x105b   :  { %5679 = vrcp.f32 %v3403_v0 }
0x1063   :  { %v5676_v18 = vpop.eup %5675 }
0x1064   :  { %v5678_v37 = vpop.eup %5677  ;;  %v3407_v63 = vmul.f32 %v5676_v18, %v5674_v34 }
0x1065   :  { %v3406_v25 = vmul.f32 %v5678_v37, %v7226_v43  ;;  %v5680_v15 = vpop.eup %5679 }
0x1067   :  { %v7268_v62 = vadd.f32 %v3407_v63, %v3406_v25 }
0x1069   :  { %5681 = vtanh.f32 %v7268_v62 }
0x1073   :  { %v5682_v30 = vpop.eup %5681 }
0x1074   :  { %v3410_v52 = vmul.f32 %v5682_v30, %v5680_v15 }
0x1076   :  { %3476 = vmatmul.mubr.f32.vlgmr.msra.gmra.mrb[34].mxu0 %v3410_v52  ;;  %3547 = vmatmul.mubr.f32.vlgmr.msra.gmra.mrb[38].mxu1 %v3410_v52  ;;  %v3922_v52 = vld [vmem:[%s7435_s12 + $0x8] sm:$0xff] }
0x1077   :  { %5162 = vmatpush1.bf16.msra.mxu0 %v6336_v9  ;;  %5194 = vmatpush1.bf16.msra.mxu1 %v6172_v14 }
0x1078   :  { %5164 = vmatprep.subr.bf16.mxu0 %v6338_v12  ;;  %5196 = vmatprep.subr.bf16.mxu1 %v6185_v19 }
0x1079   :  { %3645 = vmatprep.mubr.f32.mxu0 %v7485_v10  ;;  %3716 = vmatprep.mubr.f32.mxu1 %v7485_v10 }
0x107b   :  { %5166 = vmatpush1.bf16.msra.mxu0 %v6353_v20  ;;  %5198 = vmatpush1.bf16.msra.mxu1 %v6190_v21 }
0x107c   :  { %5168 = vmatprep.subr.bf16.mxu0 %v6357_v23  ;;  %5200 = vmatprep.subr.bf16.mxu1 %v6203_v27 }
0x107f   :  { %5170 = vmatpush1.bf16.msra.mxu0 %v6372_v31  ;;  %5202 = vmatpush1.bf16.msra.mxu1 %v6208_v29 }
0x1080   :  { %5172 = vmatprep.subr.bf16.mxu0 %v6375_v32  ;;  %5204 = vmatprep.subr.bf16.mxu1 %v6221_v33 }
0x1083   :  { %5174 = vmatpush1.bf16.msra.mxu0 %v6390_v40  ;;  %5206 = vmatpush1.bf16.msra.mxu1 %v6226_v35 }
0x1084   :  { %5176 = vmatprep.subr.bf16.mxu0 %v6393_v42  ;;  %5208 = vmatprep.subr.bf16.mxu1 %v6239_v39 }
0x1087   :  { %5178 = vmatpush1.bf16.msra.mxu0 %v6408_v49  ;;  %5210 = vmatpush1.bf16.msra.mxu1 %v6244_v41 }
0x1088   :  { %5180 = vmatprep.subr.bf16.mxu0 %v6411_v50  ;;  %5212 = vmatprep.subr.bf16.mxu1 %v6257_v45 }
0x108b   :  { %5182 = vmatpush1.bf16.msra.mxu0 %v6426_v59  ;;  %5214 = vmatpush1.bf16.msra.mxu1 %v6262_v47 }
0x108c   :  { %5184 = vmatprep.subr.bf16.mxu0 %v6429_v61  ;;  %5216 = vmatprep.subr.bf16.mxu1 %v6275_v51 }
0x108f   :  { %5186 = vmatpush1.bf16.msra.mxu0 %v6444_v2  ;;  %5218 = vmatpush1.bf16.msra.mxu1 %v6280_v53 }
0x1090   :  { %5188 = vmatprep.subr.bf16.mxu0 %v6447_v3  ;;  %5220 = vmatprep.subr.bf16.mxu1 %v6293_v58 }
0x1093   :  { %5190 = vmatpush1.bf16.msra.mxu0 %v6456_v6  ;;  %5222 = vmatpush1.bf16.msra.mxu1 %v6298_v60 }
0x1094   :  { %5224 = vmatprep.subr.bf16.mxu0 %v6155_v8  ;;  %5256 = vmatprep.subr.bf16.mxu1 %v6163_v11 }
0x1149   :  { %v3477_v43 = vpop.f32.mrb[34].mxu0  ;;  %v3548_v16 = vpop.f32.mrb[38].mxu1 }
0x114a   :  { %v3553_v57 = vadd.f32 %v3477_v43, %v7524_v46  ;;  %v3555_v17 = vadd.f32 %v3548_v16, %v6743_v4  ;;  %v3479_v56 = vpop.f32.mrb[35].mxu0  ;;  %v3550_v36 = vpop.f32.mrb[39].mxu1  ;;  %v5774_v16 = vmov 0.0|0.0   ;;  %v3923_v46 = vld [vmem:[%s7435_s12 + $0x10] sm:$0xff] }
0x114b   :  { %v3554_v44 = vadd.f32 %v3479_v56, %v6746_v26  ;;  %v3556_v22 = vadd.f32 %v3550_v36, %v7525_v7  ;;  %v3926_v56 = vld [vmem:[%s7435_s12 + $0x28] sm:$0xff]  ;;  %v3928_v7 = vld [vmem:[%s7435_s12 + $0x38] sm:$0xff] }
0x114c   :  { %v4162_v54 = vmul.f32 -1.442695, %v3553_v57 }
0x114d   :  { %v4163_v24 = vmul.f32 -1.442695, %v3554_v44  ;;  %v4164_v13 = vmul.f32 -1.442695, %v3556_v22  ;;  %v3927_v44 = vld [vmem:[%s7435_s12 + $0x30] sm:$0xff] }
0x114e   :  { %5683 = vpow2.f32 %v4162_v54  ;;  %v5297_v22 = vpack.c.bf16 %v3928_v7, %v3927_v44  ;;  %v3929_v54 = vld [vmem:[%s7435_s12 + $0x40] sm:$0xff] }
0x114f   :  { %5685 = vpow2.f32 %v4163_v24  ;;  %v3930_v24 = vld [vmem:[%s7435_s12 + $0x48] sm:$0xff] }
0x1150   :  { %5687 = vpow2.f32 %v4164_v13  ;;  %v5300_v13 = vpack.c.bf16 %v3930_v24, %v3929_v54 }
0x1151   :  { %5689 = vtanh.f32 %v3555_v17  ;;  %v3925_v17 = vld [vmem:[%s7435_s12 + $0x20] sm:$0xff] }
0x1152   :  { %v5294_v36 = vpack.c.bf16 %v3926_v56, %v3925_v17 }
0x1158   :  { %v5684_v8 = vpop.eup %5683 }
0x1159   :  { %v5686_v48 = vpop.eup %5685  ;;  %v3560_v11 = vadd.f32 1.0, %v5684_v8  ;;  %v3931_v8 = vld [vmem:[%s7435_s12 + $0x50] sm:$0xff] }
0x115a   :  { %v3566_v38 = vadd.f32 1.0, %v5686_v48  ;;  %v5688_v4 = vpop.eup %5687  ;;  %v3932_v48 = vld [vmem:[%s7435_s12 + $0x58] sm:$0xff] }
0x115b   :  { %5691 = vrcp.f32 %v3560_v11  ;;  %v5690_v28 = vpop.eup %5689  ;;  %v3573_v37 = vadd.f32 1.0, %v5688_v4  ;;  %v5303_v11 = vpack.c.bf16 %v3932_v48, %v3931_v8  ;;  %v3934_v4 = vld [vmem:[%s7435_s12 + $0x68] sm:$0xff] }
0x115c   :  { %5693 = vrcp.f32 %v3566_v38  ;;  %v3933_v38 = vld [vmem:[%s7435_s12 + $0x60] sm:$0xff] }
0x115d   :  { %5695 = vrcp.f32 %v3573_v37 }
0x1165   :  { %v5692_v34 = vpop.eup %5691 }
0x1166   :  { %v5694_v18 = vpop.eup %5693  ;;  %v3577_v26 = vmul.f32 %v5692_v34, %v5690_v28  ;;  %v5306_v28 = vpack.c.bf16 %v3934_v4, %v3933_v38  ;;  %v3935_v34 = vld [vmem:[%s7435_s12 + $0x70] sm:$0xff] }
0x1167   :  { %v3576_v63 = vmul.f32 %v5694_v18, %v7268_v62  ;;  %v5696_v25 = vpop.eup %5695  ;;  %v3921_v62 = vld [vmem:[%s7435_s12] sm:$0xff]  ;;  %v3936_v18 = vld [vmem:[%s7435_s12 + $0x78] sm:$0xff] }
0x1168   :  { %v5288_v43 = vpack.c.bf16 %v3922_v52, %v3921_v62 }
0x1169   :  { %v7310_v0 = vadd.f32 %v3577_v26, %v3576_v63  ;;  %v5309_v26 = vpack.c.bf16 %v3936_v18, %v3935_v34 }
0x116b   :  { %5697 = vtanh.f32 %v7310_v0 }
0x1175   :  { %v5698_v15 = vpop.eup %5697 }
0x1176   :  { %v3580_v30 = vmul.f32 %v5698_v15, %v5696_v25 }
0x1178   :  { %3646 = vmatmul.mubr.f32.vlgmr.msra.gmra.mrb[36].mxu0 %v3580_v30  ;;  %3717 = vmatmul.mubr.f32.vlgmr.msra.gmra.mrb[40].mxu1 %v3580_v30 }
0x1179   :  { %5226 = vmatpush1.bf16.msra.mxu0 %v6336_v9  ;;  %5258 = vmatpush1.bf16.msra.mxu1 %v6172_v14 }
0x117a   :  { %5228 = vmatprep.subr.bf16.mxu0 %v6338_v12  ;;  %5260 = vmatprep.subr.bf16.mxu1 %v6185_v19 }
0x117b   :  { %3815 = vmatprep.mubr.f32.mxu0 %v7485_v10  ;;  %3886 = vmatprep.mubr.f32.mxu1 %v7485_v10 }
0x117d   :  { %5230 = vmatpush1.bf16.msra.mxu0 %v6353_v20  ;;  %5262 = vmatpush1.bf16.msra.mxu1 %v6190_v21  ;;  %v7526_v21 = vld [vmem:[#allocation36_spill] sm:$0xff] }
0x117e   :  { %5232 = vmatprep.subr.bf16.mxu0 %v6357_v23  ;;  %5264 = vmatprep.subr.bf16.mxu1 %v6203_v27 }
0x1181   :  { %5234 = vmatpush1.bf16.msra.mxu0 %v6372_v31  ;;  %5266 = vmatpush1.bf16.msra.mxu1 %v6208_v29  ;;  %v7527_v29 = vld [vmem:[#allocation40_spill] sm:$0xff] }
0x1182   :  { %5236 = vmatprep.subr.bf16.mxu0 %v6375_v32  ;;  %5268 = vmatprep.subr.bf16.mxu1 %v6221_v33 }
0x1185   :  { %5238 = vmatpush1.bf16.msra.mxu0 %v6390_v40  ;;  %5270 = vmatpush1.bf16.msra.mxu1 %v6226_v35 }
0x1186   :  { %5240 = vmatprep.subr.bf16.mxu0 %v6393_v42  ;;  %5272 = vmatprep.subr.bf16.mxu1 %v6239_v39 }
0x1189   :  { %5242 = vmatpush1.bf16.msra.mxu0 %v6408_v49  ;;  %5274 = vmatpush1.bf16.msra.mxu1 %v6244_v41  ;;  %v7528_v41 = vld [vmem:[#allocation41_spill] sm:$0xff] }
0x118a   :  { %5244 = vmatprep.subr.bf16.mxu0 %v6411_v50  ;;  %5276 = vmatprep.subr.bf16.mxu1 %v6257_v45 }
0x118d   :  { %5246 = vmatpush1.bf16.msra.mxu0 %v6426_v59  ;;  %5278 = vmatpush1.bf16.msra.mxu1 %v6262_v47  ;;  %v7529_v47 = vld [vmem:[#allocation42_spill] sm:$0xff] }
0x118e   :  { %5248 = vmatprep.subr.bf16.mxu0 %v6429_v61  ;;  %5280 = vmatprep.subr.bf16.mxu1 %v6275_v51 }
0x1191   :  { %5250 = vmatpush1.bf16.msra.mxu0 %v6444_v2  ;;  %5282 = vmatpush1.bf16.msra.mxu1 %v6280_v53 }
0x1192   :  { %5252 = vmatprep.subr.bf16.mxu0 %v6447_v3  ;;  %5284 = vmatprep.subr.bf16.mxu1 %v6293_v58 }
0x1195   :  { %5254 = vmatpush1.bf16.msra.mxu0 %v6456_v6  ;;  %5286 = vmatpush1.bf16.msra.mxu1 %v6298_v60 }
0x1196   :  { %5287 = vmatprep.subr.bf16.mxu0 %v5774_v16 }
0x124b   :  { %v3647_v14 = vpop.f32.mrb[36].mxu0  ;;  %v3718_v19 = vpop.f32.mrb[40].mxu1 }
0x124c   :  { %v3723_v27 = vadd.f32 %v3647_v14, %v7526_v21  ;;  %v3725_v33 = vadd.f32 %v3718_v19, %v7527_v29  ;;  %v3649_v35 = vpop.f32.mrb[37].mxu0  ;;  %v3720_v39 = vpop.f32.mrb[41].mxu1  ;;  %v7530_v19 = vld [vmem:[#allocation49_spill] sm:$0xff] }
0x124d   :  { %v3724_v45 = vadd.f32 %v3649_v35, %v7528_v41  ;;  %v3726_v51 = vadd.f32 %v3720_v39, %v7529_v47 }
0x124e   :  { %v4165_v53 = vmul.f32 -1.442695, %v3723_v27 }
0x124f   :  { %v4166_v9 = vmul.f32 -1.442695, %v3724_v45  ;;  %v4167_v58 = vmul.f32 -1.442695, %v3726_v51 }
0x1250   :  { %5699 = vpow2.f32 %v4165_v53 }
0x1251   :  { %5701 = vpow2.f32 %v4166_v9 }
0x1252   :  { %5703 = vpow2.f32 %v4167_v58 }
0x1253   :  { %5705 = vtanh.f32 %v3725_v33 }
0x125a   :  { %v5700_v12 = vpop.eup %5699 }
0x125b   :  { %v5702_v20 = vpop.eup %5701  ;;  %v3730_v60 = vadd.f32 1.0, %v5700_v12 }
0x125c   :  { %v3736_v23 = vadd.f32 1.0, %v5702_v20  ;;  %v5704_v31 = vpop.eup %5703 }
0x125d   :  { %5707 = vrcp.f32 %v3730_v60  ;;  %v5706_v32 = vpop.eup %5705  ;;  %v3743_v50 = vadd.f32 1.0, %v5704_v31 }
0x125e   :  { %5709 = vrcp.f32 %v3736_v23  ;;  %v4171_v23 = vld [vmem:[%s7436_s13] ss:$0 sm:$0xff] }
0x125f   :  { %5711 = vrcp.f32 %v3743_v50 }
0x1267   :  { %v5708_v40 = vpop.eup %5707 }
0x1268   :  { %v5710_v42 = vpop.eup %5709  ;;  %v3747_v49 = vmul.f32 %v5708_v40, %v5706_v32 }
0x1269   :  { %v3746_v59 = vmul.f32 %v5710_v42, %v7310_v0  ;;  %v5712_v2 = vpop.eup %5711 }
0x126b   :  { %v7350_v61 = vadd.f32 %v3747_v49, %v3746_v59 }
0x126d   :  { %5713 = vtanh.f32 %v7350_v61 }
0x1277   :  { %v5714_v3 = vpop.eup %5713 }
0x1278   :  { %v3750_v6 = vmul.f32 %v5714_v3, %v5712_v2 }
0x127a   :  { %3816 = vmatmul.mubr.f32.vlgmr.msra.gmra.mrb[38].mxu0 %v3750_v6  ;;  %3887 = vmatmul.mubr.f32.vlgmr.msra.gmra.mrb[42].mxu1 %v3750_v6 }
0x127b   :  { %4260 = vmatprep.mubr.msk.f32.mxu0 %vm5758_vm1, %v7485_v10  ;;  %5289 = vmatpush3.bf16.msra.mxu0 %v5288_v43  ;;  %v3924_v10 = vld [vmem:[%s7435_s12 + $0x18] sm:$0xff] }
0x127c   :  { %5290 = vmatprep.subr.bf16.mxu0 %v5774_v16  ;;  %v5291_v57 = vpack.c.bf16 %v3924_v10, %v3923_v46 }
0x127f   :  { %5292 = vmatpush3.bf16.msra.mxu0 %v5291_v57 }
0x1280   :  { %5293 = vmatprep.subr.bf16.mxu0 %v5774_v16 }
0x1283   :  { %5295 = vmatpush3.bf16.msra.mxu0 %v5294_v36 }
0x1284   :  { %5296 = vmatprep.subr.bf16.mxu0 %v5774_v16 }
0x1287   :  { %5298 = vmatpush3.bf16.msra.mxu0 %v5297_v22 }
0x1288   :  { %5299 = vmatprep.subr.bf16.mxu0 %v5774_v16 }
0x128b   :  { %5301 = vmatpush3.bf16.msra.mxu0 %v5300_v13 }
0x128c   :  { %5302 = vmatprep.subr.bf16.mxu0 %v5774_v16 }
0x128f   :  { %5304 = vmatpush3.bf16.msra.mxu0 %v5303_v11 }
0x1290   :  { %5305 = vmatprep.subr.bf16.mxu0 %v5774_v16 }
0x1293   :  { %5307 = vmatpush3.bf16.msra.mxu0 %v5306_v28 }
0x1294   :  { %5308 = vmatprep.subr.bf16.mxu0 %v5774_v16 }
0x1297   :  { %5310 = vmatpush3.bf16.msra.mxu0 %v5309_v26 }
0x134d   :  { %v3817_v37 = vpop.f32.mrb[38].mxu0  ;;  %v3888_v63 = vpop.f32.mrb[42].mxu1 }
0x134e   :  { %v3893_v0 = vadd.f32 %v3817_v37, %v6756_v5  ;;  %v3895_v25 = vadd.f32 %v3888_v63, %v6759_v55  ;;  %v3819_v15 = vpop.f32.mrb[39].mxu0  ;;  %v3890_v30 = vpop.f32.mrb[43].mxu1 }
0x134f   :  { %v3894_v14 = vadd.f32 %v3819_v15, %v6762_v1  ;;  %v3896_v21 = vadd.f32 %v3890_v30, %v7530_v19 }
0x1350   :  { %v4168_v27 = vmul.f32 -1.442695, %v3893_v0 }
0x1351   :  { %v4169_v29 = vmul.f32 -1.442695, %v3894_v14  ;;  %v4170_v33 = vmul.f32 -1.442695, %v3896_v21 }
0x1352   :  { %5715 = vpow2.f32 %v4168_v27 }
0x1353   :  { %5717 = vpow2.f32 %v4169_v29 }
0x1354   :  { %5719 = vpow2.f32 %v4170_v33 }
0x1355   :  { %5721 = vtanh.f32 %v3895_v25 }
0x135c   :  { %v5716_v35 = vpop.eup %5715 }
0x135d   :  { %v5718_v39 = vpop.eup %5717  ;;  %v3900_v41 = vadd.f32 1.0, %v5716_v35 }
0x135e   :  { %v3906_v45 = vadd.f32 1.0, %v5718_v39  ;;  %v5720_v5 = vpop.eup %5719 }
0x135f   :  { %5723 = vrcp.f32 %v3900_v41  ;;  %v5722_v55 = vpop.eup %5721  ;;  %v3913_v53 = vadd.f32 1.0, %v5720_v5 }
0x1360   :  { %5725 = vrcp.f32 %v3906_v45 }
0x1361   :  { %5727 = vrcp.f32 %v3913_v53 }
0x1369   :  { %v5724_v47 = vpop.eup %5723 }
0x136a   :  { %v5726_v51 = vpop.eup %5725  ;;  %v3917_v1 = vmul.f32 %v5724_v47, %v5722_v55 }
0x136b   :  { %v3916_v9 = vmul.f32 %v5726_v51, %v7350_v61  ;;  %v5728_v12 = vpop.eup %5727 }
0x136d   :  { %v3918_v58 = vadd.f32 %v3917_v1, %v3916_v9 }
0x136f   :  { %5729 = vtanh.f32 %v3918_v58 }
0x1379   :  { %v5730_v20 = vpop.eup %5729 }
0x137a   :  { %v3920_v60 = vmul.f32 %v5730_v20, %v5728_v12 }
0x137c   :  { %4261 = vmatmul.mubr.f32.vlgmr.msra.gmra.mrb[40].mxu0 %v3920_v60 }
0x144f   :  { %v4010_v31 = vpop.f32.mrb[40].mxu0 }
0x1450   :  { %v4011_v32 = vadd.f32 %v4171_v23, %v4010_v31  ;;  %v4262_v40 = vpop.f32.mrb[41].mxu0 }
0x1452   :  { %4015 = vst.msk [vmem:[#allocation2] sm:$0x3] %vm4014_vm3, %v4011_v32 }
0x1453   :  { %5742 = shalt.err (!%p5739_p4)
}
0x1454   :  { %s5743_s18 = scalar_lea.hbm %s7437_s14, 32 }
0x1455   :  { %p5744_p5 = scmp.ne.s32.totalorder %s7437_s14, %s5743_s18  ;;  %p5747_p6 = scmp.lt.u32.totalorder %s5743_s18, %s7437_s14 }
0x1457   :  { %p5749_p7 = pnand %p5747_p6, %p5744_p5 }
0x1459   :  { %5752 = shalt.err (!%p5749_p7)
}
0x145a   :  { %4025 = dma.vmem_to_hbm [thread:$0]  %s4023_s15, 32, %s7437_s14, [#allocation3]  }
0x145b   :  { %5753 = dma.done.wait [#allocation3], 32  }
0x145c   :  { %5754 = vsyncadd [#allocation3], 4294967264 }
0x145d   :  { %4029 = vsyncpa [#allocation3], 1 }

</bundles_post_ra>
